<compile_context>
chip_gen: v5e
topology: v5e:2x2
jax: 0.10.0
libtpu: 0.0.40
codegen_flags: <defaults>
</compile_context>

<pallas_src>
import functools

import jax
import jax.numpy as jnp
from jax.experimental import pallas as pl
from jax.experimental.pallas import tpu as pltpu


def effnet_fc_kernel(x_ref, w1_ref, b1_ref, w2_ref, b2_ref, y_ref, pooled_ref,
                     *, inv_hw):
    # ---- global average pooling (backbone._avg_pooling) + flatten ----------
    # x_ref: (tn, C, HW) tile; reduce over the lane (HW) axis -> (tn, C) with
    # C landing in the lane dim, which is exactly the layout fc1 wants.
    x = x_ref[...].astype(jnp.float32)
    pooled_sum = jnp.sum(x, axis=2)                          # (tn, C) f32
    pooled_ref[...] = (pooled_sum * inv_hw).astype(pooled_ref.dtype)

    # ---- dropout: identity in eval mode ------------------------------------
    # ---- proj_fc1 (1/HW folded into w1) + proj_relu -------------------------
    h = jnp.dot(pooled_sum.astype(w1_ref.dtype), w1_ref[...],
                preferred_element_type=jnp.float32)
    h = jnp.maximum(h + b1_ref[...], 0.0)                    # (tn, P) f32

    # ---- proj_bn folded into proj_fc2 (w2', b2' precomputed in wrapper) -----
    y = jnp.dot(h.astype(w2_ref.dtype), w2_ref[...],
                preferred_element_type=jnp.float32)
    y_ref[...] = (y + b2_ref[...]).astype(y_ref.dtype)


def _pick_batch_tile(N, C, HW, x_bytes=4):
    """Largest batch tile whose double-buffered x DMA stays v7x-VMEM-safe."""
    x_budget = 40 * 1024 * 1024                 # 2 * tile * C * HW * x_bytes
    per_row = 2 * C * HW * x_bytes
    cap = max(8, (x_budget // per_row) // 8 * 8)
    tile = min(N, 256, cap)
    tile = max(8, (tile + 7) // 8 * 8)          # sublane-aligned
    return tile


def efficientnet_fc_head(x_feat_nchw, params):
    """x_feat_nchw: backbone feature map, shape (N, C, H, W) float32."""
    N, C, H, W = x_feat_nchw.shape
    HW = H * W
    P = params["w1"].shape[1]

    # (N, C, H, W) -> (N, C, HW): contiguous collapse, no HBM transpose pass.
    x = x_feat_nchw.reshape(N, C, HW)

    batch_tile = _pick_batch_tile(N, C, HW)
    num_tiles = pl.cdiv(N, batch_tile)
    n_pad = num_tiles * batch_tile
    if n_pad != N:
        x = jnp.pad(x, ((0, n_pad - N), (0, 0), (0, 0)))

    # Fold eval-mode BatchNorm into fc2:  bn(h) = h*s + t  with
    #   s = gamma * rsqrt(var + eps),  t = beta - mean*s
    #   y = bn(h) @ w2 + b2 = h @ (s[:,None]*w2) + (t @ w2 + b2)
    s = (params["gamma"] * jax.lax.rsqrt(params["running_var"] + 1e-5)).reshape(P)
    t = (params["beta"] - params["running_mean"].reshape(1, P) * s).reshape(1, P)
    w2_folded = s[:, None] * params["w2"]                     # (P, P)
    b2_folded = t @ params["w2"] + params["b2"]               # (1, P)

    # Fold the 1/HW pooling scale into w1; bf16 weights, f32 biases.
    inv_hw = 1.0 / float(HW)
    w1 = (params["w1"] * inv_hw).astype(jnp.bfloat16)
    w2 = w2_folded.astype(jnp.bfloat16)
    b1 = params["b1"].astype(jnp.float32)
    b2 = b2_folded.astype(jnp.float32)

    # VMEM budget: double-buffered x tile + double-buffered outputs + weights.
    x_tile_bytes = batch_tile * C * HW * 4
    out_tile_bytes = batch_tile * (P + C) * 4
    weight_bytes = (C * P + P * P) * 2 + 2 * P * 4
    vmem_needed = 2 * x_tile_bytes + 2 * out_tile_bytes + weight_bytes
    vmem_limit = int(min(max(vmem_needed + (4 << 20), 32 << 20), 60 << 20))

    flops = 2 * N * (C * P + P * P) + N * C * HW
    bytes_accessed = (x.size * 4 + w1.size * 2 + w2.size * 2
                      + (b1.size + b2.size) * 4 + n_pad * P * 4 + n_pad * C * 4)

    kernel = functools.partial(effnet_fc_kernel, inv_hw=inv_hw)

    y, pooled = pl.pallas_call(
        kernel,
        out_shape=(
            jax.ShapeDtypeStruct((n_pad, P), jnp.float32),   # y
            jax.ShapeDtypeStruct((n_pad, C), jnp.float32),   # pooled features (x)
        ),
        grid=(num_tiles,),
        in_specs=[
            pl.BlockSpec((batch_tile, C, HW), lambda i: (i, 0, 0)),  # x tile
            pl.BlockSpec((C, P), lambda i: (0, 0)),   # w1 (resident)
            pl.BlockSpec((1, P), lambda i: (0, 0)),   # b1 (resident)
            pl.BlockSpec((P, P), lambda i: (0, 0)),   # w2' (resident)
            pl.BlockSpec((1, P), lambda i: (0, 0)),   # b2' (resident)
        ],
        out_specs=(
            pl.BlockSpec((batch_tile, P), lambda i: (i, 0)),
            pl.BlockSpec((batch_tile, C), lambda i: (i, 0)),
        ),
        compiler_params=pltpu.CompilerParams(
            dimension_semantics=("parallel",),
            vmem_limit_bytes=vmem_limit,
        ),
        cost_estimate=pl.CostEstimate(
            flops=flops, transcendentals=0, bytes_accessed=bytes_accessed),
    )(x, w1, b1, w2, b2)

    if n_pad != N:
        y = y[:N]
        pooled = pooled[:N]
    return y, pooled


def init_params(key, feature_dim, projector_dim):
    """Deterministic init matching PyTorch nn.Linear / nn.BatchNorm1d defaults."""
    k1, k2, k3, k4 = jax.random.split(key, 4)
    bound1 = 1.0 / jnp.sqrt(jnp.float32(feature_dim))
    bound2 = 1.0 / jnp.sqrt(jnp.float32(projector_dim))
    # Linear weights stored pre-transposed: (in, out)
    w1 = jax.random.uniform(k1, (feature_dim, projector_dim),
                            jnp.float32, -bound1, bound1)
    b1 = jax.random.uniform(k2, (1, projector_dim), jnp.float32, -bound1, bound1)
    w2 = jax.random.uniform(k3, (projector_dim, projector_dim),
                            jnp.float32, -bound2, bound2)
    b2 = jax.random.uniform(k4, (1, projector_dim), jnp.float32, -bound2, bound2)
    return {
        "w1": w1, "b1": b1,
        "w2": w2, "b2": b2,
        "gamma": jnp.ones((1, projector_dim), jnp.float32),
        "beta": jnp.zeros((1, projector_dim), jnp.float32),
        "running_mean": jnp.zeros((1, projector_dim), jnp.float32),
        "running_var": jnp.ones((1, projector_dim), jnp.float32),
    }


def reference(x_feat_nchw, params):
    """Plain-JAX f32 reference for the same head (for a sanity check)."""
    pooled = jnp.mean(x_feat_nchw, axis=(2, 3))
    h = pooled @ params["w1"] + params["b1"]
    h = jnp.maximum(h, 0.0)
    h = (h - params["running_mean"]) * jax.lax.rsqrt(
        params["running_var"] + 1e-5) * params["gamma"] + params["beta"]
    y = h @ params["w2"] + params["b2"]
    return y, pooled


if __name__ == "__main__":
    # Small shapes consistent with the module (feature_dim -> 256,
    # projector_dim -> 128, backbone feature map 8x8 spatial, batch 16).
    N, C, H, W = 16, 256, 8, 8
    P = 128

    key = jax.random.PRNGKey(0)
    k_x, k_p = jax.random.split(key)
    x_feat = jax.random.normal(k_x, (N, C, H, W), dtype=jnp.float32)
    params = init_params(k_p, feature_dim=C, projector_dim=P)

    run = jax.jit(efficientnet_fc_head)
    y, x_pooled = jax.block_until_ready(run(x_feat, params))

    y_ref, x_ref = reference(x_feat, params)
    # bf16 weights inside the kernel -> slightly looser tolerance for y.
    assert jnp.allclose(y, y_ref, atol=1e-2, rtol=1e-2), "y mismatch"
    assert jnp.allclose(x_pooled, x_ref, atol=1e-4, rtol=1e-4), "pooled mismatch"
    assert y.shape == (N, P) and x_pooled.shape == (N, C)

    print("KERNEL_OK")
</pallas_src>

<mosaic_0001>
module attributes {stable_mosaic.version = 11 : i64} {
  func.func @effnet_fc_kernel(%arg0: i32, %arg1: memref<16x256x64xf32, #tpu.memory_space<vmem>>, %arg2: memref<256x128xbf16, #tpu.memory_space<vmem>>, %arg3: memref<1x128xf32, #tpu.memory_space<vmem>>, %arg4: memref<128x128xbf16, #tpu.memory_space<vmem>>, %arg5: memref<1x128xf32, #tpu.memory_space<vmem>>, %arg6: memref<16x128xf32, #tpu.memory_space<vmem>>, %arg7: memref<16x256xf32, #tpu.memory_space<vmem>>) attributes {dimension_semantics = [#tpu.dimension_semantics<parallel>], iteration_bounds = array<i64: 1>, scalar_prefetch = 0 : i64, scratch_operands = 0 : i64, tpu.core_type = #tpu.core_type<tc>, window_params = [{transform_indices = @transform_0, window_bounds = array<i64: 16, 256, 64>}, {pipeline_mode = #tpu.pipeline_mode<synchronous>, transform_indices = @transform_1, window_bounds = array<i64: 256, 128>}, {pipeline_mode = #tpu.pipeline_mode<synchronous>, transform_indices = @transform_2, window_bounds = array<i64: 1, 128>}, {pipeline_mode = #tpu.pipeline_mode<synchronous>, transform_indices = @transform_3, window_bounds = array<i64: 128, 128>}, {pipeline_mode = #tpu.pipeline_mode<synchronous>, transform_indices = @transform_4, window_bounds = array<i64: 1, 128>}, {transform_indices = @transform_5, window_bounds = array<i64: 16, 128>}, {transform_indices = @transform_6, window_bounds = array<i64: 16, 256>}]} {
    %c0 = arith.constant 0 : index
    %c0_0 = arith.constant 0 : index
    %c0_1 = arith.constant 0 : index
    %0 = vector.load %arg1[%c0, %c0_0, %c0_1] : memref<16x256x64xf32, #tpu.memory_space<vmem>>, vector<16x256x64xf32>
    %cst = arith.constant dense<0.000000e+00> : vector<16x256xf32>
    %1 = vector.multi_reduction <add>, %0, %cst [2] : vector<16x256x64xf32> to vector<16x256xf32>
    %cst_2 = arith.constant 1.562500e-02 : f32
    %2 = vector.broadcast %cst_2 : f32 to vector<16x256xf32>
    %3 = arith.mulf %1, %2 : vector<16x256xf32>
    %c0_3 = arith.constant 0 : index
    %c0_4 = arith.constant 0 : index
    %4 = vector.load %arg7[%c0_3, %c0_4] : memref<16x256xf32, #tpu.memory_space<vmem>>, vector<16x256xf32>
    tpu.vector_store %arg7[%c0_3, %c0_4], %3 {strides = array<i32>} : memref<16x256xf32, #tpu.memory_space<vmem>>, vector<16x256xf32>,
    %5 = arith.truncf %1 : vector<16x256xf32> to vector<16x256xbf16>
    %c0_5 = arith.constant 0 : index
    %c0_6 = arith.constant 0 : index
    %6 = vector.load %arg2[%c0_5, %c0_6] : memref<256x128xbf16, #tpu.memory_space<vmem>>, vector<256x128xbf16>
    %cst_7 = arith.constant dense<0.000000e+00> : vector<16x128xf32>
    %7 = tpu.matmul %5, %6, %cst_7 {dimension_numbers = #tpu.dot_dimension_numbers<[1], [0], [0], [1], [0, 0, 1, 1], [], []>} : vector<16x256xbf16>, vector<256x128xbf16>, vector<16x128xf32> -> vector<16x128xf32>
    %c0_8 = arith.constant 0 : index
    %c0_9 = arith.constant 0 : index
    %8 = vector.load %arg3[%c0_8, %c0_9] : memref<1x128xf32, #tpu.memory_space<vmem>>, vector<1x128xf32>
    %9 = vector.broadcast %8 : vector<1x128xf32> to vector<16x128xf32>
    %10 = arith.addf %7, %9 : vector<16x128xf32>
    %cst_10 = arith.constant 0.000000e+00 : f32
    %11 = vector.broadcast %cst_10 : f32 to vector<16x128xf32>
    %12 = arith.maximumf %10, %11 : vector<16x128xf32>
    %13 = arith.truncf %12 : vector<16x128xf32> to vector<16x128xbf16>
    %c0_11 = arith.constant 0 : index
    %c0_12 = arith.constant 0 : index
    %14 = vector.load %arg4[%c0_11, %c0_12] : memref<128x128xbf16, #tpu.memory_space<vmem>>, vector<128x128xbf16>
    %cst_13 = arith.constant dense<0.000000e+00> : vector<16x128xf32>
    %15 = tpu.matmul %13, %14, %cst_13 {dimension_numbers = #tpu.dot_dimension_numbers<[1], [0], [0], [1], [0, 0, 1, 1], [], []>} : vector<16x128xbf16>, vector<128x128xbf16>, vector<16x128xf32> -> vector<16x128xf32>
    %c0_14 = arith.constant 0 : index
    %c0_15 = arith.constant 0 : index
    %16 = vector.load %arg5[%c0_14, %c0_15] : memref<1x128xf32, #tpu.memory_space<vmem>>, vector<1x128xf32>
    %17 = vector.broadcast %16 : vector<1x128xf32> to vector<16x128xf32>
    %18 = arith.addf %15, %17 : vector<16x128xf32>
    %c0_16 = arith.constant 0 : index
    %c0_17 = arith.constant 0 : index
    %19 = vector.load %arg6[%c0_16, %c0_17] : memref<16x128xf32, #tpu.memory_space<vmem>>, vector<16x128xf32>
    tpu.vector_store %arg6[%c0_16, %c0_17], %18 {strides = array<i32>} : memref<16x128xf32, #tpu.memory_space<vmem>>, vector<16x128xf32>,
    return
  }
  func.func @transform_0(%arg0: i32) -> (i32, i32, i32) {
    %c0_i32 = arith.constant 0 : i32
    %c0_i32_0 = arith.constant 0 : i32
    %c0_i32_1 = arith.constant 0 : i32
    return %arg0, %c0_i32, %c0_i32_0 : i32, i32, i32
  }
  func.func @transform_1(%arg0: i32) -> (i32, i32) {
    %c0_i32 = arith.constant 0 : i32
    %c0_i32_0 = arith.constant 0 : i32
    %c0_i32_1 = arith.constant 0 : i32
    return %c0_i32, %c0_i32_0 : i32, i32
  }
  func.func @transform_2(%arg0: i32) -> (i32, i32) {
    %c0_i32 = arith.constant 0 : i32
    %c0_i32_0 = arith.constant 0 : i32
    %c0_i32_1 = arith.constant 0 : i32
    return %c0_i32, %c0_i32_0 : i32, i32
  }
  func.func @transform_3(%arg0: i32) -> (i32, i32) {
    %c0_i32 = arith.constant 0 : i32
    %c0_i32_0 = arith.constant 0 : i32
    %c0_i32_1 = arith.constant 0 : i32
    return %c0_i32, %c0_i32_0 : i32, i32
  }
  func.func @transform_4(%arg0: i32) -> (i32, i32) {
    %c0_i32 = arith.constant 0 : i32
    %c0_i32_0 = arith.constant 0 : i32
    %c0_i32_1 = arith.constant 0 : i32
    return %c0_i32, %c0_i32_0 : i32, i32
  }
  func.func @transform_5(%arg0: i32) -> (i32, i32) {
    %c0_i32 = arith.constant 0 : i32
    %c0_i32_0 = arith.constant 0 : i32
    return %arg0, %c0_i32 : i32, i32
  }
  func.func @transform_6(%arg0: i32) -> (i32, i32) {
    %c0_i32 = arith.constant 0 : i32
    %c0_i32_0 = arith.constant 0 : i32
    return %arg0, %c0_i32 : i32, i32
  }
}

</mosaic_0001>

<bundles_post_ra>
// kernel: efficientnet_fc_head.1
= control target key start
LH: loop header
LB: loop body
LE: loop exit
PB: predicated region body
PF: predicated region fallthrough
CT: control target
= control target key end

     0   :  { %12 = vsyncpa [#allocation3], 0  ;;  %vm536_vm0 = vcmask 523264   ;;  %s13571_s0 = inlined_call_operand.vmem [shape: f32[16,256,64], index: 0, kind: input, shape index: {}]   ;;  %s13572_s1 = inlined_call_operand.vmem [shape: bf16[256,128], index: 1, kind: input, shape index: {}]   ;;  %s13573_s2 = inlined_call_operand.vmem [shape: f32[1,128], index: 2, kind: input, shape index: {}]   ;;  %s13574_s3 = inlined_call_operand.vmem [shape: bf16[128,128], index: 3, kind: input, shape index: {}]   ;;  %s13575_s4 = inlined_call_operand.vmem [shape: f32[1,128], index: 4, kind: input, shape index: {}]   ;;  %s13576_s5 = inlined_call_operand.hbm [shape: f32[16,128], index: 5, kind: output, shape index: {0}]   ;;  %s13577_s6 = inlined_call_operand.hbm [shape: f32[16,256], index: 6, kind: output, shape index: {1}]  }
   0x1   :  { %v28_v0 = vld [vmem:[%s13571_s0 + $0x20] sm:$0xff]  ;;  %v26_v1 = vld [vmem:[%s13571_s0 + $0x10] sm:$0xff]  ;;  %v29_v6 = vld [vmem:[%s13571_s0 + $0x28] sm:$0xff] }
   0x2   :  { %v24_v2 = vld [vmem:[%s13571_s0] sm:$0xff]  ;;  %v549_v3 = vsel %vm536_vm0, %v28_v0, 0.0  ;;  %v543_v4 = vsel %vm536_vm0, %v26_v1, 0.0  ;;  %v27_v7 = vld [vmem:[%s13571_s0 + $0x18] sm:$0xff]  ;;  %v25_v8 = vld [vmem:[%s13571_s0 + $0x8] sm:$0xff] }
   0x3   :  { %v537_v5 = vsel %vm536_vm0, %v24_v2, 0.0  ;;  %550 = vadd.xlane.f32.xlu2 %v549_v3  ;;  %544 = vadd.xlane.f32.xlu1 %v543_v4 }
   0x4   :  { %538 = vadd.xlane.f32.xlu0 %v537_v5 }
   0x5   :  { %13 = vsyncpa [#allocation5], 0  ;;  %v552_v9 = vsel %vm536_vm0, %v29_v6, 0.0  ;;  %v546_v10 = vsel %vm536_vm0, %v27_v7, 0.0  ;;  %v540_v11 = vsel %vm536_vm0, %v25_v8, 0.0  ;;  %v32_v12 = vld [vmem:[%s13571_s0 + $0x40] sm:$0xff] }
   0x6   :  { %v31_v13 = vld [vmem:[%s13571_s0 + $0x38] sm:$0xff]  ;;  %v30_v14 = vld [vmem:[%s13571_s0 + $0x30] sm:$0xff]  ;;  %v561_v15 = vsel %vm536_vm0, %v32_v12, 0.0  ;;  %v33_v20 = vld [vmem:[%s13571_s0 + $0x48] sm:$0xff]  ;;  %vm13830_vm1 = vcmask 130112   ;;  %vm3106_vm2 = vcmask 195712  }
   0x7   :  { %v558_v16 = vsel %vm536_vm0, %v31_v13, 0.0  ;;  %v555_v17 = vsel %vm536_vm0, %v30_v14, 0.0  ;;  %v35_v18 = vld [vmem:[%s13571_s0 + $0x58] sm:$0xff]  ;;  %v34_v19 = vld [vmem:[%s13571_s0 + $0x50] sm:$0xff]  ;;  %v564_v23 = vsel %vm536_vm0, %v33_v20, 0.0  ;;  %v37_v25 = vld [vmem:[%s13571_s0 + $0x68] sm:$0xff] }
   0x8   :  { %v570_v21 = vsel %vm536_vm0, %v35_v18, 0.0  ;;  %v567_v22 = vsel %vm536_vm0, %v34_v19, 0.0  ;;  %v38_v24 = vld [vmem:[%s13571_s0 + $0x70] sm:$0xff]  ;;  %v36_v26 = vld [vmem:[%s13571_s0 + $0x60] sm:$0xff]  ;;  %v576_v28 = vsel %vm536_vm0, %v37_v25, 0.0  ;;  %v41_v30 = vld [vmem:[%s13571_s0 + $0x88] sm:$0xff] }
   0x9   :  { %v579_v27 = vsel %vm536_vm0, %v38_v24, 0.0  ;;  %v573_v29 = vsel %vm536_vm0, %v36_v26, 0.0  ;;  %v40_v31 = vld [vmem:[%s13571_s0 + $0x80] sm:$0xff]  ;;  %v39_v32 = vld [vmem:[%s13571_s0 + $0x78] sm:$0xff]  ;;  %v588_v33 = vsel %vm536_vm0, %v41_v30, 0.0  ;;  %v42_v38 = vld [vmem:[%s13571_s0 + $0x90] sm:$0xff] }
   0xa   :  { %v585_v34 = vsel %vm536_vm0, %v40_v31, 0.0  ;;  %v582_v35 = vsel %vm536_vm0, %v39_v32, 0.0  ;;  %v44_v36 = vld [vmem:[%s13571_s0 + $0xa0] sm:$0xff]  ;;  %v43_v37 = vld [vmem:[%s13571_s0 + $0x98] sm:$0xff]  ;;  %v591_v41 = vsel %vm536_vm0, %v42_v38, 0.0  ;;  %v46_v43 = vld [vmem:[%s13571_s0 + $0xb0] sm:$0xff] }
   0xb   :  { %553 = vadd.xlane.f32.xlu2 %v552_v9  ;;  %547 = vadd.xlane.f32.xlu1 %v546_v10  ;;  %v597_v39 = vsel %vm536_vm0, %v44_v36, 0.0  ;;  %v594_v40 = vsel %vm536_vm0, %v43_v37, 0.0  ;;  %v47_v42 = vld [vmem:[%s13571_s0 + $0xb8] sm:$0xff]  ;;  %v45_v44 = vld [vmem:[%s13571_s0 + $0xa8] sm:$0xff]  ;;  %v603_v46 = vsel %vm536_vm0, %v46_v43, 0.0  ;;  %v50_v48 = vld [vmem:[%s13571_s0 + $0xd0] sm:$0xff] }
   0xc   :  { %541 = vadd.xlane.f32.xlu0 %v540_v11  ;;  %v606_v45 = vsel %vm536_vm0, %v47_v42, 0.0  ;;  %v600_v47 = vsel %vm536_vm0, %v45_v44, 0.0  ;;  %v49_v49 = vld [vmem:[%s13571_s0 + $0xc8] sm:$0xff]  ;;  %v48_v50 = vld [vmem:[%s13571_s0 + $0xc0] sm:$0xff]  ;;  %v615_v51 = vsel %vm536_vm0, %v50_v48, 0.0  ;;  %v51_v56 = vld [vmem:[%s13571_s0 + $0xd8] sm:$0xff] }
   0xd   :  { %v612_v52 = vsel %vm536_vm0, %v49_v49, 0.0  ;;  %v609_v53 = vsel %vm536_vm0, %v48_v50, 0.0  ;;  %v53_v54 = vld [vmem:[%s13571_s0 + $0xe8] sm:$0xff]  ;;  %v52_v55 = vld [vmem:[%s13571_s0 + $0xe0] sm:$0xff]  ;;  %v618_v59 = vsel %vm536_vm0, %v51_v56, 0.0  ;;  %v55_v61 = vld [vmem:[%s13571_s0 + $0xf8] sm:$0xff] }
   0xe   :  { %v624_v57 = vsel %vm536_vm0, %v53_v54, 0.0  ;;  %v621_v58 = vsel %vm536_vm0, %v52_v55, 0.0  ;;  %v56_v60 = vld [vmem:[%s13571_s0 + $0x100] sm:$0xff]  ;;  %v54_v62 = vld [vmem:[%s13571_s0 + $0xf0] sm:$0xff]  ;;  %v630_v0 = vsel %vm536_vm0, %v55_v61, 0.0  ;;  %v59_v2 = vld [vmem:[%s13571_s0 + $0x118] sm:$0xff] }
   0xf   :  { %v633_v63 = vsel %vm536_vm0, %v56_v60, 0.0  ;;  %v627_v1 = vsel %vm536_vm0, %v54_v62, 0.0  ;;  %v58_v3 = vld [vmem:[%s13571_s0 + $0x110] sm:$0xff]  ;;  %v57_v4 = vld [vmem:[%s13571_s0 + $0x108] sm:$0xff]  ;;  %v642_v5 = vsel %vm536_vm0, %v59_v2, 0.0  ;;  %v60_v10 = vld [vmem:[%s13571_s0 + $0x120] sm:$0xff] }
  0x10   :  { %v639_v6 = vsel %vm536_vm0, %v58_v3, 0.0  ;;  %v636_v7 = vsel %vm536_vm0, %v57_v4, 0.0  ;;  %v62_v8 = vld [vmem:[%s13571_s0 + $0x130] sm:$0xff]  ;;  %v61_v9 = vld [vmem:[%s13571_s0 + $0x128] sm:$0xff]  ;;  %v645_v13 = vsel %vm536_vm0, %v60_v10, 0.0  ;;  %v68_v20 = vld [vmem:[%s13571_s0 + $0x160] sm:$0xff] }
  0x11   :  { %v651_v11 = vsel %vm536_vm0, %v62_v8, 0.0  ;;  %v648_v12 = vsel %vm536_vm0, %v61_v9, 0.0  ;;  %v65_v14 = vld [vmem:[%s13571_s0 + $0x148] sm:$0xff]  ;;  %v71_v26 = vld [vmem:[%s13571_s0 + $0x178] sm:$0xff]  ;;  %vm3110_vm3 = vcmask 261312   ;;  %vm3114_vm4 = vcmask 326912  }
  0x12   :  { %v69_v30 = vld [vmem:[%s13571_s0 + $0x168] sm:$0xff]  ;;  %v678_v32 = vsel %vm536_vm0, %v71_v26, 0.0  ;;  %v75_v48 = vld [vmem:[%s13571_s0 + $0x198] sm:$0xff]  ;;  %vm3118_vm5 = vcmask 392512   ;;  %vm13831_vm6 = vcmask 458112   ;;  %vm13812_vm7 = vcmask 523712  }
  0x13   :  { %562 = vadd.xlane.f32.xlu2 %v561_v15  ;;  %559 = vadd.xlane.f32.xlu1 %v558_v16  ;;  %v64_v15 = vld [vmem:[%s13571_s0 + $0x140] sm:$0xff]  ;;  %v63_v16 = vld [vmem:[%s13571_s0 + $0x138] sm:$0xff]  ;;  %v73_v36 = vld [vmem:[%s13571_s0 + $0x188] sm:$0xff]  ;;  %vm13747_vm8 = vcmask 589312   ;;  %vm13829_vm9 = vcmask 654912   ;;  %vm3138_vm10 = vcmask 720512  }
  0x14   :  { %556 = vadd.xlane.f32.xlu0 %v555_v17  ;;  %v660_v17 = vsel %vm536_vm0, %v65_v14, 0.0  ;;  %v657_v18 = vsel %vm536_vm0, %v64_v15, 0.0  ;;  %v654_v19 = vsel %vm536_vm0, %v63_v16, 0.0  ;;  %v684_v42 = vsel %vm536_vm0, %v73_v36, 0.0  ;;  %v77_v44 = vld [vmem:[%s13571_s0 + $0x1a8] sm:$0xff]  ;;  %v79_v54 = vld [vmem:[%s13571_s0 + $0x1b8] sm:$0xff] }
  0x15   :  { %v696_v50 = vsel %vm536_vm0, %v77_v44, 0.0  ;;  %v702_v60 = vsel %vm536_vm0, %v79_v54, 0.0  ;;  %v83_v62 = vld [vmem:[%s13571_s0 + $0x1d8] sm:$0xff]  ;;  %v81_v2 = vld [vmem:[%s13571_s0 + $0x1c8] sm:$0xff]  ;;  %vm13813_vm11 = vcmask 786112   ;;  %vm3146_vm12 = vcmask 851712  }
  0x16   :  { %v714_v4 = vsel %vm536_vm0, %v83_v62, 0.0  ;;  %v85_v8 = vld [vmem:[%s13571_s0 + $0x1e8] sm:$0xff]  ;;  %v91_v26 = vld [vmem:[%s13571_s0 + $0x218] sm:$0xff]  ;;  %vm3150_vm13 = vcmask 917312   ;;  %vm13779_vm14 = vcmask 982912   ;;  %vm13757_vm15 = vcmask 1048512  }
  0x17   :  { %v720_v14 = vsel %vm536_vm0, %v85_v8, 0.0  ;;  %v89_v16 = vld [vmem:[%s13571_s0 + $0x208] sm:$0xff]  ;;  %s6675_s12 = smov [#allocation4]   ;;  %s6478_s14 = sshll.u32 %s13577_s6, 4  ;;  %s6479_s14 = int_to_ptr.hbm [resolvable:$true] %s6478_s14 }
  0x18   :  { %v93_v44 = vld [vmem:[%s13571_s0 + $0x228] sm:$0xff]  ;;  %s6676_s15 = smov 256   ;;  %s6678_s18 = smov [#allocation2]  }
  0x19   :  { %s6465_s21 = sshll.u32 %s13576_s5, 4  ;;  %s6679_s6 = smov 128   ;;  %s6466_s21 = int_to_ptr.hbm [resolvable:$true] %s6465_s21 }
  0x1a   :  { %s6680_s22 = smov 8  }
  0x1b   :  { %571 = vadd.xlane.f32.xlu2 %v570_v21  ;;  %568 = vadd.xlane.f32.xlu1 %v567_v22  ;;  %v67_v21 = vld [vmem:[%s13571_s0 + $0x158] sm:$0xff]  ;;  %v66_v22 = vld [vmem:[%s13571_s0 + $0x150] sm:$0xff] }
  0x1c   :  { %565 = vadd.xlane.f32.xlu0 %v564_v23  ;;  %v669_v23 = vsel %vm536_vm0, %v68_v20, 0.0  ;;  %v666_v24 = vsel %vm536_vm0, %v67_v21, 0.0  ;;  %v663_v25 = vsel %vm536_vm0, %v66_v22, 0.0  ;;  %v87_v20 = vld [vmem:[%s13571_s0 + $0x1f8] sm:$0xff]  ;;  %v732_v22 = vsel %vm536_vm0, %v89_v16, 0.0 }
  0x1d   :  { %v103_v16 = vld [vmem:[%s13571_s0 + $0x278] sm:$0xff] }
  0x23   :  { %580 = vadd.xlane.f32.xlu2 %v579_v27  ;;  %577 = vadd.xlane.f32.xlu1 %v576_v28  ;;  %v70_v27 = vld [vmem:[%s13571_s0 + $0x170] sm:$0xff] }
  0x24   :  { %574 = vadd.xlane.f32.xlu0 %v573_v29 }
  0x2b   :  { %589 = vadd.xlane.f32.xlu2 %v588_v33  ;;  %586 = vadd.xlane.f32.xlu1 %v585_v34  ;;  %v675_v33 = vsel %vm536_vm0, %v70_v27, 0.0  ;;  %v672_v34 = vsel %vm536_vm0, %v69_v30, 0.0 }
  0x2c   :  { %583 = vadd.xlane.f32.xlu0 %v582_v35  ;;  %v74_v35 = vld [vmem:[%s13571_s0 + $0x190] sm:$0xff] }
  0x33   :  { %598 = vadd.xlane.f32.xlu2 %v597_v39  ;;  %595 = vadd.xlane.f32.xlu1 %v594_v40  ;;  %v72_v39 = vld [vmem:[%s13571_s0 + $0x180] sm:$0xff] }
  0x34   :  { %592 = vadd.xlane.f32.xlu0 %v591_v41  ;;  %v687_v41 = vsel %vm536_vm0, %v74_v35, 0.0  ;;  %v681_v43 = vsel %vm536_vm0, %v72_v39, 0.0  ;;  %v738_v35 = vsel %vm536_vm0, %v91_v26, 0.0  ;;  %v95_v39 = vld [vmem:[%s13571_s0 + $0x238] sm:$0xff] }
  0x3b   :  { %607 = vadd.xlane.f32.xlu2 %v606_v45  ;;  %604 = vadd.xlane.f32.xlu1 %v603_v46  ;;  %v76_v45 = vld [vmem:[%s13571_s0 + $0x1a0] sm:$0xff] }
  0x3c   :  { %601 = vadd.xlane.f32.xlu0 %v600_v47 }
  0x43   :  { %616 = vadd.xlane.f32.xlu2 %v615_v51  ;;  %613 = vadd.xlane.f32.xlu1 %v612_v52  ;;  %v693_v51 = vsel %vm536_vm0, %v76_v45, 0.0  ;;  %v690_v52 = vsel %vm536_vm0, %v75_v48, 0.0  ;;  %v750_v48 = vsel %vm536_vm0, %v95_v39, 0.0  ;;  %v105_v39 = vld [vmem:[%s13571_s0 + $0x288] sm:$0xff] }
  0x44   :  { %610 = vadd.xlane.f32.xlu0 %v609_v53  ;;  %v80_v53 = vld [vmem:[%s13571_s0 + $0x1c0] sm:$0xff] }
  0x4b   :  { %625 = vadd.xlane.f32.xlu2 %v624_v57  ;;  %622 = vadd.xlane.f32.xlu1 %v621_v58  ;;  %v78_v57 = vld [vmem:[%s13571_s0 + $0x1b0] sm:$0xff] }
  0x4c   :  { %619 = vadd.xlane.f32.xlu0 %v618_v59  ;;  %v705_v59 = vsel %vm536_vm0, %v80_v53, 0.0  ;;  %v699_v61 = vsel %vm536_vm0, %v78_v57, 0.0  ;;  %v97_v53 = vld [vmem:[%s13571_s0 + $0x248] sm:$0xff] }
  0x4d   :  { %v756_v62 = vsel %vm536_vm0, %v97_v53, 0.0 }
  0x53   :  { %634 = vadd.xlane.f32.xlu2 %v633_v63  ;;  %631 = vadd.xlane.f32.xlu1 %v630_v0  ;;  %v82_v63 = vld [vmem:[%s13571_s0 + $0x1d0] sm:$0xff] }
  0x54   :  { %628 = vadd.xlane.f32.xlu0 %v627_v1 }
  0x5b   :  { %643 = vadd.xlane.f32.xlu2 %v642_v5  ;;  %640 = vadd.xlane.f32.xlu1 %v639_v6  ;;  %v711_v5 = vsel %vm536_vm0, %v82_v63, 0.0  ;;  %v708_v6 = vsel %vm536_vm0, %v81_v2, 0.0  ;;  %v101_v2 = vld [vmem:[%s13571_s0 + $0x268] sm:$0xff] }
  0x5c   :  { %637 = vadd.xlane.f32.xlu0 %v636_v7  ;;  %v86_v7 = vld [vmem:[%s13571_s0 + $0x1f0] sm:$0xff] }
  0x63   :  { %652 = vadd.xlane.f32.xlu2 %v651_v11  ;;  %649 = vadd.xlane.f32.xlu1 %v648_v12  ;;  %v84_v11 = vld [vmem:[%s13571_s0 + $0x1e0] sm:$0xff] }
  0x64   :  { %646 = vadd.xlane.f32.xlu0 %v645_v13  ;;  %v723_v13 = vsel %vm536_vm0, %v86_v7, 0.0  ;;  %v717_v15 = vsel %vm536_vm0, %v84_v11, 0.0  ;;  %v99_v7 = vld [vmem:[%s13571_s0 + $0x258] sm:$0xff]  ;;  %v768_v11 = vsel %vm536_vm0, %v101_v2, 0.0 }
  0x6b   :  { %661 = vadd.xlane.f32.xlu2 %v660_v17  ;;  %658 = vadd.xlane.f32.xlu1 %v657_v18  ;;  %v88_v17 = vld [vmem:[%s13571_s0 + $0x200] sm:$0xff] }
  0x6c   :  { %655 = vadd.xlane.f32.xlu0 %v654_v19 }
  0x73   :  { %670 = vadd.xlane.f32.xlu2 %v669_v23  ;;  %667 = vadd.xlane.f32.xlu1 %v666_v24  ;;  %v729_v23 = vsel %vm536_vm0, %v88_v17, 0.0  ;;  %v726_v24 = vsel %vm536_vm0, %v87_v20, 0.0 }
  0x74   :  { %664 = vadd.xlane.f32.xlu0 %v663_v25  ;;  %v92_v25 = vld [vmem:[%s13571_s0 + $0x220] sm:$0xff] }
  0x76   :  { %v6902_v28 = vpop.xlane.xlu2 %550  ;;  %v6904_v29 = vpop.xlane.xlu1 %544 }
  0x77   :  { %v6909_v31 = vpop.xlane.xlu0 %538 }
  0x7b   :  { %679 = vadd.xlane.f32.xlu2 %v678_v32  ;;  %676 = vadd.xlane.f32.xlu1 %v675_v33  ;;  %v90_v32 = vld [vmem:[%s13571_s0 + $0x210] sm:$0xff] }
  0x7c   :  { %673 = vadd.xlane.f32.xlu0 %v672_v34  ;;  %v741_v34 = vsel %vm536_vm0, %v92_v25, 0.0  ;;  %v735_v36 = vsel %vm536_vm0, %v90_v32, 0.0  ;;  %v774_v25 = vsel %vm536_vm0, %v103_v16, 0.0  ;;  %v107_v32 = vld [vmem:[%s13571_s0 + $0x298] sm:$0xff] }
  0x7e   :  { %v6920_v37 = vpop.xlane.xlu2 %553  ;;  %v6922_v38 = vpop.xlane.xlu1 %547 }
  0x7f   :  { %v6927_v40 = vpop.xlane.xlu0 %541 }
  0x83   :  { %688 = vadd.xlane.f32.xlu2 %v687_v41  ;;  %685 = vadd.xlane.f32.xlu1 %v684_v42  ;;  %v94_v41 = vld [vmem:[%s13571_s0 + $0x230] sm:$0xff] }
  0x84   :  { %682 = vadd.xlane.f32.xlu0 %v681_v43 }
  0x86   :  { %v6938_v46 = vpop.xlane.xlu2 %562  ;;  %v6940_v47 = vpop.xlane.xlu1 %559 }
  0x87   :  { %v6945_v49 = vpop.xlane.xlu0 %556 }
  0x8b   :  { %697 = vadd.xlane.f32.xlu2 %v696_v50  ;;  %694 = vadd.xlane.f32.xlu1 %v693_v51  ;;  %v747_v50 = vsel %vm536_vm0, %v94_v41, 0.0  ;;  %v744_v51 = vsel %vm536_vm0, %v93_v44, 0.0  ;;  %v786_v44 = vsel %vm536_vm0, %v107_v32, 0.0  ;;  %v115_v32 = vld [vmem:[%s13571_s0 + $0x2d8] sm:$0xff] }
  0x8c   :  { %691 = vadd.xlane.f32.xlu0 %v690_v52  ;;  %v98_v52 = vld [vmem:[%s13571_s0 + $0x250] sm:$0xff] }
  0x8e   :  { %v6956_v55 = vpop.xlane.xlu2 %571  ;;  %v6958_v56 = vpop.xlane.xlu1 %568 }
  0x8f   :  { %v6963_v58 = vpop.xlane.xlu0 %565 }
  0x93   :  { %706 = vadd.xlane.f32.xlu2 %v705_v59  ;;  %703 = vadd.xlane.f32.xlu1 %v702_v60  ;;  %v96_v59 = vld [vmem:[%s13571_s0 + $0x240] sm:$0xff] }
  0x94   :  { %700 = vadd.xlane.f32.xlu0 %v699_v61  ;;  %v759_v61 = vsel %vm536_vm0, %v98_v52, 0.0  ;;  %v753_v63 = vsel %vm536_vm0, %v96_v59, 0.0  ;;  %v109_v52 = vld [vmem:[%s13571_s0 + $0x2a8] sm:$0xff] }
  0x95   :  { %v792_v2 = vsel %vm536_vm0, %v109_v52, 0.0 }
  0x96   :  { %v6974_v0 = vpop.xlane.xlu2 %580  ;;  %v6976_v1 = vpop.xlane.xlu1 %577 }
  0x97   :  { %13931 = vst [vmem:[#allocation8_spill] sm:$0xff] %v6974_v0  ;;  %v6981_v3 = vpop.xlane.xlu0 %574 }
  0x9b   :  { %715 = vadd.xlane.f32.xlu2 %v714_v4  ;;  %712 = vadd.xlane.f32.xlu1 %v711_v5  ;;  %v100_v4 = vld [vmem:[%s13571_s0 + $0x260] sm:$0xff] }
  0x9c   :  { %709 = vadd.xlane.f32.xlu0 %v708_v6 }
  0x9e   :  { %v6992_v9 = vpop.xlane.xlu2 %589  ;;  %v6994_v10 = vpop.xlane.xlu1 %586 }
  0x9f   :  { %v6999_v12 = vpop.xlane.xlu0 %583 }
  0xa0   :  { %13932 = vst [vmem:[#allocation9_spill] sm:$0xff] %v6999_v12 }
  0xa3   :  { %724 = vadd.xlane.f32.xlu2 %v723_v13  ;;  %721 = vadd.xlane.f32.xlu1 %v720_v14  ;;  %v765_v13 = vsel %vm536_vm0, %v100_v4, 0.0  ;;  %v762_v14 = vsel %vm536_vm0, %v99_v7, 0.0  ;;  %v113_v7 = vld [vmem:[%s13571_s0 + $0x2c8] sm:$0xff] }
  0xa4   :  { %718 = vadd.xlane.f32.xlu0 %v717_v15  ;;  %v104_v15 = vld [vmem:[%s13571_s0 + $0x280] sm:$0xff] }
  0xa6   :  { %v7010_v18 = vpop.xlane.xlu2 %598  ;;  %v7012_v19 = vpop.xlane.xlu1 %595 }
  0xa7   :  { %v7017_v21 = vpop.xlane.xlu0 %592 }
  0xab   :  { %733 = vadd.xlane.f32.xlu2 %v732_v22  ;;  %730 = vadd.xlane.f32.xlu1 %v729_v23  ;;  %v102_v22 = vld [vmem:[%s13571_s0 + $0x270] sm:$0xff] }
  0xac   :  { %727 = vadd.xlane.f32.xlu0 %v726_v24  ;;  %v777_v24 = vsel %vm536_vm0, %v104_v15, 0.0  ;;  %v771_v26 = vsel %vm536_vm0, %v102_v22, 0.0  ;;  %v111_v15 = vld [vmem:[%s13571_s0 + $0x2b8] sm:$0xff]  ;;  %v804_v22 = vsel %vm536_vm0, %v113_v7, 0.0  ;;  %v117_v7 = vld [vmem:[%s13571_s0 + $0x2e8] sm:$0xff] }
  0xae   :  { %v7028_v27 = vpop.xlane.xlu2 %607  ;;  %v7030_v30 = vpop.xlane.xlu1 %604 }
  0xaf   :  { %13933 = vst [vmem:[#allocation10_spill] sm:$0xff] %v7028_v27  ;;  %v7035_v33 = vpop.xlane.xlu0 %601 }
  0xb0   :  { %13934 = vst [vmem:[#allocation11_spill] sm:$0xff] %v7030_v30 }
  0xb3   :  { %742 = vadd.xlane.f32.xlu2 %v741_v34  ;;  %739 = vadd.xlane.f32.xlu1 %v738_v35  ;;  %v106_v34 = vld [vmem:[%s13571_s0 + $0x290] sm:$0xff] }
  0xb4   :  { %736 = vadd.xlane.f32.xlu0 %v735_v36 }
  0xb6   :  { %v7046_v42 = vpop.xlane.xlu2 %616  ;;  %v7048_v43 = vpop.xlane.xlu1 %613 }
  0xb7   :  { %13935 = vst [vmem:[#allocation12_spill] sm:$0xff] %v7046_v42  ;;  %v7053_v45 = vpop.xlane.xlu0 %610 }
  0xb8   :  { %13936 = vst [vmem:[#allocation13_spill] sm:$0xff] %v7048_v43 }
  0xb9   :  { %13937 = vst [vmem:[#allocation14_spill] sm:$0xff] %v7053_v45 }
  0xbb   :  { %751 = vadd.xlane.f32.xlu2 %v750_v48  ;;  %748 = vadd.xlane.f32.xlu1 %v747_v50  ;;  %v783_v48 = vsel %vm536_vm0, %v106_v34, 0.0  ;;  %v780_v50 = vsel %vm536_vm0, %v105_v39, 0.0 }
  0xbc   :  { %745 = vadd.xlane.f32.xlu0 %v744_v51  ;;  %v110_v51 = vld [vmem:[%s13571_s0 + $0x2b0] sm:$0xff] }
  0xbe   :  { %v7064_v54 = vpop.xlane.xlu2 %625  ;;  %v7066_v57 = vpop.xlane.xlu1 %622 }
  0xbf   :  { %13938 = vst [vmem:[#allocation15_spill] sm:$0xff] %v7064_v54  ;;  %v7071_v60 = vpop.xlane.xlu0 %619 }
  0xc0   :  { %13939 = vst [vmem:[#allocation16_spill] sm:$0xff] %v7066_v57 }
  0xc1   :  { %13940 = vst [vmem:[#allocation17_spill] sm:$0xff] %v7071_v60  ;;  %v2084_v60 = vmul.f32 0.015625, %v6956_v55 }
  0xc3   :  { %760 = vadd.xlane.f32.xlu2 %v759_v61  ;;  %757 = vadd.xlane.f32.xlu1 %v756_v62  ;;  %v108_v61 = vld [vmem:[%s13571_s0 + $0x2a0] sm:$0xff] }
  0xc4   :  { %754 = vadd.xlane.f32.xlu0 %v753_v63  ;;  %v795_v63 = vsel %vm536_vm0, %v110_v51, 0.0  ;;  %v789_v4 = vsel %vm536_vm0, %v108_v61, 0.0  ;;  %v810_v51 = vsel %vm536_vm0, %v115_v32, 0.0  ;;  %v119_v61 = vld [vmem:[%s13571_s0 + $0x2f8] sm:$0xff] }
  0xc6   :  { %v7082_v5 = vpop.xlane.xlu2 %634  ;;  %v7084_v6 = vpop.xlane.xlu1 %631 }
  0xc7   :  { %13941 = vst [vmem:[#allocation18_spill] sm:$0xff] %v7082_v5  ;;  %v7089_v8 = vpop.xlane.xlu0 %628 }
  0xc8   :  { %13942 = vst [vmem:[#allocation19_spill] sm:$0xff] %v7084_v6 }
  0xc9   :  { %13943 = vst [vmem:[#allocation20_spill] sm:$0xff] %v7089_v8 }
  0xcb   :  { %769 = vadd.xlane.f32.xlu2 %v768_v11  ;;  %766 = vadd.xlane.f32.xlu1 %v765_v13  ;;  %v112_v11 = vld [vmem:[%s13571_s0 + $0x2c0] sm:$0xff] }
  0xcc   :  { %763 = vadd.xlane.f32.xlu0 %v762_v14 }
  0xce   :  { %v7100_v17 = vpop.xlane.xlu2 %643  ;;  %v7102_v20 = vpop.xlane.xlu1 %640 }
  0xcf   :  { %13944 = vst [vmem:[#allocation21_spill] sm:$0xff] %v7100_v17  ;;  %v7107_v23 = vpop.xlane.xlu0 %637 }
  0xd0   :  { %13945 = vst [vmem:[#allocation22_spill] sm:$0xff] %v7102_v20 }
  0xd1   :  { %13946 = vst [vmem:[#allocation23_spill] sm:$0xff] %v7107_v23 }
  0xd3   :  { %778 = vadd.xlane.f32.xlu2 %v777_v24  ;;  %775 = vadd.xlane.f32.xlu1 %v774_v25  ;;  %v801_v24 = vsel %vm536_vm0, %v112_v11, 0.0  ;;  %v798_v25 = vsel %vm536_vm0, %v111_v15, 0.0  ;;  %v822_v15 = vsel %vm536_vm0, %v119_v61, 0.0 }
  0xd4   :  { %772 = vadd.xlane.f32.xlu0 %v771_v26  ;;  %v116_v26 = vld [vmem:[%s13571_s0 + $0x2e0] sm:$0xff] }
  0xd6   :  { %v7118_v35 = vpop.xlane.xlu2 %652  ;;  %v7120_v36 = vpop.xlane.xlu1 %649 }
  0xd7   :  { %13947 = vst [vmem:[#allocation24_spill] sm:$0xff] %v7118_v35  ;;  %v7125_v41 = vpop.xlane.xlu0 %646 }
  0xd8   :  { %13948 = vst [vmem:[#allocation25_spill] sm:$0xff] %v7120_v36 }
  0xd9   :  { %13949 = vst [vmem:[#allocation26_spill] sm:$0xff] %v7125_v41 }
  0xdb   :  { %787 = vadd.xlane.f32.xlu2 %v786_v44  ;;  %784 = vadd.xlane.f32.xlu1 %v783_v48  ;;  %v114_v44 = vld [vmem:[%s13571_s0 + $0x2d0] sm:$0xff] }
  0xdc   :  { %781 = vadd.xlane.f32.xlu0 %v780_v50  ;;  %v813_v50 = vsel %vm536_vm0, %v116_v26, 0.0  ;;  %v807_v52 = vsel %vm536_vm0, %v114_v44, 0.0  ;;  %v121_v26 = vld [vmem:[%s13571_s0 + $0x308] sm:$0xff] }
  0xdd   :  { %v828_v61 = vsel %vm536_vm0, %v121_v26, 0.0 }
  0xde   :  { %v7136_v53 = vpop.xlane.xlu2 %661  ;;  %v7138_v59 = vpop.xlane.xlu1 %658 }
  0xdf   :  { %13950 = vst [vmem:[#allocation27_spill] sm:$0xff] %v7136_v53  ;;  %v7143_v62 = vpop.xlane.xlu0 %655 }
  0xe0   :  { %13951 = vst [vmem:[#allocation28_spill] sm:$0xff] %v7138_v59 }
  0xe1   :  { %13952 = vst [vmem:[#allocation29_spill] sm:$0xff] %v7143_v62 }
  0xe3   :  { %796 = vadd.xlane.f32.xlu2 %v795_v63  ;;  %793 = vadd.xlane.f32.xlu1 %v792_v2  ;;  %v118_v63 = vld [vmem:[%s13571_s0 + $0x2f0] sm:$0xff] }
  0xe4   :  { %790 = vadd.xlane.f32.xlu0 %v789_v4 }
  0xe6   :  { %v7154_v13 = vpop.xlane.xlu2 %670  ;;  %v7156_v14 = vpop.xlane.xlu1 %667 }
  0xe7   :  { %13953 = vst [vmem:[#allocation30_spill] sm:$0xff] %v7154_v13  ;;  %v7161_v16 = vpop.xlane.xlu0 %664 }
  0xe8   :  { %13954 = vst [vmem:[#allocation31_spill] sm:$0xff] %v7156_v14 }
  0xe9   :  { %13955 = vst [vmem:[#allocation32_spill] sm:$0xff] %v7161_v16  ;;  %v4166_v16 = vpack.c.bf16 %v6920_v37, %v6902_v28 }
  0xeb   :  { %805 = vadd.xlane.f32.xlu2 %v804_v22  ;;  %802 = vadd.xlane.f32.xlu1 %v801_v24  ;;  %v819_v22 = vsel %vm536_vm0, %v118_v63, 0.0  ;;  %v816_v24 = vsel %vm536_vm0, %v117_v7, 0.0  ;;  %v125_v7 = vld [vmem:[%s13571_s0 + $0x328] sm:$0xff] }
  0xec   :  { %799 = vadd.xlane.f32.xlu0 %v798_v25  ;;  %v122_v25 = vld [vmem:[%s13571_s0 + $0x310] sm:$0xff] }
  0xee   :  { %v7172_v34 = vpop.xlane.xlu2 %679  ;;  %v7174_v39 = vpop.xlane.xlu1 %676 }
  0xef   :  { %13956 = vst [vmem:[#allocation33_spill] sm:$0xff] %v7172_v34  ;;  %v7179_v48 = vpop.xlane.xlu0 %673  ;;  %v127_v34 = vld [vmem:[%s13571_s0 + $0x338] sm:$0xff] }
  0xf0   :  { %13957 = vst [vmem:[#allocation34_spill] sm:$0xff] %v7174_v39 }
  0xf1   :  { %13958 = vst [vmem:[#allocation35_spill] sm:$0xff] %v7179_v48 }
  0xf3   :  { %814 = vadd.xlane.f32.xlu2 %v813_v50  ;;  %811 = vadd.xlane.f32.xlu1 %v810_v51  ;;  %v120_v50 = vld [vmem:[%s13571_s0 + $0x300] sm:$0xff] }
  0xf4   :  { %808 = vadd.xlane.f32.xlu0 %v807_v52  ;;  %v831_v52 = vsel %vm536_vm0, %v122_v25, 0.0  ;;  %v825_v63 = vsel %vm536_vm0, %v120_v50, 0.0  ;;  %v123_v25 = vld [vmem:[%s13571_s0 + $0x318] sm:$0xff]  ;;  %v840_v50 = vsel %vm536_vm0, %v125_v7, 0.0  ;;  %v126_v7 = vld [vmem:[%s13571_s0 + $0x330] sm:$0xff] }
  0xf6   :  { %v7190_v2 = vpop.xlane.xlu2 %688  ;;  %v7192_v4 = vpop.xlane.xlu1 %685 }
  0xf7   :  { %13959 = vst [vmem:[#allocation36_spill] sm:$0xff] %v7190_v2  ;;  %v7197_v11 = vpop.xlane.xlu0 %682 }
  0xf8   :  { %13960 = vst [vmem:[#allocation37_spill] sm:$0xff] %v7192_v4 }
  0xf9   :  { %13961 = vst [vmem:[#allocation38_spill] sm:$0xff] %v7197_v11 }
  0xfb   :  { %823 = vadd.xlane.f32.xlu2 %v822_v15  ;;  %820 = vadd.xlane.f32.xlu1 %v819_v22  ;;  %v124_v15 = vld [vmem:[%s13571_s0 + $0x320] sm:$0xff] }
  0xfc   :  { %817 = vadd.xlane.f32.xlu0 %v816_v24 }
  0xfe   :  { %v7208_v32 = vpop.xlane.xlu2 %697  ;;  %v7210_v44 = vpop.xlane.xlu1 %694 }
  0xff   :  { %13962 = vst [vmem:[#allocation39_spill] sm:$0xff] %v7208_v32  ;;  %v7215_v51 = vpop.xlane.xlu0 %691 }
 0x100   :  { %13963 = vst [vmem:[#allocation40_spill] sm:$0xff] %v7210_v44 }
 0x101   :  { %13964 = vst [vmem:[#allocation41_spill] sm:$0xff] %v7215_v51 }
 0x103   :  { %832 = vadd.xlane.f32.xlu2 %v831_v52  ;;  %829 = vadd.xlane.f32.xlu1 %v828_v61  ;;  %v837_v52 = vsel %vm536_vm0, %v124_v15, 0.0  ;;  %v834_v61 = vsel %vm536_vm0, %v123_v25, 0.0 }
 0x104   :  { %826 = vadd.xlane.f32.xlu0 %v825_v63  ;;  %v128_v63 = vld [vmem:[%s13571_s0 + $0x340] sm:$0xff] }
 0x105   :  { %v849_v25 = vsel %vm536_vm0, %v128_v63, 0.0 }
 0x106   :  { %v7226_v22 = vpop.xlane.xlu2 %706  ;;  %v7228_v24 = vpop.xlane.xlu1 %703 }
 0x107   :  { %13965 = vst [vmem:[#allocation42_spill] sm:$0xff] %v7226_v22  ;;  %v7233_v26 = vpop.xlane.xlu0 %700 }
 0x108   :  { %13966 = vst [vmem:[#allocation43_spill] sm:$0xff] %v7228_v24 }
 0x109   :  { %13967 = vst [vmem:[#allocation44_spill] sm:$0xff] %v7233_v26 }
 0x10b   :  { %841 = vadd.xlane.f32.xlu2 %v840_v50  ;;  %838 = vadd.xlane.f32.xlu1 %v837_v52  ;;  %v846_v50 = vsel %vm536_vm0, %v127_v34, 0.0  ;;  %v843_v52 = vsel %vm536_vm0, %v126_v7, 0.0  ;;  %v129_v34 = vld [vmem:[%s13571_s0 + $0x348] sm:$0xff] }
 0x10c   :  { %835 = vadd.xlane.f32.xlu0 %v834_v61  ;;  %v131_v61 = vld [vmem:[%s13571_s0 + $0x358] sm:$0xff] }
 0x10d   :  { %v858_v7 = vsel %vm536_vm0, %v131_v61, 0.0 }
 0x10e   :  { %v7244_v8 = vpop.xlane.xlu2 %715  ;;  %v7246_v6 = vpop.xlane.xlu1 %712 }
 0x10f   :  { %13968 = vst [vmem:[#allocation45_spill] sm:$0xff] %v7244_v8  ;;  %v7251_v15 = vpop.xlane.xlu0 %709  ;;  %v130_v8 = vld [vmem:[%s13571_s0 + $0x350] sm:$0xff] }
 0x110   :  { %13969 = vst [vmem:[#allocation46_spill] sm:$0xff] %v7246_v6 }
 0x111   :  { %13970 = vst [vmem:[#allocation47_spill] sm:$0xff] %v7251_v15  ;;  %v136_v15 = vld [vmem:[%s13571_s0 + $0x380] sm:$0xff] }
 0x113   :  { %850 = vadd.xlane.f32.xlu2 %v849_v25  ;;  %847 = vadd.xlane.f32.xlu1 %v846_v50  ;;  %v855_v25 = vsel %vm536_vm0, %v130_v8, 0.0  ;;  %v852_v50 = vsel %vm536_vm0, %v129_v34, 0.0  ;;  %v132_v8 = vld [vmem:[%s13571_s0 + $0x360] sm:$0xff] }
 0x114   :  { %844 = vadd.xlane.f32.xlu0 %v843_v52  ;;  %v134_v52 = vld [vmem:[%s13571_s0 + $0x370] sm:$0xff] }
 0x115   :  { %v867_v34 = vsel %vm536_vm0, %v134_v52, 0.0 }
 0x116   :  { %v7262_v6 = vpop.xlane.xlu2 %724  ;;  %v7264_v39 = vpop.xlane.xlu1 %721 }
 0x117   :  { %13971 = vst [vmem:[#allocation48_spill] sm:$0xff] %v7262_v6  ;;  %v7269_v63 = vpop.xlane.xlu0 %718  ;;  %v133_v6 = vld [vmem:[%s13571_s0 + $0x368] sm:$0xff] }
 0x118   :  { %13972 = vst [vmem:[#allocation49_spill] sm:$0xff] %v7264_v39 }
 0x119   :  { %13973 = vst [vmem:[#allocation50_spill] sm:$0xff] %v7269_v63 }
 0x11b   :  { %859 = vadd.xlane.f32.xlu2 %v858_v7  ;;  %856 = vadd.xlane.f32.xlu1 %v855_v25  ;;  %v864_v7 = vsel %vm536_vm0, %v133_v6, 0.0  ;;  %v861_v25 = vsel %vm536_vm0, %v132_v8, 0.0  ;;  %v135_v6 = vld [vmem:[%s13571_s0 + $0x378] sm:$0xff] }
 0x11c   :  { %853 = vadd.xlane.f32.xlu0 %v852_v50  ;;  %v137_v50 = vld [vmem:[%s13571_s0 + $0x388] sm:$0xff] }
 0x11d   :  { %v876_v8 = vsel %vm536_vm0, %v137_v50, 0.0 }
 0x11e   :  { %v7280_v39 = vpop.xlane.xlu2 %733  ;;  %v7282_v63 = vpop.xlane.xlu1 %730 }
 0x11f   :  { %13974 = vst [vmem:[#allocation51_spill] sm:$0xff] %v7280_v39  ;;  %v7287_v61 = vpop.xlane.xlu0 %727 }
 0x120   :  { %13975 = vst [vmem:[#allocation52_spill] sm:$0xff] %v7282_v63 }
 0x121   :  { %13976 = vst [vmem:[#allocation53_spill] sm:$0xff] %v7287_v61 }
 0x123   :  { %868 = vadd.xlane.f32.xlu2 %v867_v34  ;;  %865 = vadd.xlane.f32.xlu1 %v864_v7  ;;  %v873_v34 = vsel %vm536_vm0, %v136_v15, 0.0  ;;  %v870_v7 = vsel %vm536_vm0, %v135_v6, 0.0  ;;  %v138_v15 = vld [vmem:[%s13571_s0 + $0x390] sm:$0xff] }
 0x124   :  { %862 = vadd.xlane.f32.xlu0 %v861_v25  ;;  %v140_v25 = vld [vmem:[%s13571_s0 + $0x3a0] sm:$0xff] }
 0x125   :  { %v885_v6 = vsel %vm536_vm0, %v140_v25, 0.0 }
 0x126   :  { %v7298_v22 = vpop.xlane.xlu2 %742  ;;  %v7300_v61 = vpop.xlane.xlu1 %739 }
 0x127   :  { %13977 = vst [vmem:[#allocation54_spill] sm:$0xff] %v7298_v22  ;;  %v7305_v52 = vpop.xlane.xlu0 %736  ;;  %v139_v22 = vld [vmem:[%s13571_s0 + $0x398] sm:$0xff] }
 0x128   :  { %13978 = vst [vmem:[#allocation55_spill] sm:$0xff] %v7300_v61 }
 0x129   :  { %13979 = vst [vmem:[#allocation56_spill] sm:$0xff] %v7305_v52  ;;  %v2075_v52 = vmul.f32 0.015625, %v6904_v29 }
 0x12b   :  { %877 = vadd.xlane.f32.xlu2 %v876_v8  ;;  %874 = vadd.xlane.f32.xlu1 %v873_v34  ;;  %v882_v8 = vsel %vm536_vm0, %v139_v22, 0.0  ;;  %v879_v34 = vsel %vm536_vm0, %v138_v15, 0.0  ;;  %v141_v22 = vld [vmem:[%s13571_s0 + $0x3a8] sm:$0xff] }
 0x12c   :  { %871 = vadd.xlane.f32.xlu0 %v870_v7  ;;  %v143_v7 = vld [vmem:[%s13571_s0 + $0x3b8] sm:$0xff] }
 0x12d   :  { %v894_v15 = vsel %vm536_vm0, %v143_v7, 0.0 }
 0x12e   :  { %v7316_v48 = vpop.xlane.xlu2 %751  ;;  %v7318_v24 = vpop.xlane.xlu1 %748 }
 0x12f   :  { %13980 = vst [vmem:[#allocation57_spill] sm:$0xff] %v7316_v48  ;;  %v7323_v50 = vpop.xlane.xlu0 %745  ;;  %v142_v48 = vld [vmem:[%s13571_s0 + $0x3b0] sm:$0xff] }
 0x130   :  { %13981 = vst [vmem:[#allocation58_spill] sm:$0xff] %v7318_v24 }
 0x131   :  { %13982 = vst [vmem:[#allocation59_spill] sm:$0xff] %v7323_v50 }
 0x133   :  { %886 = vadd.xlane.f32.xlu2 %v885_v6  ;;  %883 = vadd.xlane.f32.xlu1 %v882_v8  ;;  %v891_v6 = vsel %vm536_vm0, %v142_v48, 0.0  ;;  %v888_v8 = vsel %vm536_vm0, %v141_v22, 0.0  ;;  %v144_v48 = vld [vmem:[%s13571_s0 + $0x3c0] sm:$0xff] }
 0x134   :  { %880 = vadd.xlane.f32.xlu0 %v879_v34  ;;  %v146_v34 = vld [vmem:[%s13571_s0 + $0x3d0] sm:$0xff] }
 0x135   :  { %v903_v22 = vsel %vm536_vm0, %v146_v34, 0.0 }
 0x136   :  { %v7334_v24 = vpop.xlane.xlu2 %760  ;;  %v7336_v50 = vpop.xlane.xlu1 %757 }
 0x137   :  { %13983 = vst [vmem:[#allocation60_spill] sm:$0xff] %v7334_v24  ;;  %v7341_v25 = vpop.xlane.xlu0 %754  ;;  %v145_v24 = vld [vmem:[%s13571_s0 + $0x3c8] sm:$0xff] }
 0x138   :  { %13984 = vst [vmem:[#allocation61_spill] sm:$0xff] %v7336_v50 }
 0x139   :  { %13985 = vst [vmem:[#allocation62_spill] sm:$0xff] %v7341_v25 }
 0x13b   :  { %895 = vadd.xlane.f32.xlu2 %v894_v15  ;;  %892 = vadd.xlane.f32.xlu1 %v891_v6  ;;  %v900_v15 = vsel %vm536_vm0, %v145_v24, 0.0  ;;  %v897_v6 = vsel %vm536_vm0, %v144_v48, 0.0  ;;  %v147_v24 = vld [vmem:[%s13571_s0 + $0x3d8] sm:$0xff] }
 0x13c   :  { %889 = vadd.xlane.f32.xlu0 %v888_v8  ;;  %v149_v8 = vld [vmem:[%s13571_s0 + $0x3e8] sm:$0xff] }
 0x13d   :  { %v912_v48 = vsel %vm536_vm0, %v149_v8, 0.0 }
 0x13e   :  { %v7352_v50 = vpop.xlane.xlu2 %769  ;;  %v7354_v25 = vpop.xlane.xlu1 %766 }
 0x13f   :  { %13986 = vst [vmem:[#allocation63_spill] sm:$0xff] %v7352_v50  ;;  %v7359_v7 = vpop.xlane.xlu0 %763  ;;  %v148_v50 = vld [vmem:[%s13571_s0 + $0x3e0] sm:$0xff] }
 0x140   :  { %13987 = vst [vmem:[#allocation64_spill] sm:$0xff] %v7354_v25 }
 0x141   :  { %13988 = vst [vmem:[#allocation65_spill] sm:$0xff] %v7359_v7 }
 0x143   :  { %904 = vadd.xlane.f32.xlu2 %v903_v22  ;;  %901 = vadd.xlane.f32.xlu1 %v900_v15  ;;  %v909_v22 = vsel %vm536_vm0, %v148_v50, 0.0  ;;  %v906_v15 = vsel %vm536_vm0, %v147_v24, 0.0  ;;  %v150_v50 = vld [vmem:[%s13571_s0 + $0x3f0] sm:$0xff] }
 0x144   :  { %898 = vadd.xlane.f32.xlu0 %v897_v6  ;;  %v152_v6 = vld [vmem:[%s13571_s0 + $0x400] sm:$0xff] }
 0x145   :  { %v921_v24 = vsel %vm536_vm0, %v152_v6, 0.0 }
 0x146   :  { %v7370_v25 = vpop.xlane.xlu2 %778  ;;  %v7372_v7 = vpop.xlane.xlu1 %775 }
 0x147   :  { %13989 = vst [vmem:[#allocation66_spill] sm:$0xff] %v7370_v25  ;;  %v7377_v34 = vpop.xlane.xlu0 %772 }
 0x148   :  { %13990 = vst [vmem:[#allocation67_spill] sm:$0xff] %v7372_v7  ;;  %v151_v7 = vld [vmem:[%s13571_s0 + $0x3f8] sm:$0xff] }
 0x149   :  { %13991 = vst [vmem:[#allocation68_spill] sm:$0xff] %v7377_v34 }
 0x14b   :  { %913 = vadd.xlane.f32.xlu2 %v912_v48  ;;  %910 = vadd.xlane.f32.xlu1 %v909_v22  ;;  %v918_v48 = vsel %vm536_vm0, %v151_v7, 0.0  ;;  %v915_v22 = vsel %vm536_vm0, %v150_v50, 0.0  ;;  %v153_v7 = vld [vmem:[%s13571_s0 + $0x408] sm:$0xff] }
 0x14c   :  { %907 = vadd.xlane.f32.xlu0 %v906_v15  ;;  %v155_v15 = vld [vmem:[%s13571_s0 + $0x418] sm:$0xff] }
 0x14d   :  { %v930_v50 = vsel %vm536_vm0, %v155_v15, 0.0 }
 0x14e   :  { %v7388_v25 = vpop.xlane.xlu2 %787  ;;  %v7390_v34 = vpop.xlane.xlu1 %784 }
 0x14f   :  { %13992 = vst [vmem:[#allocation69_spill] sm:$0xff] %v7388_v25  ;;  %v7395_v8 = vpop.xlane.xlu0 %781  ;;  %v154_v25 = vld [vmem:[%s13571_s0 + $0x410] sm:$0xff] }
 0x150   :  { %13993 = vst [vmem:[#allocation70_spill] sm:$0xff] %v7390_v34 }
 0x151   :  { %13994 = vst [vmem:[#allocation71_spill] sm:$0xff] %v7395_v8 }
 0x153   :  { %922 = vadd.xlane.f32.xlu2 %v921_v24  ;;  %919 = vadd.xlane.f32.xlu1 %v918_v48  ;;  %v927_v24 = vsel %vm536_vm0, %v154_v25, 0.0  ;;  %v924_v48 = vsel %vm536_vm0, %v153_v7, 0.0  ;;  %v156_v25 = vld [vmem:[%s13571_s0 + $0x420] sm:$0xff] }
 0x154   :  { %916 = vadd.xlane.f32.xlu0 %v915_v22  ;;  %v158_v22 = vld [vmem:[%s13571_s0 + $0x430] sm:$0xff] }
 0x155   :  { %v939_v7 = vsel %vm536_vm0, %v158_v22, 0.0 }
 0x156   :  { %v7406_v34 = vpop.xlane.xlu2 %796  ;;  %v7408_v8 = vpop.xlane.xlu1 %793 }
 0x157   :  { %13995 = vst [vmem:[#allocation72_spill] sm:$0xff] %v7406_v34  ;;  %v7413_v6 = vpop.xlane.xlu0 %790  ;;  %v157_v34 = vld [vmem:[%s13571_s0 + $0x428] sm:$0xff] }
 0x158   :  { %13996 = vst [vmem:[#allocation73_spill] sm:$0xff] %v7408_v8 }
 0x159   :  { %13997 = vst [vmem:[#allocation74_spill] sm:$0xff] %v7413_v6 }
 0x15b   :  { %931 = vadd.xlane.f32.xlu2 %v930_v50  ;;  %928 = vadd.xlane.f32.xlu1 %v927_v24  ;;  %v936_v50 = vsel %vm536_vm0, %v157_v34, 0.0  ;;  %v933_v24 = vsel %vm536_vm0, %v156_v25, 0.0  ;;  %v159_v34 = vld [vmem:[%s13571_s0 + $0x438] sm:$0xff] }
 0x15c   :  { %925 = vadd.xlane.f32.xlu0 %v924_v48  ;;  %v161_v48 = vld [vmem:[%s13571_s0 + $0x448] sm:$0xff] }
 0x15d   :  { %v948_v25 = vsel %vm536_vm0, %v161_v48, 0.0 }
 0x15e   :  { %v7424_v8 = vpop.xlane.xlu2 %805  ;;  %v7426_v6 = vpop.xlane.xlu1 %802 }
 0x15f   :  { %13998 = vst [vmem:[#allocation75_spill] sm:$0xff] %v7424_v8  ;;  %v7431_v15 = vpop.xlane.xlu0 %799  ;;  %v160_v8 = vld [vmem:[%s13571_s0 + $0x440] sm:$0xff] }
 0x160   :  { %13999 = vst [vmem:[#allocation76_spill] sm:$0xff] %v7426_v6 }
 0x161   :  { %14000 = vst [vmem:[#allocation77_spill] sm:$0xff] %v7431_v15 }
 0x163   :  { %940 = vadd.xlane.f32.xlu2 %v939_v7  ;;  %937 = vadd.xlane.f32.xlu1 %v936_v50  ;;  %v945_v7 = vsel %vm536_vm0, %v160_v8, 0.0  ;;  %v942_v50 = vsel %vm536_vm0, %v159_v34, 0.0  ;;  %v162_v8 = vld [vmem:[%s13571_s0 + $0x450] sm:$0xff] }
 0x164   :  { %934 = vadd.xlane.f32.xlu0 %v933_v24  ;;  %v164_v24 = vld [vmem:[%s13571_s0 + $0x460] sm:$0xff] }
 0x165   :  { %v957_v34 = vsel %vm536_vm0, %v164_v24, 0.0 }
 0x166   :  { %v7442_v6 = vpop.xlane.xlu2 %814  ;;  %v7444_v15 = vpop.xlane.xlu1 %811 }
 0x167   :  { %14001 = vst [vmem:[#allocation78_spill] sm:$0xff] %v7442_v6  ;;  %v7449_v22 = vpop.xlane.xlu0 %808 }
 0x168   :  { %14002 = vst [vmem:[#allocation79_spill] sm:$0xff] %v7444_v15  ;;  %v163_v15 = vld [vmem:[%s13571_s0 + $0x458] sm:$0xff] }
 0x169   :  { %14003 = vst [vmem:[#allocation80_spill] sm:$0xff] %v7449_v22 }
 0x16b   :  { %949 = vadd.xlane.f32.xlu2 %v948_v25  ;;  %946 = vadd.xlane.f32.xlu1 %v945_v7  ;;  %v954_v25 = vsel %vm536_vm0, %v163_v15, 0.0  ;;  %v951_v7 = vsel %vm536_vm0, %v162_v8, 0.0  ;;  %v165_v15 = vld [vmem:[%s13571_s0 + $0x468] sm:$0xff] }
 0x16c   :  { %943 = vadd.xlane.f32.xlu0 %v942_v50  ;;  %v167_v50 = vld [vmem:[%s13571_s0 + $0x478] sm:$0xff] }
 0x16d   :  { %v966_v8 = vsel %vm536_vm0, %v167_v50, 0.0 }
 0x16e   :  { %v7460_v6 = vpop.xlane.xlu2 %823  ;;  %v7462_v22 = vpop.xlane.xlu1 %820 }
 0x16f   :  { %14004 = vst [vmem:[#allocation81_spill] sm:$0xff] %v7460_v6  ;;  %v7467_v48 = vpop.xlane.xlu0 %817 }
 0x170   :  { %14005 = vst [vmem:[#allocation82_spill] sm:$0xff] %v7462_v22  ;;  %v166_v22 = vld [vmem:[%s13571_s0 + $0x470] sm:$0xff] }
 0x171   :  { %14006 = vst [vmem:[#allocation83_spill] sm:$0xff] %v7467_v48 }
 0x173   :  { %958 = vadd.xlane.f32.xlu2 %v957_v34  ;;  %955 = vadd.xlane.f32.xlu1 %v954_v25  ;;  %v963_v34 = vsel %vm536_vm0, %v166_v22, 0.0  ;;  %v960_v25 = vsel %vm536_vm0, %v165_v15, 0.0  ;;  %v168_v22 = vld [vmem:[%s13571_s0 + $0x480] sm:$0xff] }
 0x174   :  { %952 = vadd.xlane.f32.xlu0 %v951_v7  ;;  %v170_v7 = vld [vmem:[%s13571_s0 + $0x490] sm:$0xff] }
 0x175   :  { %v975_v15 = vsel %vm536_vm0, %v170_v7, 0.0 }
 0x176   :  { %v7478_v6 = vpop.xlane.xlu2 %832  ;;  %v7480_v48 = vpop.xlane.xlu1 %829 }
 0x177   :  { %14007 = vst [vmem:[#allocation84_spill] sm:$0xff] %v7478_v6  ;;  %v7485_v24 = vpop.xlane.xlu0 %826  ;;  %v169_v6 = vld [vmem:[%s13571_s0 + $0x488] sm:$0xff] }
 0x178   :  { %14008 = vst [vmem:[#allocation85_spill] sm:$0xff] %v7480_v48 }
 0x179   :  { %14009 = vst [vmem:[#allocation86_spill] sm:$0xff] %v7485_v24 }
 0x17b   :  { %967 = vadd.xlane.f32.xlu2 %v966_v8  ;;  %964 = vadd.xlane.f32.xlu1 %v963_v34  ;;  %v972_v8 = vsel %vm536_vm0, %v169_v6, 0.0  ;;  %v969_v34 = vsel %vm536_vm0, %v168_v22, 0.0  ;;  %v171_v6 = vld [vmem:[%s13571_s0 + $0x498] sm:$0xff] }
 0x17c   :  { %961 = vadd.xlane.f32.xlu0 %v960_v25  ;;  %v173_v25 = vld [vmem:[%s13571_s0 + $0x4a8] sm:$0xff] }
 0x17d   :  { %v984_v22 = vsel %vm536_vm0, %v173_v25, 0.0 }
 0x17e   :  { %v7496_v48 = vpop.xlane.xlu2 %841  ;;  %v7498_v24 = vpop.xlane.xlu1 %838 }
 0x17f   :  { %14010 = vst [vmem:[#allocation87_spill] sm:$0xff] %v7496_v48  ;;  %v7503_v50 = vpop.xlane.xlu0 %835  ;;  %v172_v48 = vld [vmem:[%s13571_s0 + $0x4a0] sm:$0xff] }
 0x180   :  { %14011 = vst [vmem:[#allocation88_spill] sm:$0xff] %v7498_v24 }
 0x181   :  { %14012 = vst [vmem:[#allocation89_spill] sm:$0xff] %v7503_v50 }
 0x183   :  { %976 = vadd.xlane.f32.xlu2 %v975_v15  ;;  %973 = vadd.xlane.f32.xlu1 %v972_v8  ;;  %v981_v15 = vsel %vm536_vm0, %v172_v48, 0.0  ;;  %v978_v8 = vsel %vm536_vm0, %v171_v6, 0.0  ;;  %v174_v48 = vld [vmem:[%s13571_s0 + $0x4b0] sm:$0xff] }
 0x184   :  { %970 = vadd.xlane.f32.xlu0 %v969_v34  ;;  %v176_v34 = vld [vmem:[%s13571_s0 + $0x4c0] sm:$0xff] }
 0x185   :  { %v993_v6 = vsel %vm536_vm0, %v176_v34, 0.0 }
 0x186   :  { %v7514_v24 = vpop.xlane.xlu2 %850  ;;  %v7516_v50 = vpop.xlane.xlu1 %847 }
 0x187   :  { %14013 = vst [vmem:[#allocation90_spill] sm:$0xff] %v7514_v24  ;;  %v7521_v7 = vpop.xlane.xlu0 %844  ;;  %v175_v24 = vld [vmem:[%s13571_s0 + $0x4b8] sm:$0xff] }
 0x188   :  { %14014 = vst [vmem:[#allocation91_spill] sm:$0xff] %v7516_v50 }
 0x189   :  { %14015 = vst [vmem:[#allocation92_spill] sm:$0xff] %v7521_v7 }
 0x18b   :  { %985 = vadd.xlane.f32.xlu2 %v984_v22  ;;  %982 = vadd.xlane.f32.xlu1 %v981_v15  ;;  %v990_v22 = vsel %vm536_vm0, %v175_v24, 0.0  ;;  %v987_v15 = vsel %vm536_vm0, %v174_v48, 0.0  ;;  %v177_v24 = vld [vmem:[%s13571_s0 + $0x4c8] sm:$0xff] }
 0x18c   :  { %979 = vadd.xlane.f32.xlu0 %v978_v8  ;;  %v179_v8 = vld [vmem:[%s13571_s0 + $0x4d8] sm:$0xff] }
 0x18d   :  { %v1002_v48 = vsel %vm536_vm0, %v179_v8, 0.0 }
 0x18e   :  { %v7532_v50 = vpop.xlane.xlu2 %859  ;;  %v7534_v7 = vpop.xlane.xlu1 %856 }
 0x18f   :  { %14016 = vst [vmem:[#allocation93_spill] sm:$0xff] %v7532_v50  ;;  %v7539_v25 = vpop.xlane.xlu0 %853  ;;  %v178_v50 = vld [vmem:[%s13571_s0 + $0x4d0] sm:$0xff] }
 0x190   :  { %14017 = vst [vmem:[#allocation94_spill] sm:$0xff] %v7534_v7 }
 0x191   :  { %14018 = vst [vmem:[#allocation95_spill] sm:$0xff] %v7539_v25 }
 0x193   :  { %994 = vadd.xlane.f32.xlu2 %v993_v6  ;;  %991 = vadd.xlane.f32.xlu1 %v990_v22  ;;  %v999_v6 = vsel %vm536_vm0, %v178_v50, 0.0  ;;  %v996_v22 = vsel %vm536_vm0, %v177_v24, 0.0  ;;  %v180_v50 = vld [vmem:[%s13571_s0 + $0x4e0] sm:$0xff] }
 0x194   :  { %988 = vadd.xlane.f32.xlu0 %v987_v15  ;;  %v182_v15 = vld [vmem:[%s13571_s0 + $0x4f0] sm:$0xff] }
 0x195   :  { %v1011_v24 = vsel %vm536_vm0, %v182_v15, 0.0 }
 0x196   :  { %v7550_v7 = vpop.xlane.xlu2 %868  ;;  %v7552_v25 = vpop.xlane.xlu1 %865 }
 0x197   :  { %14019 = vst [vmem:[#allocation96_spill] sm:$0xff] %v7550_v7  ;;  %v7557_v34 = vpop.xlane.xlu0 %862  ;;  %v181_v7 = vld [vmem:[%s13571_s0 + $0x4e8] sm:$0xff] }
 0x198   :  { %14020 = vst [vmem:[#allocation97_spill] sm:$0xff] %v7552_v25 }
 0x199   :  { %14021 = vst [vmem:[#allocation98_spill] sm:$0xff] %v7557_v34 }
 0x19b   :  { %1003 = vadd.xlane.f32.xlu2 %v1002_v48  ;;  %1000 = vadd.xlane.f32.xlu1 %v999_v6  ;;  %v1008_v48 = vsel %vm536_vm0, %v181_v7, 0.0  ;;  %v1005_v6 = vsel %vm536_vm0, %v180_v50, 0.0  ;;  %v183_v7 = vld [vmem:[%s13571_s0 + $0x4f8] sm:$0xff] }
 0x19c   :  { %997 = vadd.xlane.f32.xlu0 %v996_v22  ;;  %v185_v22 = vld [vmem:[%s13571_s0 + $0x508] sm:$0xff] }
 0x19d   :  { %v1020_v50 = vsel %vm536_vm0, %v185_v22, 0.0 }
 0x19e   :  { %v7568_v25 = vpop.xlane.xlu2 %877  ;;  %v7570_v34 = vpop.xlane.xlu1 %874 }
 0x19f   :  { %14022 = vst [vmem:[#allocation99_spill] sm:$0xff] %v7568_v25  ;;  %v7575_v8 = vpop.xlane.xlu0 %871 }
 0x1a0   :  { %14023 = vst [vmem:[#allocation100_spill] sm:$0xff] %v7570_v34  ;;  %v184_v34 = vld [vmem:[%s13571_s0 + $0x500] sm:$0xff] }
 0x1a1   :  { %14024 = vst [vmem:[#allocation101_spill] sm:$0xff] %v7575_v8 }
 0x1a3   :  { %1012 = vadd.xlane.f32.xlu2 %v1011_v24  ;;  %1009 = vadd.xlane.f32.xlu1 %v1008_v48  ;;  %v1017_v24 = vsel %vm536_vm0, %v184_v34, 0.0  ;;  %v1014_v48 = vsel %vm536_vm0, %v183_v7, 0.0  ;;  %v186_v34 = vld [vmem:[%s13571_s0 + $0x510] sm:$0xff] }
 0x1a4   :  { %1006 = vadd.xlane.f32.xlu0 %v1005_v6  ;;  %v188_v6 = vld [vmem:[%s13571_s0 + $0x520] sm:$0xff] }
 0x1a5   :  { %v1029_v7 = vsel %vm536_vm0, %v188_v6, 0.0 }
 0x1a6   :  { %v7586_v25 = vpop.xlane.xlu2 %886  ;;  %v7588_v8 = vpop.xlane.xlu1 %883 }
 0x1a7   :  { %14025 = vst [vmem:[#allocation102_spill] sm:$0xff] %v7586_v25  ;;  %v7593_v15 = vpop.xlane.xlu0 %880  ;;  %v187_v25 = vld [vmem:[%s13571_s0 + $0x518] sm:$0xff] }
 0x1a8   :  { %14026 = vst [vmem:[#allocation103_spill] sm:$0xff] %v7588_v8 }
 0x1a9   :  { %14027 = vst [vmem:[#allocation104_spill] sm:$0xff] %v7593_v15 }
 0x1ab   :  { %1021 = vadd.xlane.f32.xlu2 %v1020_v50  ;;  %1018 = vadd.xlane.f32.xlu1 %v1017_v24  ;;  %v1026_v50 = vsel %vm536_vm0, %v187_v25, 0.0  ;;  %v1023_v24 = vsel %vm536_vm0, %v186_v34, 0.0  ;;  %v189_v25 = vld [vmem:[%s13571_s0 + $0x528] sm:$0xff] }
 0x1ac   :  { %1015 = vadd.xlane.f32.xlu0 %v1014_v48  ;;  %v191_v48 = vld [vmem:[%s13571_s0 + $0x538] sm:$0xff] }
 0x1ad   :  { %v1038_v34 = vsel %vm536_vm0, %v191_v48, 0.0 }
 0x1ae   :  { %v7604_v8 = vpop.xlane.xlu2 %895  ;;  %v7606_v15 = vpop.xlane.xlu1 %892 }
 0x1af   :  { %14028 = vst [vmem:[#allocation105_spill] sm:$0xff] %v7604_v8  ;;  %v7611_v22 = vpop.xlane.xlu0 %889  ;;  %v190_v8 = vld [vmem:[%s13571_s0 + $0x530] sm:$0xff] }
 0x1b0   :  { %14029 = vst [vmem:[#allocation106_spill] sm:$0xff] %v7606_v15 }
 0x1b1   :  { %14030 = vst [vmem:[#allocation107_spill] sm:$0xff] %v7611_v22 }
 0x1b3   :  { %1030 = vadd.xlane.f32.xlu2 %v1029_v7  ;;  %1027 = vadd.xlane.f32.xlu1 %v1026_v50  ;;  %v1035_v7 = vsel %vm536_vm0, %v190_v8, 0.0  ;;  %v1032_v50 = vsel %vm536_vm0, %v189_v25, 0.0  ;;  %v192_v8 = vld [vmem:[%s13571_s0 + $0x540] sm:$0xff] }
 0x1b4   :  { %1024 = vadd.xlane.f32.xlu0 %v1023_v24  ;;  %v194_v24 = vld [vmem:[%s13571_s0 + $0x550] sm:$0xff] }
 0x1b5   :  { %v1047_v25 = vsel %vm536_vm0, %v194_v24, 0.0 }
 0x1b6   :  { %v7622_v15 = vpop.xlane.xlu2 %904  ;;  %v7624_v22 = vpop.xlane.xlu1 %901 }
 0x1b7   :  { %14031 = vst [vmem:[#allocation108_spill] sm:$0xff] %v7622_v15  ;;  %v7629_v6 = vpop.xlane.xlu0 %898  ;;  %v193_v15 = vld [vmem:[%s13571_s0 + $0x548] sm:$0xff] }
 0x1b8   :  { %14032 = vst [vmem:[#allocation109_spill] sm:$0xff] %v7624_v22 }
 0x1b9   :  { %14033 = vst [vmem:[#allocation110_spill] sm:$0xff] %v7629_v6 }
 0x1bb   :  { %1039 = vadd.xlane.f32.xlu2 %v1038_v34  ;;  %1036 = vadd.xlane.f32.xlu1 %v1035_v7  ;;  %v1044_v34 = vsel %vm536_vm0, %v193_v15, 0.0  ;;  %v1041_v7 = vsel %vm536_vm0, %v192_v8, 0.0  ;;  %v195_v15 = vld [vmem:[%s13571_s0 + $0x558] sm:$0xff] }
 0x1bc   :  { %1033 = vadd.xlane.f32.xlu0 %v1032_v50  ;;  %v197_v50 = vld [vmem:[%s13571_s0 + $0x568] sm:$0xff] }
 0x1bd   :  { %v1056_v8 = vsel %vm536_vm0, %v197_v50, 0.0 }
 0x1be   :  { %v7640_v22 = vpop.xlane.xlu2 %913  ;;  %v7642_v6 = vpop.xlane.xlu1 %910 }
 0x1bf   :  { %14034 = vst [vmem:[#allocation111_spill] sm:$0xff] %v7640_v22  ;;  %v7647_v48 = vpop.xlane.xlu0 %907  ;;  %v196_v22 = vld [vmem:[%s13571_s0 + $0x560] sm:$0xff] }
 0x1c0   :  { %14035 = vst [vmem:[#allocation112_spill] sm:$0xff] %v7642_v6 }
 0x1c1   :  { %14036 = vst [vmem:[#allocation113_spill] sm:$0xff] %v7647_v48 }
 0x1c3   :  { %1048 = vadd.xlane.f32.xlu2 %v1047_v25  ;;  %1045 = vadd.xlane.f32.xlu1 %v1044_v34  ;;  %v1053_v25 = vsel %vm536_vm0, %v196_v22, 0.0  ;;  %v1050_v34 = vsel %vm536_vm0, %v195_v15, 0.0  ;;  %v198_v22 = vld [vmem:[%s13571_s0 + $0x570] sm:$0xff] }
 0x1c4   :  { %1042 = vadd.xlane.f32.xlu0 %v1041_v7  ;;  %v200_v7 = vld [vmem:[%s13571_s0 + $0x580] sm:$0xff] }
 0x1c5   :  { %v1065_v15 = vsel %vm536_vm0, %v200_v7, 0.0 }
 0x1c6   :  { %v7658_v6 = vpop.xlane.xlu2 %922  ;;  %v7660_v48 = vpop.xlane.xlu1 %919 }
 0x1c7   :  { %14037 = vst [vmem:[#allocation114_spill] sm:$0xff] %v7658_v6  ;;  %v7665_v24 = vpop.xlane.xlu0 %916 }
 0x1c8   :  { %14038 = vst [vmem:[#allocation115_spill] sm:$0xff] %v7660_v48  ;;  %v199_v48 = vld [vmem:[%s13571_s0 + $0x578] sm:$0xff] }
 0x1c9   :  { %14039 = vst [vmem:[#allocation116_spill] sm:$0xff] %v7665_v24 }
 0x1cb   :  { %1057 = vadd.xlane.f32.xlu2 %v1056_v8  ;;  %1054 = vadd.xlane.f32.xlu1 %v1053_v25  ;;  %v1062_v8 = vsel %vm536_vm0, %v199_v48, 0.0  ;;  %v1059_v25 = vsel %vm536_vm0, %v198_v22, 0.0  ;;  %v201_v48 = vld [vmem:[%s13571_s0 + $0x588] sm:$0xff] }
 0x1cc   :  { %1051 = vadd.xlane.f32.xlu0 %v1050_v34  ;;  %v203_v34 = vld [vmem:[%s13571_s0 + $0x598] sm:$0xff] }
 0x1cd   :  { %v1074_v22 = vsel %vm536_vm0, %v203_v34, 0.0 }
 0x1ce   :  { %v7676_v6 = vpop.xlane.xlu2 %931  ;;  %v7678_v24 = vpop.xlane.xlu1 %928 }
 0x1cf   :  { %14040 = vst [vmem:[#allocation117_spill] sm:$0xff] %v7676_v6  ;;  %v7683_v50 = vpop.xlane.xlu0 %925  ;;  %v202_v6 = vld [vmem:[%s13571_s0 + $0x590] sm:$0xff] }
 0x1d0   :  { %14041 = vst [vmem:[#allocation118_spill] sm:$0xff] %v7678_v24 }
 0x1d1   :  { %14042 = vst [vmem:[#allocation119_spill] sm:$0xff] %v7683_v50 }
 0x1d3   :  { %1066 = vadd.xlane.f32.xlu2 %v1065_v15  ;;  %1063 = vadd.xlane.f32.xlu1 %v1062_v8  ;;  %v1071_v15 = vsel %vm536_vm0, %v202_v6, 0.0  ;;  %v1068_v8 = vsel %vm536_vm0, %v201_v48, 0.0  ;;  %v204_v6 = vld [vmem:[%s13571_s0 + $0x5a0] sm:$0xff] }
 0x1d4   :  { %1060 = vadd.xlane.f32.xlu0 %v1059_v25  ;;  %v206_v25 = vld [vmem:[%s13571_s0 + $0x5b0] sm:$0xff] }
 0x1d5   :  { %v1083_v48 = vsel %vm536_vm0, %v206_v25, 0.0 }
 0x1d6   :  { %v7694_v24 = vpop.xlane.xlu2 %940  ;;  %v7696_v50 = vpop.xlane.xlu1 %937 }
 0x1d7   :  { %14043 = vst [vmem:[#allocation120_spill] sm:$0xff] %v7694_v24  ;;  %v7701_v7 = vpop.xlane.xlu0 %934  ;;  %v205_v24 = vld [vmem:[%s13571_s0 + $0x5a8] sm:$0xff] }
 0x1d8   :  { %14044 = vst [vmem:[#allocation121_spill] sm:$0xff] %v7696_v50 }
 0x1d9   :  { %14045 = vst [vmem:[#allocation122_spill] sm:$0xff] %v7701_v7 }
 0x1db   :  { %1075 = vadd.xlane.f32.xlu2 %v1074_v22  ;;  %1072 = vadd.xlane.f32.xlu1 %v1071_v15  ;;  %v1080_v22 = vsel %vm536_vm0, %v205_v24, 0.0  ;;  %v1077_v15 = vsel %vm536_vm0, %v204_v6, 0.0  ;;  %v207_v24 = vld [vmem:[%s13571_s0 + $0x5b8] sm:$0xff] }
 0x1dc   :  { %1069 = vadd.xlane.f32.xlu0 %v1068_v8  ;;  %v209_v8 = vld [vmem:[%s13571_s0 + $0x5c8] sm:$0xff] }
 0x1dd   :  { %v1092_v6 = vsel %vm536_vm0, %v209_v8, 0.0 }
 0x1de   :  { %v7712_v50 = vpop.xlane.xlu2 %949  ;;  %v7714_v7 = vpop.xlane.xlu1 %946 }
 0x1df   :  { %14046 = vst [vmem:[#allocation123_spill] sm:$0xff] %v7712_v50  ;;  %v7719_v34 = vpop.xlane.xlu0 %943  ;;  %v208_v50 = vld [vmem:[%s13571_s0 + $0x5c0] sm:$0xff] }
 0x1e0   :  { %14047 = vst [vmem:[#allocation124_spill] sm:$0xff] %v7714_v7 }
 0x1e1   :  { %14048 = vst [vmem:[#allocation125_spill] sm:$0xff] %v7719_v34 }
 0x1e3   :  { %1084 = vadd.xlane.f32.xlu2 %v1083_v48  ;;  %1081 = vadd.xlane.f32.xlu1 %v1080_v22  ;;  %v1089_v48 = vsel %vm536_vm0, %v208_v50, 0.0  ;;  %v1086_v22 = vsel %vm536_vm0, %v207_v24, 0.0  ;;  %v210_v50 = vld [vmem:[%s13571_s0 + $0x5d0] sm:$0xff] }
 0x1e4   :  { %1078 = vadd.xlane.f32.xlu0 %v1077_v15  ;;  %v212_v15 = vld [vmem:[%s13571_s0 + $0x5e0] sm:$0xff] }
 0x1e5   :  { %v1101_v24 = vsel %vm536_vm0, %v212_v15, 0.0 }
 0x1e6   :  { %v7730_v7 = vpop.xlane.xlu2 %958  ;;  %v7732_v34 = vpop.xlane.xlu1 %955 }
 0x1e7   :  { %14049 = vst [vmem:[#allocation126_spill] sm:$0xff] %v7730_v7  ;;  %v7737_v25 = vpop.xlane.xlu0 %952  ;;  %v211_v7 = vld [vmem:[%s13571_s0 + $0x5d8] sm:$0xff] }
 0x1e8   :  { %14050 = vst [vmem:[#allocation127_spill] sm:$0xff] %v7732_v34 }
 0x1e9   :  { %14051 = vst [vmem:[#allocation128_spill] sm:$0xff] %v7737_v25 }
 0x1eb   :  { %1093 = vadd.xlane.f32.xlu2 %v1092_v6  ;;  %1090 = vadd.xlane.f32.xlu1 %v1089_v48  ;;  %v1098_v6 = vsel %vm536_vm0, %v211_v7, 0.0  ;;  %v1095_v48 = vsel %vm536_vm0, %v210_v50, 0.0  ;;  %v213_v7 = vld [vmem:[%s13571_s0 + $0x5e8] sm:$0xff] }
 0x1ec   :  { %1087 = vadd.xlane.f32.xlu0 %v1086_v22  ;;  %v215_v22 = vld [vmem:[%s13571_s0 + $0x5f8] sm:$0xff] }
 0x1ed   :  { %v1110_v50 = vsel %vm536_vm0, %v215_v22, 0.0 }
 0x1ee   :  { %v7748_v34 = vpop.xlane.xlu2 %967  ;;  %v7750_v25 = vpop.xlane.xlu1 %964 }
 0x1ef   :  { %14052 = vst [vmem:[#allocation129_spill] sm:$0xff] %v7748_v34  ;;  %v7755_v8 = vpop.xlane.xlu0 %961  ;;  %v214_v34 = vld [vmem:[%s13571_s0 + $0x5f0] sm:$0xff] }
 0x1f0   :  { %14053 = vst [vmem:[#allocation130_spill] sm:$0xff] %v7750_v25 }
 0x1f1   :  { %14054 = vst [vmem:[#allocation131_spill] sm:$0xff] %v7755_v8 }
 0x1f3   :  { %1102 = vadd.xlane.f32.xlu2 %v1101_v24  ;;  %1099 = vadd.xlane.f32.xlu1 %v1098_v6  ;;  %v1107_v24 = vsel %vm536_vm0, %v214_v34, 0.0  ;;  %v1104_v6 = vsel %vm536_vm0, %v213_v7, 0.0  ;;  %v216_v34 = vld [vmem:[%s13571_s0 + $0x600] sm:$0xff] }
 0x1f4   :  { %1096 = vadd.xlane.f32.xlu0 %v1095_v48  ;;  %v218_v48 = vld [vmem:[%s13571_s0 + $0x610] sm:$0xff] }
 0x1f5   :  { %v1119_v7 = vsel %vm536_vm0, %v218_v48, 0.0 }
 0x1f6   :  { %v7766_v25 = vpop.xlane.xlu2 %976  ;;  %v7768_v8 = vpop.xlane.xlu1 %973 }
 0x1f7   :  { %14055 = vst [vmem:[#allocation132_spill] sm:$0xff] %v7766_v25  ;;  %v7773_v15 = vpop.xlane.xlu0 %970  ;;  %v217_v25 = vld [vmem:[%s13571_s0 + $0x608] sm:$0xff] }
 0x1f8   :  { %14056 = vst [vmem:[#allocation133_spill] sm:$0xff] %v7768_v8 }
 0x1f9   :  { %14057 = vst [vmem:[#allocation134_spill] sm:$0xff] %v7773_v15 }
 0x1fb   :  { %1111 = vadd.xlane.f32.xlu2 %v1110_v50  ;;  %1108 = vadd.xlane.f32.xlu1 %v1107_v24  ;;  %v1116_v50 = vsel %vm536_vm0, %v217_v25, 0.0  ;;  %v1113_v24 = vsel %vm536_vm0, %v216_v34, 0.0  ;;  %v219_v25 = vld [vmem:[%s13571_s0 + $0x618] sm:$0xff] }
 0x1fc   :  { %1105 = vadd.xlane.f32.xlu0 %v1104_v6  ;;  %v221_v6 = vld [vmem:[%s13571_s0 + $0x628] sm:$0xff] }
 0x1fd   :  { %v1128_v34 = vsel %vm536_vm0, %v221_v6, 0.0 }
 0x1fe   :  { %v7784_v8 = vpop.xlane.xlu2 %985  ;;  %v7786_v15 = vpop.xlane.xlu1 %982 }
 0x1ff   :  { %14058 = vst [vmem:[#allocation135_spill] sm:$0xff] %v7784_v8  ;;  %v7791_v22 = vpop.xlane.xlu0 %979  ;;  %v220_v8 = vld [vmem:[%s13571_s0 + $0x620] sm:$0xff] }
 0x200   :  { %14059 = vst [vmem:[#allocation136_spill] sm:$0xff] %v7786_v15 }
 0x201   :  { %14060 = vst [vmem:[#allocation137_spill] sm:$0xff] %v7791_v22 }
 0x203   :  { %1120 = vadd.xlane.f32.xlu2 %v1119_v7  ;;  %1117 = vadd.xlane.f32.xlu1 %v1116_v50  ;;  %v1125_v7 = vsel %vm536_vm0, %v220_v8, 0.0  ;;  %v1122_v50 = vsel %vm536_vm0, %v219_v25, 0.0  ;;  %v222_v8 = vld [vmem:[%s13571_s0 + $0x630] sm:$0xff] }
 0x204   :  { %1114 = vadd.xlane.f32.xlu0 %v1113_v24  ;;  %v224_v24 = vld [vmem:[%s13571_s0 + $0x640] sm:$0xff] }
 0x205   :  { %v1137_v25 = vsel %vm536_vm0, %v224_v24, 0.0 }
 0x206   :  { %v7802_v15 = vpop.xlane.xlu2 %994  ;;  %v7804_v22 = vpop.xlane.xlu1 %991 }
 0x207   :  { %14061 = vst [vmem:[#allocation138_spill] sm:$0xff] %v7802_v15  ;;  %v7809_v48 = vpop.xlane.xlu0 %988  ;;  %v223_v15 = vld [vmem:[%s13571_s0 + $0x638] sm:$0xff] }
 0x208   :  { %14062 = vst [vmem:[#allocation139_spill] sm:$0xff] %v7804_v22 }
 0x209   :  { %14063 = vst [vmem:[#allocation140_spill] sm:$0xff] %v7809_v48 }
 0x20b   :  { %1129 = vadd.xlane.f32.xlu2 %v1128_v34  ;;  %1126 = vadd.xlane.f32.xlu1 %v1125_v7  ;;  %v1134_v34 = vsel %vm536_vm0, %v223_v15, 0.0  ;;  %v1131_v7 = vsel %vm536_vm0, %v222_v8, 0.0  ;;  %v225_v15 = vld [vmem:[%s13571_s0 + $0x648] sm:$0xff] }
 0x20c   :  { %1123 = vadd.xlane.f32.xlu0 %v1122_v50  ;;  %v227_v50 = vld [vmem:[%s13571_s0 + $0x658] sm:$0xff] }
 0x20d   :  { %v1146_v8 = vsel %vm536_vm0, %v227_v50, 0.0 }
 0x20e   :  { %v7820_v22 = vpop.xlane.xlu2 %1003  ;;  %v7822_v48 = vpop.xlane.xlu1 %1000 }
 0x20f   :  { %14064 = vst [vmem:[#allocation141_spill] sm:$0xff] %v7820_v22  ;;  %v7827_v6 = vpop.xlane.xlu0 %997  ;;  %v226_v22 = vld [vmem:[%s13571_s0 + $0x650] sm:$0xff] }
 0x210   :  { %14065 = vst [vmem:[#allocation142_spill] sm:$0xff] %v7822_v48 }
 0x211   :  { %14066 = vst [vmem:[#allocation143_spill] sm:$0xff] %v7827_v6 }
 0x213   :  { %1138 = vadd.xlane.f32.xlu2 %v1137_v25  ;;  %1135 = vadd.xlane.f32.xlu1 %v1134_v34  ;;  %v1143_v25 = vsel %vm536_vm0, %v226_v22, 0.0  ;;  %v1140_v34 = vsel %vm536_vm0, %v225_v15, 0.0  ;;  %v228_v22 = vld [vmem:[%s13571_s0 + $0x660] sm:$0xff] }
 0x214   :  { %1132 = vadd.xlane.f32.xlu0 %v1131_v7  ;;  %v230_v7 = vld [vmem:[%s13571_s0 + $0x670] sm:$0xff] }
 0x215   :  { %v1155_v15 = vsel %vm536_vm0, %v230_v7, 0.0 }
 0x216   :  { %v7838_v48 = vpop.xlane.xlu2 %1012  ;;  %v7840_v6 = vpop.xlane.xlu1 %1009 }
 0x217   :  { %14067 = vst [vmem:[#allocation144_spill] sm:$0xff] %v7838_v48  ;;  %v7845_v24 = vpop.xlane.xlu0 %1006  ;;  %v229_v48 = vld [vmem:[%s13571_s0 + $0x668] sm:$0xff] }
 0x218   :  { %14068 = vst [vmem:[#allocation145_spill] sm:$0xff] %v7840_v6 }
 0x219   :  { %14069 = vst [vmem:[#allocation146_spill] sm:$0xff] %v7845_v24 }
 0x21b   :  { %1147 = vadd.xlane.f32.xlu2 %v1146_v8  ;;  %1144 = vadd.xlane.f32.xlu1 %v1143_v25  ;;  %v1152_v8 = vsel %vm536_vm0, %v229_v48, 0.0  ;;  %v1149_v25 = vsel %vm536_vm0, %v228_v22, 0.0  ;;  %v231_v48 = vld [vmem:[%s13571_s0 + $0x678] sm:$0xff] }
 0x21c   :  { %1141 = vadd.xlane.f32.xlu0 %v1140_v34  ;;  %v233_v34 = vld [vmem:[%s13571_s0 + $0x688] sm:$0xff] }
 0x21d   :  { %v1164_v22 = vsel %vm536_vm0, %v233_v34, 0.0  ;;  %v3097_v34 = vlaneseq }
 0x21e   :  { %v7856_v6 = vpop.xlane.xlu2 %1021  ;;  %v7858_v24 = vpop.xlane.xlu1 %1018 }
 0x21f   :  { %14070 = vst [vmem:[#allocation147_spill] sm:$0xff] %v7856_v6  ;;  %v7863_v50 = vpop.xlane.xlu0 %1015  ;;  %v7904_v61 = vand.u32 127, %v3097_v34 }
 0x220   :  { %14071 = vst [vmem:[#allocation148_spill] sm:$0xff] %v7858_v24  ;;  %v232_v24 = vld [vmem:[%s13571_s0 + $0x680] sm:$0xff] }
 0x221   :  { %14072 = vst [vmem:[#allocation149_spill] sm:$0xff] %v7863_v50  ;;  %v7931_v13 = vadd.s32 4294967280, %v7904_v61  ;;  %v7965_v32 = vadd.s32 4294967256, %v7904_v61  ;;  %v7980_v51 = vadd.s32 4294967248, %v7904_v61 }
 0x223   :  { %1156 = vadd.xlane.f32.xlu2 %v1155_v15  ;;  %1153 = vadd.xlane.f32.xlu1 %v1152_v8  ;;  %v1161_v15 = vsel %vm536_vm0, %v232_v24, 0.0  ;;  %v1158_v8 = vsel %vm536_vm0, %v231_v48, 0.0  ;;  %v234_v24 = vld [vmem:[%s13571_s0 + $0x690] sm:$0xff]  ;;  %14082 = vst [vmem:[#allocation159_spill] sm:$0xff] %v7931_v13 }
 0x224   :  { %1150 = vadd.xlane.f32.xlu0 %v1149_v25  ;;  %v236_v25 = vld [vmem:[%s13571_s0 + $0x6a0] sm:$0xff] }
 0x226   :  { %v7874_v6 = vpop.xlane.xlu2 %1030  ;;  %v7876_v50 = vpop.xlane.xlu1 %1027 }
 0x227   :  { %14073 = vst [vmem:[#allocation150_spill] sm:$0xff] %v7874_v6  ;;  %v7881_v7 = vpop.xlane.xlu0 %1024  ;;  %v235_v6 = vld [vmem:[%s13571_s0 + $0x698] sm:$0xff] }
 0x228   :  { %14074 = vst [vmem:[#allocation151_spill] sm:$0xff] %v7876_v50 }
 0x229   :  { %14075 = vst [vmem:[#allocation152_spill] sm:$0xff] %v7881_v7 }
 0x22b   :  { %1165 = vadd.xlane.f32.xlu2 %v1164_v22  ;;  %1162 = vadd.xlane.f32.xlu1 %v1161_v15  ;;  %v1173_v22 = vsel %vm536_vm0, %v236_v25, 0.0  ;;  %v1170_v15 = vsel %vm536_vm0, %v235_v6, 0.0  ;;  %v238_v6 = vld [vmem:[%s13571_s0 + $0x6b0] sm:$0xff]  ;;  %v4164_v25 = vpack.c.bf16 %v6927_v40, %v6909_v31 }
 0x22c   :  { %1159 = vadd.xlane.f32.xlu0 %v1158_v8  ;;  %v1167_v8 = vsel %vm536_vm0, %v234_v24, 0.0  ;;  %v1179_v14 = vsel %vm536_vm0, %v238_v6, 0.0  ;;  %v2076_v6 = vmul.f32 0.015625, %v6922_v38 }
 0x22d   :  { %v4713_v63 = vunpack.c.h.b16 %v4164_v25 }
 0x22e   :  { %v7892_v50 = vpop.xlane.xlu2 %1039  ;;  %v7894_v7 = vpop.xlane.xlu1 %1036 }
 0x22f   :  { %14076 = vst [vmem:[#allocation153_spill] sm:$0xff] %v7892_v50  ;;  %v7899_v48 = vpop.xlane.xlu0 %1033  ;;  %v7907_v50 = vadd.s32 4294967288, %v7904_v61 }
 0x230   :  { %14077 = vst [vmem:[#allocation154_spill] sm:$0xff] %v7894_v7  ;;  %v2074_v7 = vmul.f32 0.015625, %v6927_v40  ;;  %v4165_v40 = vpack.c.bf16 %v6922_v38, %v6904_v29  ;;  %v242_v29 = vld [vmem:[%s13571_s0 + $0x6d0] sm:$0xff] }
 0x231   :  { %14078 = vst [vmem:[#allocation155_spill] sm:$0xff] %v7899_v48  ;;  %v239_v48 = vld [vmem:[%s13571_s0 + $0x6b8] sm:$0xff]  ;;  %v5225_v38 = vperm.slane %v4713_v63, %v7907_v50 }
 0x232   :  { %v1182_v26 = vsel %vm536_vm0, %v239_v48, 0.0  ;;  %v7940_v48 = vadd.s32 4294967272, %v7904_v61  ;;  %v4714_v39 = vunpack.c.l.b16 %v4165_v40  ;;  %v4715_v53 = vunpack.c.h.b16 %v4165_v40 }
 0x233   :  { %1174 = vadd.xlane.f32.xlu2 %v1173_v22  ;;  %1171 = vadd.xlane.f32.xlu1 %v1170_v15  ;;  %v237_v22 = vld [vmem:[%s13571_s0 + $0x6a8] sm:$0xff]  ;;  %v2073_v15 = vmul.f32 0.015625, %v6909_v31  ;;  %v4712_v31 = vunpack.c.l.b16 %v4164_v25 }
 0x234   :  { %1168 = vadd.xlane.f32.xlu0 %v1167_v8  ;;  %v241_v25 = vld [vmem:[%s13571_s0 + $0x6c8] sm:$0xff]  ;;  %v3109_v54 = vperm.slane %v2076_v6, %v7940_v48  ;;  %v5227_v44 = vperm.slane %v4714_v39, %v7931_v13  ;;  %v7991_v39 = vadd.s32 4294967240, %v7904_v61 }
 0x236   :  { %v7918_v24 = vpop.xlane.xlu2 %1048  ;;  %v7920_v34 = vpop.xlane.xlu1 %1045 }
 0x237   :  { %14079 = vst [vmem:[#allocation156_spill] sm:$0xff] %v7918_v24  ;;  %v7926_v8 = vpop.xlane.xlu0 %1042  ;;  %v3101_v24 = vperm.slane %v2074_v7, %v7907_v50 }
 0x238   :  { %14080 = vst [vmem:[#allocation157_spill] sm:$0xff] %v7920_v34  ;;  %v1176_v34 = vsel %vm536_vm0, %v237_v22, 0.0 }
 0x239   :  { %14081 = vst [vmem:[#allocation158_spill] sm:$0xff] %v7926_v8  ;;  %v3099_v8 = vperm.slane %v2073_v15, %v7904_v61  ;;  %v240_v15 = vld [vmem:[%s13571_s0 + $0x6c0] sm:$0xff] }
 0x23a   :  { %v1185_v59 = vsel %vm536_vm0, %v240_v15, 0.0  ;;  %v243_v15 = vld [vmem:[%s13571_s0 + $0x6d8] sm:$0xff] }
 0x23b   :  { %1183 = vadd.xlane.f32.xlu2 %v1182_v26  ;;  %1180 = vadd.xlane.f32.xlu1 %v1179_v14  ;;  %v3103_v7 = vsel %vm13830_vm1, %v3101_v24, %v3099_v8  ;;  %v7951_v14 = vadd.s32 4294967264, %v7904_v61  ;;  %v3105_v26 = vperm.slane %v2075_v52, %v7931_v13  ;;  %v2077_v8 = vmul.f32 0.015625, %v6902_v28 }
 0x23c   :  { %1177 = vadd.xlane.f32.xlu0 %v1176_v34  ;;  %v5224_v34 = vperm.slane %v4712_v31, %v7904_v61  ;;  %v2078_v31 = vmul.f32 0.015625, %v6920_v37  ;;  %v4167_v28 = vpack.c.bf16 %v6940_v47, %v6945_v49  ;;  %v1194_v57 = vsel %vm536_vm0, %v243_v15, 0.0 }
 0x23d   :  { %v3107_v63 = vsel %vm3106_vm2, %v3105_v26, %v3103_v7  ;;  %v2079_v7 = vmul.f32 0.015625, %v6945_v49  ;;  %v3113_v37 = vperm.slane %v2077_v8, %v7951_v14  ;;  %v2080_v26 = vmul.f32 0.015625, %v6940_v47  ;;  %v245_v49 = vld [vmem:[%s13571_s0 + $0x6e8] sm:$0xff] }
 0x23e   :  { %v7956_v22 = vpop.xlane.xlu2 %1057  ;;  %v7958_v24 = vpop.xlane.xlu1 %1054  ;;  %v3117_v40 = vperm.slane %v2078_v31, %v7965_v32  ;;  %v4717_v8 = vunpack.c.h.b16 %v4166_v16  ;;  %v8016_v31 = vadd.s32 4294967216, %v7904_v61  ;;  %v4719_v35 = vunpack.c.h.b16 %v4167_v28 }
 0x23f   :  { %14083 = vst [vmem:[#allocation160_spill] sm:$0xff] %v7956_v22  ;;  %v7967_v52 = vpop.xlane.xlu0 %1051  ;;  %v1191_v22 = vsel %vm536_vm0, %v242_v29, 0.0  ;;  %v3111_v29 = vsel %vm3110_vm3, %v3109_v54, %v3107_v63  ;;  %v4716_v54 = vunpack.c.l.b16 %v4166_v16  ;;  %v3125_v16 = vperm.slane %v2080_v26, %v7991_v39 }
 0x240   :  { %14084 = vst [vmem:[#allocation161_spill] sm:$0xff] %v7958_v24  ;;  %v1188_v24 = vsel %vm536_vm0, %v241_v25, 0.0  ;;  %v7985_v25 = vadd.s32 4294967232, %v7904_v61  ;;  %v8049_v15 = vadd.s32 4294967200, %v7904_v61 }
 0x241   :  { %14085 = vst [vmem:[#allocation162_spill] sm:$0xff] %v7967_v52  ;;  %v5226_v52 = vsel %vm13830_vm1, %v5225_v38, %v5224_v34  ;;  %v244_v34 = vld [vmem:[%s13571_s0 + $0x6e0] sm:$0xff]  ;;  %v5229_v38 = vperm.slane %v4715_v53, %v7940_v48  ;;  %v8019_v53 = vadd.s32 4294967224, %v7904_v61 }
 0x242   :  { %v5228_v6 = vsel %vm3106_vm2, %v5227_v44, %v5226_v52  ;;  %v4718_v52 = vunpack.c.l.b16 %v4167_v28  ;;  %v2091_v28 = vmul.f32 0.015625, %v7017_v21 }
 0x243   :  { %1192 = vadd.xlane.f32.xlu2 %v1191_v22  ;;  %1189 = vadd.xlane.f32.xlu1 %v1188_v24  ;;  %v3121_v22 = vperm.slane %v2079_v7, %v7980_v51  ;;  %v8006_v24 = vadd.s32 4294967208, %v7904_v61  ;;  %v5230_v7 = vsel %vm3110_vm3, %v5229_v38, %v5228_v6  ;;  %v2082_v6 = vmul.f32 0.015625, %v6963_v58 }
 0x244   :  { %1186 = vadd.xlane.f32.xlu0 %v1185_v59  ;;  %v3115_v59 = vsel %vm3114_vm4, %v3113_v37, %v3111_v29  ;;  %v2081_v29 = vmul.f32 0.015625, %v6938_v46  ;;  %v1200_v37 = vsel %vm536_vm0, %v245_v49, 0.0  ;;  %v5235_v49 = vperm.slane %v4718_v52, %v7980_v51 }
 0x245   :  { %v3119_v2 = vsel %vm3118_vm5, %v3117_v40, %v3115_v59  ;;  %v5233_v40 = vperm.slane %v4717_v8, %v7965_v32  ;;  %v247_v8 = vld [vmem:[%s13571_s0 + $0x6f8] sm:$0xff]  ;;  %v3133_v52 = vperm.slane %v2082_v6, %v8019_v53  ;;  %v2092_v6 = vmul.f32 0.015625, %v7012_v19 }
 0x246   :  { %v8008_v44 = vpop.xlane.xlu2 %1066  ;;  %v8010_v47 = vpop.xlane.xlu1 %1063  ;;  %v3123_v62 = vsel %vm13831_vm6, %v3121_v22, %v3119_v2  ;;  %v3129_v26 = vperm.slane %v2081_v29, %v7985_v25  ;;  %v8040_v2 = vadd.s32 4294967184, %v7904_v61  ;;  %v2083_v22 = vmul.f32 0.015625, %v6958_v56 }
 0x247   :  { %14086 = vst [vmem:[#allocation163_spill] sm:$0xff] %v8008_v44  ;;  %v8021_v63 = vpop.xlane.xlu0 %1060  ;;  %v5231_v44 = vperm.slane %v4716_v54, %v7951_v14  ;;  %v2089_v54 = vmul.f32 0.015625, %v6994_v10  ;;  %v3127_v59 = vsel %vm13812_vm7, %v3125_v16, %v3123_v62  ;;  %v5237_v62 = vperm.slane %v4719_v35, %v7991_v39  ;;  %v246_v16 = vld [vmem:[%s13571_s0 + $0x6f0] sm:$0xff] }
 0x248   :  { %14087 = vst [vmem:[#allocation164_spill] sm:$0xff] %v8010_v47  ;;  %v1197_v47 = vsel %vm536_vm0, %v244_v34, 0.0  ;;  %v2090_v34 = vmul.f32 0.015625, %v6992_v9 }
 0x249   :  { %14088 = vst [vmem:[#allocation165_spill] sm:$0xff] %v8021_v63  ;;  %v5232_v38 = vsel %vm3114_vm4, %v5231_v44, %v5230_v7  ;;  %v8046_v44 = vadd.s32 4294967192, %v7904_v61  ;;  %v4168_v7 = vpack.c.bf16 %v6963_v58, %v6938_v46  ;;  %v3160_v35 = vperm.slane %v2089_v54, %v7904_v61 }
 0x24a   :  { %v3131_v46 = vsel %vm13747_vm8, %v3129_v26, %v3127_v59  ;;  %v3163_v58 = vperm.slane %v2091_v28, %v7931_v13  ;;  %v1203_v54 = vsel %vm536_vm0, %v246_v16, 0.0  ;;  %v2085_v28 = vmul.f32 0.015625, %v6981_v3 }
 0x24b   :  { %1201 = vadd.xlane.f32.xlu2 %v1200_v37  ;;  %1198 = vadd.xlane.f32.xlu1 %v1197_v47  ;;  %14089 = vst [vmem:[#allocation166_spill] sm:$0xff] %v8046_v44  ;;  %v248_v47 = vld [vmem:[%s13571_s0 + $0x700] sm:$0xff]  ;;  %v4721_v26 = vunpack.c.h.b16 %v4168_v7 }
 0x24c   :  { %1195 = vadd.xlane.f32.xlu0 %v1194_v57  ;;  %v5234_v57 = vsel %vm3118_vm5, %v5233_v40, %v5232_v38  ;;  %v3161_v38 = vperm.slane %v2090_v34, %v7907_v50  ;;  %v8083_v34 = vpack.c.bf16 %v6956_v55, %v6958_v56  ;;  %v8093_v55 = vadd.s32 4294967176, %v7904_v61 }
 0x24d   :  { %v5236_v63 = vsel %vm13831_vm6, %v5235_v49, %v5234_v57  ;;  %v3137_v49 = vperm.slane %v2083_v22, %v8016_v31  ;;  %v3135_v57 = vsel %vm13829_vm9, %v3133_v52, %v3131_v46  ;;  %v2094_v22 = vmul.f32 0.015625, %v7035_v33 }
 0x24e   :  { %v8062_v29 = vpop.xlane.xlu2 %1075  ;;  %v8064_v37 = vpop.xlane.xlu1 %1072  ;;  %14093 = vst [vmem:[#allocation170_spill] sm:$0xff] %v8083_v34  ;;  %v3162_v59 = vsel %vm13830_vm1, %v3161_v38, %v3160_v35  ;;  %v5238_v52 = vsel %vm13812_vm7, %v5237_v62, %v5236_v63  ;;  %v2086_v38 = vmul.f32 0.015625, %v6976_v1  ;;  %v5241_v63 = vperm.slane %v4721_v26, %v8019_v53 }
 0x24f   :  { %14090 = vst [vmem:[#allocation167_spill] sm:$0xff] %v8062_v29  ;;  %v8073_v40 = vpop.xlane.xlu0 %1069  ;;  %v1209_v29 = vsel %vm536_vm0, %v248_v47, 0.0  ;;  %v2093_v47 = vmul.f32 0.015625, %v7010_v18  ;;  %v3164_v56 = vsel %vm3106_vm2, %v3163_v58, %v3162_v59  ;;  %v3139_v35 = vsel %vm3138_vm10, %v3137_v49, %v3135_v57  ;;  %v249_v58 = vld [vmem:[%s13571_s0 + $0x708] sm:$0xff] }
 0x250   :  { %14091 = vst [vmem:[#allocation168_spill] sm:$0xff] %v8064_v37  ;;  %v1206_v37 = vsel %vm536_vm0, %v247_v8, 0.0  ;;  %v3165_v8 = vperm.slane %v2092_v6, %v7940_v48  ;;  %v2095_v49 = vmul.f32 0.015625, %v7030_v30  ;;  %v2105_v26 = vmul.f32 0.015625, %v7082_v5 }
 0x251   :  { %14092 = vst [vmem:[#allocation169_spill] sm:$0xff] %v8073_v40  ;;  %v4720_v40 = vunpack.c.l.b16 %v4168_v7  ;;  %v3141_v7 = vperm.slane %v2084_v60, %v8006_v24  ;;  %v3145_v60 = vperm.slane %v2085_v28, %v8049_v15  ;;  %v2106_v28 = vmul.f32 0.015625, %v7107_v23 }
 0x252   :  { %v3166_v59 = vsel %vm3110_vm3, %v3165_v8, %v3164_v56  ;;  %v1212_v56 = vsel %vm536_vm0, %v249_v58, 0.0  ;;  %v4172_v5 = vpack.c.bf16 %v6992_v9, %v6994_v10  ;;  %v2096_v23 = vmul.f32 0.015625, %v7028_v27 }
 0x253   :  { %1210 = vadd.xlane.f32.xlu2 %v1209_v29  ;;  %1207 = vadd.xlane.f32.xlu1 %v1206_v37  ;;  %v251_v29 = vld [vmem:[%s13571_s0 + $0x718] sm:$0xff]  ;;  %v250_v37 = vld [vmem:[%s13571_s0 + $0x710] sm:$0xff]  ;;  %v5239_v6 = vperm.slane %v4720_v40, %v7985_v25  ;;  %v3169_v40 = vperm.slane %v2094_v22, %v7965_v32  ;;  %v3143_v8 = vsel %vm13813_vm11, %v3141_v7, %v3139_v35  ;;  %v8150_v58 = vmul.f32 0.015625, %v6999_v12 }
 0x254   :  { %1204 = vadd.xlane.f32.xlu0 %v1203_v54  ;;  %v3167_v54 = vperm.slane %v2093_v47, %v7951_v14  ;;  %v1218_v16 = vsel %vm536_vm0, %v251_v29, 0.0  ;;  %v3149_v47 = vperm.slane %v2086_v38, %v8046_v44  ;;  %v3147_v30 = vsel %vm3146_vm12, %v3145_v60, %v3143_v8 }
 0x255   :  { %v5240_v22 = vsel %vm13747_vm8, %v5239_v6, %v5238_v52  ;;  %v3171_v29 = vperm.slane %v2095_v49, %v7980_v51  ;;  %v2107_v38 = vmul.f32 0.015625, %v7102_v20  ;;  %v3191_v35 = vperm.slane %v2105_v26, %v7904_v61  ;;  %v14125_v20 = vld [vmem:[#allocation30_spill] sm:$0xff] }
 0x256   :  { %v8110_v62 = vpop.xlane.xlu2 %1084  ;;  %v8112_v46 = vpop.xlane.xlu1 %1081  ;;  %v3192_v9 = vperm.slane %v2106_v28, %v7907_v50  ;;  %v8145_v10 = vsel %vm13829_vm9, %v5241_v63, %v5240_v22  ;;  %v3151_v60 = vsel %vm3150_vm13, %v3149_v47, %v3147_v30  ;;  %v2098_v63 = vmul.f32 0.015625, %v7048_v43 }
 0x257   :  { %14094 = vst [vmem:[#allocation171_spill] sm:$0xff] %v8110_v62  ;;  %v8121_v57 = vpop.xlane.xlu0 %1078  ;;  %v1215_v62 = vsel %vm536_vm0, %v250_v37, 0.0  ;;  %v3168_v37 = vsel %vm3114_vm4, %v3167_v54, %v3166_v59  ;;  %v4728_v54 = vunpack.c.l.b16 %v4172_v5  ;;  %v3173_v59 = vperm.slane %v2096_v23, %v7991_v39 }
 0x258   :  { %14095 = vst [vmem:[#allocation172_spill] sm:$0xff] %v8112_v46  ;;  %v2087_v46 = vmul.f32 0.015625, %v6974_v0  ;;  %v2097_v0 = vmul.f32 0.015625, %v7053_v45  ;;  %v3170_v52 = vsel %vm3118_vm5, %v3169_v40, %v3168_v37  ;;  %v252_v40 = vld [vmem:[%s13571_s0 + $0x720] sm:$0xff]  ;;  %v3194_v47 = vperm.slane %v2107_v38, %v7931_v13 }
 0x259   :  { %14096 = vst [vmem:[#allocation173_spill] sm:$0xff] %v8121_v57  ;;  %v3172_v26 = vsel %vm13831_vm6, %v3171_v29, %v3170_v52  ;;  %v2109_v23 = vmul.f32 0.015625, %v7125_v41  ;;  %v3193_v22 = vsel %vm13830_vm1, %v3192_v9, %v3191_v35  ;;  %v8179_v43 = vpack.c.bf16 %v6976_v1, %v6981_v3  ;;  %v14112_v41 = vld [vmem:[#allocation27_spill] sm:$0xff] }
 0x25a   :  { %14097 = vst [vmem:[#allocation174_spill] sm:$0xff] %v8145_v10  ;;  %v3153_v6 = vperm.slane %v2087_v46, %v8040_v2  ;;  %v2108_v46 = vmul.f32 0.015625, %v7100_v17  ;;  %v3175_v28 = vperm.slane %v2097_v0, %v7985_v25  ;;  %v2099_v0 = vmul.f32 0.015625, %v7046_v42  ;;  %v14209_v57 = vld [vmem:[#allocation99_spill] sm:$0xff] }
 0x25b   :  { %1219 = vadd.xlane.f32.xlu2 %v1218_v16  ;;  %1216 = vadd.xlane.f32.xlu1 %v1215_v62  ;;  %v254_v16 = vld [vmem:[%s13571_s0 + $0x730] sm:$0xff]  ;;  %v253_v62 = vld [vmem:[%s13571_s0 + $0x728] sm:$0xff]  ;;  %14101 = vst [vmem:[#allocation178_spill] sm:$0xff] %v8179_v43  ;;  %v1221_v38 = vsel %vm536_vm0, %v252_v40, 0.0  ;;  %v3177_v52 = vperm.slane %v2098_v63, %v8019_v53  ;;  %v2110_v9 = vmul.f32 0.015625, %v7120_v36  ;;  %v3198_v1 = vperm.slane %v2109_v23, %v7951_v14 }
 0x25c   :  { %1213 = vadd.xlane.f32.xlu0 %v1212_v56  ;;  %v4729_v56 = vunpack.c.h.b16 %v4172_v5  ;;  %v1227_v37 = vsel %vm536_vm0, %v254_v16, 0.0  ;;  %v1224_v7 = vsel %vm536_vm0, %v253_v62, 0.0  ;;  %v3155_v29 = vsel %vm13779_vm14, %v3153_v6, %v3151_v60 }
 0x25d   :  { %v3174_v5 = vsel %vm13812_vm7, %v3173_v59, %v3172_v26  ;;  %v3196_v35 = vperm.slane %v2108_v46, %v7940_v48  ;;  %v3195_v62 = vsel %vm3106_vm2, %v3194_v47, %v3193_v22  ;;  %v2122_v3 = vmul.f32 0.015625, %v7192_v4  ;;  %v14103_v26 = vld [vmem:[#allocation17_spill] sm:$0xff]  ;;  %v14104_v47 = vld [vmem:[#allocation24_spill] sm:$0xff] }
 0x25e   :  { %v8161_v49 = vpop.xlane.xlu2 %1093  ;;  %v8163_v30 = vpop.xlane.xlu1 %1090  ;;  %v3176_v16 = vsel %vm13747_vm8, %v3175_v28, %v3174_v5  ;;  %v5255_v6 = vperm.slane %v4728_v54, %v7904_v61  ;;  %v5256_v60 = vperm.slane %v4729_v56, %v7907_v50  ;;  %v3157_v59 = vperm.slane %v8150_v58, %v8093_v55  ;;  %v257_v54 = vld [vmem:[%s13571_s0 + $0x748] sm:$0xff]  ;;  %v256_v58 = vld [vmem:[%s13571_s0 + $0x740] sm:$0xff]  ;;  %v14108_v5 = vld [vmem:[#allocation16_spill] sm:$0xff] }
 0x25f   :  { %14098 = vst [vmem:[#allocation175_spill] sm:$0xff] %v8161_v49  ;;  %v8172_v8 = vpop.xlane.xlu0 %1087  ;;  %v2121_v63 = vmul.f32 0.015625, %v7197_v11  ;;  %v8199_v46 = vpack.c.bf16 %v7012_v19, %v7017_v21  ;;  %v3179_v40 = vperm.slane %v2099_v0, %v8016_v31  ;;  %v2100_v28 = vmul.f32 0.015625, %v14103_v26  ;;  %v14105_v21 = vld [vmem:[#allocation29_spill] sm:$0xff]  ;;  %v14182_v49 = vld [vmem:[#allocation88_spill] sm:$0xff] }
 0x260   :  { %14099 = vst [vmem:[#allocation176_spill] sm:$0xff] %v8163_v30  ;;  %v3178_v23 = vsel %vm13829_vm9, %v3177_v52, %v3176_v16  ;;  %v3200_v56 = vperm.slane %v2110_v9, %v7965_v32  ;;  %v3197_v19 = vsel %vm3110_vm3, %v3196_v35, %v3195_v62  ;;  %v2112_v22 = vmul.f32 0.015625, %v14105_v21  ;;  %v14109_v52 = vld [vmem:[#allocation36_spill] sm:$0xff]  ;;  %v14111_v4 = vld [vmem:[#allocation41_spill] sm:$0xff] }
 0x261   :  { %14100 = vst [vmem:[#allocation177_spill] sm:$0xff] %v8172_v8  ;;  %v8222_v26 = vmul.f32 0.015625, %v14108_v5  ;;  %v3199_v42 = vsel %vm3114_vm4, %v3198_v1, %v3197_v19  ;;  %v2123_v16 = vmul.f32 0.015625, %v14109_v52  ;;  %v3223_v9 = vperm.slane %v2122_v3, %v7907_v50  ;;  %v14183_v30 = vld [vmem:[#allocation72_spill] sm:$0xff] }
 0x262   :  { %14102 = vst [vmem:[#allocation179_spill] sm:$0xff] %v8199_v46  ;;  %v3222_v62 = vperm.slane %v2121_v63, %v7904_v61  ;;  %v2124_v11 = vmul.f32 0.015625, %v14111_v4  ;;  %v1236_v21 = vsel %vm536_vm0, %v257_v54, 0.0  ;;  %v3181_v36 = vperm.slane %v2100_v28, %v8006_v24  ;;  %v14113_v63 = vld [vmem:[#allocation28_spill] sm:$0xff] }
 0x263   :  { %1228 = vadd.xlane.f32.xlu2 %v1227_v37  ;;  %1225 = vadd.xlane.f32.xlu1 %v1224_v7  ;;  %v2111_v7 = vmul.f32 0.015625, %v14104_v47  ;;  %v1233_v47 = vsel %vm536_vm0, %v256_v58, 0.0  ;;  %v2114_v1 = vmul.f32 0.015625, %v14112_v41  ;;  %v8238_v3 = vsel %vm13757_vm15, %v3157_v59, %v3155_v29  ;;  %v14115_v58 = vld [vmem:[#allocation40_spill] sm:$0xff] }
 0x264   :  { %1222 = vadd.xlane.f32.xlu0 %v1221_v38  ;;  %v255_v38 = vld [vmem:[%s13571_s0 + $0x738] sm:$0xff]  ;;  %v3201_v52 = vsel %vm3118_vm5, %v3200_v56, %v3199_v42  ;;  %v2113_v45 = vmul.f32 0.015625, %v14113_v63  ;;  %v3204_v4 = vperm.slane %v2112_v22, %v7991_v39  ;;  %v8244_v54 = vsel %vm13830_vm1, %v5256_v60, %v5255_v6 }
 0x265   :  { %v3202_v5 = vperm.slane %v2111_v7, %v7980_v51  ;;  %v1230_v19 = vsel %vm536_vm0, %v255_v38, 0.0  ;;  %14114 = vst [vmem:[#allocation183_spill] sm:$0xff] %v8244_v54  ;;  %v4730_v28 = vunpack.c.l.b16 %v8199_v46  ;;  %v3225_v7 = vperm.slane %v2123_v16, %v7931_v13  ;;  %v14116_v38 = vld [vmem:[#allocation15_spill] sm:$0xff]  ;;  %v14117_v16 = vld [vmem:[#allocation32_spill] sm:$0xff] }
 0x266   :  { %v8214_v37 = vpop.xlane.xlu2 %1102  ;;  %v8216_v0 = vpop.xlane.xlu1 %1099  ;;  %v2125_v41 = vmul.f32 0.015625, %v14115_v58  ;;  %v8250_v29 = vmul.f32 0.015625, %v14116_v38  ;;  %v3180_v42 = vsel %vm3138_vm10, %v3179_v40, %v3178_v23  ;;  %v3224_v59 = vsel %vm13830_vm1, %v3223_v9, %v3222_v62  ;;  %v259_v40 = vld [vmem:[%s13571_s0 + $0x758] sm:$0xff]  ;;  %v14118_v9 = vld [vmem:[#allocation39_spill] sm:$0xff]  ;;  %v14122_v58 = vld [vmem:[#allocation52_spill] sm:$0xff] }
 0x267   :  { %14106 = vst [vmem:[#allocation180_spill] sm:$0xff] %v8214_v37  ;;  %v8227_v35 = vpop.xlane.xlu0 %1096  ;;  %v3227_v56 = vperm.slane %v2124_v11, %v7940_v48  ;;  %v3183_v6 = vperm.slane %v8222_v26, %v8049_v15  ;;  %v3182_v60 = vsel %vm13813_vm11, %v3181_v36, %v3180_v42  ;;  %v3208_v22 = vperm.slane %v2114_v1, %v8019_v53  ;;  %v14121_v42 = vld [vmem:[#allocation51_spill] sm:$0xff] }
 0x268   :  { %14107 = vst [vmem:[#allocation181_spill] sm:$0xff] %v8216_v0  ;;  %v3206_v11 = vperm.slane %v2113_v45, %v7985_v25  ;;  %v2115_v26 = vmul.f32 0.015625, %v14117_v16  ;;  %v2126_v36 = vmul.f32 0.015625, %v14118_v9  ;;  %v2138_v45 = vmul.f32 0.015625, %v14121_v42  ;;  %v14124_v9 = vld [vmem:[#allocation56_spill] sm:$0xff]  ;;  %v14181_v37 = vld [vmem:[#allocation67_spill] sm:$0xff] }
 0x269   :  { %14110 = vst [vmem:[#allocation182_spill] sm:$0xff] %v8227_v35  ;;  %v2139_v38 = vmul.f32 0.015625, %v14124_v9  ;;  %v1242_v17 = vsel %vm536_vm0, %v259_v40, 0.0  ;;  %v8288_v12 = vmul.f32 0.015625, %v14125_v20  ;;  %v2152_v35 = vmul.f32 0.015625, %v14181_v37  ;;  %v14191_v37 = vld [vmem:[#allocation75_spill] sm:$0xff] }
 0x26a   :  { %v3254_v20 = vperm.slane %v2138_v45, %v7907_v50  ;;  %v14132_v45 = vld [vmem:[#allocation54_spill] sm:$0xff] }
 0x26b   :  { %1237 = vadd.xlane.f32.xlu2 %v1236_v21  ;;  %1234 = vadd.xlane.f32.xlu1 %v1233_v47  ;;  %v3203_v21 = vsel %vm13831_vm6, %v3202_v5, %v3201_v52  ;;  %v260_v47 = vld [vmem:[%s13571_s0 + $0x760] sm:$0xff]  ;;  %v258_v5 = vld [vmem:[%s13571_s0 + $0x750] sm:$0xff]  ;;  %v3229_v52 = vperm.slane %v2125_v41, %v7951_v14  ;;  %v14126_v41 = vld [vmem:[#allocation31_spill] sm:$0xff] }
 0x26c   :  { %1231 = vadd.xlane.f32.xlu0 %v1230_v19  ;;  %v3205_v23 = vsel %vm13812_vm7, %v3204_v4, %v3203_v21  ;;  %v3226_v19 = vsel %vm3106_vm2, %v3225_v7, %v3224_v59  ;;  %v2137_v4 = vmul.f32 0.015625, %v14122_v58  ;;  %v1245_v63 = vsel %vm536_vm0, %v260_v47, 0.0  ;;  %v14127_v7 = vld [vmem:[#allocation44_spill] sm:$0xff] }
 0x26d   :  { %v3228_v16 = vsel %vm3110_vm3, %v3227_v56, %v3226_v19  ;;  %v2116_v10 = vmul.f32 0.015625, %v14126_v41  ;;  %v2127_v59 = vmul.f32 0.015625, %v14127_v7  ;;  %v1239_v42 = vsel %vm536_vm0, %v258_v5, 0.0  ;;  %v14129_v41 = vld [vmem:[#allocation55_spill] sm:$0xff] }
 0x26e   :  { %v8270_v62 = vpop.xlane.xlu2 %1111  ;;  %v8272_v1 = vpop.xlane.xlu1 %1108  ;;  %v8294_v58 = vperm.slane %v4730_v28, %v7931_v13  ;;  %v3207_v56 = vsel %vm13747_vm8, %v3206_v11, %v3205_v23  ;;  %v3210_v19 = vperm.slane %v2115_v26, %v8016_v31  ;;  %v3231_v47 = vperm.slane %v2126_v36, %v7965_v32  ;;  %v14130_v11 = vld [vmem:[#allocation43_spill] sm:$0xff] }
 0x26f   :  { %14119 = vst [vmem:[#allocation184_spill] sm:$0xff] %v8270_v62  ;;  %v8281_v21 = vpop.xlane.xlu0 %1105  ;;  %v3230_v40 = vsel %vm3114_vm4, %v3229_v52, %v3228_v16  ;;  %v3253_v9 = vperm.slane %v2137_v4, %v7904_v61  ;;  %v2140_v34 = vmul.f32 0.015625, %v14129_v41  ;;  %v8306_v5 = vsel %vm3146_vm12, %v3183_v6, %v3182_v60  ;;  %v262_v6 = vld [vmem:[%s13571_s0 + $0x770] sm:$0xff]  ;;  %v14131_v60 = vld [vmem:[#allocation35_spill] sm:$0xff]  ;;  %v14140_v62 = vld [vmem:[#allocation58_spill] sm:$0xff] }
 0x270   :  { %14120 = vst [vmem:[#allocation185_spill] sm:$0xff] %v8272_v1  ;;  %v2128_v23 = vmul.f32 0.015625, %v14130_v11  ;;  %v3256_v26 = vperm.slane %v2139_v38, %v7931_v13  ;;  %v3214_v16 = vperm.slane %v8288_v12, %v8049_v15  ;;  %v3212_v36 = vperm.slane %v2116_v10, %v8006_v24 }
 0x271   :  { %14123 = vst [vmem:[#allocation186_spill] sm:$0xff] %v8281_v21  ;;  %v3209_v52 = vsel %vm13829_vm9, %v3208_v22, %v3207_v56  ;;  %v3232_v12 = vsel %vm3118_vm5, %v3231_v47, %v3230_v40  ;;  %v2141_v10 = vmul.f32 0.015625, %v14132_v45  ;;  %v14135_v56 = vld [vmem:[#allocation42_spill] sm:$0xff]  ;;  %v3255_v41 = vsel %vm13830_vm1, %v3254_v20, %v3253_v9 }
 0x272   :  { %14128 = vst [vmem:[#allocation187_spill] sm:$0xff] %v8294_v58  ;;  %v3211_v38 = vsel %vm3138_vm10, %v3210_v19, %v3209_v52  ;;  %v2129_v28 = vmul.f32 0.015625, %v14135_v56  ;;  %v3258_v19 = vperm.slane %v2140_v34, %v7940_v48  ;;  %v14136_v52 = vld [vmem:[#allocation59_spill] sm:$0xff]  ;;  %v3235_v47 = vperm.slane %v2128_v23, %v7991_v39  ;;  %v14139_v9 = vld [vmem:[#allocation34_spill] sm:$0xff] }
 0x273   :  { %1246 = vadd.xlane.f32.xlu2 %v1245_v63  ;;  %1243 = vadd.xlane.f32.xlu1 %v1242_v17  ;;  %v3233_v17 = vperm.slane %v2127_v59, %v7980_v51  ;;  %v263_v63 = vld [vmem:[%s13571_s0 + $0x778] sm:$0xff]  ;;  %v261_v59 = vld [vmem:[%s13571_s0 + $0x768] sm:$0xff]  ;;  %v3257_v40 = vsel %vm3106_vm2, %v3256_v26, %v3255_v41  ;;  %v1251_v7 = vsel %vm536_vm0, %v262_v6, 0.0  ;;  %v3213_v27 = vsel %vm13813_vm11, %v3212_v36, %v3211_v38 }
 0x274   :  { %1240 = vadd.xlane.f32.xlu0 %v1239_v42  ;;  %v2118_v42 = vmul.f32 0.015625, %v14131_v60  ;;  %v2142_v60 = vmul.f32 0.015625, %v14136_v52  ;;  %v1254_v45 = vsel %vm536_vm0, %v263_v63, 0.0  ;;  %v14138_v58 = vld [vmem:[#allocation47_spill] sm:$0xff]  ;;  %v1248_v34 = vsel %vm536_vm0, %v261_v59, 0.0  ;;  %v14145_v26 = vld [vmem:[#allocation33_spill] sm:$0xff] }
 0x275   :  { %v3234_v56 = vsel %vm13831_vm6, %v3233_v17, %v3232_v12  ;;  %v2130_v20 = vmul.f32 0.015625, %v14138_v58  ;;  %v2119_v52 = vmul.f32 0.015625, %v14139_v9  ;;  %v3260_v23 = vperm.slane %v2141_v10, %v7951_v14  ;;  %v14141_v6 = vld [vmem:[#allocation19_spill] sm:$0xff]  ;;  %v14143_v12 = vld [vmem:[#allocation20_spill] sm:$0xff]  ;;  %v14144_v10 = vld [vmem:[#allocation46_spill] sm:$0xff] }
 0x276   :  { %v8325_v4 = vpop.xlane.xlu2 %1120  ;;  %v8327_v22 = vpop.xlane.xlu1 %1117  ;;  %v3216_v54 = vperm.slane %v2118_v42, %v8046_v44  ;;  %v2143_v41 = vmul.f32 0.015625, %v14140_v62  ;;  %v3237_v63 = vperm.slane %v2129_v28, %v7985_v25  ;;  %v3259_v36 = vsel %vm3110_vm3, %v3258_v19, %v3257_v40  ;;  %v265_v40 = vld [vmem:[%s13571_s0 + $0x788] sm:$0xff] }
 0x277   :  { %14133 = vst [vmem:[#allocation188_spill] sm:$0xff] %v8325_v4  ;;  %v8336_v11 = vpop.xlane.xlu0 %1114  ;;  %v3262_v17 = vperm.slane %v2142_v60, %v7965_v32  ;;  %v8355_v38 = vmul.f32 0.015625, %v14141_v6  ;;  %v8358_v59 = vmul.f32 0.015625, %v14143_v12  ;;  %v3236_v42 = vsel %vm13812_vm7, %v3235_v47, %v3234_v56  ;;  %v14146_v60 = vld [vmem:[#allocation57_spill] sm:$0xff] }
 0x278   :  { %14134 = vst [vmem:[#allocation189_spill] sm:$0xff] %v8327_v22  ;;  %v2131_v62 = vmul.f32 0.015625, %v14144_v10  ;;  %v2120_v9 = vmul.f32 0.015625, %v14145_v26  ;;  %v3215_v28 = vsel %vm3146_vm12, %v3214_v16, %v3213_v27  ;;  %v3239_v19 = vperm.slane %v2130_v20, %v8019_v53  ;;  %v14147_v26 = vld [vmem:[#allocation62_spill] sm:$0xff]  ;;  %v14150_v6 = vld [vmem:[#allocation45_spill] sm:$0xff] }
 0x279   :  { %14137 = vst [vmem:[#allocation190_spill] sm:$0xff] %v8336_v11  ;;  %v3218_v56 = vperm.slane %v2119_v52, %v8040_v2  ;;  %v3264_v47 = vperm.slane %v2143_v41, %v7980_v51  ;;  %v2145_v27 = vmul.f32 0.015625, %v14147_v26  ;;  %v3217_v10 = vsel %vm3150_vm13, %v3216_v54, %v3215_v28  ;;  %v14153_v28 = vld [vmem:[#allocation61_spill] sm:$0xff] }
 0x27a   :  { %14142 = vst [vmem:[#allocation191_spill] sm:$0xff] %v8355_v38  ;;  %v2132_v12 = vmul.f32 0.015625, %v14150_v6  ;;  %v3238_v52 = vsel %vm13747_vm8, %v3237_v63, %v3236_v42  ;;  %v1260_v1 = vsel %vm536_vm0, %v265_v40, 0.0  ;;  %v2146_v6 = vmul.f32 0.015625, %v14153_v28 }
 0x27b   :  { %1255 = vadd.xlane.f32.xlu2 %v1254_v45  ;;  %1252 = vadd.xlane.f32.xlu1 %v1251_v7  ;;  %v2144_v45 = vmul.f32 0.015625, %v14146_v60  ;;  %v266_v7 = vld [vmem:[%s13571_s0 + $0x790] sm:$0xff]  ;;  %v264_v60 = vld [vmem:[%s13571_s0 + $0x780] sm:$0xff]  ;;  %v3240_v21 = vsel %vm13829_vm9, %v3239_v19, %v3238_v52  ;;  %v3268_v19 = vperm.slane %v2145_v27, %v7985_v25  ;;  %v3187_v27 = vperm.slane %v8358_v59, %v8040_v2 }
 0x27c   :  { %1249 = vadd.xlane.f32.xlu0 %v1248_v34  ;;  %v3261_v34 = vsel %vm3114_vm4, %v3260_v23, %v3259_v36  ;;  %v3241_v23 = vperm.slane %v2131_v62, %v8016_v31  ;;  %v14152_v36 = vld [vmem:[#allocation50_spill] sm:$0xff]  ;;  %v1263_v43 = vsel %vm536_vm0, %v266_v7, 0.0  ;;  %v1257_v63 = vsel %vm536_vm0, %v264_v60, 0.0  ;;  %v14157_v52 = vld [vmem:[#allocation60_spill] sm:$0xff] }
 0x27d   :  { %v3263_v41 = vsel %vm3118_vm5, %v3262_v17, %v3261_v34  ;;  %v2133_v26 = vmul.f32 0.015625, %v14152_v36  ;;  %v3266_v54 = vperm.slane %v2144_v45, %v7991_v39  ;;  %v8399_v17 = vpack.c.bf16 %v7035_v33, %v7010_v18  ;;  %v14163_v45 = vld [vmem:[#allocation48_spill] sm:$0xff] }
 0x27e   :  { %v8376_v16 = vpop.xlane.xlu2 %1129  ;;  %v8378_v20 = vpop.xlane.xlu1 %1126  ;;  %v14155_v62 = vperm.slane %v8250_v29, %v8046_v44  ;;  %v3265_v7 = vsel %vm13831_vm6, %v3264_v47, %v3263_v41  ;;  %v3220_v60 = vperm.slane %v2120_v9, %v8093_v55  ;;  %v3243_v18 = vperm.slane %v2132_v12, %v8006_v24 }
 0x27f   :  { %14148 = vst [vmem:[#allocation192_spill] sm:$0xff] %v8376_v16  ;;  %v8387_v58 = vpop.xlane.xlu0 %1123  ;;  %v3219_v33 = vsel %vm13779_vm14, %v3218_v56, %v3217_v10  ;;  %v3242_v29 = vsel %vm3138_vm10, %v3241_v23, %v3240_v21  ;;  %v3245_v47 = vperm.slane %v2133_v26, %v8049_v15  ;;  %v2147_v41 = vmul.f32 0.015625, %v14157_v52  ;;  %v14158_v26 = vld [vmem:[#allocation65_spill] sm:$0xff]  ;;  %v14159_v56 = vld [vmem:[#allocation66_spill] sm:$0xff]  ;;  %v14160_v23 = vld [vmem:[#allocation71_spill] sm:$0xff] }
 0x280   :  { %14149 = vst [vmem:[#allocation193_spill] sm:$0xff] %v8378_v20  ;;  %v3186_v42 = vsel %vm3150_vm13, %v14155_v62, %v8306_v5  ;;  %v14156_v5 = vld [vmem:[#allocation49_spill] sm:$0xff]  ;;  %v3270_v9 = vperm.slane %v2146_v6, %v8019_v53  ;;  %v3267_v12 = vsel %vm13812_vm7, %v3266_v54, %v3265_v7  ;;  %v2148_v10 = vmul.f32 0.015625, %v14158_v26 }
 0x281   :  { %14151 = vst [vmem:[#allocation194_spill] sm:$0xff] %v8387_v58  ;;  %v2134_v34 = vmul.f32 0.015625, %v14156_v5  ;;  %v3269_v21 = vsel %vm13747_vm8, %v3268_v19, %v3267_v12  ;;  %v2153_v59 = vmul.f32 0.015625, %v14159_v56  ;;  %v267_v54 = vld [vmem:[%s13571_s0 + $0x798] sm:$0xff]  ;;  %v3221_v7 = vsel %vm13757_vm15, %v3220_v60, %v3219_v33  ;;  %v14165_v33 = vld [vmem:[#allocation70_spill] sm:$0xff] }
 0x282   :  { %14154 = vst [vmem:[#allocation195_spill] sm:$0xff] %v8399_v17  ;;  %v8441_v40 = vmul.f32 0.015625, %v14163_v45  ;;  %v3244_v19 = vsel %vm13813_vm11, %v3243_v18, %v3242_v29  ;;  %vm13756_vm8 = vcmask 1041409   ;;  %v3272_v56 = vperm.slane %v2147_v41, %v8016_v31  ;;  %v14166_v18 = vld [vmem:[#allocation64_spill] sm:$0xff]  ;;  %v14169_v41 = vld [vmem:[#allocation86_spill] sm:$0xff] }
 0x283   :  { %1264 = vadd.xlane.f32.xlu2 %v1263_v43  ;;  %1261 = vadd.xlane.f32.xlu1 %v1260_v1  ;;  %v269_v43 = vld [vmem:[%s13571_s0 + $0x7a8] sm:$0xff]  ;;  %v268_v1 = vld [vmem:[%s13571_s0 + $0x7a0] sm:$0xff]  ;;  %v3247_v26 = vperm.slane %v2134_v34, %v8046_v44  ;;  %v3246_v52 = vsel %vm3146_vm12, %v3245_v47, %v3244_v19  ;;  %v3271_v60 = vsel %vm13829_vm9, %v3270_v9, %v3269_v21  ;;  %v2155_v45 = vmul.f32 0.015625, %v14165_v33  ;;  %v14178_v33 = vld [vmem:[#allocation89_spill] sm:$0xff] }
 0x284   :  { %1258 = vadd.xlane.f32.xlu0 %v1257_v63  ;;  %v2154_v63 = vmul.f32 0.015625, %v14160_v23  ;;  %v1272_v28 = vsel %vm536_vm0, %v269_v43, 0.0  ;;  %v1269_v23 = vsel %vm536_vm0, %v268_v1, 0.0  ;;  %v1266_v5 = vsel %vm536_vm0, %v267_v54, 0.0  ;;  %v14168_v1 = vld [vmem:[#allocation85_spill] sm:$0xff]  ;;  %v14172_v54 = vld [vmem:[#allocation63_spill] sm:$0xff] }
 0x285   :  { %v2149_v29 = vmul.f32 0.015625, %v14166_v18  ;;  %v3274_v36 = vperm.slane %v2148_v10, %v8006_v24  ;;  %v3284_v34 = vperm.slane %v2153_v59, %v7904_v61  ;;  %v8459_v43 = vsel %vm13779_vm14, %v3187_v27, %v3186_v42  ;;  %v14170_v59 = vld [vmem:[#allocation53_spill] sm:$0xff]  ;;  %v270_v18 = vld [vmem:[%s13571_s0 + $0x7b0] sm:$0xff] }
 0x286   :  { %v8432_v62 = vpop.xlane.xlu2 %1138  ;;  %v8434_v6 = vpop.xlane.xlu1 %1135  ;;  %v3285_v47 = vperm.slane %v2154_v63, %v7907_v50  ;;  %14167 = vst [vmem:[#allocation199_spill] sm:$0xff] %v8459_v43  ;;  %v2170_v19 = vmul.f32 0.015625, %v14168_v1  ;;  %v2169_v46 = vmul.f32 0.015625, %v14169_v41  ;;  %v8465_v9 = vsel %vm13756_vm8, %v3221_v7, %v8238_v3  ;;  %v14171_v42 = vld [vmem:[#allocation69_spill] sm:$0xff]  ;;  %v14173_v7 = vld [vmem:[#allocation74_spill] sm:$0xff] }
 0x287   :  { %14161 = vst [vmem:[#allocation196_spill] sm:$0xff] %v8432_v62  ;;  %v8444_v12 = vpop.xlane.xlu0 %1132  ;;  %v3249_v21 = vperm.slane %v8441_v40, %v8040_v2  ;;  %v3248_v10 = vsel %vm3150_vm13, %v3247_v26, %v3246_v52  ;;  %v8471_v63 = vmul.f32 0.015625, %v14170_v59  ;;  %v2156_v27 = vmul.f32 0.015625, %v14171_v42  ;;  %v272_v40 = vld [vmem:[%s13571_s0 + $0x7c0] sm:$0xff]  ;;  %v271_v52 = vld [vmem:[%s13571_s0 + $0x7b8] sm:$0xff] }
 0x288   :  { %14162 = vst [vmem:[#allocation197_spill] sm:$0xff] %v8434_v6  ;;  %v2150_v1 = vmul.f32 0.015625, %v14172_v54  ;;  %v3273_v41 = vsel %vm3138_vm10, %v3272_v56, %v3271_v60  ;;  %v3287_v3 = vperm.slane %v2155_v45, %v7931_v13  ;;  %v3276_v26 = vperm.slane %v2149_v29, %v8049_v15  ;;  %v14174_v54 = vld [vmem:[#allocation84_spill] sm:$0xff] }
 0x289   :  { %14164 = vst [vmem:[#allocation198_spill] sm:$0xff] %v8444_v12  ;;  %v2171_v56 = vmul.f32 0.015625, %v14174_v54  ;;  %v3316_v42 = vperm.slane %v2170_v19, %v7907_v50  ;;  %v3315_v29 = vperm.slane %v2169_v46, %v7904_v61  ;;  %v1281_v38 = vsel %vm536_vm0, %v272_v40, 0.0 }
 0x28a   :  { %v1278_v43 = vsel %vm536_vm0, %v271_v52, 0.0  ;;  %v3278_v0 = vperm.slane %v2150_v1, %v8046_v44  ;;  %v1275_v46 = vsel %vm536_vm0, %v270_v18, 0.0  ;;  %v2159_v52 = vmul.f32 0.015625, %v14183_v30  ;;  %v14193_v30 = vld [vmem:[#allocation114_spill] sm:$0xff] }
 0x28b   :  { %1273 = vadd.xlane.f32.xlu2 %v1272_v28  ;;  %1270 = vadd.xlane.f32.xlu1 %v1269_v23  ;;  %v2157_v28 = vmul.f32 0.015625, %v14173_v7  ;;  %v3286_v23 = vsel %vm13830_vm1, %v3285_v47, %v3284_v34  ;;  %v14177_v7 = vld [vmem:[#allocation68_spill] sm:$0xff]  ;;  %v3289_v34 = vperm.slane %v2156_v27, %v7940_v48  ;;  %v14180_v47 = vld [vmem:[#allocation73_spill] sm:$0xff]  ;;  %v3318_v27 = vperm.slane %v2171_v56, %v7931_v13 }
 0x28c   :  { %1267 = vadd.xlane.f32.xlu0 %v1266_v5  ;;  %v3275_v5 = vsel %vm13813_vm11, %v3274_v36, %v3273_v41  ;;  %v2151_v59 = vmul.f32 0.015625, %v14177_v7  ;;  %v2172_v36 = vmul.f32 0.015625, %v14178_v33  ;;  %v2158_v54 = vmul.f32 0.015625, %v14180_v47 }
 0x28d   :  { %v3288_v7 = vsel %vm3106_vm2, %v3287_v3, %v3286_v23  ;;  %v3291_v19 = vperm.slane %v2157_v28, %v7951_v14  ;;  %v3277_v33 = vsel %vm3146_vm12, %v3276_v26, %v3275_v5  ;;  %v2173_v47 = vmul.f32 0.015625, %v14182_v49  ;;  %v14184_v5 = vld [vmem:[#allocation77_spill] sm:$0xff] }
 0x28e   :  { %v8488_v60 = vpop.xlane.xlu2 %1147  ;;  %v8490_v45 = vpop.xlane.xlu1 %1144  ;;  %v3280_v40 = vperm.slane %v2151_v59, %v8040_v2  ;;  %v3317_v1 = vsel %vm13830_vm1, %v3316_v42, %v3315_v29  ;;  %v3320_v3 = vperm.slane %v2172_v36, %v7940_v48  ;;  %v3250_v18 = vsel %vm13779_vm14, %v3249_v21, %v3248_v10  ;;  %v14185_v29 = vld [vmem:[#allocation87_spill] sm:$0xff] }
 0x28f   :  { %14175 = vst [vmem:[#allocation200_spill] sm:$0xff] %v8488_v60  ;;  %v8499_v41 = vpop.xlane.xlu0 %1141  ;;  %v3293_v28 = vperm.slane %v2158_v54, %v7965_v32  ;;  %v3290_v26 = vsel %vm3110_vm3, %v3289_v34, %v3288_v7  ;;  %v2160_v23 = vmul.f32 0.015625, %v14184_v5  ;;  %v3251_v59 = vperm.slane %v8471_v63, %v8093_v55  ;;  %v14186_v54 = vld [vmem:[#allocation92_spill] sm:$0xff]  ;;  %v273_v34 = vld [vmem:[%s13571_s0 + $0x7c8] sm:$0xff] }
 0x290   :  { %14176 = vst [vmem:[#allocation201_spill] sm:$0xff] %v8490_v45  ;;  %v3279_v56 = vsel %vm3150_vm13, %v3278_v0, %v3277_v33  ;;  %v3292_v42 = vsel %vm3114_vm4, %v3291_v19, %v3290_v26  ;;  %v2174_v36 = vmul.f32 0.015625, %v14185_v29  ;;  %v3282_v21 = vperm.slane %v2152_v35, %v8093_v55  ;;  %v14189_v26 = vld [vmem:[#allocation76_spill] sm:$0xff] }
 0x291   :  { %14179 = vst [vmem:[#allocation202_spill] sm:$0xff] %v8499_v41  ;;  %v3322_v10 = vperm.slane %v2173_v47, %v7951_v14  ;;  %v3319_v63 = vsel %vm3106_vm2, %v3318_v27, %v3317_v1  ;;  %v2175_v0 = vmul.f32 0.015625, %v14186_v54  ;;  %v3281_v19 = vsel %vm13779_vm14, %v3280_v40, %v3279_v56  ;;  %v14192_v56 = vld [vmem:[#allocation91_spill] sm:$0xff] }
 0x292   :  { %v2161_v35 = vmul.f32 0.015625, %v14189_v26  ;;  %v3321_v47 = vsel %vm3110_vm3, %v3320_v3, %v3319_v63  ;;  %v3294_v27 = vsel %vm3118_vm5, %v3293_v28, %v3292_v42  ;;  %v3297_v1 = vperm.slane %v2160_v23, %v7991_v39  ;;  %v14194_v42 = vld [vmem:[#allocation119_spill] sm:$0xff] }
 0x293   :  { %1282 = vadd.xlane.f32.xlu2 %v1281_v38  ;;  %1279 = vadd.xlane.f32.xlu1 %v1278_v43  ;;  %v275_v38 = vld [vmem:[%s13571_s0 + $0x7d8] sm:$0xff]  ;;  %v274_v43 = vld [vmem:[%s13571_s0 + $0x7d0] sm:$0xff]  ;;  %v2162_v5 = vmul.f32 0.015625, %v14191_v37  ;;  %v3324_v40 = vperm.slane %v2174_v36, %v7965_v32  ;;  %v1284_v26 = vsel %vm536_vm0, %v273_v34, 0.0  ;;  %v3323_v3 = vsel %vm3114_vm4, %v3322_v10, %v3321_v47 }
 0x294   :  { %1276 = vadd.xlane.f32.xlu0 %v1275_v46  ;;  %v3295_v46 = vperm.slane %v2159_v52, %v7980_v51  ;;  %v1290_v54 = vsel %vm536_vm0, %v275_v38, 0.0  ;;  %v1287_v49 = vsel %vm536_vm0, %v274_v43, 0.0  ;;  %v2176_v52 = vmul.f32 0.015625, %v14192_v56  ;;  %v14196_v36 = vld [vmem:[#allocation80_spill] sm:$0xff] }
 0x295   :  { %v3326_v63 = vperm.slane %v2175_v0, %v7980_v51  ;;  %v2201_v28 = vmul.f32 0.015625, %v14193_v30  ;;  %v2202_v23 = vmul.f32 0.015625, %v14194_v42  ;;  %v8562_v38 = vsel %vm13757_vm15, %v3251_v59, %v3250_v18  ;;  %v14197_v0 = vld [vmem:[#allocation90_spill] sm:$0xff] }
 0x296   :  { %v8536_v33 = vpop.xlane.xlu2 %1156  ;;  %v8538_v7 = vpop.xlane.xlu1 %1153  ;;  %14195 = vst [vmem:[#allocation206_spill] sm:$0xff] %v8562_v38  ;;  %v3299_v43 = vperm.slane %v2161_v35, %v7985_v25  ;;  %v3296_v37 = vsel %vm13831_vm6, %v3295_v46, %v3294_v27  ;;  %v2163_v8 = vmul.f32 0.015625, %v14196_v36  ;;  %v3283_v34 = vsel %vm13757_vm15, %v3282_v21, %v3281_v19  ;;  %v14198_v35 = vld [vmem:[#allocation118_spill] sm:$0xff] }
 0x297   :  { %14187 = vst [vmem:[#allocation203_spill] sm:$0xff] %v8536_v33  ;;  %v8547_v29 = vpop.xlane.xlu0 %1150  ;;  %v3298_v10 = vsel %vm13812_vm7, %v3297_v1, %v3296_v37  ;;  %v2177_v47 = vmul.f32 0.015625, %v14197_v0  ;;  %vm13772_vm8 = vcmask 1042434   ;;  %v3301_v42 = vperm.slane %v2162_v5, %v8019_v53  ;;  %v277_v37 = vld [vmem:[%s13571_s0 + $0x7e8] sm:$0xff] }
 0x298   :  { %14188 = vst [vmem:[#allocation204_spill] sm:$0xff] %v8538_v7  ;;  %v3328_v18 = vperm.slane %v2176_v52, %v7991_v39  ;;  %v3325_v59 = vsel %vm3118_vm5, %v3324_v40, %v3323_v3  ;;  %v2203_v46 = vmul.f32 0.015625, %v14198_v35  ;;  %v3377_v5 = vperm.slane %v2201_v28, %v7904_v61  ;;  %v276_v40 = vld [vmem:[%s13571_s0 + $0x7e0] sm:$0xff] }
 0x299   :  { %14190 = vst [vmem:[#allocation205_spill] sm:$0xff] %v8547_v29  ;;  %v3327_v21 = vsel %vm13831_vm6, %v3326_v63, %v3325_v59  ;;  %vm14202_vm15 = vcmask 589312   ;;  %v14203_v3 = vld [vmem:[#allocation78_spill] sm:$0xff]  ;;  %v14204_v63 = vld [vmem:[#allocation79_spill] sm:$0xff]  ;;  %v3303_v30 = vperm.slane %v2163_v8, %v8016_v31  ;;  %v1296_v36 = vsel %vm536_vm0, %v277_v37, 0.0 }
 0x29a   :  { %v3300_v52 = vsel %vm14202_vm15, %v3299_v43, %v3298_v10  ;;  %v8593_v35 = vmul.f32 0.015625, %v14203_v3  ;;  %v2164_v59 = vmul.f32 0.015625, %v14204_v63  ;;  %v3329_v38 = vsel %vm13812_vm7, %v3328_v18, %v3327_v21  ;;  %v14207_v10 = vld [vmem:[#allocation122_spill] sm:$0xff] }
 0x29b   :  { %1291 = vadd.xlane.f32.xlu2 %v1290_v54  ;;  %1288 = vadd.xlane.f32.xlu1 %v1287_v49  ;;  %v278_v49 = vld [vmem:[%s13571_s0 + $0x7f0] sm:$0xff]  ;;  %v14199_v54 = vld [vmem:[#allocation95_spill] sm:$0xff]  ;;  %v3380_v43 = vperm.slane %v2203_v46, %v7931_v13  ;;  %v2205_v3 = vmul.f32 0.015625, %v14207_v10  ;;  %v1293_v63 = vsel %vm536_vm0, %v276_v40, 0.0  ;;  %v8615_v18 = vsel %vm13772_vm8, %v3283_v34, %v8465_v9 }
 0x29c   :  { %1285 = vadd.xlane.f32.xlu0 %v1284_v26  ;;  %v2178_v19 = vmul.f32 0.015625, %v14199_v54  ;;  %v3378_v26 = vperm.slane %v2202_v23, %v7907_v50  ;;  %v3330_v23 = vperm.slane %v2177_v47, %v7985_v25  ;;  %v14206_v54 = vld [vmem:[#allocation117_spill] sm:$0xff]  ;;  %v1299_v56 = vsel %vm536_vm0, %v278_v49, 0.0  ;;  %v14211_v46 = vld [vmem:[#allocation104_spill] sm:$0xff] }
 0x29d   :  { %v2204_v0 = vmul.f32 0.015625, %v14206_v54  ;;  %v2186_v47 = vmul.f32 0.015625, %v14209_v57  ;;  %v3302_v49 = vsel %vm13829_vm9, %v3301_v42, %v3300_v52  ;;  %v2187_v21 = vmul.f32 0.015625, %v14211_v46  ;;  %v14219_v57 = vld [vmem:[#allocation98_spill] sm:$0xff] }
 0x29e   :  { %v8584_v27 = vpop.xlane.xlu2 %1165  ;;  %v8586_v1 = vpop.xlane.xlu1 %1162  ;;  %v3379_v54 = vsel %vm13830_vm1, %v3378_v26, %v3377_v5  ;;  %v14212_v5 = vld [vmem:[#allocation121_spill] sm:$0xff]  ;;  %v3304_v42 = vsel %vm3138_vm10, %v3303_v30, %v3302_v49  ;;  %v3331_v52 = vsel %vm14202_vm15, %v3330_v23, %v3329_v38  ;;  %v3384_v34 = vperm.slane %v2205_v3, %v7951_v14  ;;  %v14216_v49 = vld [vmem:[#allocation103_spill] sm:$0xff] }
 0x29f   :  { %14200 = vst [vmem:[#allocation207_spill] sm:$0xff] %v8584_v27  ;;  %v8597_v28 = vpop.xlane.xlu0 %1159  ;;  %v3332_v27 = vperm.slane %v2178_v19, %v8019_v53  ;;  %v3305_v19 = vperm.slane %v2164_v59, %v8006_v24  ;;  %v3382_v10 = vperm.slane %v2204_v0, %v7940_v48  ;;  %v2206_v26 = vmul.f32 0.015625, %v14212_v5  ;;  %v14213_v0 = vld [vmem:[#allocation93_spill] sm:$0xff] }
 0x2a0   :  { %14201 = vst [vmem:[#allocation208_spill] sm:$0xff] %v8586_v1  ;;  %v14208_v1 = vld [vmem:[#allocation94_spill] sm:$0xff]  ;;  %v3381_v9 = vsel %vm3106_vm2, %v3380_v43, %v3379_v54  ;;  %v2180_v59 = vmul.f32 0.015625, %v14213_v0  ;;  %v3347_v38 = vperm.slane %v2186_v47, %v7907_v50  ;;  %v279_v3 = vld [vmem:[%s13571_s0 + $0x7f8] sm:$0xff]  ;;  %v2188_v40 = vmul.f32 0.015625, %v14216_v49  ;;  %v14217_v0 = vld [vmem:[#allocation120_spill] sm:$0xff] }
 0x2a1   :  { %14205 = vst [vmem:[#allocation209_spill] sm:$0xff] %v8597_v28  ;;  %v2179_v8 = vmul.f32 0.015625, %v14208_v1  ;;  %v14210_v28 = vld [vmem:[#allocation100_spill] sm:$0xff]  ;;  %v3333_v30 = vsel %vm13829_vm9, %v3332_v27, %v3331_v52  ;;  %v3349_v5 = vperm.slane %v2187_v21, %v7931_v13  ;;  %v3386_v27 = vperm.slane %v2206_v26, %v7965_v32 }
 0x2a2   :  { %v2185_v37 = vmul.f32 0.015625, %v14210_v28  ;;  %v3383_v47 = vsel %vm3110_vm3, %v3382_v10, %v3381_v9  ;;  %v2181_v28 = vmul.f32 0.015625, %v14219_v57  ;;  %v1302_v21 = vsel %vm536_vm0, %v279_v3, 0.0 }
 0x2a3   :  { %1300 = vadd.xlane.f32.xlu2 %v1299_v56  ;;  %1297 = vadd.xlane.f32.xlu1 %v1296_v36  ;;  %v281_v56 = vld [vmem:[%s13571_s0 + $0x808] sm:$0xff]  ;;  %v280_v36 = vld [vmem:[%s13571_s0 + $0x800] sm:$0xff]  ;;  %vm14250_vm8 = vcmask 1048512  }
 0x2a4   :  { %1294 = vadd.xlane.f32.xlu0 %v1293_v63  ;;  %v3334_v63 = vperm.slane %v2179_v8, %v8016_v31  ;;  %v3346_v43 = vperm.slane %v2185_v37, %v7904_v61  ;;  %v2207_v8 = vmul.f32 0.015625, %v14217_v0  ;;  %v1308_v52 = vsel %vm536_vm0, %v281_v56, 0.0 }
 0x2a5   :  { %v1305_v46 = vsel %vm536_vm0, %v280_v36, 0.0  ;;  %v3385_v37 = vsel %vm3114_vm4, %v3384_v34, %v3383_v47  ;;  %v3306_v0 = vsel %vm13813_vm11, %v3305_v19, %v3304_v42  ;;  %v3351_v56 = vperm.slane %v2188_v40, %v7940_v48  ;;  %v14222_v36 = vld [vmem:[#allocation107_spill] sm:$0xff]  ;;  %v14223_v47 = vld [vmem:[#allocation81_spill] sm:$0xff] }
 0x2a6   :  { %v8637_v23 = vpop.xlane.xlu2 %1174  ;;  %v8639_v54 = vpop.xlane.xlu1 %1171  ;;  %v3335_v26 = vsel %vm3138_vm10, %v3334_v63, %v3333_v30  ;;  %v3348_v9 = vsel %vm13830_vm1, %v3347_v38, %v3346_v43  ;;  %v2190_v57 = vmul.f32 0.015625, %v14222_v36  ;;  %v3388_v34 = vperm.slane %v2207_v8, %v7980_v51  ;;  %v14226_v30 = vld [vmem:[#allocation83_spill] sm:$0xff]  ;;  %v14227_v40 = vld [vmem:[#allocation97_spill] sm:$0xff] }
 0x2a7   :  { %14214 = vst [vmem:[#allocation210_spill] sm:$0xff] %v8637_v23  ;;  %v8648_v1 = vpop.xlane.xlu0 %1168  ;;  %v14220_v23 = vld [vmem:[#allocation125_spill] sm:$0xff]  ;;  %v8667_v3 = vmul.f32 0.015625, %v14223_v47  ;;  %v3350_v19 = vsel %vm3106_vm2, %v3349_v5, %v3348_v9  ;;  %v3387_v42 = vsel %vm3118_vm5, %v3386_v27, %v3385_v37  ;;  %v8673_v38 = vmul.f32 0.015625, %v14226_v30  ;;  %v14228_v27 = vld [vmem:[#allocation96_spill] sm:$0xff]  ;;  %v14229_v9 = vld [vmem:[#allocation106_spill] sm:$0xff] }
 0x2a8   :  { %14215 = vst [vmem:[#allocation211_spill] sm:$0xff] %v8639_v54  ;;  %v2208_v49 = vmul.f32 0.015625, %v14220_v23  ;;  %v3336_v54 = vperm.slane %v2180_v59, %v8006_v24  ;;  %v14225_v59 = vld [vmem:[#allocation124_spill] sm:$0xff]  ;;  %v2182_v43 = vmul.f32 0.015625, %v14227_v40  ;;  %v3338_v23 = vperm.slane %v2181_v28, %v8049_v15  ;;  %v283_v5 = vld [vmem:[%s13571_s0 + $0x818] sm:$0xff] }
 0x2a9   :  { %14218 = vst [vmem:[#allocation212_spill] sm:$0xff] %v8648_v1  ;;  %v14221_v1 = vld [vmem:[#allocation102_spill] sm:$0xff]  ;;  %v2209_v63 = vmul.f32 0.015625, %v14225_v59  ;;  %v2191_v59 = vmul.f32 0.015625, %v14229_v9  ;;  %v282_v40 = vld [vmem:[%s13571_s0 + $0x810] sm:$0xff]  ;;  %v3352_v36 = vsel %vm3110_vm3, %v3351_v56, %v3350_v19 }
 0x2aa   :  { %v2189_v10 = vmul.f32 0.015625, %v14221_v1  ;;  %14224 = vst [vmem:[#allocation213_spill] sm:$0xff] %v8667_v3  ;;  %v3390_v8 = vperm.slane %v2208_v49, %v7991_v39  ;;  %v3337_v37 = vsel %vm13813_vm11, %v3336_v54, %v3335_v26  ;;  %v3355_v1 = vperm.slane %v2190_v57, %v7965_v32  ;;  %v14234_v9 = vld [vmem:[#allocation128_spill] sm:$0xff] }
 0x2ab   :  { %1309 = vadd.xlane.f32.xlu2 %v1308_v52  ;;  %1306 = vadd.xlane.f32.xlu1 %v1305_v46  ;;  %v284_v46 = vld [vmem:[%s13571_s0 + $0x820] sm:$0xff]  ;;  %v8685_v52 = vmul.f32 0.015625, %v14228_v27  ;;  %v14232_v27 = vld [vmem:[#allocation123_spill] sm:$0xff]  ;;  %v3389_v54 = vsel %vm13831_vm6, %v3388_v34, %v3387_v42  ;;  %v2211_v30 = vmul.f32 0.015625, %v14234_v9  ;;  %v3340_v33 = vperm.slane %v2182_v43, %v8046_v44  ;;  %v14236_v42 = vld [vmem:[#allocation105_spill] sm:$0xff] }
 0x2ac   :  { %1303 = vadd.xlane.f32.xlu0 %v1302_v21  ;;  %v3353_v21 = vperm.slane %v2189_v10, %v7951_v14  ;;  %v2210_v47 = vmul.f32 0.015625, %v14232_v27  ;;  %v3392_v10 = vperm.slane %v2209_v63, %v7985_v25  ;;  %v3339_v56 = vsel %vm3146_vm12, %v3338_v23, %v3337_v37  ;;  %v14235_v27 = vld [vmem:[#allocation101_spill] sm:$0xff]  ;;  %v14238_v23 = vld [vmem:[#allocation110_spill] sm:$0xff] }
 0x2ad   :  { %v3391_v57 = vsel %vm13812_vm7, %v3390_v8, %v3389_v54  ;;  %v1311_v19 = vsel %vm536_vm0, %v282_v40, 0.0  ;;  %v2184_v34 = vmul.f32 0.015625, %v14235_v27  ;;  %v3357_v63 = vperm.slane %v2191_v59, %v7980_v51  ;;  %v14239_v40 = vld [vmem:[#allocation82_spill] sm:$0xff]  ;;  %v14240_v27 = vld [vmem:[#allocation127_spill] sm:$0xff] }
 0x2ae   :  { %v8690_v28 = vpop.xlane.xlu2 %1183  ;;  %v8692_v49 = vpop.xlane.xlu1 %1180  ;;  %v3354_v9 = vsel %vm3114_vm4, %v3353_v21, %v3352_v36  ;;  %v2193_v37 = vmul.f32 0.015625, %v14238_v23  ;;  %v3394_v8 = vperm.slane %v2210_v47, %v8019_v53  ;;  %v8723_v54 = vmul.f32 0.015625, %v14239_v40  ;;  %v14247_v40 = vld [vmem:[#allocation131_spill] sm:$0xff] }
 0x2af   :  { %14230 = vst [vmem:[#allocation214_spill] sm:$0xff] %v8690_v28  ;;  %v8701_v26 = vpop.xlane.xlu0 %1177  ;;  %v1317_v28 = vsel %vm536_vm0, %v284_v46, 0.0  ;;  %v14237_v46 = vperm.slane %v8593_v35, %v8049_v15  ;;  %v3356_v43 = vsel %vm3118_vm5, %v3355_v1, %v3354_v9  ;;  %v3393_v59 = vsel %vm14202_vm15, %v3392_v10, %v3391_v57  ;;  %v287_v9 = vld [vmem:[%s13571_s0 + $0x838] sm:$0xff] }
 0x2b0   :  { %14231 = vst [vmem:[#allocation215_spill] sm:$0xff] %v8692_v49  ;;  %v1314_v49 = vsel %vm536_vm0, %v283_v5, 0.0  ;;  %v2212_v36 = vmul.f32 0.015625, %v14240_v27  ;;  %v3396_v21 = vperm.slane %v2211_v30, %v8016_v31  ;;  %v3309_v1 = vperm.slane %v8673_v38, %v8046_v44  ;;  %v286_v30 = vld [vmem:[%s13571_s0 + $0x830] sm:$0xff]  ;;  %v14241_v38 = vld [vmem:[#allocation109_spill] sm:$0xff]  ;;  %v14245_v27 = vld [vmem:[#allocation126_spill] sm:$0xff] }
 0x2b1   :  { %14233 = vst [vmem:[#allocation216_spill] sm:$0xff] %v8701_v26  ;;  %v2192_v26 = vmul.f32 0.015625, %v14236_v42  ;;  %v3308_v5 = vsel %vm3146_vm12, %v14237_v46, %v3306_v0  ;;  %v3342_v0 = vperm.slane %v8685_v52, %v8040_v2  ;;  %v3341_v47 = vsel %vm3150_vm13, %v3340_v33, %v3339_v56  ;;  %v285_v33 = vld [vmem:[%s13571_s0 + $0x828] sm:$0xff]  ;;  %v14244_v56 = vld [vmem:[#allocation108_spill] sm:$0xff] }
 0x2b2   :  { %v3358_v10 = vsel %vm13831_vm6, %v3357_v63, %v3356_v43  ;;  %v2194_v57 = vmul.f32 0.015625, %v14241_v38  ;;  %v2195_v46 = vmul.f32 0.015625, %v14244_v56  ;;  %v3361_v35 = vperm.slane %v2193_v37, %v7985_v25 }
 0x2b3   :  { %1318 = vadd.xlane.f32.xlu2 %v1317_v28  ;;  %1315 = vadd.xlane.f32.xlu1 %v1314_v49  ;;  %v3344_v28 = vperm.slane %v2184_v34, %v8093_v55  ;;  %v3359_v49 = vperm.slane %v2192_v26, %v7991_v39  ;;  %v2213_v34 = vmul.f32 0.015625, %v14245_v27  ;;  %v3395_v26 = vsel %vm13829_vm9, %v3394_v8, %v3393_v59 }
 0x2b4   :  { %1312 = vadd.xlane.f32.xlu0 %v1311_v19  ;;  %v3398_v63 = vperm.slane %v2212_v36, %v8006_v24  ;;  %v3397_v43 = vsel %vm3138_vm10, %v3396_v21, %v3395_v26  ;;  %v1326_v38 = vsel %vm536_vm0, %v287_v9, 0.0  ;;  %v1323_v42 = vsel %vm536_vm0, %v286_v30, 0.0 }
 0x2b5   :  { %v2214_v3 = vmul.f32 0.015625, %v14247_v40  ;;  %v1320_v27 = vsel %vm536_vm0, %v285_v33, 0.0  ;;  %v8769_v59 = vsel %vm3150_vm13, %v3309_v1, %v3308_v5  ;;  %v3363_v36 = vperm.slane %v2194_v57, %v8019_v53  ;;  %v14251_v57 = vld [vmem:[#allocation130_spill] sm:$0xff] }
 0x2b6   :  { %v8745_v19 = vpop.xlane.xlu2 %1192  ;;  %v8747_v52 = vpop.xlane.xlu1 %1189  ;;  %v3360_v21 = vsel %vm13812_vm7, %v3359_v49, %v3358_v10  ;;  %v3343_v30 = vsel %vm13779_vm14, %v3342_v0, %v3341_v47  ;;  %v3400_v40 = vperm.slane %v2213_v34, %v8049_v15  ;;  %v3365_v5 = vperm.slane %v2195_v46, %v8016_v31  ;;  %v14252_v10 = vld [vmem:[#allocation132_spill] sm:$0xff] }
 0x2b7   :  { %14242 = vst [vmem:[#allocation217_spill] sm:$0xff] %v8745_v19  ;;  %v8756_v23 = vpop.xlane.xlu0 %1186  ;;  %v14248_v19 = vld [vmem:[#allocation133_spill] sm:$0xff]  ;;  %v3362_v26 = vsel %vm14202_vm15, %v3361_v35, %v3360_v21  ;;  %v8778_v33 = vsel %vm14250_vm8, %v3344_v28, %v3343_v30  ;;  %v3399_v1 = vsel %vm13813_vm11, %v3398_v63, %v3397_v43  ;;  %v2215_v8 = vmul.f32 0.015625, %v14251_v57  ;;  %v289_v28 = vld [vmem:[%s13571_s0 + $0x848] sm:$0xff]  ;;  %v14253_v46 = vld [vmem:[#allocation112_spill] sm:$0xff] }
 0x2b8   :  { %14243 = vst [vmem:[#allocation218_spill] sm:$0xff] %v8747_v52  ;;  %v2218_v56 = vmul.f32 0.015625, %v14248_v19  ;;  %v14249_v52 = vld [vmem:[#allocation134_spill] sm:$0xff]  ;;  %v3402_v49 = vperm.slane %v2214_v3, %v8046_v44  ;;  %v2219_v0 = vmul.f32 0.015625, %v14252_v10  ;;  %v14254_v3 = vld [vmem:[#allocation147_spill] sm:$0xff]  ;;  %v14255_v63 = vld [vmem:[#allocation148_spill] sm:$0xff]  ;;  %v3401_v57 = vsel %vm3146_vm12, %v3400_v40, %v3399_v1 }
 0x2b9   :  { %14246 = vst [vmem:[#allocation219_spill] sm:$0xff] %v8756_v23  ;;  %v2217_v37 = vmul.f32 0.015625, %v14249_v52  ;;  %v2234_v34 = vmul.f32 0.015625, %v14254_v3  ;;  %v2233_v43 = vmul.f32 0.015625, %v14255_v63  ;;  %v288_v21 = vld [vmem:[%s13571_s0 + $0x840] sm:$0xff]  ;;  %v14258_v30 = vld [vmem:[#allocation113_spill] sm:$0xff] }
 0x2ba   :  { %v3409_v35 = vperm.slane %v2218_v56, %v7907_v50  ;;  %v2196_v9 = vmul.f32 0.015625, %v14258_v30  ;;  %v14260_v10 = vld [vmem:[#allocation152_spill] sm:$0xff]  ;;  %v14262_v3 = vld [vmem:[#allocation129_spill] sm:$0xff]  ;;  %v3411_v30 = vperm.slane %v2219_v0, %v7931_v13  ;;  %v1329_v1 = vsel %vm536_vm0, %v288_v21, 0.0  ;;  %v14264_v23 = vld [vmem:[#allocation151_spill] sm:$0xff] }
 0x2bb   :  { %1327 = vadd.xlane.f32.xlu2 %v1326_v38  ;;  %1324 = vadd.xlane.f32.xlu1 %v1323_v42  ;;  %v3408_v47 = vperm.slane %v2217_v37, %v7904_v61  ;;  %v290_v42 = vld [vmem:[%s13571_s0 + $0x850] sm:$0xff]  ;;  %v3364_v38 = vsel %vm13829_vm9, %v3363_v36, %v3362_v26  ;;  %v14259_v36 = vld [vmem:[#allocation137_spill] sm:$0xff]  ;;  %v2235_v19 = vmul.f32 0.015625, %v14260_v10  ;;  %v2216_v63 = vmul.f32 0.015625, %v14262_v3 }
 0x2bc   :  { %1321 = vadd.xlane.f32.xlu0 %v1320_v27  ;;  %v8795_v27 = vmul.f32 0.015625, %v14253_v46  ;;  %v2220_v26 = vmul.f32 0.015625, %v14259_v36  ;;  %v3404_v46 = vperm.slane %v2215_v8, %v8040_v2  ;;  %v1335_v17 = vsel %vm536_vm0, %v290_v42, 0.0  ;;  %v14263_v36 = vld [vmem:[#allocation136_spill] sm:$0xff] }
 0x2bd   :  { %v3410_v40 = vsel %vm13830_vm1, %v3409_v35, %v3408_v47  ;;  %v2221_v10 = vmul.f32 0.015625, %v14263_v36  ;;  %v3439_v3 = vperm.slane %v2233_v43, %v7904_v61  ;;  %v2236_v8 = vmul.f32 0.015625, %v14264_v23 }
 0x2be   :  { %v8799_v56 = vpop.xlane.xlu2 %1201  ;;  %v8801_v37 = vpop.xlane.xlu1 %1198  ;;  %vm13810_vm8 = vcmask 1043459   ;;  %v3366_v42 = vsel %vm3138_vm10, %v3365_v5, %v3364_v38  ;;  %v3369_v35 = vperm.slane %v8795_v27, %v8049_v15  ;;  %v3367_v47 = vperm.slane %v2196_v9, %v8006_v24  ;;  %v14266_v5 = vld [vmem:[#allocation135_spill] sm:$0xff]  ;;  %v292_v27 = vld [vmem:[%s13571_s0 + $0x860] sm:$0xff] }
 0x2bf   :  { %14256 = vst [vmem:[#allocation220_spill] sm:$0xff] %v8799_v56  ;;  %v8810_v52 = vpop.xlane.xlu0 %1195  ;;  %v1332_v56 = vsel %vm536_vm0, %v289_v28, 0.0  ;;  %v3413_v28 = vperm.slane %v2220_v26, %v7940_v48  ;;  %v2222_v38 = vmul.f32 0.015625, %v14266_v5  ;;  %v3412_v21 = vsel %vm3106_vm2, %v3411_v30, %v3410_v40  ;;  %v291_v40 = vld [vmem:[%s13571_s0 + $0x858] sm:$0xff] }
 0x2c0   :  { %14257 = vst [vmem:[#allocation221_spill] sm:$0xff] %v8801_v37  ;;  %v3403_v37 = vsel %vm3150_vm13, %v3402_v49, %v3401_v57  ;;  %v3442_v57 = vperm.slane %v2235_v19, %v7931_v13  ;;  %v14265_v49 = vld [vmem:[#allocation111_spill] sm:$0xff]  ;;  %v14267_v19 = vld [vmem:[#allocation150_spill] sm:$0xff]  ;;  %v3415_v9 = vperm.slane %v2221_v10, %v7951_v14  ;;  %v2266_v10 = vmul.f32 0.015625, %v8327_v22 }
 0x2c1   :  { %14261 = vst [vmem:[#allocation222_spill] sm:$0xff] %v8810_v52  ;;  %v3440_v52 = vperm.slane %v2234_v34, %v7907_v50  ;;  %v8828_v0 = vmul.f32 0.015625, %v14265_v49  ;;  %v3406_v34 = vperm.slane %v2216_v63, %v8093_v55  ;;  %v3405_v43 = vsel %vm13779_vm14, %v3404_v46, %v3403_v37  ;;  %v14268_v37 = vld [vmem:[#allocation155_spill] sm:$0xff]  ;;  %v14273_v22 = vld [vmem:[#allocation154_spill] sm:$0xff] }
 0x2c2   :  { %v3444_v46 = vperm.slane %v2236_v8, %v7940_v48  ;;  %v2238_v26 = vmul.f32 0.015625, %v14268_v37  ;;  %v3368_v8 = vsel %vm13813_vm11, %v3367_v47, %v3366_v42  ;;  %vm13804_vm15 = vcmask 1044484  }
 0x2c3   :  { %1336 = vadd.xlane.f32.xlu2 %v1335_v17  ;;  %1333 = vadd.xlane.f32.xlu1 %v1332_v56  ;;  %v2237_v17 = vmul.f32 0.015625, %v14267_v19  ;;  %v293_v56 = vld [vmem:[%s13571_s0 + $0x868] sm:$0xff]  ;;  %v3441_v63 = vsel %vm13830_vm1, %v3440_v52, %v3439_v3  ;;  %v3414_v19 = vsel %vm3110_vm3, %v3413_v28, %v3412_v21  ;;  %v2265_v52 = vmul.f32 0.015625, %v8336_v11 }
 0x2c4   :  { %1330 = vadd.xlane.f32.xlu0 %v1329_v1  ;;  %v3443_v23 = vsel %vm3106_vm2, %v3442_v57, %v3441_v63  ;;  %v1344_v37 = vsel %vm536_vm0, %v293_v56, 0.0  ;;  %v1341_v5 = vsel %vm536_vm0, %v292_v27, 0.0  ;;  %vm14272_vm14 = vcmask 1048512  }
 0x2c5   :  { %v3407_v36 = vsel %vm14272_vm14, %v3406_v34, %v3405_v43  ;;  %v3417_v49 = vperm.slane %v2222_v38, %v7965_v32  ;;  %v3446_v28 = vperm.slane %v2237_v17, %v7951_v14  ;;  %v1338_v57 = vsel %vm536_vm0, %v291_v40, 0.0  ;;  %v14274_v17 = vld [vmem:[#allocation115_spill] sm:$0xff] }
 0x2c6   :  { %v8848_v1 = vpop.xlane.xlu2 %1210  ;;  %v8850_v30 = vpop.xlane.xlu1 %1207  ;;  %v3416_v21 = vsel %vm3114_vm4, %v3415_v9, %v3414_v19  ;;  %v3445_v63 = vsel %vm3110_vm3, %v3444_v46, %v3443_v23  ;;  %v2239_v11 = vmul.f32 0.015625, %v14273_v22  ;;  %v3448_v42 = vperm.slane %v2238_v26, %v7965_v32  ;;  %v14275_v9 = vld [vmem:[#allocation116_spill] sm:$0xff]  ;;  %v14276_v26 = vld [vmem:[#allocation153_spill] sm:$0xff] }
 0x2c7   :  { %14269 = vst [vmem:[#allocation223_spill] sm:$0xff] %v8848_v1  ;;  %v8859_v3 = vpop.xlane.xlu0 %1204  ;;  %v2267_v47 = vmul.f32 0.015625, %v8325_v4  ;;  %v3502_v56 = vperm.slane %v2266_v10, %v7907_v50  ;;  %v3501_v34 = vperm.slane %v2265_v52, %v7904_v61  ;;  %v2268_v43 = vmul.f32 0.015625, %v8387_v58  ;;  %v14282_v22 = vld [vmem:[#allocation157_spill] sm:$0xff] }
 0x2c8   :  { %14270 = vst [vmem:[#allocation224_spill] sm:$0xff] %v8850_v30  ;;  %v4126_v38 = vsel %vm13810_vm8, %v8778_v33, %v8615_v18  ;;  %v8882_v19 = vsel %vm3146_vm12, %v3369_v35, %v3368_v8  ;;  %v8885_v27 = vmul.f32 0.015625, %v14274_v17  ;;  %v8888_v46 = vmul.f32 0.015625, %v14275_v9  ;;  %v296_v18 = vld [vmem:[%s13571_s0 + $0x880] sm:$0xff]  ;;  %v295_v33 = vld [vmem:[%s13571_s0 + $0x878] sm:$0xff] }
 0x2c9   :  { %14271 = vst [vmem:[#allocation225_spill] sm:$0xff] %v8859_v3  ;;  %v8893_v40 = vsel %vm13804_vm15, %v3407_v36, %v4126_v38  ;;  %v3418_v35 = vsel %vm3118_vm5, %v3417_v49, %v3416_v21  ;;  %v3450_v10 = vperm.slane %v2239_v11, %v7980_v51  ;;  %v14277_v8 = vld [vmem:[#allocation158_spill] sm:$0xff]  ;;  %v3504_v38 = vperm.slane %v2267_v47, %v7931_v13 }
 0x2ca   :  { %v3503_v23 = vsel %vm13830_vm1, %v3502_v56, %v3501_v34  ;;  %v2269_v49 = vmul.f32 0.015625, %v8378_v20  ;;  %v3506_v11 = vperm.slane %v2268_v43, %v7940_v48  ;;  %v1353_v58 = vsel %vm536_vm0, %v296_v18, 0.0  ;;  %v14283_v20 = vld [vmem:[#allocation139_spill] sm:$0xff] }
 0x2cb   :  { %1345 = vadd.xlane.f32.xlu2 %v1344_v37  ;;  %1342 = vadd.xlane.f32.xlu1 %v1341_v5  ;;  %v2240_v37 = vmul.f32 0.015625, %v14276_v26  ;;  %v3447_v5 = vsel %vm3114_vm4, %v3446_v28, %v3445_v63  ;;  %v294_v63 = vld [vmem:[%s13571_s0 + $0x870] sm:$0xff]  ;;  %v1350_v4 = vsel %vm536_vm0, %v295_v33, 0.0  ;;  %v2242_v56 = vmul.f32 0.015625, %v14282_v22  ;;  %v14284_v22 = vld [vmem:[#allocation138_spill] sm:$0xff] }
 0x2cc   :  { %1339 = vadd.xlane.f32.xlu0 %v1338_v57  ;;  %v3449_v52 = vsel %vm3118_vm5, %v3448_v42, %v3447_v5  ;;  %v2241_v57 = vmul.f32 0.015625, %v14277_v8  ;;  %v2297_v42 = vmul.f32 0.015625, %v8848_v1  ;;  %v14281_v8 = vld [vmem:[#allocation140_spill] sm:$0xff]  ;;  %v1347_v34 = vsel %vm536_vm0, %v294_v63, 0.0 }
 0x2cd   :  { %v2223_v26 = vmul.f32 0.015625, %v14281_v8  ;;  %v3452_v47 = vperm.slane %v2240_v37, %v7991_v39  ;;  %v2224_v43 = vmul.f32 0.015625, %v14283_v20  ;;  %v3451_v17 = vsel %vm13831_vm6, %v3450_v10, %v3449_v52 }
 0x2ce   :  { %v8905_v28 = vpop.xlane.xlu2 %1219  ;;  %v8907_v36 = vpop.xlane.xlu1 %1216  ;;  %v3454_v1 = vperm.slane %v2241_v57, %v7985_v25  ;;  %v3508_v18 = vperm.slane %v2269_v49, %v7951_v14  ;;  %v3505_v33 = vsel %vm3106_vm2, %v3504_v38, %v3503_v23  ;;  %v2271_v8 = vmul.f32 0.015625, %v8444_v12  ;;  %v14285_v49 = vld [vmem:[#allocation156_spill] sm:$0xff] }
 0x2cf   :  { %14278 = vst [vmem:[#allocation116_spill] sm:$0xff] %v8905_v28  ;;  %v8916_v21 = vpop.xlane.xlu0 %1213  ;;  %v2299_v37 = vmul.f32 0.015625, %v8907_v36  ;;  %v8935_v63 = vmul.f32 0.015625, %v14284_v22  ;;  %v3507_v20 = vsel %vm3110_vm3, %v3506_v11, %v3505_v33  ;;  %v3563_v10 = vperm.slane %v2297_v42, %v7904_v61 }
 0x2d0   :  { %14279 = vst [vmem:[#allocation226_spill] sm:$0xff] %v8907_v36  ;;  %v2298_v5 = vmul.f32 0.015625, %v8916_v21  ;;  %v3419_v57 = vperm.slane %v2223_v26, %v7980_v51  ;;  %v2243_v23 = vmul.f32 0.015625, %v14285_v49  ;;  %v3456_v38 = vperm.slane %v2242_v56, %v8019_v53 }
 0x2d1   :  { %14280 = vst [vmem:[#allocation227_spill] sm:$0xff] %v8916_v21  ;;  %v2270_v21 = vmul.f32 0.015625, %v8376_v16  ;;  %v3453_v36 = vsel %vm13812_vm7, %v3452_v47, %v3451_v17  ;;  %v3421_v11 = vperm.slane %v2224_v43, %v7991_v39  ;;  %vm14286_vm14 = vcmask 589312   ;;  %v297_v17 = vld [vmem:[%s13571_s0 + $0x888] sm:$0xff] }
 0x2d2   :  { %v3564_v52 = vperm.slane %v2298_v5, %v7907_v50  ;;  %v3455_v42 = vsel %vm14286_vm14, %v3454_v1, %v3453_v36  ;;  %v2300_v5 = vmul.f32 0.015625, %v8905_v28  ;;  %v3509_v47 = vsel %vm3114_vm4, %v3508_v18, %v3507_v20 }
 0x2d3   :  { %1354 = vadd.xlane.f32.xlu2 %v1353_v58  ;;  %1351 = vadd.xlane.f32.xlu1 %v1350_v4  ;;  %v299_v58 = vld [vmem:[%s13571_s0 + $0x898] sm:$0xff]  ;;  %v298_v4 = vld [vmem:[%s13571_s0 + $0x890] sm:$0xff]  ;;  %v3510_v26 = vperm.slane %v2270_v21, %v7965_v32  ;;  %v2272_v33 = vmul.f32 0.015625, %v8434_v6  ;;  %v3512_v43 = vperm.slane %v2271_v8, %v7980_v51  ;;  %v3566_v1 = vperm.slane %v2299_v37, %v7931_v13  ;;  %v14290_v6 = vld [vmem:[#allocation162_spill] sm:$0xff] }
 0x2d4   :  { %1348 = vadd.xlane.f32.xlu0 %v1347_v34  ;;  %v3565_v21 = vsel %vm13830_vm1, %v3564_v52, %v3563_v10  ;;  %v1362_v12 = vsel %vm536_vm0, %v299_v58, 0.0  ;;  %v1359_v16 = vsel %vm536_vm0, %v298_v4, 0.0  ;;  %v3420_v49 = vsel %vm13831_vm6, %v3419_v57, %v3418_v35 }
 0x2d5   :  { %v3458_v20 = vperm.slane %v2243_v23, %v8016_v31  ;;  %v3457_v18 = vsel %vm13829_vm9, %v3456_v38, %v3455_v42  ;;  %v1356_v8 = vsel %vm536_vm0, %v297_v17, 0.0  ;;  %v2244_v37 = vmul.f32 0.015625, %v14290_v6 }
 0x2d6   :  { %v8954_v34 = vpop.xlane.xlu2 %1228  ;;  %v8956_v56 = vpop.xlane.xlu1 %1225  ;;  %v3511_v22 = vsel %vm3118_vm5, %v3510_v26, %v3509_v47  ;;  %v3568_v10 = vperm.slane %v2300_v5, %v7940_v48  ;;  %v2273_v58 = vmul.f32 0.015625, %v8432_v62  ;;  %v3514_v4 = vperm.slane %v2272_v33, %v7991_v39  ;;  %v14291_v5 = vld [vmem:[#allocation142_spill] sm:$0xff]  ;;  %v14292_v47 = vld [vmem:[#allocation161_spill] sm:$0xff] }
 0x2d7   :  { %14287 = vst [vmem:[#allocation228_spill] sm:$0xff] %v8954_v34  ;;  %v8965_v36 = vpop.xlane.xlu0 %1222  ;;  %v2302_v52 = vmul.f32 0.015625, %v8956_v56  ;;  %v3567_v35 = vsel %vm3106_vm2, %v3566_v1, %v3565_v21  ;;  %v8986_v38 = vsel %vm13812_vm7, %v3421_v11, %v3420_v49  ;;  %v3513_v42 = vsel %vm13831_vm6, %v3512_v43, %v3511_v22  ;;  %v301_v22 = vld [vmem:[%s13571_s0 + $0x8a8] sm:$0xff]  ;;  %v14293_v49 = vld [vmem:[#allocation160_spill] sm:$0xff] }
 0x2d8   :  { %14288 = vst [vmem:[#allocation229_spill] sm:$0xff] %v8956_v56  ;;  %v2301_v28 = vmul.f32 0.015625, %v8965_v36  ;;  %v2274_v26 = vmul.f32 0.015625, %v8499_v41  ;;  %v8991_v17 = vmul.f32 0.015625, %v14291_v5  ;;  %v2245_v33 = vmul.f32 0.015625, %v14292_v47  ;;  %v14305_v47 = vld [vmem:[#allocation169_spill] sm:$0xff] }
 0x2d9   :  { %14289 = vst [vmem:[#allocation230_spill] sm:$0xff] %v8965_v36  ;;  %v9003_v11 = vmul.f32 0.015625, %v14293_v49  ;;  %v3460_v43 = vperm.slane %v2244_v37, %v8006_v24  ;;  %v3572_v1 = vperm.slane %v2302_v52, %v7965_v32  ;;  %v3569_v21 = vsel %vm3110_vm3, %v3568_v10, %v3567_v35 }
 0x2da   :  { %v3570_v57 = vperm.slane %v2301_v28, %v7951_v14  ;;  %v3459_v28 = vsel %vm3138_vm10, %v3458_v20, %v3457_v18  ;;  %v3516_v23 = vperm.slane %v2273_v58, %v7985_v25  ;;  %v2275_v56 = vmul.f32 0.015625, %v8490_v45  ;;  %v14297_v45 = vld [vmem:[#allocation165_spill] sm:$0xff] }
 0x2db   :  { %1363 = vadd.xlane.f32.xlu2 %v1362_v12  ;;  %1360 = vadd.xlane.f32.xlu1 %v1359_v16  ;;  %v2303_v16 = vmul.f32 0.015625, %v8954_v34  ;;  %v302_v12 = vld [vmem:[%s13571_s0 + $0x8b0] sm:$0xff]  ;;  %v3515_v34 = vsel %vm13812_vm7, %v3514_v4, %v3513_v42  ;;  %v3518_v10 = vperm.slane %v2274_v26, %v8019_v53  ;;  %v1368_v41 = vsel %vm536_vm0, %v301_v22, 0.0 }
 0x2dc   :  { %1357 = vadd.xlane.f32.xlu0 %v1356_v8  ;;  %v300_v8 = vld [vmem:[%s13571_s0 + $0x8a0] sm:$0xff]  ;;  %v3571_v37 = vsel %vm3114_vm4, %v3570_v57, %v3569_v21  ;;  %v1371_v35 = vsel %vm536_vm0, %v302_v12, 0.0  ;;  %v3462_v62 = vperm.slane %v2245_v33, %v8049_v15  ;;  %v3461_v57 = vsel %vm13813_vm11, %v3460_v43, %v3459_v28 }
 0x2dd   :  { %v3574_v58 = vperm.slane %v2303_v16, %v7980_v51  ;;  %v1365_v42 = vsel %vm536_vm0, %v300_v8, 0.0  ;;  %v2276_v21 = vmul.f32 0.015625, %v8488_v60  ;;  %v3573_v26 = vsel %vm3118_vm5, %v3572_v1, %v3571_v37 }
 0x2de   :  { %v9008_v20 = vpop.xlane.xlu2 %1237  ;;  %v9010_v18 = vpop.xlane.xlu1 %1234  ;;  %v2247_v12 = vmul.f32 0.015625, %v14297_v45  ;;  %v3520_v22 = vperm.slane %v2275_v56, %v8016_v31  ;;  %v3517_v33 = vsel %vm14286_vm14, %v3516_v23, %v3515_v34  ;;  %v2277_v16 = vmul.f32 0.015625, %v8547_v29  ;;  %v305_v56 = vld [vmem:[%s13571_s0 + $0x8c8] sm:$0xff]  ;;  %v14304_v45 = vld [vmem:[#allocation168_spill] sm:$0xff] }
 0x2df   :  { %14294 = vst [vmem:[#allocation142_spill] sm:$0xff] %v9008_v20  ;;  %v9019_v36 = vpop.xlane.xlu0 %1231  ;;  %v2305_v4 = vmul.f32 0.015625, %v9010_v18  ;;  %v3464_v28 = vperm.slane %v9003_v11, %v8046_v44  ;;  %v3519_v43 = vsel %vm13829_vm9, %v3518_v10, %v3517_v33  ;;  %v2306_v1 = vmul.f32 0.015625, %v9008_v20  ;;  %v14299_v23 = vld [vmem:[#allocation163_spill] sm:$0xff]  ;;  %v304_v11 = vld [vmem:[%s13571_s0 + $0x8c0] sm:$0xff]  ;;  %v14300_v10 = vld [vmem:[#allocation164_spill] sm:$0xff] }
 0x2e0   :  { %14295 = vst [vmem:[#allocation231_spill] sm:$0xff] %v9010_v18  ;;  %v2304_v52 = vmul.f32 0.015625, %v9019_v36  ;;  %v14298_v18 = vld [vmem:[#allocation143_spill] sm:$0xff]  ;;  %v3463_v34 = vsel %vm3146_vm12, %v3462_v62, %v3461_v57  ;;  %v9049_v37 = vmul.f32 0.015625, %v14299_v23  ;;  %v2278_v33 = vmul.f32 0.015625, %v8538_v7 }
 0x2e1   :  { %14296 = vst [vmem:[#allocation232_spill] sm:$0xff] %v9019_v36  ;;  %v9038_v8 = vmul.f32 0.015625, %v14298_v18  ;;  %v3524_v29 = vperm.slane %v2277_v16, %v8049_v15  ;;  %v2251_v49 = vmul.f32 0.015625, %v14304_v45  ;;  %vm4129_vm15 = vcmask 1045509   ;;  %v14307_v45 = vld [vmem:[#allocation209_spill] sm:$0xff] }
 0x2e2   :  { %v3576_v36 = vperm.slane %v2304_v52, %v7991_v39  ;;  %v3575_v52 = vsel %vm13831_vm6, %v3574_v58, %v3573_v26  ;;  %v303_v58 = vld [vmem:[%s13571_s0 + $0x8b8] sm:$0xff]  ;;  %v3521_v26 = vsel %vm3138_vm10, %v3520_v22, %v3519_v43  ;;  %v14306_v43 = vld [vmem:[#allocation203_spill] sm:$0xff]  ;;  %v2280_v23 = vmul.f32 0.015625, %v14307_v45 }
 0x2e3   :  { %1372 = vadd.xlane.f32.xlu2 %v1371_v35  ;;  %1369 = vadd.xlane.f32.xlu1 %v1368_v41  ;;  %v3578_v41 = vperm.slane %v2305_v4, %v7985_v25  ;;  %v2248_v35 = vmul.f32 0.015625, %v14300_v10  ;;  %v3466_v4 = vperm.slane %v2247_v12, %v8040_v2  ;;  %v1377_v10 = vsel %vm536_vm0, %v304_v11, 0.0 }
 0x2e4   :  { %1366 = vadd.xlane.f32.xlu0 %v1365_v42  ;;  %v3522_v42 = vperm.slane %v2276_v21, %v8006_v24  ;;  %v3577_v20 = vsel %vm13812_vm7, %v3576_v36, %v3575_v52  ;;  %v1380_v21 = vsel %vm536_vm0, %v305_v56, 0.0  ;;  %v3580_v36 = vperm.slane %v2306_v1, %v8019_v53 }
 0x2e5   :  { %v2250_v12 = vmul.f32 0.015625, %v14305_v47  ;;  %v3579_v22 = vsel %vm14286_vm14, %v3578_v41, %v3577_v20  ;;  %v1374_v16 = vsel %vm536_vm0, %v303_v58, 0.0  ;;  %v2279_v6 = vmul.f32 0.015625, %v14306_v43  ;;  %v14340_v43 = vld [vmem:[#allocation175_spill] sm:$0xff] }
 0x2e6   :  { %v9060_v62 = vpop.xlane.xlu2 %1246  ;;  %v9062_v57 = vpop.xlane.xlu1 %1243  ;;  %v3526_v56 = vperm.slane %v2278_v33, %v8046_v44  ;;  %v3523_v1 = vsel %vm13813_vm11, %v3522_v42, %v3521_v26  ;;  %v3470_v20 = vperm.slane %v9049_v37, %v7904_v61  ;;  %v3468_v41 = vperm.slane %v2248_v35, %v8093_v55  ;;  %v307_v37 = vld [vmem:[%s13571_s0 + $0x8d8] sm:$0xff] }
 0x2e7   :  { %14301 = vst [vmem:[#allocation143_spill] sm:$0xff] %v9060_v62  ;;  %v9070_v60 = vpop.xlane.xlu0 %1240  ;;  %v2308_v52 = vmul.f32 0.015625, %v9062_v57  ;;  %v3525_v11 = vsel %vm3146_vm12, %v3524_v29, %v3523_v1  ;;  %v2309_v47 = vmul.f32 0.015625, %v9060_v62  ;;  %v3581_v33 = vsel %vm13829_vm9, %v3580_v36, %v3579_v22  ;;  %v14310_v26 = vld [vmem:[#allocation173_spill] sm:$0xff] }
 0x2e8   :  { %14302 = vst [vmem:[#allocation233_spill] sm:$0xff] %v9062_v57  ;;  %v2307_v7 = vmul.f32 0.015625, %v9070_v60  ;;  %vm14308_vm14 = vcmask 982912   ;;  %v3473_v35 = vperm.slane %v2251_v49, %v7931_v13  ;;  %vm14315_vm8 = vcmask 982912  }
 0x2e9   :  { %14303 = vst [vmem:[#allocation234_spill] sm:$0xff] %v9070_v60  ;;  %v3465_v60 = vsel %vm3150_vm13, %v3464_v28, %v3463_v34  ;;  %v3584_v42 = vperm.slane %v2308_v52, %v8006_v24  ;;  %v14309_v28 = vld [vmem:[#allocation167_spill] sm:$0xff]  ;;  %v3471_v34 = vperm.slane %v2250_v12, %v7907_v50  ;;  %v3530_v12 = vperm.slane %v2280_v23, %v8093_v55 }
 0x2ea   :  { %v3582_v57 = vperm.slane %v2307_v7, %v8016_v31  ;;  %v3467_v7 = vsel %vm14308_vm14, %v3466_v4, %v3465_v60  ;;  %v2252_v29 = vmul.f32 0.015625, %v14309_v28  ;;  %v3528_v60 = vperm.slane %v2279_v6, %v8040_v2 }
 0x2eb   :  { %1381 = vadd.xlane.f32.xlu2 %v1380_v21  ;;  %1378 = vadd.xlane.f32.xlu1 %v1377_v10  ;;  %v308_v10 = vld [vmem:[%s13571_s0 + $0x8e0] sm:$0xff]  ;;  %v2253_v21 = vmul.f32 0.015625, %v14310_v26  ;;  %v3527_v4 = vsel %vm3150_vm13, %v3526_v56, %v3525_v11  ;;  %v3586_v22 = vperm.slane %v2309_v47, %v8049_v15  ;;  %vm14314_vm14 = vcmask 1048512  }
 0x2ec   :  { %1375 = vadd.xlane.f32.xlu0 %v1374_v16  ;;  %v3583_v58 = vsel %vm3138_vm10, %v3582_v57, %v3581_v33  ;;  %v306_v57 = vld [vmem:[%s13571_s0 + $0x8d0] sm:$0xff]  ;;  %v1389_v11 = vsel %vm536_vm0, %v308_v10, 0.0  ;;  %v1386_v33 = vsel %vm536_vm0, %v307_v37, 0.0  ;;  %v3469_v62 = vsel %vm14314_vm14, %v3468_v41, %v3467_v7 }
 0x2ed   :  { %v3585_v6 = vsel %vm13813_vm11, %v3584_v42, %v3583_v58  ;;  %v3472_v23 = vsel %vm13830_vm1, %v3471_v34, %v3470_v20  ;;  %v3529_v45 = vsel %vm14315_vm8, %v3528_v60, %v3527_v4  ;;  %vm4131_vm7 = vcmask 1046534   ;;  %vm14317_vm11 = vmmov %vm14314_vm14  ;;  %v14318_v60 = vld [vmem:[#allocation171_spill] sm:$0xff] }
 0x2ee   :  { %v9108_v36 = vpop.xlane.xlu2 %1255  ;;  %v9110_v52 = vpop.xlane.xlu1 %1252  ;;  %v3531_v37 = vsel %vm14317_vm11, %v3530_v12, %v3529_v45  ;;  %v3587_v41 = vsel %vm3146_vm12, %v3586_v22, %v3585_v6  ;;  %v3474_v20 = vsel %vm3106_vm2, %v3473_v35, %v3472_v23  ;;  %v3477_v7 = vperm.slane %v2253_v21, %v7951_v14  ;;  %vm14319_vm11 = vmmov %vm14315_vm8  ;;  %v311_v35 = vld [vmem:[%s13571_s0 + $0x8f8] sm:$0xff]  ;;  %v310_v21 = vld [vmem:[%s13571_s0 + $0x8f0] sm:$0xff] }
 0x2ef   :  { %14311 = vst [vmem:[#allocation167_spill] sm:$0xff] %v9108_v36  ;;  %v2312_v49 = vmul.f32 0.015625, %v9108_v36  ;;  %v2311_v16 = vmul.f32 0.015625, %v9110_v52  ;;  %v9119_v1 = vpop.xlane.xlu0 %1249  ;;  %v1383_v36 = vsel %vm536_vm0, %v306_v57, 0.0  ;;  %vm13817_vm14 = vcmask 1047559   ;;  %v14320_v12 = vld [vmem:[#allocation207_spill] sm:$0xff] }
 0x2f0   :  { %14312 = vst [vmem:[#allocation173_spill] sm:$0xff] %v9110_v52  ;;  %v2310_v56 = vmul.f32 0.015625, %v9119_v1  ;;  %v3475_v52 = vperm.slane %v2252_v29, %v7940_v48  ;;  %v3425_v34 = vperm.slane %v9038_v8, %v8019_v53  ;;  %v2255_v4 = vmul.f32 0.015625, %v14318_v60  ;;  %v14321_v22 = vld [vmem:[#allocation208_spill] sm:$0xff] }
 0x2f1   :  { %14313 = vst [vmem:[#allocation235_spill] sm:$0xff] %v9119_v1  ;;  %v3590_v47 = vperm.slane %v2311_v16, %v8040_v2  ;;  %v3592_v42 = vperm.slane %v2312_v49, %v8093_v55  ;;  %v14316_v1 = vld [vmem:[#allocation172_spill] sm:$0xff]  ;;  %v4130_v45 = vsel %vm4129_vm15, %v3469_v62, %v8893_v40  ;;  %v2281_v49 = vmul.f32 0.015625, %v14321_v22  ;;  %v309_v62 = vld [vmem:[%s13571_s0 + $0x8e8] sm:$0xff] }
 0x2f2   :  { %v3588_v58 = vperm.slane %v2310_v56, %v8046_v44  ;;  %v2254_v10 = vmul.f32 0.015625, %v14316_v1  ;;  %v4132_v8 = vsel %vm4131_vm7, %v3531_v37, %v4130_v45  ;;  %vm14322_vm8 = vcmask 1048512   ;;  %v14357_v60 = vld [vmem:[#allocation144_spill] sm:$0xff] }
 0x2f3   :  { %1390 = vadd.xlane.f32.xlu2 %v1389_v11  ;;  %1387 = vadd.xlane.f32.xlu1 %v1386_v33  ;;  %v3476_v11 = vsel %vm3110_vm3, %v3475_v52, %v3474_v20  ;;  %v14325_v33 = vld [vmem:[#allocation212_spill] sm:$0xff]  ;;  %v14329_v52 = vld [vmem:[#allocation141_spill] sm:$0xff]  ;;  %v3427_v45 = vperm.slane %v8991_v17, %v8016_v31 }
 0x2f4   :  { %v3589_v29 = vsel %vm3150_vm13, %v3588_v58, %v3587_v41  ;;  %1384 = vadd.xlane.f32.xlu0 %v1383_v36  ;;  %v2282_v36 = vmul.f32 0.015625, %v14320_v12  ;;  %v3479_v56 = vperm.slane %v2254_v10, %v7965_v32  ;;  %v2283_v23 = vmul.f32 0.015625, %v14325_v33  ;;  %v14354_v12 = vld [vmem:[#allocation219_spill] sm:$0xff] }
 0x2f5   :  { %v3591_v57 = vsel %vm14319_vm11, %v3590_v47, %v3589_v29  ;;  %vm14328_vm11 = vcmask 589312   ;;  %v3478_v41 = vsel %vm3114_vm4, %v3477_v7, %v3476_v11  ;;  %v1398_v29 = vsel %vm536_vm0, %v311_v35, 0.0 }
 0x2f6   :  { %v3593_v16 = vsel %vm14322_vm8, %v3592_v42, %v3591_v57  ;;  %v9155_v6 = vpop.xlane.xlu2 %1264  ;;  %v9157_v40 = vpop.xlane.xlu1 %1261  ;;  %v14327_v42 = vperm.slane %v8935_v63, %v7985_v25  ;;  %v1395_v10 = vsel %vm536_vm0, %v310_v21, 0.0  ;;  %v2228_v20 = vmul.f32 0.015625, %v14329_v52 }
 0x2f7   :  { %14323 = vst [vmem:[#allocation172_spill] sm:$0xff] %v9155_v6  ;;  %v4134_v47 = vsel %vm13817_vm14, %v3593_v16, %v4132_v8  ;;  %v9166_v58 = vpop.xlane.xlu0 %1258  ;;  %v1392_v8 = vsel %vm536_vm0, %v309_v62, 0.0  ;;  %v3481_v63 = vperm.slane %v2255_v4, %v7980_v51  ;;  %v14330_v16 = vld [vmem:[#allocation177_spill] sm:$0xff]  ;;  %v3533_v7 = vperm.slane %v2282_v36, %v7907_v50 }
 0x2f8   :  { %14324 = vst [vmem:[#allocation236_spill] sm:$0xff] %v9157_v40  ;;  %v3424_v37 = vsel %vm14328_vm11, %v14327_v42, %v8986_v38  ;;  %v2256_v38 = vmul.f32 0.015625, %v14330_v16  ;;  %v3532_v11 = vperm.slane %v2281_v49, %v7904_v61  ;;  %v14331_v35 = vperm.slane %v8723_v54, %v8040_v2 }
 0x2f9   :  { %14326 = vst [vmem:[#allocation237_spill] sm:$0xff] %v9166_v58  ;;  %v3426_v57 = vsel %vm13829_vm9, %v3425_v34, %v3424_v37  ;;  %vm14332_vm8 = vcmask 982912   ;;  %v3480_v17 = vsel %vm3118_vm5, %v3479_v56, %v3478_v41  ;;  %v14333_v34 = vld [vmem:[#allocation211_spill] sm:$0xff]  ;;  %v3535_v62 = vperm.slane %v2283_v23, %v7931_v13  ;;  %v314_v56 = vld [vmem:[%s13571_s0 + $0x910] sm:$0xff] }
 0x2fa   :  { %4160 = vst [vmem:[#allocation4] sm:$0xff] %v4134_v47  ;;  %v9190_v21 = vsel %vm14332_vm8, %v14331_v35, %v8769_v59  ;;  %v2284_v47 = vmul.f32 0.015625, %v14333_v34  ;;  %v14334_v36 = vperm.slane %v8828_v0, %v8046_v44  ;;  %v2314_v59 = vmul.f32 0.015625, %v9157_v40  ;;  %v14335_v41 = vld [vmem:[#allocation176_spill] sm:$0xff]  ;;  %v14336_v35 = vld [vmem:[#allocation210_spill] sm:$0xff]  ;;  %vm14342_vm11 = vmmov %vm14332_vm8 }
 0x2fb   :  { %1399 = vadd.xlane.f32.xlu2 %v1398_v29  ;;  %1396 = vadd.xlane.f32.xlu1 %v1395_v10  ;;  %v2313_v49 = vmul.f32 0.015625, %v9166_v58  ;;  %v3373_v23 = vperm.slane %v8888_v46, %v8040_v2  ;;  %v3429_v42 = vperm.slane %v2228_v20, %v8006_v24  ;;  %v3428_v37 = vsel %vm3138_vm10, %v3427_v45, %v3426_v57  ;;  %v312_v20 = vld [vmem:[%s13571_s0 + $0x900] sm:$0xff]  ;;  %v14341_v34 = vld [vmem:[#allocation216_spill] sm:$0xff] }
 0x2fc   :  { %v3372_v54 = vsel %vm3150_vm13, %v14334_v36, %v8882_v19  ;;  %1393 = vadd.xlane.f32.xlu0 %v1392_v8  ;;  %v2257_v0 = vmul.f32 0.015625, %v14335_v41  ;;  %v313_v19 = vld [vmem:[%s13571_s0 + $0x908] sm:$0xff]  ;;  %v3482_v29 = vsel %vm13831_vm6, %v3481_v63, %v3480_v17  ;;  %v3483_v10 = vperm.slane %v2256_v38, %v7991_v39  ;;  %v14356_v41 = vld [vmem:[#allocation181_spill] sm:$0xff] }
 0x2fd   :  { %v3534_v8 = vsel %vm13830_vm1, %v3533_v7, %v3532_v11  ;;  %v2285_v36 = vmul.f32 0.015625, %v14336_v35  ;;  %v3537_v45 = vperm.slane %v2284_v47, %v7940_v48  ;;  %v2315_v63 = vmul.f32 0.015625, %v9155_v6 }
 0x2fe   :  { %v9219_v4 = vpop.xlane.xlu2 %1273  ;;  %v9221_v46 = vpop.xlane.xlu1 %1270  ;;  %v3536_v57 = vsel %vm3106_vm2, %v3535_v62, %v3534_v8  ;;  %v1407_v38 = vsel %vm536_vm0, %v314_v56, 0.0  ;;  %v3595_v7 = vperm.slane %v2314_v59, %v7907_v50  ;;  %v3594_v11 = vperm.slane %v2313_v49, %v7904_v61 }
 0x2ff   :  { %14337 = vst [vmem:[#allocation141_spill] sm:$0xff] %v9219_v4  ;;  %v9229_v17 = vpop.xlane.xlu0 %1267  ;;  %v1404_v58 = vsel %vm536_vm0, %v313_v19, 0.0  ;;  %v2258_v35 = vmul.f32 0.015625, %v14340_v43  ;;  %v3485_v47 = vperm.slane %v2257_v0, %v7985_v25  ;;  %v2286_v62 = vmul.f32 0.015625, %v14341_v34 }
 0x300   :  { %14338 = vst [vmem:[#allocation238_spill] sm:$0xff] %v9221_v46  ;;  %v2316_v40 = vmul.f32 0.015625, %v9229_v17  ;;  %v1401_v8 = vsel %vm536_vm0, %v312_v20, 0.0  ;;  %v9241_v6 = vsel %vm14342_vm11, %v3373_v23, %v3372_v54  ;;  %vm14343_vm8 = vcmask 786112   ;;  %v14346_v20 = vld [vmem:[#allocation145_spill] sm:$0xff]  ;;  %v14347_v23 = vld [vmem:[#allocation146_spill] sm:$0xff] }
 0x301   :  { %14339 = vst [vmem:[#allocation239_spill] sm:$0xff] %v9229_v17  ;;  %v9244_v56 = vsel %vm14343_vm8, %v3429_v42, %v3428_v37  ;;  %vm14344_vm14 = vcmask 523712   ;;  %v3539_v49 = vperm.slane %v2285_v36, %v7951_v14  ;;  %v3538_v19 = vsel %vm3110_vm3, %v3537_v45, %v3536_v57  ;;  %v14345_v17 = vld [vmem:[#allocation215_spill] sm:$0xff]  ;;  %v14349_v45 = vld [vmem:[#allocation182_spill] sm:$0xff] }
 0x302   :  { %v3484_v59 = vsel %vm14344_vm14, %v3483_v10, %v3482_v29  ;;  %v2287_v33 = vmul.f32 0.015625, %v14345_v17  ;;  %v3597_v0 = vperm.slane %v2315_v63, %v7931_v13  ;;  %v2317_v34 = vmul.f32 0.015625, %v9221_v46  ;;  %v315_v46 = vld [vmem:[%s13571_s0 + $0x918] sm:$0xff] }
 0x303   :  { %1408 = vadd.xlane.f32.xlu2 %v1407_v38  ;;  %1405 = vadd.xlane.f32.xlu1 %v1404_v58  ;;  %v9253_v54 = vmul.f32 0.015625, %v14346_v20  ;;  %v9256_v42 = vmul.f32 0.015625, %v14347_v23  ;;  %v3596_v37 = vsel %vm13830_vm1, %v3595_v7, %v3594_v11  ;;  %v3599_v29 = vperm.slane %v2316_v40, %v7940_v48  ;;  %v317_v58 = vld [vmem:[%s13571_s0 + $0x928] sm:$0xff]  ;;  %v316_v38 = vld [vmem:[%s13571_s0 + $0x920] sm:$0xff]  ;;  %v14350_v7 = vld [vmem:[#allocation180_spill] sm:$0xff] }
 0x304   :  { %1402 = vadd.xlane.f32.xlu0 %v1401_v8  ;;  %v3487_v10 = vperm.slane %v2258_v35, %v8019_v53  ;;  %vm14348_vm14 = vcmask 589312   ;;  %v2259_v57 = vmul.f32 0.015625, %v14349_v45  ;;  %v3541_v63 = vperm.slane %v2286_v62, %v7965_v32  ;;  %v14351_v40 = vld [vmem:[#allocation214_spill] sm:$0xff] }
 0x305   :  { %v3486_v36 = vsel %vm14348_vm14, %v3485_v47, %v3484_v59  ;;  %v9271_v11 = vmul.f32 0.015625, %v14350_v7  ;;  %v2288_v8 = vmul.f32 0.015625, %v14351_v40  ;;  %v3540_v35 = vsel %vm3114_vm4, %v3539_v49, %v3538_v19  ;;  %vm14366_vm8 = vmmov %vm14348_vm14 }
 0x306   :  { %v2318_v47 = vmul.f32 0.015625, %v9219_v4  ;;  %v9276_v59 = vpop.xlane.xlu2 %1282  ;;  %v9278_v62 = vpop.xlane.xlu1 %1279  ;;  %v3543_v17 = vperm.slane %v2287_v33, %v7980_v51  ;;  %v2289_v22 = vmul.f32 0.015625, %v14354_v12  ;;  %v3601_v7 = vperm.slane %v2317_v34, %v7951_v14 }
 0x307   :  { %14352 = vst [vmem:[#allocation145_spill] sm:$0xff] %v9276_v59  ;;  %v3598_v40 = vsel %vm3106_vm2, %v3597_v0, %v3596_v37  ;;  %v9287_v45 = vpop.xlane.xlu0 %1276  ;;  %v1416_v4 = vsel %vm536_vm0, %v317_v58, 0.0  ;;  %v1413_v43 = vsel %vm536_vm0, %v316_v38, 0.0  ;;  %v2260_v16 = vmul.f32 0.015625, %v14356_v41 }
 0x308   :  { %14353 = vst [vmem:[#allocation146_spill] sm:$0xff] %v9278_v62  ;;  %v3600_v49 = vsel %vm3110_vm3, %v3599_v29, %v3598_v40  ;;  %v2319_v19 = vmul.f32 0.015625, %v9287_v45  ;;  %v3489_v33 = vperm.slane %v2259_v57, %v8016_v31  ;;  %v3542_v12 = vsel %vm3118_vm5, %v3541_v63, %v3540_v35  ;;  %v14358_v40 = vld [vmem:[#allocation218_spill] sm:$0xff] }
 0x309   :  { %14355 = vst [vmem:[#allocation240_spill] sm:$0xff] %v9287_v45  ;;  %v1410_v34 = vsel %vm536_vm0, %v315_v46, 0.0  ;;  %v9298_v0 = vmul.f32 0.015625, %v14357_v60  ;;  %v3603_v29 = vperm.slane %v2318_v47, %v7965_v32  ;;  %v2320_v58 = vmul.f32 0.015625, %v9278_v62 }
 0x30a   :  { %v3545_v38 = vperm.slane %v2288_v8, %v7991_v39  ;;  %v2290_v45 = vmul.f32 0.015625, %v14358_v40  ;;  %v3602_v57 = vsel %vm3114_vm4, %v3601_v7, %v3600_v49  ;;  %v3605_v63 = vperm.slane %v2319_v19, %v7980_v51  ;;  %v318_v19 = vld [vmem:[%s13571_s0 + $0x930] sm:$0xff] }
 0x30b   :  { %1417 = vadd.xlane.f32.xlu2 %v1416_v4  ;;  %1414 = vadd.xlane.f32.xlu1 %v1413_v43  ;;  %v3431_v46 = vperm.slane %v9256_v42, %v8049_v15  ;;  %v3488_v35 = vsel %vm13829_vm9, %v3487_v10, %v3486_v36  ;;  %v3544_v37 = vsel %vm13831_vm6, %v3543_v17, %v3542_v12  ;;  %v2321_v4 = vmul.f32 0.015625, %v9276_v59  ;;  %v320_v43 = vld [vmem:[%s13571_s0 + $0x940] sm:$0xff]  ;;  %v319_v12 = vld [vmem:[%s13571_s0 + $0x938] sm:$0xff] }
 0x30c   :  { %v3547_v47 = vperm.slane %v2289_v22, %v7985_v25  ;;  %1411 = vadd.xlane.f32.xlu0 %v1410_v34  ;;  %v3493_v8 = vperm.slane %v9271_v11, %v8049_v15  ;;  %v3491_v62 = vperm.slane %v2260_v16, %v8006_v24  ;;  %v3490_v7 = vsel %vm3138_vm10, %v3489_v33, %v3488_v35  ;;  %v14359_v17 = vld [vmem:[#allocation186_spill] sm:$0xff]  ;;  %v14360_v42 = vld [vmem:[#allocation217_spill] sm:$0xff] }
 0x30d   :  { %v2262_v22 = vmul.f32 0.015625, %v14359_v17  ;;  %v2291_v10 = vmul.f32 0.015625, %v14360_v42  ;;  %v3607_v36 = vperm.slane %v2320_v58, %v7991_v39  ;;  %v3604_v16 = vsel %vm3118_vm5, %v3603_v29, %v3602_v57  ;;  %v14364_v35 = vld [vmem:[#allocation222_spill] sm:$0xff] }
 0x30e   :  { %v9328_v11 = vpop.xlane.xlu2 %1291  ;;  %v9330_v49 = vpop.xlane.xlu1 %1288  ;;  %v3549_v33 = vperm.slane %v2290_v45, %v8019_v53  ;;  %vm14363_vm11 = vcmask 523712   ;;  %v2292_v59 = vmul.f32 0.015625, %v14364_v35  ;;  %v3606_v42 = vsel %vm13831_vm6, %v3605_v63, %v3604_v16  ;;  %v14368_v16 = vld [vmem:[#allocation221_spill] sm:$0xff] }
 0x30f   :  { %14361 = vst [vmem:[#allocation241_spill] sm:$0xff] %v9328_v11  ;;  %v3546_v34 = vsel %vm14363_vm11, %v3545_v38, %v3544_v37  ;;  %v9339_v40 = vpop.xlane.xlu0 %1285  ;;  %v1425_v57 = vsel %vm536_vm0, %v320_v43, 0.0  ;;  %v1422_v17 = vsel %vm536_vm0, %v319_v12, 0.0  ;;  %vm14367_vm14 = vcmask 786112  }
 0x310   :  { %14362 = vst [vmem:[#allocation242_spill] sm:$0xff] %v9330_v49  ;;  %v3548_v29 = vsel %vm14366_vm8, %v3547_v47, %v3546_v34  ;;  %v2322_v58 = vmul.f32 0.015625, %v9339_v40  ;;  %v3492_v41 = vsel %vm14367_vm14, %v3491_v62, %v3490_v7  ;;  %v3609_v45 = vperm.slane %v2321_v4, %v7985_v25 }
 0x311   :  { %14365 = vst [vmem:[#allocation243_spill] sm:$0xff] %v9339_v40  ;;  %v2323_v37 = vmul.f32 0.015625, %v9330_v49  ;;  %v1419_v38 = vsel %vm536_vm0, %v318_v19, 0.0  ;;  %v3551_v63 = vperm.slane %v2291_v10, %v8016_v31  ;;  %v2293_v35 = vmul.f32 0.015625, %v14368_v16  ;;  %v14369_v40 = vld [vmem:[#allocation185_spill] sm:$0xff] }
 0x312   :  { %v3608_v47 = vsel %vm14363_vm11, %v3607_v36, %v3606_v42  ;;  %v3611_v34 = vperm.slane %v2322_v58, %v8019_v53  ;;  %v2263_v43 = vmul.f32 0.015625, %v14369_v40  ;;  %v3495_v12 = vperm.slane %v2262_v22, %v8046_v44  ;;  %v14370_v10 = vld [vmem:[#allocation149_spill] sm:$0xff]  ;;  %v14371_v36 = vld [vmem:[#allocation184_spill] sm:$0xff] }
 0x313   :  { %v3550_v62 = vsel %vm13829_vm9, %v3549_v33, %v3548_v29  ;;  %v3553_v7 = vperm.slane %v2292_v59, %v8006_v24  ;;  %1426 = vadd.xlane.f32.xlu2 %v1425_v57  ;;  %1423 = vadd.xlane.f32.xlu1 %v1422_v17  ;;  %v3432_v4 = vsel %vm3146_vm12, %v3431_v46, %v9244_v56  ;;  %v2232_v19 = vmul.f32 0.015625, %v14370_v10  ;;  %v323_v22 = vld [vmem:[%s13571_s0 + $0x958] sm:$0xff]  ;;  %v14372_v29 = vld [vmem:[#allocation220_spill] sm:$0xff] }
 0x314   :  { %v3494_v49 = vsel %vm3146_vm12, %v3493_v8, %v3492_v41  ;;  %v2324_v42 = vmul.f32 0.015625, %v9328_v11  ;;  %1420 = vadd.xlane.f32.xlu0 %v1419_v38  ;;  %v2264_v33 = vmul.f32 0.015625, %v14371_v36  ;;  %v2294_v59 = vmul.f32 0.015625, %v14372_v29  ;;  %v322_v56 = vld [vmem:[%s13571_s0 + $0x950] sm:$0xff] }
 0x315   :  { %v3613_v17 = vperm.slane %v2323_v37, %v8016_v31  ;;  %v3610_v58 = vsel %vm14366_vm8, %v3609_v45, %v3608_v47  ;;  %v3555_v41 = vperm.slane %v2293_v35, %v8049_v15  ;;  %v3552_v46 = vsel %vm3138_vm10, %v3551_v63, %v3550_v62  ;;  %v321_v45 = vld [vmem:[%s13571_s0 + $0x948] sm:$0xff] }
 0x316   :  { %v2295_v8 = vmul.f32 0.015625, %v8859_v3  ;;  %v3612_v57 = vsel %vm13829_vm9, %v3611_v34, %v3610_v58  ;;  %v9376_v38 = vpop.xlane.xlu2 %1300  ;;  %v9378_v11 = vpop.xlane.xlu1 %1297  ;;  %v3497_v37 = vperm.slane %v2263_v43, %v8040_v2  ;;  %v3496_v47 = vsel %vm3150_vm13, %v3495_v12, %v3494_v49 }
 0x317   :  { %14373 = vst [vmem:[#allocation244_spill] sm:$0xff] %v9376_v38  ;;  %v3554_v35 = vsel %vm14367_vm14, %v3553_v7, %v3552_v46  ;;  %v9386_v29 = vpop.xlane.xlu0 %1294  ;;  %v1434_v63 = vsel %vm536_vm0, %v323_v22, 0.0  ;;  %v3615_v34 = vperm.slane %v2324_v42, %v8006_v24  ;;  %v2326_v62 = vmul.f32 0.015625, %v9378_v11 }
 0x318   :  { %14374 = vst [vmem:[#allocation245_spill] sm:$0xff] %v9378_v11  ;;  %v2325_v58 = vmul.f32 0.015625, %v9386_v29  ;;  %v1431_v3 = vsel %vm536_vm0, %v322_v56, 0.0  ;;  %v3557_v16 = vperm.slane %v2294_v59, %v8046_v44  ;;  %v2296_v43 = vmul.f32 0.015625, %v8850_v30 }
 0x319   :  { %14375 = vst [vmem:[#allocation246_spill] sm:$0xff] %v9386_v29  ;;  %v3614_v49 = vsel %vm3138_vm10, %v3613_v17, %v3612_v57  ;;  %v1428_v12 = vsel %vm536_vm0, %v321_v45, 0.0  ;;  %v3435_v7 = vperm.slane %v9298_v0, %v8040_v2  ;;  %v3556_v22 = vsel %vm3146_vm12, %v3555_v41, %v3554_v35  ;;  %v14377_v0 = vld [vmem:[#allocation213_spill] sm:$0xff]  ;;  %v14382_v35 = vld [vmem:[#allocation191_spill] sm:$0xff]  ;;  %v14426_v29 = vld [vmem:[#allocation26_spill] sm:$0xff] }
 0x31a   :  { %v3559_v42 = vperm.slane %v2295_v8, %v8040_v2  ;;  %v3617_v46 = vperm.slane %v2325_v58, %v8049_v15  ;;  %v14376_v56 = vperm.slane %v9253_v54, %v8046_v44  ;;  %v3437_v11 = vperm.slane %v2232_v19, %v8093_v55  ;;  %v14381_v19 = vld [vmem:[#allocation199_spill] sm:$0xff] }
 0x31b   :  { %v3499_v17 = vperm.slane %v2264_v33, %v8093_v55  ;;  %v2327_v57 = vmul.f32 0.015625, %v9376_v38  ;;  %1435 = vadd.xlane.f32.xlu2 %v1434_v63  ;;  %1432 = vadd.xlane.f32.xlu1 %v1431_v3  ;;  %v14378_v41 = vperm.slane %v14377_v0, %v8093_v55  ;;  %vm14379_vm11 = vcmask 1048512  }
 0x31c   :  { %v3434_v59 = vsel %vm3150_vm13, %v14376_v56, %v3432_v4  ;;  %vm14380_vm8 = vcmask 982912   ;;  %v3619_v54 = vperm.slane %v2326_v62, %v8046_v44  ;;  %v3616_v4 = vsel %vm14367_vm14, %v3615_v34, %v3614_v49  ;;  %1429 = vadd.xlane.f32.xlu0 %v1428_v12  ;;  %vm14384_vm9 = vmmov %vm14379_vm11 }
 0x31d   :  { %v3314_v8 = vsel %vm14379_vm11, %v14378_v41, %v9190_v21  ;;  %v3498_v45 = vsel %vm14380_vm8, %v3497_v37, %v3496_v47  ;;  %v14383_v33 = vperm.slane %v14382_v35, %v8093_v55  ;;  %v3561_v3 = vperm.slane %v2296_v43, %v8093_v55  ;;  %v326_v21 = vld [vmem:[%s13571_s0 + $0x970] sm:$0xff]  ;;  %v325_v37 = vld [vmem:[%s13571_s0 + $0x968] sm:$0xff]  ;;  %v14385_v47 = vld [vmem:[#allocation206_spill] sm:$0xff] }
 0x31e   :  { %v3558_v58 = vsel %vm3150_vm13, %v3557_v16, %v3556_v22  ;;  %v3618_v56 = vsel %vm3146_vm12, %v3617_v46, %v3616_v4  ;;  %vm14386_vm11 = vcmask 1041409   ;;  %v14387_v62 = vperm.slane %v8885_v27, %v8093_v55  ;;  %vm14388_vm14 = vmmov %vm14380_vm8  ;;  %v9440_v12 = vpop.xlane.xlu2 %1309  ;;  %v9442_v22 = vpop.xlane.xlu1 %1306  ;;  %v324_v46 = vld [vmem:[%s13571_s0 + $0x960] sm:$0xff]  ;;  %v14395_v35 = vld [vmem:[#allocation179_spill] sm:$0xff] }
 0x31f   :  { %v3190_v63 = vsel %vm14384_vm9, %v14383_v33, %v14381_v19  ;;  %v3436_v16 = vsel %vm14380_vm8, %v3435_v7, %v3434_v59  ;;  %v3560_v49 = vsel %vm14388_vm14, %v3559_v42, %v3558_v58  ;;  %14389 = vst [vmem:[#allocation213_spill] sm:$0xff] %v9440_v12  ;;  %vm14391_vm1 = vcmask 1042434   ;;  %vm14393_vm6 = vmmov %vm14384_vm9  ;;  %v9451_v4 = vpop.xlane.xlu0 %1303  ;;  %v14401_v58 = vld [vmem:[#allocation11_spill] sm:$0xff] }
 0x320   :  { %v4135_v34 = vsel %vm14386_vm11, %v14385_v47, %v3190_v63  ;;  %v3376_v43 = vsel %vm14384_vm9, %v14387_v62, %v9241_v6  ;;  %14390 = vst [vmem:[#allocation199_spill] sm:$0xff] %v9442_v22  ;;  %vm14392_vm11 = vmmov %vm14384_vm9  ;;  %v3500_v27 = vsel %vm14393_vm6, %v3499_v17, %v3498_v45  ;;  %v3621_v6 = vperm.slane %v2327_v57, %v8040_v2  ;;  %v14399_v45 = vld [vmem:[#allocation183_spill] sm:$0xff] }
 0x321   :  { %v4136_v0 = vsel %vm14391_vm1, %v3314_v8, %v4135_v34  ;;  %v3438_v41 = vsel %vm14392_vm11, %v3437_v11, %v3436_v16  ;;  %14394 = vst [vmem:[#allocation191_spill] sm:$0xff] %v9451_v4  ;;  %v3620_v7 = vsel %vm3150_vm13, %v3619_v54, %v3618_v56  ;;  %v2328_v42 = vmul.f32 0.015625, %v9451_v4  ;;  %vm14398_vm9 = vmmov %vm14393_vm6  ;;  %v14400_v63 = vld [vmem:[#allocation187_spill] sm:$0xff]  ;;  %v14402_v56 = vld [vmem:[#allocation10_spill] sm:$0xff] }
 0x322   :  { %v1443_v59 = vsel %vm536_vm0, %v326_v21, 0.0  ;;  %v1440_v19 = vsel %vm536_vm0, %v325_v37, 0.0  ;;  %v14396_v33 = vunpack.c.h.b16 %v14395_v35  ;;  %vm14397_vm1 = vcmask 1043459   ;;  %v14404_v34 = vld [vmem:[#allocation195_spill] sm:$0xff]  ;;  %vm14410_vm14 = vmmov %vm14398_vm9  ;;  %v14425_v4 = vld [vmem:[#allocation13_spill] sm:$0xff] }
 0x323   :  { %v4137_v11 = vsel %vm14397_vm1, %v3376_v43, %v4136_v0  ;;  %v3562_v17 = vsel %vm14398_vm9, %v3561_v3, %v3560_v49  ;;  %v1437_v57 = vsel %vm536_vm0, %v324_v46, 0.0  ;;  %v5259_v54 = vsel %vm3106_vm2, %v14400_v63, %v14399_v45  ;;  %1444 = vadd.xlane.f32.xlu2 %v1443_v59  ;;  %1441 = vadd.xlane.f32.xlu1 %v1440_v19  ;;  %v14406_v46 = vld [vmem:[#allocation170_spill] sm:$0xff]  ;;  %v329_v19 = vld [vmem:[%s13571_s0 + $0x988] sm:$0xff] }
 0x324   :  { %v5260_v8 = vperm.slane %v14396_v33, %v7940_v48  ;;  %v9468_v47 = vpack.c.bf16 %v14402_v56, %v14401_v58  ;;  %vm14403_vm6 = vcmask 1044484   ;;  %v3623_v37 = vperm.slane %v2328_v42, %v8093_v55  ;;  %v14408_v33 = vld [vmem:[#allocation18_spill] sm:$0xff]  ;;  %1438 = vadd.xlane.f32.xlu0 %v1437_v57 }
 0x325   :  { %v4138_v21 = vsel %vm14403_vm6, %v3438_v41, %v4137_v11  ;;  %v4733_v62 = vunpack.c.h.b16 %v14404_v34  ;;  %v14405_v43 = vunpack.c.l.b16 %v14404_v34  ;;  %v3622_v16 = vsel %vm14380_vm8, %v3621_v6, %v3620_v7  ;;  %v14409_v41 = vld [vmem:[#allocation23_spill] sm:$0xff]  ;;  %v14412_v7 = vld [vmem:[#allocation178_spill] sm:$0xff]  ;;  %v14417_v34 = vld [vmem:[#allocation9_spill] sm:$0xff] }
 0x326   :  { %v4139_v49 = vsel %vm4129_vm15, %v3500_v27, %v4138_v21  ;;  %v14407_v0 = vunpack.c.l.b16 %v14406_v46  ;;  %v4180_v11 = vpack.c.bf16 %v14409_v41, %v14408_v33  ;;  %v3624_v45 = vsel %vm14410_vm14, %v3623_v37, %v3622_v16  ;;  %v328_v58 = vld [vmem:[%s13571_s0 + $0x980] sm:$0xff]  ;;  %v14416_v37 = vld [vmem:[#allocation8_spill] sm:$0xff] }
 0x327   :  { %v5262_v3 = vperm.slane %v14405_v43, %v7951_v14  ;;  %v4140_v42 = vsel %vm4131_vm7, %v3562_v17, %v4139_v49  ;;  %v14411_v63 = vunpack.c.h.b16 %v14406_v46  ;;  %v4725_v27 = vunpack.c.h.b16 %v14412_v7  ;;  %v14414_v17 = vld [vmem:[#allocation174_spill] sm:$0xff]  ;;  %v9504_v49 = vpop.xlane.xlu2 %1318  ;;  %v9506_v46 = vpop.xlane.xlu1 %1315 }
 0x328   :  { %v5243_v35 = vperm.slane %v14407_v0, %v8016_v31  ;;  %vm14413_vm11 = vcmask 1047559   ;;  %v14415_v57 = vunpack.c.l.b16 %v14412_v7  ;;  %v4171_v43 = vpack.c.bf16 %v14417_v34, %v14416_v37  ;;  %14418 = vst [vmem:[#allocation206_spill] sm:$0xff] %v9504_v49  ;;  %v327_v0 = vld [vmem:[%s13571_s0 + $0x978] sm:$0xff]  ;;  %v9516_v7 = vpop.xlane.xlu0 %1312  ;;  %v14424_v34 = vld [vmem:[#allocation14_spill] sm:$0xff] }
 0x329   :  { %v5245_v6 = vperm.slane %v14411_v63, %v8006_v24  ;;  %v4141_v59 = vsel %vm14413_vm11, %v3624_v45, %v4140_v42  ;;  %v5261_v16 = vsel %vm3110_vm3, %v5260_v8, %v5259_v54  ;;  %14419 = vst [vmem:[#allocation179_spill] sm:$0xff] %v9506_v46  ;;  %v5264_v41 = vperm.slane %v4733_v62, %v7965_v32  ;;  %v14420_v42 = vld [vmem:[#allocation22_spill] sm:$0xff]  ;;  %v14421_v45 = vld [vmem:[#allocation21_spill] sm:$0xff] }
 0x32a   :  { %v5244_v56 = vsel %vm3138_vm10, %v5243_v35, %v14414_v17  ;;  %v5247_v21 = vperm.slane %v14415_v57, %v8049_v15  ;;  %4161 = vst [vmem:[#allocation4 + $0x8] sm:$0xff] %v4141_v59  ;;  %v4734_v35 = vunpack.c.l.b16 %v9468_v47  ;;  %v5263_v33 = vsel %vm3114_vm4, %v5262_v3, %v5261_v16  ;;  %v14438_v46 = vld [vmem:[#allocation41_spill] sm:$0xff] }
 0x32b   :  { %v4181_v63 = vpack.c.bf16 %v14421_v45, %v14420_v42  ;;  %14422 = vst [vmem:[#allocation183_spill] sm:$0xff] %v9516_v7  ;;  %v4744_v8 = vunpack.c.l.b16 %v4180_v11  ;;  %v4745_v54 = vunpack.c.h.b16 %v4180_v11  ;;  %v1452_v59 = vsel %vm536_vm0, %v329_v19, 0.0  ;;  %v14427_v19 = vld [vmem:[#allocation25_spill] sm:$0xff] }
 0x32c   :  { %v1449_v17 = vsel %vm536_vm0, %v328_v58, 0.0  ;;  %vm14423_vm1 = vcmask 786112   ;;  %v5249_v37 = vperm.slane %v4725_v27, %v8046_v44  ;;  %v4176_v3 = vpack.c.bf16 %v14425_v4, %v14424_v34  ;;  %1453 = vadd.xlane.f32.xlu2 %v1452_v59 }
 0x32d   :  { %v5246_v57 = vsel %vm14423_vm1, %v5245_v6, %v5244_v56  ;;  %v1446_v62 = vsel %vm536_vm0, %v327_v0, 0.0  ;;  %v4726_v42 = vunpack.c.l.b16 %v4171_v43  ;;  %v4727_v45 = vunpack.c.h.b16 %v4171_v43  ;;  %1450 = vadd.xlane.f32.xlu1 %v1449_v17 }
 0x32e   :  { %v5248_v16 = vsel %vm3146_vm12, %v5247_v21, %v5246_v57  ;;  %v5265_v38 = vsel %vm3118_vm5, %v5264_v41, %v5263_v33  ;;  %v4746_v11 = vunpack.c.l.b16 %v4181_v63  ;;  %v4182_v49 = vpack.c.bf16 %v14427_v19, %v14426_v29  ;;  %1447 = vadd.xlane.f32.xlu0 %v1446_v62  ;;  %v332_v21 = vld [vmem:[%s13571_s0 + $0x9a0] sm:$0xff]  ;;  %v331_v29 = vld [vmem:[%s13571_s0 + $0x998] sm:$0xff]  ;;  %v14431_v57 = vld [vmem:[#allocation24_spill] sm:$0xff] }
 0x32f   :  { %v5266_v6 = vperm.slane %v4734_v35, %v7980_v51  ;;  %v5286_v27 = vperm.slane %v4744_v8, %v7904_v61  ;;  %v5287_v4 = vperm.slane %v4745_v54, %v7907_v50  ;;  %v5250_v58 = vsel %vm3150_vm13, %v5249_v37, %v5248_v16  ;;  %v9543_v41 = vpop.xlane.xlu2 %1327  ;;  %v9545_v8 = vpop.xlane.xlu1 %1324  ;;  %v330_v54 = vld [vmem:[%s13571_s0 + $0x990] sm:$0xff]  ;;  %v14432_v37 = vld [vmem:[#allocation29_spill] sm:$0xff]  ;;  %v14433_v62 = vld [vmem:[#allocation38_spill] sm:$0xff] }
 0x330   :  { %v4736_v56 = vunpack.c.l.b16 %v4176_v3  ;;  %v5251_v43 = vperm.slane %v4726_v42, %v8040_v2  ;;  %v5253_v0 = vperm.slane %v4727_v45, %v8093_v55  ;;  %v4735_v35 = vunpack.c.h.b16 %v9468_v47  ;;  %14429 = vst [vmem:[#allocation187_spill] sm:$0xff] %v9543_v41  ;;  %v14434_v16 = vld [vmem:[#allocation37_spill] sm:$0xff]  ;;  %v9555_v47 = vpop.xlane.xlu0 %1321 }
 0x331   :  { %vm14428_vm9 = vcmask 458112   ;;  %14430 = vst [vmem:[#allocation11_spill] sm:$0xff] %v9545_v8  ;;  %v5289_v59 = vperm.slane %v4746_v11, %v7931_v13  ;;  %v4748_v17 = vunpack.c.l.b16 %v4182_v49  ;;  %v4183_v34 = vpack.c.bf16 %v14432_v37, %v14431_v57  ;;  %v14437_v11 = vld [vmem:[#allocation36_spill] sm:$0xff] }
 0x332   :  { %v5267_v33 = vsel %vm14428_vm9, %v5266_v6, %v5265_v38  ;;  %v4188_v42 = vpack.c.bf16 %v14434_v16, %v14433_v62  ;;  %14435 = vst [vmem:[#allocation10_spill] sm:$0xff] %v9555_v47  ;;  %v4747_v38 = vunpack.c.h.b16 %v4181_v63  ;;  %vm14436_vm6 = vcmask 130112   ;;  %v14439_v16 = vld [vmem:[#allocation12_spill] sm:$0xff]  ;;  %v14440_v63 = vld [vmem:[#allocation17_spill] sm:$0xff] }
 0x333   :  { %v5288_v45 = vsel %vm14436_vm6, %v5287_v4, %v5286_v27  ;;  %v1461_v19 = vsel %vm536_vm0, %v332_v21, 0.0  ;;  %v1458_v6 = vsel %vm536_vm0, %v331_v29, 0.0  ;;  %v4737_v41 = vunpack.c.h.b16 %v4176_v3 }
 0x334   :  { %v5270_v8 = vperm.slane %v4736_v56, %v7985_v25  ;;  %v4189_v7 = vpack.c.bf16 %v14438_v46, %v14437_v11  ;;  %v1455_v57 = vsel %vm536_vm0, %v330_v54, 0.0  ;;  %v5252_v37 = vsel %vm14380_vm8, %v5251_v43, %v5250_v58  ;;  %1462 = vadd.xlane.f32.xlu2 %v1461_v19 }
 0x335   :  { %v5268_v62 = vperm.slane %v4735_v35, %v7991_v39  ;;  %v4177_v47 = vpack.c.bf16 %v14440_v63, %v14439_v16  ;;  %v4749_v27 = vunpack.c.h.b16 %v4182_v49  ;;  %v5290_v4 = vsel %vm3106_vm2, %v5289_v59, %v5288_v45  ;;  %1459 = vadd.xlane.f32.xlu1 %v1458_v6  ;;  %v335_v59 = vld [vmem:[%s13571_s0 + $0x9b8] sm:$0xff]  ;;  %v14445_v45 = vld [vmem:[#allocation27_spill] sm:$0xff] }
 0x336   :  { %v5293_v21 = vperm.slane %v4748_v17, %v7951_v14  ;;  %v4750_v3 = vunpack.c.l.b16 %v4183_v34  ;;  %v4760_v29 = vunpack.c.l.b16 %v4188_v42  ;;  %vm14441_vm14 = vcmask 523712   ;;  %1456 = vadd.xlane.f32.xlu0 %v1455_v57  ;;  %v333_v6 = vld [vmem:[%s13571_s0 + $0x9a8] sm:$0xff] }
 0x337   :  { %v5269_v46 = vsel %vm14441_vm14, %v5268_v62, %v5267_v33  ;;  %v5291_v56 = vperm.slane %v4747_v38, %v7940_v48  ;;  %v4761_v54 = vunpack.c.h.b16 %v4188_v42  ;;  %vm14442_vm11 = vcmask 1048512   ;;  %v334_v33 = vld [vmem:[%s13571_s0 + $0x9b0] sm:$0xff] }
 0x338   :  { %v9573_v58 = vsel %vm14442_vm11, %v5253_v0, %v5252_v37  ;;  %vm14443_vm1 = vcmask 589312   ;;  %v5272_v49 = vperm.slane %v4737_v41, %v8019_v53  ;;  %v4762_v35 = vunpack.c.l.b16 %v4189_v7  ;;  %v14444_v0 = vld [vmem:[#allocation28_spill] sm:$0xff]  ;;  %v9589_v41 = vpop.xlane.xlu1 %1333  ;;  %v9597_v16 = vpop.xlane.xlu0 %1330 }
 0x339   :  { %v5271_v43 = vsel %vm14443_vm1, %v5270_v8, %v5269_v46  ;;  %v4738_v17 = vunpack.c.l.b16 %v4177_v47  ;;  %v5292_v42 = vsel %vm3110_vm3, %v5291_v56, %v5290_v4  ;;  %v5295_v38 = vperm.slane %v4749_v27, %v7965_v32  ;;  %v9587_v8 = vpop.xlane.xlu2 %1336  ;;  %14447 = vst [vmem:[#allocation170_spill] sm:$0xff] %v9589_v41  ;;  %v14449_v56 = vld [vmem:[#allocation16_spill] sm:$0xff]  ;;  %v14452_v41 = vld [vmem:[#allocation39_spill] sm:$0xff] }
 0x33a   :  { %v4184_v19 = vpack.c.bf16 %v14445_v45, %v14444_v0  ;;  %14446 = vst [vmem:[#allocation195_spill] sm:$0xff] %v9587_v8  ;;  %v5294_v11 = vsel %vm3114_vm4, %v5293_v21, %v5292_v42  ;;  %v4751_v57 = vunpack.c.h.b16 %v4183_v34  ;;  %v5297_v37 = vperm.slane %v4750_v3, %v7980_v51  ;;  %v14450_v0 = vld [vmem:[#allocation15_spill] sm:$0xff]  ;;  %v14451_v8 = vld [vmem:[#allocation40_spill] sm:$0xff] }
 0x33b   :  { %v5317_v62 = vperm.slane %v4760_v29, %v7904_v61  ;;  %14448 = vst [vmem:[#allocation18_spill] sm:$0xff] %v9597_v16  ;;  %v5318_v63 = vperm.slane %v4761_v54, %v7907_v50  ;;  %v4763_v27 = vunpack.c.h.b16 %v4189_v7  ;;  %v1470_v4 = vsel %vm536_vm0, %v335_v59, 0.0  ;;  %v14453_v16 = vld [vmem:[#allocation32_spill] sm:$0xff] }
 0x33c   :  { %v1467_v46 = vsel %vm536_vm0, %v334_v33, 0.0  ;;  %v4178_v45 = vpack.c.bf16 %v14450_v0, %v14449_v56  ;;  %v4190_v21 = vpack.c.bf16 %v14452_v41, %v14451_v8  ;;  %v5320_v34 = vperm.slane %v4762_v35, %v7931_v13  ;;  %v14454_v33 = vld [vmem:[#allocation31_spill] sm:$0xff]  ;;  %v14455_v56 = vld [vmem:[#allocation44_spill] sm:$0xff]  ;;  %1471 = vadd.xlane.f32.xlu2 %v1470_v4  ;;  %v336_v4 = vld [vmem:[%s13571_s0 + $0x9c0] sm:$0xff] }
 0x33d   :  { %v1464_v3 = vsel %vm536_vm0, %v333_v6, 0.0  ;;  %v4739_v29 = vunpack.c.h.b16 %v4177_v47  ;;  %v5274_v42 = vperm.slane %v4738_v17, %v8016_v31  ;;  %v5296_v54 = vsel %vm3118_vm5, %v5295_v38, %v5294_v11  ;;  %v14456_v0 = vld [vmem:[#allocation43_spill] sm:$0xff]  ;;  %1468 = vadd.xlane.f32.xlu1 %v1467_v46 }
 0x33e   :  { %v4752_v7 = vunpack.c.l.b16 %v4184_v19  ;;  %v5299_v59 = vperm.slane %v4751_v57, %v7991_v39  ;;  %v9613_v12 = vpack.c.bf16 %v14454_v33, %v14453_v16  ;;  %v4191_v22 = vpack.c.bf16 %v14456_v0, %v14455_v56  ;;  %1465 = vadd.xlane.f32.xlu0 %v1464_v3  ;;  %v338_v57 = vld [vmem:[%s13571_s0 + $0x9d0] sm:$0xff] }
 0x33f   :  { %vm14457_vm9 = vcmask 654912   ;;  %vm14458_vm6 = vcmask 458112   ;;  %vm14459_vm8 = vcmask 130112   ;;  %v5322_v38 = vperm.slane %v4763_v27, %v7940_v48 }
 0x340   :  { %v5273_v35 = vsel %vm14457_vm9, %v5272_v49, %v5271_v43  ;;  %v5298_v47 = vsel %vm14458_vm6, %v5297_v37, %v5296_v54  ;;  %v5319_v17 = vsel %vm14459_vm8, %v5318_v63, %v5317_v62  ;;  %v4740_v8 = vunpack.c.l.b16 %v4178_v45  ;;  %v337_v43 = vld [vmem:[%s13571_s0 + $0x9c8] sm:$0xff]  ;;  %v9633_v27 = vpop.xlane.xlu1 %1342  ;;  %vm14481_vm8 = vmmov %vm14441_vm14 }
 0x341   :  { %v4741_v41 = vunpack.c.h.b16 %v4178_v45  ;;  %v4764_v6 = vunpack.c.l.b16 %v4190_v21  ;;  %v5321_v11 = vsel %vm3106_vm2, %v5320_v34, %v5319_v17  ;;  %v5275_v49 = vsel %vm3138_vm10, %v5274_v42, %v5273_v35  ;;  %v9631_v63 = vpop.xlane.xlu2 %1345  ;;  %14461 = vst [vmem:[#allocation178_spill] sm:$0xff] %v9633_v27  ;;  %v9640_v42 = vpop.xlane.xlu0 %1339  ;;  %v14464_v54 = vld [vmem:[#allocation47_spill] sm:$0xff]  ;;  %v14465_v35 = vld [vmem:[#allocation20_spill] sm:$0xff]  ;;  %v14479_v27 = vld [vmem:[#allocation54_spill] sm:$0xff] }
 0x342   :  { %v5276_v37 = vperm.slane %v4739_v29, %v8006_v24  ;;  %v4753_v62 = vunpack.c.h.b16 %v4184_v19  ;;  %v5301_v16 = vperm.slane %v4752_v7, %v7985_v25  ;;  %14460 = vst [vmem:[#allocation23_spill] sm:$0xff] %v9631_v63  ;;  %v5300_v46 = vsel %vm14441_vm14, %v5299_v59, %v5298_v47  ;;  %v14463_v29 = vld [vmem:[#allocation42_spill] sm:$0xff]  ;;  %v14466_v17 = vld [vmem:[#allocation19_spill] sm:$0xff]  ;;  %vm14484_vm14 = vmmov %vm14443_vm1 }
 0x343   :  { %v4754_v45 = vunpack.c.l.b16 %v9613_v12  ;;  %v4765_v34 = vunpack.c.h.b16 %v4190_v21  ;;  %v4766_v3 = vunpack.c.l.b16 %v4191_v22  ;;  %14462 = vst [vmem:[#allocation174_spill] sm:$0xff] %v9640_v42  ;;  %v5323_v19 = vsel %vm3110_vm3, %v5322_v38, %v5321_v11 }
 0x344   :  { %v4192_v7 = vpack.c.bf16 %v14464_v54, %v14463_v29  ;;  %v1479_v33 = vsel %vm536_vm0, %v338_v57, 0.0  ;;  %v1476_v56 = vsel %vm536_vm0, %v337_v43, 0.0  ;;  %v5278_v0 = vperm.slane %v4740_v8, %v8049_v15  ;;  %v14468_v54 = vld [vmem:[#allocation52_spill] sm:$0xff] }
 0x345   :  { %v9650_v59 = vpack.c.bf16 %v14466_v17, %v14465_v35  ;;  %v5324_v21 = vperm.slane %v4764_v6, %v7951_v14  ;;  %v1473_v47 = vsel %vm536_vm0, %v336_v4, 0.0  ;;  %vm14467_vm11 = vcmask 786112   ;;  %v14469_v35 = vld [vmem:[#allocation51_spill] sm:$0xff]  ;;  %1480 = vadd.xlane.f32.xlu2 %v1479_v33  ;;  %1477 = vadd.xlane.f32.xlu1 %v1476_v56  ;;  %v14470_v4 = vld [vmem:[#allocation56_spill] sm:$0xff] }
 0x346   :  { %v5277_v63 = vsel %vm14467_vm11, %v5276_v37, %v5275_v49  ;;  %v5303_v38 = vperm.slane %v4753_v62, %v8019_v53  ;;  %v5302_v11 = vsel %vm14443_vm1, %v5301_v16, %v5300_v46  ;;  %v4767_v29 = vunpack.c.h.b16 %v4191_v22  ;;  %1474 = vadd.xlane.f32.xlu0 %v1473_v47  ;;  %v14471_v46 = vld [vmem:[#allocation55_spill] sm:$0xff]  ;;  %vm14489_vm1 = vmmov %vm14457_vm9 }
 0x347   :  { %v4755_v57 = vunpack.c.h.b16 %v9613_v12  ;;  %v5325_v43 = vsel %vm3114_vm4, %v5324_v21, %v5323_v19  ;;  %v5328_v8 = vperm.slane %v4766_v3, %v7980_v51  ;;  %v4196_v17 = vpack.c.bf16 %v14469_v35, %v14468_v54  ;;  %v341_v19 = vld [vmem:[%s13571_s0 + $0x9e8] sm:$0xff] }
 0x348   :  { %v5280_v6 = vperm.slane %v4741_v41, %v8046_v44  ;;  %v5305_v49 = vperm.slane %v4754_v45, %v8016_v31  ;;  %v5326_v37 = vperm.slane %v4765_v34, %v7965_v32  ;;  %v4768_v62 = vunpack.c.l.b16 %v4192_v7  ;;  %v340_v41 = vld [vmem:[%s13571_s0 + $0x9e0] sm:$0xff]  ;;  %v14473_v34 = vld [vmem:[#allocation35_spill] sm:$0xff]  ;;  %v9682_v47 = vpop.xlane.xlu1 %1351 }
 0x349   :  { %v5279_v22 = vsel %vm3146_vm12, %v5278_v0, %v5277_v63  ;;  %v4742_v12 = vunpack.c.l.b16 %v9650_v59  ;;  %v5304_v16 = vsel %vm14457_vm9, %v5303_v38, %v5302_v11  ;;  %v4197_v3 = vpack.c.bf16 %v14471_v46, %v14470_v4  ;;  %v14472_v45 = vld [vmem:[#allocation30_spill] sm:$0xff]  ;;  %v9680_v21 = vpop.xlane.xlu2 %1354  ;;  %14475 = vst [vmem:[#allocation9_spill] sm:$0xff] %v9682_v47  ;;  %v339_v38 = vld [vmem:[%s13571_s0 + $0x9d8] sm:$0xff]  ;;  %v9689_v46 = vpop.xlane.xlu0 %1348 }
 0x34a   :  { %v4186_v33 = vpack.c.bf16 %v14473_v34, %v14472_v45  ;;  %v5327_v63 = vsel %vm3118_vm5, %v5326_v37, %v5325_v43  ;;  %v5330_v56 = vperm.slane %v4767_v29, %v7991_v39  ;;  %v4769_v0 = vunpack.c.h.b16 %v4192_v7  ;;  %14474 = vst [vmem:[#allocation8_spill] sm:$0xff] %v9680_v21  ;;  %v14477_v45 = vld [vmem:[#allocation46_spill] sm:$0xff]  ;;  %v14478_v34 = vld [vmem:[#allocation45_spill] sm:$0xff] }
 0x34b   :  { %v5307_v11 = vperm.slane %v4755_v57, %v8006_v24  ;;  %v5329_v54 = vsel %vm14458_vm6, %v5328_v8, %v5327_v63  ;;  %v4776_v35 = vunpack.c.l.b16 %v4196_v17  ;;  %v4777_v4 = vunpack.c.h.b16 %v4196_v17  ;;  %14476 = vst [vmem:[#allocation22_spill] sm:$0xff] %v9689_v46  ;;  %v14480_v57 = vld [vmem:[#allocation59_spill] sm:$0xff]  ;;  %vm14500_vm6 = vmmov %vm14467_vm11 }
 0x34c   :  { %v5306_v43 = vsel %vm3138_vm10, %v5305_v49, %v5304_v16  ;;  %v5332_v7 = vperm.slane %v4768_v62, %v7985_v25  ;;  %v1488_v29 = vsel %vm536_vm0, %v341_v19, 0.0  ;;  %v1485_v37 = vsel %vm536_vm0, %v340_v41, 0.0  ;;  %v14482_v62 = vld [vmem:[#allocation50_spill] sm:$0xff]  ;;  %v14483_v16 = vld [vmem:[#allocation49_spill] sm:$0xff] }
 0x34d   :  { %v4193_v21 = vpack.c.bf16 %v14478_v34, %v14477_v45  ;;  %v4778_v47 = vunpack.c.l.b16 %v4197_v3  ;;  %v4198_v42 = vpack.c.bf16 %v14480_v57, %v14479_v27  ;;  %v1482_v8 = vsel %vm536_vm0, %v339_v38, 0.0  ;;  %1489 = vadd.xlane.f32.xlu2 %v1488_v29  ;;  %1486 = vadd.xlane.f32.xlu1 %v1485_v37  ;;  %v342_v29 = vld [vmem:[%s13571_s0 + $0x9f0] sm:$0xff] }
 0x34e   :  { %v4756_v17 = vunpack.c.l.b16 %v4186_v33  ;;  %v4757_v63 = vunpack.c.h.b16 %v4186_v33  ;;  %v5331_v46 = vsel %vm14481_vm8, %v5330_v56, %v5329_v54  ;;  %v5334_v49 = vperm.slane %v4769_v0, %v8019_v53  ;;  %1483 = vadd.xlane.f32.xlu0 %v1482_v8 }
 0x34f   :  { %v4194_v19 = vpack.c.bf16 %v14483_v16, %v14482_v62  ;;  %v5348_v41 = vperm.slane %v4776_v35, %v7904_v61  ;;  %v5349_v30 = vperm.slane %v4777_v4, %v7907_v50  ;;  %v4779_v45 = vunpack.c.h.b16 %v4197_v3  ;;  %v344_v3 = vld [vmem:[%s13571_s0 + $0xa00] sm:$0xff] }
 0x350   :  { %v9707_v27 = vsel %vm3150_vm13, %v5280_v6, %v5279_v22  ;;  %v4743_v38 = vunpack.c.h.b16 %v9650_v59  ;;  %v9711_v33 = vperm.slane %v4742_v12, %v8040_v2  ;;  %v5333_v56 = vsel %vm14484_vm14, %v5332_v7, %v5331_v46  ;;  %v343_v59 = vld [vmem:[%s13571_s0 + $0x9f8] sm:$0xff]  ;;  %v14485_v6 = vld [vmem:[#allocation34_spill] sm:$0xff] }
 0x351   :  { %v5308_v0 = vsel %vm14467_vm11, %v5307_v11, %v5306_v43  ;;  %v4770_v54 = vunpack.c.l.b16 %v4193_v21  ;;  %v5351_v35 = vperm.slane %v4778_v47, %v7931_v13  ;;  %v4780_v4 = vunpack.c.l.b16 %v4198_v42  ;;  %v14486_v22 = vld [vmem:[#allocation33_spill] sm:$0xff]  ;;  %v9728_v7 = vpop.xlane.xlu2 %1363  ;;  %v9730_v47 = vpop.xlane.xlu1 %1360 }
 0x352   :  { %v9724_v12 = vpack.c.bf16 %v14486_v22, %v14485_v6  ;;  %v5309_v46 = vperm.slane %v4756_v17, %v8049_v15  ;;  %v5311_v11 = vperm.slane %v4757_v63, %v8046_v44  ;;  %v4771_v43 = vunpack.c.h.b16 %v4193_v21  ;;  %14487 = vst [vmem:[#allocation21_spill] sm:$0xff] %v9728_v7  ;;  %v9738_v62 = vpop.xlane.xlu0 %1357  ;;  %v14492_v17 = vld [vmem:[#allocation58_spill] sm:$0xff]  ;;  %v14493_v63 = vld [vmem:[#allocation57_spill] sm:$0xff] }
 0x353   :  { %14488 = vst [vmem:[#allocation14_spill] sm:$0xff] %v9730_v47  ;;  %v5335_v37 = vsel %vm14489_vm1, %v5334_v49, %v5333_v56  ;;  %v4772_v34 = vunpack.c.l.b16 %v4194_v19  ;;  %vm14490_vm9 = vcmask 130112   ;;  %v5353_v8 = vperm.slane %v4779_v45, %v7940_v48 }
 0x354   :  { %v5350_v57 = vsel %vm14490_vm9, %v5349_v30, %v5348_v41  ;;  %14491 = vst [vmem:[#allocation13_spill] sm:$0xff] %v9738_v62  ;;  %v9742_v21 = vpack.c.bf16 %v14493_v63, %v14492_v17  ;;  %v4781_v16 = vunpack.c.h.b16 %v4198_v42  ;;  %v1497_v6 = vsel %vm536_vm0, %v344_v3, 0.0  ;;  %v14494_v63 = vld [vmem:[#allocation66_spill] sm:$0xff]  ;;  %v14495_v42 = vld [vmem:[#allocation71_spill] sm:$0xff] }
 0x355   :  { %v1494_v22 = vsel %vm536_vm0, %v343_v59, 0.0  ;;  %v5336_v47 = vperm.slane %v4770_v54, %v8016_v31  ;;  %v5352_v49 = vsel %vm3106_vm2, %v5351_v35, %v5350_v57  ;;  %v5355_v56 = vperm.slane %v4780_v4, %v7951_v14  ;;  %v14496_v35 = vld [vmem:[#allocation62_spill] sm:$0xff]  ;;  %v14497_v57 = vld [vmem:[#allocation61_spill] sm:$0xff]  ;;  %1498 = vadd.xlane.f32.xlu2 %v1497_v6 }
 0x356   :  { %v1491_v30 = vsel %vm536_vm0, %v342_v29, 0.0  ;;  %v9751_v41 = vperm.slane %v4743_v38, %v8093_v55  ;;  %v5310_v45 = vsel %vm3146_vm12, %v5309_v46, %v5308_v0  ;;  %v4773_v17 = vunpack.c.h.b16 %v4194_v19  ;;  %1495 = vadd.xlane.f32.xlu1 %v1494_v22 }
 0x357   :  { %v4204_v62 = vpack.c.bf16 %v14495_v42, %v14494_v63  ;;  %v4758_v3 = vunpack.c.l.b16 %v9724_v12  ;;  %v5337_v59 = vsel %vm3138_vm10, %v5336_v47, %v5335_v37  ;;  %v5340_v54 = vperm.slane %v4772_v34, %v8049_v15  ;;  %1492 = vadd.xlane.f32.xlu0 %v1491_v30  ;;  %v14498_v34 = vld [vmem:[#allocation70_spill] sm:$0xff]  ;;  %v14499_v63 = vld [vmem:[#allocation69_spill] sm:$0xff] }
 0x358   :  { %v9761_v4 = vpack.c.bf16 %v14497_v57, %v14496_v35  ;;  %v5338_v38 = vperm.slane %v4771_v43, %v8006_v24  ;;  %v5354_v0 = vsel %vm3110_vm3, %v5353_v8, %v5352_v49  ;;  %v4782_v19 = vunpack.c.l.b16 %v9742_v21  ;;  %v347_v43 = vld [vmem:[%s13571_s0 + $0xa18] sm:$0xff]  ;;  %v346_v8 = vld [vmem:[%s13571_s0 + $0xa10] sm:$0xff] }
 0x359   :  { %v5357_v46 = vperm.slane %v4781_v16, %v7965_v32  ;;  %v4759_v29 = vunpack.c.h.b16 %v9724_v12  ;;  %v5312_v47 = vsel %vm3150_vm13, %v5311_v11, %v5310_v45  ;;  %v5356_v37 = vsel %vm3114_vm4, %v5355_v56, %v5354_v0  ;;  %v9782_v22 = vpop.xlane.xlu2 %1372  ;;  %v9784_v49 = vpop.xlane.xlu1 %1369  ;;  %v345_v56 = vld [vmem:[%s13571_s0 + $0xa08] sm:$0xff]  ;;  %v14503_v45 = vld [vmem:[#allocation48_spill] sm:$0xff]  ;;  %v14504_v35 = vld [vmem:[#allocation53_spill] sm:$0xff] }
 0x35a   :  { %v9772_v42 = vpack.c.bf16 %v14499_v63, %v14498_v34  ;;  %v5339_v16 = vsel %vm14500_vm6, %v5338_v38, %v5337_v59  ;;  %v5342_v12 = vperm.slane %v4773_v17, %v8046_v44  ;;  %v4792_v6 = vunpack.c.l.b16 %v4204_v62  ;;  %14501 = vst [vmem:[#allocation26_spill] sm:$0xff] %v9782_v22  ;;  %v9794_v17 = vpop.xlane.xlu0 %1366  ;;  %v14506_v22 = vld [vmem:[#allocation60_spill] sm:$0xff] }
 0x35b   :  { %v4793_v11 = vunpack.c.h.b16 %v4204_v62  ;;  %14502 = vst [vmem:[#allocation25_spill] sm:$0xff] %v9784_v49  ;;  %v5341_v30 = vsel %vm3146_vm12, %v5340_v54, %v5339_v16  ;;  %v4195_v57 = vpack.c.bf16 %v14504_v35, %v14503_v45  ;;  %v4783_v0 = vunpack.c.h.b16 %v9742_v21  ;;  %v14507_v49 = vld [vmem:[#allocation65_spill] sm:$0xff]  ;;  %v14508_v45 = vld [vmem:[#allocation74_spill] sm:$0xff] }
 0x35c   :  { %v4784_v59 = vunpack.c.l.b16 %v9761_v4  ;;  %14505 = vst [vmem:[#allocation24_spill] sm:$0xff] %v9794_v17  ;;  %v5359_v62 = vperm.slane %v4782_v19, %v7980_v51  ;;  %v5358_v38 = vsel %vm3118_vm5, %v5357_v46, %v5356_v37  ;;  %v1506_v34 = vsel %vm536_vm0, %v347_v43, 0.0  ;;  %v14509_v35 = vld [vmem:[#allocation73_spill] sm:$0xff]  ;;  %v14526_v17 = vld [vmem:[#allocation84_spill] sm:$0xff] }
 0x35d   :  { %v1503_v63 = vsel %vm536_vm0, %v346_v8, 0.0  ;;  %v4201_v54 = vpack.c.bf16 %v14507_v49, %v14506_v22  ;;  %v4794_v16 = vunpack.c.l.b16 %v9772_v42  ;;  %v4206_v21 = vpack.c.bf16 %v14509_v35, %v14508_v45  ;;  %1507 = vadd.xlane.f32.xlu2 %v1506_v34  ;;  %v348_v34 = vld [vmem:[%s13571_s0 + $0xa20] sm:$0xff] }
 0x35e   :  { %v1500_v7 = vsel %vm536_vm0, %v345_v56, 0.0  ;;  %vm14510_vm8 = vcmask 982912   ;;  %v5313_v46 = vperm.slane %v4758_v3, %v8040_v2  ;;  %v5379_v37 = vperm.slane %v4792_v6, %v7904_v61  ;;  %1504 = vadd.xlane.f32.xlu1 %v1503_v63 }
 0x35f   :  { %v9809_v19 = vsel %vm14510_vm8, %v9711_v33, %v9707_v27  ;;  %v5380_v43 = vperm.slane %v4793_v11, %v7907_v50  ;;  %v4774_v8 = vunpack.c.l.b16 %v4195_v57  ;;  %vm14511_vm14 = vcmask 458112   ;;  %vm14512_vm11 = vmmov %vm14510_vm8  ;;  %1501 = vadd.xlane.f32.xlu0 %v1500_v7  ;;  %v14514_v7 = vld [vmem:[#allocation72_spill] sm:$0xff] }
 0x360   :  { %v5360_v22 = vsel %vm14511_vm14, %v5359_v62, %v5358_v38  ;;  %v4785_v49 = vunpack.c.h.b16 %v9761_v4  ;;  %v5363_v45 = vperm.slane %v4784_v59, %v7985_v25  ;;  %v5315_v56 = vperm.slane %v4759_v29, %v8093_v55  ;;  %v350_v4 = vld [vmem:[%s13571_s0 + $0xa30] sm:$0xff]  ;;  %v349_v29 = vld [vmem:[%s13571_s0 + $0xa28] sm:$0xff]  ;;  %vm14525_vm14 = vmmov %vm14512_vm11 }
 0x361   :  { %v5314_v27 = vsel %vm14512_vm11, %v5313_v46, %v5312_v47  ;;  %v5343_v33 = vsel %vm3150_vm13, %v5342_v12, %v5341_v30  ;;  %v5361_v3 = vperm.slane %v4783_v0, %v7991_v39  ;;  %v4775_v6 = vunpack.c.h.b16 %v4195_v57  ;;  %v14515_v57 = vld [vmem:[#allocation77_spill] sm:$0xff]  ;;  %v9833_v59 = vpop.xlane.xlu2 %1381  ;;  %v9835_v38 = vpop.xlane.xlu1 %1378 }
 0x362   :  { %v4786_v11 = vunpack.c.l.b16 %v4201_v54  ;;  %v5382_v35 = vperm.slane %v4794_v16, %v7931_v13  ;;  %v4796_v62 = vunpack.c.l.b16 %v4206_v21  ;;  %vm14513_vm1 = vcmask 523712   ;;  %14516 = vst [vmem:[#allocation29_spill] sm:$0xff] %v9833_v59 }
 0x363   :  { %v5362_v47 = vsel %vm14513_vm1, %v5361_v3, %v5360_v22  ;;  %v4795_v12 = vunpack.c.h.b16 %v9772_v42  ;;  %v5381_v30 = vsel %vm14490_vm9, %v5380_v43, %v5379_v37  ;;  %v4207_v0 = vpack.c.bf16 %v14515_v57, %v14514_v7  ;;  %14517 = vst [vmem:[#allocation38_spill] sm:$0xff] %v9835_v38  ;;  %v14519_v42 = vld [vmem:[#allocation64_spill] sm:$0xff]  ;;  %v14520_v22 = vld [vmem:[#allocation63_spill] sm:$0xff]  ;;  %v9847_v43 = vpop.xlane.xlu0 %1375 }
 0x364   :  { %v5344_v63 = vperm.slane %v4774_v8, %v8040_v2  ;;  %vm14518_vm6 = vcmask 589312   ;;  %v5365_v46 = vperm.slane %v4785_v49, %v8019_v53  ;;  %v9845_v37 = vpack.c.bf16 %v14520_v22, %v14519_v42  ;;  %14521 = vst [vmem:[#allocation37_spill] sm:$0xff] %v9847_v43  ;;  %v14522_v43 = vld [vmem:[#allocation86_spill] sm:$0xff] }
 0x365   :  { %v5364_v16 = vsel %vm14518_vm6, %v5363_v45, %v5362_v47  ;;  %v4787_v3 = vunpack.c.h.b16 %v4201_v54  ;;  %v4797_v7 = vunpack.c.h.b16 %v4206_v21  ;;  %v1515_v57 = vsel %vm536_vm0, %v350_v4, 0.0  ;;  %v14523_v54 = vld [vmem:[#allocation85_spill] sm:$0xff] }
 0x366   :  { %v1512_v59 = vsel %vm536_vm0, %v349_v29, 0.0  ;;  %v5367_v38 = vperm.slane %v4786_v11, %v8016_v31  ;;  %v5383_v8 = vsel %vm3106_vm2, %v5382_v35, %v5381_v30  ;;  %v5386_v45 = vperm.slane %v4796_v62, %v7951_v14  ;;  %v14527_v35 = vld [vmem:[#allocation89_spill] sm:$0xff]  ;;  %1516 = vadd.xlane.f32.xlu2 %v1515_v57 }
 0x367   :  { %v1509_v49 = vsel %vm536_vm0, %v348_v34, 0.0  ;;  %v5346_v47 = vperm.slane %v4775_v6, %v8093_v55  ;;  %v5384_v42 = vperm.slane %v4795_v12, %v7940_v48  ;;  %v4798_v22 = vunpack.c.l.b16 %v4207_v0  ;;  %1513 = vadd.xlane.f32.xlu1 %v1512_v59  ;;  %v352_v59 = vld [vmem:[%s13571_s0 + $0xa40] sm:$0xff] }
 0x368   :  { %v4212_v21 = vpack.c.bf16 %v14523_v54, %v14522_v43  ;;  %vm14524_vm8 = vcmask 1048512   ;;  %v5345_v29 = vsel %vm14525_vm14, %v5344_v63, %v5343_v33  ;;  %v4788_v11 = vunpack.c.l.b16 %v9845_v37  ;;  %1510 = vadd.xlane.f32.xlu0 %v1509_v49  ;;  %v14529_v33 = vld [vmem:[#allocation76_spill] sm:$0xff]  ;;  %v14530_v63 = vld [vmem:[#allocation75_spill] sm:$0xff] }
 0x369   :  { %v5316_v4 = vsel %vm14524_vm8, %v5315_v56, %v5314_v27  ;;  %v4213_v30 = vpack.c.bf16 %v14527_v35, %v14526_v17  ;;  %vm14528_vm11 = vcmask 654912   ;;  %v5369_v6 = vperm.slane %v4787_v3, %v8006_v24  ;;  %v353_v17 = vld [vmem:[%s13571_s0 + $0xa48] sm:$0xff]  ;;  %vm14531_vm1 = vmmov %vm14524_vm8  ;;  %v9882_v57 = vpop.xlane.xlu1 %1387  ;;  %v14534_v49 = vld [vmem:[#allocation68_spill] sm:$0xff] }
 0x36a   :  { %v5366_v62 = vsel %vm14528_vm11, %v5365_v46, %v5364_v16  ;;  %v5385_v12 = vsel %vm3110_vm3, %v5384_v42, %v5383_v8  ;;  %v5388_v34 = vperm.slane %v4797_v7, %v7965_v32  ;;  %v4208_v43 = vpack.c.bf16 %v14530_v63, %v14529_v33  ;;  %v9880_v7 = vpop.xlane.xlu2 %1390  ;;  %14533 = vst [vmem:[#allocation41_spill] sm:$0xff] %v9882_v57  ;;  %v14535_v42 = vld [vmem:[#allocation67_spill] sm:$0xff]  ;;  %v14538_v63 = vld [vmem:[#allocation80_spill] sm:$0xff]  ;;  %vm14543_vm8 = vmmov %vm14531_vm1 }
 0x36b   :  { %v5368_v56 = vsel %vm3138_vm10, %v5367_v38, %v5366_v62  ;;  %v5387_v27 = vsel %vm3114_vm4, %v5386_v45, %v5385_v12  ;;  %v4799_v54 = vunpack.c.h.b16 %v4207_v0  ;;  %v5347_v16 = vsel %vm14531_vm1, %v5346_v47, %v5345_v29  ;;  %14532 = vst [vmem:[#allocation36_spill] sm:$0xff] %v9880_v7  ;;  %v351_v0 = vld [vmem:[%s13571_s0 + $0xa38] sm:$0xff] }
 0x36c   :  { %v5390_v46 = vperm.slane %v4798_v22, %v7980_v51  ;;  %v4808_v3 = vunpack.c.l.b16 %v4212_v21  ;;  %v4809_v38 = vunpack.c.h.b16 %v4212_v21  ;;  %v4789_v8 = vunpack.c.h.b16 %v9845_v37  ;;  %v9893_v22 = vpop.xlane.xlu0 %1384 }
 0x36d   :  { %v5371_v45 = vperm.slane %v4788_v11, %v8049_v15  ;;  %v9891_v35 = vpack.c.bf16 %v14535_v42, %v14534_v49  ;;  %v4810_v47 = vunpack.c.l.b16 %v4213_v30  ;;  %14536 = vst [vmem:[#allocation12_spill] sm:$0xff] %v9893_v22  ;;  %vm14537_vm9 = vcmask 786112   ;;  %v14539_v11 = vld [vmem:[#allocation79_spill] sm:$0xff] }
 0x36e   :  { %v5370_v21 = vsel %vm14537_vm9, %v5369_v6, %v5368_v56  ;;  %v5389_v29 = vsel %vm3118_vm5, %v5388_v34, %v5387_v27  ;;  %v1524_v62 = vsel %vm536_vm0, %v353_v17, 0.0  ;;  %v1521_v12 = vsel %vm536_vm0, %v352_v59, 0.0  ;;  %v14541_v17 = vld [vmem:[#allocation88_spill] sm:$0xff]  ;;  %v14542_v59 = vld [vmem:[#allocation87_spill] sm:$0xff] }
 0x36f   :  { %v4800_v33 = vunpack.c.l.b16 %v4208_v43  ;;  %v5392_v37 = vperm.slane %v4799_v54, %v7991_v39  ;;  %v4209_v7 = vpack.c.bf16 %v14539_v11, %v14538_v63  ;;  %v1518_v49 = vsel %vm536_vm0, %v351_v0, 0.0  ;;  %1525 = vadd.xlane.f32.xlu2 %v1524_v62  ;;  %1522 = vadd.xlane.f32.xlu1 %v1521_v12 }
 0x370   :  { %vm14540_vm6 = vcmask 458112   ;;  %v5410_v57 = vperm.slane %v4808_v3, %v7904_v61  ;;  %v5411_v6 = vperm.slane %v4809_v38, %v7907_v50  ;;  %v4811_v56 = vunpack.c.h.b16 %v4213_v30  ;;  %1519 = vadd.xlane.f32.xlu0 %v1518_v49 }
 0x371   :  { %v5391_v42 = vsel %vm14540_vm6, %v5390_v46, %v5389_v29  ;;  %v5372_v34 = vsel %vm3146_vm12, %v5371_v45, %v5370_v21  ;;  %v4790_v27 = vunpack.c.l.b16 %v9891_v35  ;;  %v4214_v22 = vpack.c.bf16 %v14542_v59, %v14541_v17  ;;  %v14547_v21 = vld [vmem:[#allocation92_spill] sm:$0xff]  ;;  %v14548_v29 = vld [vmem:[#allocation91_spill] sm:$0xff]  ;;  %v9937_v12 = vpop.xlane.xlu1 %1396 }
 0x372   :  { %v5413_v54 = vperm.slane %v4810_v47, %v7931_v13  ;;  %v5285_v46 = vsel %vm14543_vm8, %v9751_v41, %v9809_v19  ;;  %v5373_v3 = vperm.slane %v4789_v8, %v8046_v44  ;;  %v4801_v0 = vunpack.c.h.b16 %v4208_v43  ;;  %v356_v41 = vld [vmem:[%s13571_s0 + $0xa60] sm:$0xff]  ;;  %v355_v19 = vld [vmem:[%s13571_s0 + $0xa58] sm:$0xff]  ;;  %v9935_v8 = vpop.xlane.xlu2 %1399  ;;  %14551 = vst [vmem:[#allocation28_spill] sm:$0xff] %v9937_v12 }
 0x373   :  { %vm14544_vm14 = vcmask 1041409   ;;  %vm14546_vm1 = vcmask 523712   ;;  %v4802_v47 = vunpack.c.l.b16 %v4209_v7  ;;  %v4215_v62 = vpack.c.bf16 %v14548_v29, %v14547_v21  ;;  %14550 = vst [vmem:[#allocation17_spill] sm:$0xff] %v9935_v8  ;;  %v14555_v21 = vld [vmem:[#allocation95_spill] sm:$0xff] }
 0x374   :  { %v9917_v30 = vsel %vm14544_vm14, %v5316_v4, %v9573_v58  ;;  %vm14545_vm11 = vmmov %vm14544_vm14  ;;  %v5393_v45 = vsel %vm14546_vm1, %v5392_v37, %v5391_v42  ;;  %v5374_v58 = vsel %vm3150_vm13, %v5373_v3, %v5372_v34  ;;  %v5394_v4 = vperm.slane %v4800_v33, %v7985_v25  ;;  %v354_v37 = vld [vmem:[%s13571_s0 + $0xa50] sm:$0xff]  ;;  %v9945_v33 = vpop.xlane.xlu0 %1393 }
 0x375   :  { %v9920_v38 = vsel %vm14545_vm11, %v5347_v16, %v5285_v46  ;;  %vm14549_vm9 = vcmask 130112   ;;  %v5415_v16 = vperm.slane %v4811_v56, %v7940_v48  ;;  %v4791_v63 = vunpack.c.h.b16 %v9891_v35  ;;  %14552 = vst [vmem:[#allocation27_spill] sm:$0xff] %v9945_v33 }
 0x376   :  { %v5412_v43 = vsel %vm14549_vm9, %v5411_v6, %v5410_v57  ;;  %v5375_v11 = vperm.slane %v4790_v27, %v8040_v2  ;;  %v4812_v49 = vunpack.c.l.b16 %v4214_v22  ;;  %v5396_v57 = vperm.slane %v4801_v0, %v8019_v53  ;;  %v14557_v0 = vld [vmem:[#allocation99_spill] sm:$0xff] }
 0x377   :  { %v5414_v42 = vsel %vm3106_vm2, %v5413_v54, %v5412_v43  ;;  %vm14553_vm6 = vcmask 589312   ;;  %v1533_v56 = vsel %vm536_vm0, %v356_v41, 0.0  ;;  %v1530_v34 = vsel %vm536_vm0, %v355_v19, 0.0  ;;  %v14554_v54 = vld [vmem:[#allocation90_spill] sm:$0xff]  ;;  %v14556_v43 = vld [vmem:[#allocation100_spill] sm:$0xff] }
 0x378   :  { %v5395_v6 = vsel %vm14553_vm6, %v5394_v4, %v5393_v45  ;;  %v4803_v17 = vunpack.c.h.b16 %v4209_v7  ;;  %v5398_v59 = vperm.slane %v4802_v47, %v8016_v31  ;;  %v4814_v46 = vunpack.c.l.b16 %v4215_v62  ;;  %v14558_v45 = vld [vmem:[#allocation78_spill] sm:$0xff]  ;;  %v14559_v4 = vld [vmem:[#allocation83_spill] sm:$0xff]  ;;  %v14560_v19 = vld [vmem:[#allocation104_spill] sm:$0xff]  ;;  %1534 = vadd.xlane.f32.xlu2 %v1533_v56  ;;  %1531 = vadd.xlane.f32.xlu1 %v1530_v34 }
 0x379   :  { %v1527_v35 = vsel %vm536_vm0, %v354_v37, 0.0  ;;  %v4813_v27 = vunpack.c.h.b16 %v4214_v22  ;;  %v5416_v3 = vsel %vm3110_vm3, %v5415_v16, %v5414_v42  ;;  %v4216_v29 = vpack.c.bf16 %v14555_v21, %v14554_v54  ;;  %v14561_v47 = vld [vmem:[#allocation103_spill] sm:$0xff]  ;;  %v359_v56 = vld [vmem:[%s13571_s0 + $0xa78] sm:$0xff]  ;;  %v9981_v34 = vpop.xlane.xlu1 %1405 }
 0x37a   :  { %v4220_v33 = vpack.c.bf16 %v14557_v0, %v14556_v43  ;;  %v9960_v41 = vpack.c.bf16 %v14559_v4, %v14558_v45  ;;  %v5417_v7 = vperm.slane %v4812_v49, %v7951_v14  ;;  %v4221_v12 = vpack.c.bf16 %v14561_v47, %v14560_v19  ;;  %1528 = vadd.xlane.f32.xlu0 %v1527_v35  ;;  %v14568_v45 = vld [vmem:[#allocation102_spill] sm:$0xff] }
 0x37b   :  { %vm14562_vm8 = vcmask 982912   ;;  %v5377_v16 = vperm.slane %v4791_v63, %v8093_v55  ;;  %vm14563_vm14 = vcmask 654912   ;;  %v4815_v42 = vunpack.c.h.b16 %v4215_v62  ;;  %14565 = vst [vmem:[#allocation15_spill] sm:$0xff] %v9981_v34 }
 0x37c   :  { %v5376_v22 = vsel %vm14562_vm8, %v5375_v11, %v5374_v58  ;;  %v5397_v37 = vsel %vm14563_vm14, %v5396_v57, %v5395_v6  ;;  %v5400_v21 = vperm.slane %v4803_v17, %v8006_v24  ;;  %v5418_v43 = vsel %vm3114_vm4, %v5417_v7, %v5416_v3  ;;  %v358_v58 = vld [vmem:[%s13571_s0 + $0xa70] sm:$0xff]  ;;  %v9979_v6 = vpop.xlane.xlu2 %1408  ;;  %v357_v17 = vld [vmem:[%s13571_s0 + $0xa68] sm:$0xff]  ;;  %v9993_v7 = vpop.xlane.xlu0 %1402 }
 0x37d   :  { %v5399_v54 = vsel %vm3138_vm10, %v5398_v59, %v5397_v37  ;;  %v5421_v49 = vperm.slane %v4814_v46, %v7980_v51  ;;  %v5419_v63 = vperm.slane %v4813_v27, %v7965_v32  ;;  %v4816_v62 = vunpack.c.l.b16 %v4216_v29  ;;  %14564 = vst [vmem:[#allocation16_spill] sm:$0xff] %v9979_v6  ;;  %v14566_v59 = vld [vmem:[#allocation82_spill] sm:$0xff]  ;;  %v14567_v46 = vld [vmem:[#allocation81_spill] sm:$0xff]  ;;  %v14569_v27 = vld [vmem:[#allocation107_spill] sm:$0xff] }
 0x37e   :  { %v4824_v11 = vunpack.c.l.b16 %v4220_v33  ;;  %v4825_v57 = vunpack.c.h.b16 %v4220_v33  ;;  %v9988_v35 = vpack.c.bf16 %v14567_v46, %v14566_v59  ;;  %v4804_v3 = vunpack.c.l.b16 %v9960_v41  ;;  %14570 = vst [vmem:[#allocation40_spill] sm:$0xff] %v9993_v7  ;;  %v14572_v59 = vld [vmem:[#allocation94_spill] sm:$0xff]  ;;  %v14573_v46 = vld [vmem:[#allocation93_spill] sm:$0xff] }
 0x37f   :  { %v4826_v0 = vunpack.c.l.b16 %v4221_v12  ;;  %v4222_v4 = vpack.c.bf16 %v14569_v27, %v14568_v45  ;;  %v5420_v33 = vsel %vm3118_vm5, %v5419_v63, %v5418_v43  ;;  %v5423_v19 = vperm.slane %v4815_v42, %v7991_v39 }
 0x380   :  { %v1542_v47 = vsel %vm536_vm0, %v359_v56, 0.0  ;;  %v1539_v37 = vsel %vm536_vm0, %v358_v58, 0.0  ;;  %vm14571_vm11 = vcmask 458112   ;;  %v10002_v34 = vpack.c.bf16 %v14573_v46, %v14572_v59  ;;  %v14583_v59 = vld [vmem:[#allocation106_spill] sm:$0xff]  ;;  %v14584_v46 = vld [vmem:[#allocation105_spill] sm:$0xff] }
 0x381   :  { %v5422_v6 = vsel %vm14571_vm11, %v5421_v49, %v5420_v33  ;;  %v4817_v8 = vunpack.c.h.b16 %v4216_v29  ;;  %v1536_v36 = vsel %vm536_vm0, %v357_v17, 0.0  ;;  %v5425_v45 = vperm.slane %v4816_v62, %v7985_v25  ;;  %1543 = vadd.xlane.f32.xlu2 %v1542_v47  ;;  %1540 = vadd.xlane.f32.xlu1 %v1539_v37  ;;  %v14577_v33 = vld [vmem:[#allocation119_spill] sm:$0xff] }
 0x382   :  { %v5441_v27 = vperm.slane %v4824_v11, %v7904_v61  ;;  %v5442_v43 = vperm.slane %v4825_v57, %v7907_v50  ;;  %v4827_v42 = vunpack.c.h.b16 %v4221_v12  ;;  %vm14574_vm1 = vcmask 1048512   ;;  %v14576_v11 = vld [vmem:[#allocation114_spill] sm:$0xff]  ;;  %1537 = vadd.xlane.f32.xlu0 %v1536_v36 }
 0x383   :  { %v10009_v56 = vsel %vm14574_vm1, %v5377_v16, %v5376_v22  ;;  %vm14575_vm9 = vcmask 786112   ;;  %v5444_v49 = vperm.slane %v4826_v0, %v7931_v13  ;;  %v4828_v63 = vunpack.c.l.b16 %v4222_v4 }
 0x384   :  { %v5401_v58 = vsel %vm14575_vm9, %v5400_v21, %v5399_v54  ;;  %v4806_v29 = vunpack.c.l.b16 %v9988_v35  ;;  %v4805_v62 = vunpack.c.h.b16 %v9960_v41  ;;  %v4228_v57 = vpack.c.bf16 %v14577_v33, %v14576_v11  ;;  %v362_v21 = vld [vmem:[%s13571_s0 + $0xa90] sm:$0xff]  ;;  %v361_v41 = vld [vmem:[%s13571_s0 + $0xa88] sm:$0xff]  ;;  %v14585_v33 = vld [vmem:[#allocation118_spill] sm:$0xff] }
 0x385   :  { %v5402_v12 = vperm.slane %v4804_v3, %v8049_v15  ;;  %vm14578_vm6 = vcmask 523712   ;;  %v4818_v16 = vunpack.c.l.b16 %v10002_v34  ;;  %v5427_v54 = vperm.slane %v4817_v8, %v8019_v53  ;;  %v360_v8 = vld [vmem:[%s13571_s0 + $0xa80] sm:$0xff] }
 0x386   :  { %v5424_v22 = vsel %vm14578_vm6, %v5423_v19, %v5422_v6  ;;  %vm14579_vm8 = vcmask 589312   ;;  %vm14580_vm14 = vcmask 130112   ;;  %v5446_v3 = vperm.slane %v4827_v42, %v7940_v48  ;;  %v10031_v6 = vpop.xlane.xlu2 %1417  ;;  %v10033_v19 = vpop.xlane.xlu1 %1414 }
 0x387   :  { %v5426_v0 = vsel %vm14579_vm8, %v5425_v45, %v5424_v22  ;;  %v5443_v36 = vsel %vm14580_vm14, %v5442_v43, %v5441_v27  ;;  %v4829_v47 = vunpack.c.h.b16 %v4222_v4  ;;  %14581 = vst [vmem:[#allocation39_spill] sm:$0xff] %v10031_v6  ;;  %v4223_v11 = vpack.c.bf16 %v14584_v46, %v14583_v59  ;;  %v14586_v27 = vld [vmem:[#allocation117_spill] sm:$0xff]  ;;  %v10046_v4 = vpop.xlane.xlu0 %1411  ;;  %vm14602_vm1 = vmmov %vm14580_vm14 }
 0x388   :  { %14582 = vst [vmem:[#allocation32_spill] sm:$0xff] %v10033_v19  ;;  %v5445_v37 = vsel %vm3106_vm2, %v5444_v49, %v5443_v36  ;;  %v5448_v45 = vperm.slane %v4828_v63, %v7951_v14  ;;  %v10044_v43 = vpack.c.bf16 %v14586_v27, %v14585_v33  ;;  %v4840_v42 = vunpack.c.l.b16 %v4228_v57  ;;  %v14588_v49 = vld [vmem:[#allocation98_spill] sm:$0xff]  ;;  %v14589_v36 = vld [vmem:[#allocation97_spill] sm:$0xff] }
 0x389   :  { %14587 = vst [vmem:[#allocation31_spill] sm:$0xff] %v10046_v4  ;;  %v4841_v22 = vunpack.c.h.b16 %v4228_v57  ;;  %v1551_v17 = vsel %vm536_vm0, %v362_v21, 0.0  ;;  %v1548_v19 = vsel %vm536_vm0, %v361_v41, 0.0  ;;  %v10051_v6 = vperm.slane %v4806_v29, %v8040_v2  ;;  %v14590_v63 = vld [vmem:[#allocation110_spill] sm:$0xff]  ;;  %v14591_v46 = vld [vmem:[#allocation109_spill] sm:$0xff] }
 0x38a   :  { %v10055_v59 = vpack.c.bf16 %v14589_v36, %v14588_v49  ;;  %v4224_v7 = vpack.c.bf16 %v14591_v46, %v14590_v63  ;;  %v1545_v33 = vsel %vm536_vm0, %v360_v8, 0.0  ;;  %v5429_v27 = vperm.slane %v4818_v16, %v8016_v31  ;;  %v14593_v49 = vld [vmem:[#allocation122_spill] sm:$0xff]  ;;  %v14594_v36 = vld [vmem:[#allocation121_spill] sm:$0xff]  ;;  %1552 = vadd.xlane.f32.xlu2 %v1551_v17  ;;  %1549 = vadd.xlane.f32.xlu1 %v1548_v19  ;;  %v365_v17 = vld [vmem:[%s13571_s0 + $0xaa8] sm:$0xff] }
 0x38b   :  { %vm14592_vm11 = vcmask 654912   ;;  %v5447_v21 = vsel %vm3110_vm3, %v5446_v3, %v5445_v37  ;;  %v5450_v41 = vperm.slane %v4829_v47, %v7965_v32  ;;  %v4830_v4 = vunpack.c.l.b16 %v4223_v11  ;;  %1546 = vadd.xlane.f32.xlu0 %v1545_v33  ;;  %v14598_v63 = vld [vmem:[#allocation113_spill] sm:$0xff] }
 0x38c   :  { %v5428_v57 = vsel %vm14592_vm11, %v5427_v54, %v5426_v0  ;;  %v5449_v29 = vsel %vm3114_vm4, %v5448_v45, %v5447_v21  ;;  %v4842_v40 = vunpack.c.l.b16 %v10044_v43  ;;  %v10068_v10 = vpack.c.bf16 %v14594_v36, %v14593_v49 }
 0x38d   :  { %v5403_v8 = vsel %vm3146_vm12, %v5402_v12, %v5401_v58  ;;  %v5404_v16 = vperm.slane %v4805_v62, %v8046_v44  ;;  %v5472_v54 = vperm.slane %v4840_v42, %v7904_v61  ;;  %v5473_v0 = vperm.slane %v4841_v22, %v7907_v50  ;;  %v364_v58 = vld [vmem:[%s13571_s0 + $0xaa0] sm:$0xff]  ;;  %v14595_v62 = vld [vmem:[#allocation96_spill] sm:$0xff]  ;;  %v14596_v12 = vld [vmem:[#allocation101_spill] sm:$0xff] }
 0x38e   :  { %v4819_v3 = vunpack.c.h.b16 %v10002_v34  ;;  %v5430_v47 = vsel %vm3138_vm10, %v5429_v27, %v5428_v57  ;;  %v4820_v37 = vunpack.c.l.b16 %v10055_v59  ;;  %v4832_v45 = vunpack.c.l.b16 %v4224_v7  ;;  %v14597_v22 = vld [vmem:[#allocation108_spill] sm:$0xff]  ;;  %v10090_v33 = vpop.xlane.xlu2 %1426  ;;  %v10092_v27 = vpop.xlane.xlu1 %1423  ;;  %v363_v57 = vld [vmem:[%s13571_s0 + $0xa98] sm:$0xff] }
 0x38f   :  { %v10085_v19 = vpack.c.bf16 %v14596_v12, %v14595_v62  ;;  %v4831_v42 = vunpack.c.h.b16 %v4223_v11  ;;  %v5451_v34 = vsel %vm3118_vm5, %v5450_v41, %v5449_v29  ;;  %v4225_v46 = vpack.c.bf16 %v14598_v63, %v14597_v22  ;;  %14599 = vst [vmem:[#allocation44_spill] sm:$0xff] %v10090_v33  ;;  %v10101_v41 = vpop.xlane.xlu0 %1420  ;;  %v14603_v62 = vld [vmem:[#allocation120_spill] sm:$0xff]  ;;  %v14604_v12 = vld [vmem:[#allocation125_spill] sm:$0xff] }
 0x390   :  { %14600 = vst [vmem:[#allocation43_spill] sm:$0xff] %v10092_v27  ;;  %v5452_v21 = vperm.slane %v4830_v4, %v7980_v51  ;;  %v4843_v49 = vunpack.c.h.b16 %v10044_v43  ;;  %v5475_v36 = vperm.slane %v4842_v40, %v7931_v13  ;;  %v4844_v11 = vunpack.c.l.b16 %v10068_v10 }
 0x391   :  { %14601 = vst [vmem:[#allocation42_spill] sm:$0xff] %v10101_v41  ;;  %v5474_v29 = vsel %vm14602_vm1, %v5473_v0, %v5472_v54  ;;  %v4231_v22 = vpack.c.bf16 %v14604_v12, %v14603_v62  ;;  %v1560_v63 = vsel %vm536_vm0, %v365_v17, 0.0  ;;  %v1557_v33 = vsel %vm536_vm0, %v364_v58, 0.0 }
 0x392   :  { %vm14605_vm9 = vcmask 458112   ;;  %v4833_v4 = vunpack.c.h.b16 %v4224_v7  ;;  %v5456_v43 = vperm.slane %v4832_v45, %v7985_v25  ;;  %v1554_v40 = vsel %vm536_vm0, %v363_v57, 0.0  ;;  %1561 = vadd.xlane.f32.xlu2 %v1560_v63  ;;  %1558 = vadd.xlane.f32.xlu1 %v1557_v33  ;;  %v368_v33 = vld [vmem:[%s13571_s0 + $0xac0] sm:$0xff]  ;;  %v14610_v57 = vld [vmem:[#allocation111_spill] sm:$0xff] }
 0x393   :  { %v5453_v27 = vsel %vm14605_vm9, %v5452_v21, %v5451_v34  ;;  %v5405_v60 = vsel %vm3150_vm13, %v5404_v16, %v5403_v8  ;;  %v5431_v41 = vperm.slane %v4819_v3, %v8006_v24  ;;  %v5454_v54 = vperm.slane %v4831_v42, %v7991_v39  ;;  %1555 = vadd.xlane.f32.xlu0 %v1554_v40  ;;  %v14611_v40 = vld [vmem:[#allocation124_spill] sm:$0xff]  ;;  %vm14616_vm1 = vmmov %vm14605_vm9 }
 0x394   :  { %v4834_v0 = vunpack.c.l.b16 %v4225_v46  ;;  %v4821_v62 = vunpack.c.h.b16 %v10055_v59  ;;  %v5476_v17 = vsel %vm3106_vm2, %v5475_v36, %v5474_v29  ;;  %v4845_v58 = vunpack.c.h.b16 %v10068_v10  ;;  %v366_v29 = vld [vmem:[%s13571_s0 + $0xab0] sm:$0xff] }
 0x395   :  { %v5479_v34 = vperm.slane %v4844_v11, %v7951_v14  ;;  %vm14606_vm6 = vcmask 786112   ;;  %vm14607_vm8 = vcmask 523712   ;;  %v5477_v8 = vperm.slane %v4843_v49, %v7940_v48 }
 0x396   :  { %v5432_v7 = vsel %vm14606_vm6, %v5431_v41, %v5430_v47  ;;  %v5455_v45 = vsel %vm14607_vm8, %v5454_v54, %v5453_v27  ;;  %v4846_v16 = vunpack.c.l.b16 %v4231_v22  ;;  %v5433_v3 = vperm.slane %v4820_v37, %v8049_v15  ;;  %v367_v47 = vld [vmem:[%s13571_s0 + $0xab8] sm:$0xff]  ;;  %v14609_v27 = vld [vmem:[#allocation112_spill] sm:$0xff]  ;;  %v10135_v11 = vpop.xlane.xlu2 %1435  ;;  %v10137_v41 = vpop.xlane.xlu1 %1432  ;;  %v14612_v54 = vld [vmem:[#allocation123_spill] sm:$0xff] }
 0x397   :  { %v4822_v59 = vunpack.c.l.b16 %v10085_v19  ;;  %vm14608_vm14 = vcmask 589312   ;;  %v5458_v10 = vperm.slane %v4833_v4, %v8019_v53  ;;  %v4226_v21 = vpack.c.bf16 %v14610_v57, %v14609_v27 }
 0x398   :  { %v5457_v42 = vsel %vm14608_vm14, %v5456_v43, %v5455_v45  ;;  %v4835_v49 = vunpack.c.h.b16 %v4225_v46  ;;  %v5460_v37 = vperm.slane %v4834_v0, %v8016_v31  ;;  %v5478_v36 = vsel %vm3110_vm3, %v5477_v8, %v5476_v17  ;;  %v10145_v46 = vpop.xlane.xlu0 %1429 }
 0x399   :  { %v5435_v12 = vperm.slane %v4821_v62, %v8046_v44  ;;  %v5480_v63 = vsel %vm3114_vm4, %v5479_v34, %v5478_v36  ;;  %v5481_v4 = vperm.slane %v4845_v58, %v7965_v32  ;;  %v4847_v43 = vunpack.c.h.b16 %v4231_v22 }
 0x39a   :  { %v4232_v0 = vpack.c.bf16 %v14612_v54, %v14611_v40  ;;  %v5483_v17 = vperm.slane %v4846_v16, %v7980_v51  ;;  %v1569_v45 = vsel %vm536_vm0, %v368_v33, 0.0  ;;  %v1566_v8 = vsel %vm536_vm0, %v367_v47, 0.0  ;;  %v14613_v47 = vld [vmem:[#allocation134_spill] sm:$0xff]  ;;  %v14614_v54 = vld [vmem:[#allocation133_spill] sm:$0xff] }
 0x39b   :  { %v5434_v27 = vsel %vm3146_vm12, %v5433_v3, %v5432_v7  ;;  %v4823_v62 = vunpack.c.h.b16 %v10085_v19  ;;  %v5459_v34 = vsel %vm14592_vm11, %v5458_v10, %v5457_v42  ;;  %v1563_v58 = vsel %vm536_vm0, %v366_v29, 0.0  ;;  %1570 = vadd.xlane.f32.xlu2 %v1569_v45  ;;  %1567 = vadd.xlane.f32.xlu1 %v1566_v8  ;;  %v14617_v10 = vld [vmem:[#allocation132_spill] sm:$0xff] }
 0x39c   :  { %v5437_v22 = vperm.slane %v4822_v59, %v8040_v2  ;;  %v4836_v57 = vunpack.c.l.b16 %v4226_v21  ;;  %v5461_v36 = vsel %vm3138_vm10, %v5460_v37, %v5459_v34  ;;  %v5462_v40 = vperm.slane %v4835_v49, %v8006_v24  ;;  %v14618_v37 = vld [vmem:[#allocation137_spill] sm:$0xff]  ;;  %1564 = vadd.xlane.f32.xlu0 %v1563_v58 }
 0x39d   :  { %v5482_v16 = vsel %vm3118_vm5, %v5481_v4, %v5480_v63  ;;  %v5485_v33 = vperm.slane %v4847_v43, %v7991_v39  ;;  %v4236_v7 = vpack.c.bf16 %v14614_v54, %v14613_v47  ;;  %v14615_v19 = vunpack.c.h.b16 %v9988_v35  ;;  %v371_v35 = vld [vmem:[%s13571_s0 + $0xad8] sm:$0xff] }
 0x39e   :  { %v4848_v42 = vunpack.c.l.b16 %v4232_v0  ;;  %v5484_v59 = vsel %vm14616_vm1, %v5483_v17, %v5482_v16  ;;  %v4237_v29 = vpack.c.bf16 %v14618_v37, %v14617_v10  ;;  %vm14619_vm9 = vcmask 982912   ;;  %v370_v17 = vld [vmem:[%s13571_s0 + $0xad0] sm:$0xff] }
 0x39f   :  { %v5408_v3 = vperm.slane %v14615_v19, %v8093_v55  ;;  %v5407_v49 = vsel %vm14619_vm9, %v10051_v6, %v5405_v60  ;;  %v5436_v63 = vsel %vm3150_vm13, %v5435_v12, %v5434_v27  ;;  %v5439_v4 = vperm.slane %v4823_v62, %v8093_v55  ;;  %vm14620_vm6 = vmmov %vm14619_vm9  ;;  %v14622_v60 = vld [vmem:[#allocation128_spill] sm:$0xff]  ;;  %v14623_v6 = vld [vmem:[#allocation127_spill] sm:$0xff]  ;;  %v10184_v27 = vpop.xlane.xlu2 %1444 }
 0x3a0   :  { %v4837_v43 = vunpack.c.h.b16 %v4226_v21  ;;  %v5438_v45 = vsel %vm14620_vm6, %v5437_v22, %v5436_v63  ;;  %v5464_v8 = vperm.slane %v4836_v57, %v8049_v15  ;;  %vm14621_vm8 = vcmask 786112   ;;  %14624 = vst [vmem:[#allocation47_spill] sm:$0xff] %v10184_v27  ;;  %v10186_v21 = vpop.xlane.xlu1 %1441  ;;  %v369_v62 = vld [vmem:[%s13571_s0 + $0xac8] sm:$0xff]  ;;  %v10192_v54 = vpop.xlane.xlu0 %1438  ;;  %v14651_v27 = vld [vmem:[#allocation150_spill] sm:$0xff] }
 0x3a1   :  { %v5463_v34 = vsel %vm14621_vm8, %v5462_v40, %v5461_v36  ;;  %v4233_v12 = vpack.c.bf16 %v14623_v6, %v14622_v60  ;;  %v4849_v58 = vunpack.c.h.b16 %v4232_v0  ;;  %vm14625_vm14 = vcmask 523712  }
 0x3a2   :  { %v5486_v16 = vsel %vm14625_vm14, %v5485_v33, %v5484_v59  ;;  %v4856_v47 = vunpack.c.l.b16 %v4236_v7  ;;  %v4857_v22 = vunpack.c.h.b16 %v4236_v7  ;;  %v5487_v57 = vperm.slane %v4848_v42, %v7985_v25  ;;  %v14628_v7 = vld [vmem:[#allocation115_spill] sm:$0xff] }
 0x3a3   :  { %v4858_v36 = vunpack.c.l.b16 %v4237_v29  ;;  %v1578_v40 = vsel %vm536_vm0, %v371_v35, 0.0  ;;  %v1575_v19 = vsel %vm536_vm0, %v370_v17, 0.0  ;;  %vm14626_vm11 = vcmask 1048512  }
 0x3a4   :  { %v5440_v10 = vsel %vm14626_vm11, %v5439_v4, %v5438_v45  ;;  %v5466_v37 = vperm.slane %v4837_v43, %v8046_v44  ;;  %v1572_v63 = vsel %vm536_vm0, %v369_v62, 0.0  ;;  %vm14627_vm1 = vmmov %vm14626_vm11  ;;  %v5465_v33 = vsel %vm3146_vm12, %v5464_v8, %v5463_v34  ;;  %v14630_v4 = vld [vmem:[#allocation136_spill] sm:$0xff]  ;;  %v14631_v45 = vld [vmem:[#allocation135_spill] sm:$0xff]  ;;  %1579 = vadd.xlane.f32.xlu2 %v1578_v40  ;;  %1576 = vadd.xlane.f32.xlu1 %v1575_v19 }
 0x3a5   :  { %v5409_v0 = vsel %vm14627_vm1, %v5408_v3, %v5407_v49  ;;  %v10204_v59 = vpack.c.bf16 %v14628_v7, %v14275_v9  ;;  %vm14629_vm9 = vcmask 589312   ;;  %v4850_v60 = vunpack.c.l.b16 %v4233_v12  ;;  %1573 = vadd.xlane.f32.xlu0 %v1572_v63  ;;  %v372_v63 = vld [vmem:[%s13571_s0 + $0xae0] sm:$0xff]  ;;  %v14643_v7 = vld [vmem:[#allocation148_spill] sm:$0xff] }
 0x3a6   :  { %v5488_v42 = vsel %vm14629_vm9, %v5487_v57, %v5486_v16  ;;  %v5503_v35 = vperm.slane %v4856_v47, %v7904_v61  ;;  %v5504_v17 = vperm.slane %v4857_v22, %v7907_v50  ;;  %v4238_v43 = vpack.c.bf16 %v14631_v45, %v14630_v4  ;;  %v14636_v16 = vld [vmem:[#allocation131_spill] sm:$0xff]  ;;  %v14639_v57 = vld [vmem:[#allocation140_spill] sm:$0xff] }
 0x3a7   :  { %v4859_v6 = vunpack.c.h.b16 %v4237_v29  ;;  %v5489_v3 = vperm.slane %v4849_v58, %v8019_v53  ;;  %v5506_v49 = vperm.slane %v4858_v36, %v7931_v13  ;;  %vm14632_vm6 = vcmask 1042434   ;;  %v14635_v29 = vld [vmem:[#allocation126_spill] sm:$0xff]  ;;  %v374_v58 = vld [vmem:[%s13571_s0 + $0xaf0] sm:$0xff]  ;;  %v14640_v36 = vld [vmem:[#allocation139_spill] sm:$0xff]  ;;  %v10241_v19 = vpop.xlane.xlu2 %1453 }
 0x3a8   :  { %v6217_v9 = vsel %vm14632_vm6, %v10009_v56, %v9917_v30  ;;  %vm14633_vm8 = vmmov %vm14632_vm6  ;;  %v10221_v34 = vsel %vm3150_vm13, %v5466_v37, %v5465_v33  ;;  %v4851_v62 = vunpack.c.h.b16 %v4233_v12  ;;  %v10225_v47 = vpack.c.bf16 %v14636_v16, %v14635_v29  ;;  %v373_v30 = vld [vmem:[%s13571_s0 + $0xae8] sm:$0xff]  ;;  %v10243_v37 = vpop.xlane.xlu1 %1450 }
 0x3a9   :  { %v10218_v8 = vsel %vm14633_vm8, %v5409_v0, %v9920_v38  ;;  %vm14637_vm14 = vcmask 1043459   ;;  %v4838_v38 = vunpack.c.l.b16 %v10204_v59  ;;  %vm14638_vm11 = vcmask 654912   ;;  %14641 = vst [vmem:[#allocation19_spill] sm:$0xff] %v10243_v37 }
 0x3aa   :  { %14634 = vst [vmem:[#allocation20_spill] sm:$0xff] %v10218_v8  ;;  %v10234_v56 = vsel %vm14637_vm14, %v5440_v10, %v6217_v9  ;;  %v5490_v22 = vsel %vm14638_vm11, %v5489_v3, %v5488_v42  ;;  %v5491_v12 = vperm.slane %v4850_v60, %v8016_v31  ;;  %v4239_v40 = vpack.c.bf16 %v14640_v36, %v14639_v57  ;;  %v14644_v42 = vld [vmem:[#allocation147_spill] sm:$0xff]  ;;  %v10252_v60 = vpop.xlane.xlu0 %1447  ;;  %v14646_v3 = vld [vmem:[#allocation152_spill] sm:$0xff] }
 0x3ab   :  { %vm14642_vm1 = vcmask 130112   ;;  %v4860_v0 = vunpack.c.l.b16 %v4238_v43  ;;  %v5508_v33 = vperm.slane %v4859_v6, %v7940_v48  ;;  %v4244_v4 = vpack.c.bf16 %v14644_v42, %v14643_v7  ;;  %14645 = vst [vmem:[#allocation52_spill] sm:$0xff] %v10252_v60  ;;  %v14647_v9 = vld [vmem:[#allocation151_spill] sm:$0xff] }
 0x3ac   :  { %v5505_v10 = vsel %vm14642_vm1, %v5504_v17, %v5503_v35  ;;  %v4245_v29 = vpack.c.bf16 %v14647_v9, %v14646_v3  ;;  %v1587_v16 = vsel %vm536_vm0, %v374_v58, 0.0  ;;  %v1584_v57 = vsel %vm536_vm0, %v373_v30, 0.0  ;;  %v14648_v35 = vld [vmem:[#allocation130_spill] sm:$0xff]  ;;  %v14649_v17 = vld [vmem:[#allocation129_spill] sm:$0xff]  ;;  %vm14657_vm8 = vmmov %vm14642_vm1 }
 0x3ad   :  { %v5507_v45 = vsel %vm3106_vm2, %v5506_v49, %v5505_v10  ;;  %v5493_v36 = vperm.slane %v4851_v62, %v8006_v24  ;;  %v10262_v8 = vpack.c.bf16 %v14649_v17, %v14648_v35  ;;  %v4852_v6 = vunpack.c.l.b16 %v10225_v47  ;;  %v14650_v9 = vld [vmem:[#allocation138_spill] sm:$0xff]  ;;  %1588 = vadd.xlane.f32.xlu2 %v1587_v16  ;;  %1585 = vadd.xlane.f32.xlu1 %v1584_v57  ;;  %v375_v57 = vld [vmem:[%s13571_s0 + $0xaf8] sm:$0xff] }
 0x3ae   :  { %v1581_v7 = vsel %vm536_vm0, %v372_v63, 0.0  ;;  %v4839_v42 = vunpack.c.h.b16 %v10204_v59  ;;  %v5492_v49 = vsel %vm3138_vm10, %v5491_v12, %v5490_v22  ;;  %v4861_v10 = vunpack.c.h.b16 %v4238_v43  ;;  %v14652_v59 = vld [vmem:[#allocation155_spill] sm:$0xff] }
 0x3af   :  { %v4862_v3 = vunpack.c.l.b16 %v4239_v40  ;;  %v5509_v58 = vsel %vm3110_vm3, %v5508_v33, %v5507_v45  ;;  %v4240_v30 = vpack.c.bf16 %v14298_v18, %v14650_v9  ;;  %v4872_v62 = vunpack.c.l.b16 %v4244_v4  ;;  %1582 = vadd.xlane.f32.xlu0 %v1581_v7  ;;  %v377_v33 = vld [vmem:[%s13571_s0 + $0xb08] sm:$0xff]  ;;  %v10288_v16 = vpop.xlane.xlu2 %1462 }
 0x3b0   :  { %v4873_v60 = vunpack.c.h.b16 %v4244_v4  ;;  %v5468_v35 = vperm.slane %v4838_v38, %v8040_v2  ;;  %v5510_v17 = vperm.slane %v4860_v0, %v7951_v14  ;;  %v4874_v63 = vunpack.c.l.b16 %v4245_v29  ;;  %v376_v38 = vld [vmem:[%s13571_s0 + $0xb00] sm:$0xff]  ;;  %14654 = vst [vmem:[#allocation51_spill] sm:$0xff] %v10288_v16 }
 0x3b1   :  { %v4246_v37 = vpack.c.bf16 %v14652_v59, %v14651_v27  ;;  %vm14653_vm9 = vcmask 786112   ;;  %v4854_v22 = vunpack.c.l.b16 %v10262_v8  ;;  %v4853_v12 = vunpack.c.h.b16 %v10225_v47  ;;  %v10290_v47 = vpop.xlane.xlu1 %1459 }
 0x3b2   :  { %v5494_v43 = vsel %vm14653_vm9, %v5493_v36, %v5492_v49  ;;  %v5495_v18 = vperm.slane %v4852_v6, %v8049_v15  ;;  %v5512_v0 = vperm.slane %v4861_v10, %v7965_v32  ;;  %v5511_v27 = vsel %vm3114_vm4, %v5510_v17, %v5509_v58  ;;  %14655 = vst [vmem:[#allocation56_spill] sm:$0xff] %v10290_v47  ;;  %v10297_v10 = vpop.xlane.xlu0 %1456 }
 0x3b3   :  { %v4863_v4 = vunpack.c.h.b16 %v4239_v40  ;;  %v5514_v45 = vperm.slane %v4862_v3, %v7980_v51  ;;  %v4864_v36 = vunpack.c.l.b16 %v4240_v30  ;;  %v5534_v6 = vperm.slane %v4872_v62, %v7904_v61 }
 0x3b4   :  { %v5535_v7 = vperm.slane %v4873_v60, %v7907_v50  ;;  %v4875_v49 = vunpack.c.h.b16 %v4245_v29  ;;  %v5537_v40 = vperm.slane %v4874_v63, %v7931_v13  ;;  %v4876_v58 = vunpack.c.l.b16 %v4246_v37 }
 0x3b5   :  { %v1596_v3 = vsel %vm536_vm0, %v377_v33, 0.0  ;;  %v1593_v9 = vsel %vm536_vm0, %v376_v38, 0.0  ;;  %v5496_v17 = vsel %vm3146_vm12, %v5495_v18, %v5494_v43  ;;  %v5497_v59 = vperm.slane %v4853_v12, %v8046_v44 }
 0x3b6   :  { %v5513_v16 = vsel %vm3118_vm5, %v5512_v0, %v5511_v27  ;;  %v1590_v62 = vsel %vm536_vm0, %v375_v57, 0.0  ;;  %vm14656_vm6 = vcmask 458112   ;;  %v5516_v29 = vperm.slane %v4863_v4, %v7991_v39  ;;  %1597 = vadd.xlane.f32.xlu2 %v1596_v3  ;;  %1594 = vadd.xlane.f32.xlu1 %v1593_v9  ;;  %v14658_v27 = vld [vmem:[#allocation154_spill] sm:$0xff]  ;;  %v379_v57 = vld [vmem:[%s13571_s0 + $0xb18] sm:$0xff] }
 0x3b7   :  { %v5515_v60 = vsel %vm14656_vm6, %v5514_v45, %v5513_v16  ;;  %v4241_v63 = vpack.c.bf16 %v14329_v52, %v14291_v5  ;;  %v4865_v47 = vunpack.c.h.b16 %v4240_v30  ;;  %v5518_v33 = vperm.slane %v4864_v36, %v7985_v25  ;;  %v14659_v45 = vld [vmem:[#allocation153_spill] sm:$0xff]  ;;  %1591 = vadd.xlane.f32.xlu0 %v1590_v62 }
 0x3b8   :  { %v5536_v38 = vsel %vm14657_vm8, %v5535_v7, %v5534_v6  ;;  %v5539_v43 = vperm.slane %v4875_v49, %v7940_v48  ;;  %v4877_v18 = vunpack.c.h.b16 %v4246_v37  ;;  %v5470_v12 = vperm.slane %v4839_v42, %v8093_v55  ;;  %v380_v42 = vld [vmem:[%s13571_s0 + $0xb20] sm:$0xff]  ;;  %v10333_v49 = vpop.xlane.xlu2 %1471 }
 0x3b9   :  { %v5538_v0 = vsel %vm3106_vm2, %v5537_v40, %v5536_v38  ;;  %v4247_v4 = vpack.c.bf16 %v14659_v45, %v14658_v27  ;;  %v5541_v16 = vperm.slane %v4876_v58, %v7951_v14  ;;  %vm14660_vm14 = vcmask 982912   ;;  %v378_v40 = vld [vmem:[%s13571_s0 + $0xb10] sm:$0xff] }
 0x3ba   :  { %v5469_v5 = vsel %vm14660_vm14, %v5468_v35, %v10221_v34  ;;  %v4855_v52 = vunpack.c.h.b16 %v10262_v8  ;;  %v5499_v30 = vperm.slane %v4854_v22, %v8040_v2  ;;  %v5498_v37 = vsel %vm3150_vm13, %v5497_v59, %v5496_v17  ;;  %v14662_v34 = vld [vmem:[#allocation158_spill] sm:$0xff]  ;;  %v14663_v35 = vld [vmem:[#allocation157_spill] sm:$0xff]  ;;  %v10335_v22 = vpop.xlane.xlu1 %1468  ;;  %v14666_v17 = vld [vmem:[#allocation163_spill] sm:$0xff]  ;;  %v10345_v62 = vpop.xlane.xlu0 %1465 }
 0x3bb   :  { %vm14661_vm11 = vcmask 523712   ;;  %v4866_v6 = vunpack.c.l.b16 %v4241_v63  ;;  %v5520_v7 = vperm.slane %v4865_v47, %v8019_v53  ;;  %v4248_v8 = vpack.c.bf16 %v14663_v35, %v14662_v34  ;;  %14664 = vst [vmem:[#allocation55_spill] sm:$0xff] %v10335_v22  ;;  %v14667_v59 = vld [vmem:[#allocation169_spill] sm:$0xff]  ;;  %v14670_v35 = vld [vmem:[#allocation162_spill] sm:$0xff]  ;;  %vm14671_vm6 = vmmov %vm14660_vm14 }
 0x3bc   :  { %v5517_v36 = vsel %vm14661_vm11, %v5516_v29, %v5515_v60  ;;  %vm14665_vm1 = vcmask 589312   ;;  %v5540_v3 = vsel %vm3110_vm3, %v5539_v43, %v5538_v0  ;;  %v5543_v9 = vperm.slane %v4877_v18, %v7965_v32 }
 0x3bd   :  { %v5519_v58 = vsel %vm14665_vm1, %v5518_v33, %v5517_v36  ;;  %v4252_v47 = vpack.c.bf16 %v14667_v59, %v14666_v17  ;;  %v4878_v60 = vunpack.c.l.b16 %v4247_v4  ;;  %v5542_v29 = vsel %vm3114_vm4, %v5541_v16, %v5540_v3  ;;  %v14669_v36 = vld [vmem:[#allocation156_spill] sm:$0xff] }
 0x3be   :  { %v1605_v38 = vsel %vm536_vm0, %v380_v42, 0.0  ;;  %v1602_v27 = vsel %vm536_vm0, %v379_v57, 0.0  ;;  %v5501_v45 = vperm.slane %v4855_v52, %v8093_v55  ;;  %v4867_v34 = vunpack.c.h.b16 %v4241_v63  ;;  %v14672_v3 = vld [vmem:[#allocation168_spill] sm:$0xff] }
 0x3bf   :  { %v4242_v33 = vpack.c.bf16 %v14346_v20, %v14347_v23  ;;  %v1599_v43 = vsel %vm536_vm0, %v378_v40, 0.0  ;;  %vm14668_vm9 = vcmask 654912   ;;  %v4880_v0 = vunpack.c.l.b16 %v4248_v8  ;;  %1606 = vadd.xlane.f32.xlu2 %v1605_v38  ;;  %1603 = vadd.xlane.f32.xlu1 %v1602_v27 }
 0x3c0   :  { %v5521_v18 = vsel %vm14668_vm9, %v5520_v7, %v5519_v58  ;;  %v10357_v17 = vpack.c.bf16 %v14670_v35, %v14669_v36  ;;  %v5500_v16 = vsel %vm14671_vm6, %v5499_v30, %v5498_v37  ;;  %v4879_v42 = vunpack.c.h.b16 %v4247_v4  ;;  %1600 = vadd.xlane.f32.xlu0 %v1599_v43  ;;  %v382_v58 = vld [vmem:[%s13571_s0 + $0xb30] sm:$0xff] }
 0x3c1   :  { %v5544_v57 = vsel %vm3118_vm5, %v5543_v9, %v5542_v29  ;;  %v10363_v63 = vpack.c.bf16 %v14309_v28, %v14672_v3  ;;  %v4888_v52 = vunpack.c.l.b16 %v4252_v47  ;;  %vm14673_vm8 = vcmask 1048512   ;;  %v383_v28 = vld [vmem:[%s13571_s0 + $0xb38] sm:$0xff] }
 0x3c2   :  { %v10366_v20 = vsel %vm14673_vm8, %v5470_v12, %v5469_v5  ;;  %v5522_v23 = vperm.slane %v4866_v6, %v8016_v31  ;;  %v5545_v7 = vperm.slane %v4878_v60, %v7980_v51  ;;  %v4889_v40 = vunpack.c.h.b16 %v4252_v47  ;;  %vm14675_vm14 = vmmov %vm14673_vm8  ;;  %v10386_v47 = vpop.xlane.xlu1 %1477  ;;  %v381_v60 = vld [vmem:[%s13571_s0 + $0xb28] sm:$0xff]  ;;  %v14682_v3 = vld [vmem:[#allocation161_spill] sm:$0xff] }
 0x3c3   :  { %14674 = vst [vmem:[#allocation30_spill] sm:$0xff] %v10366_v20  ;;  %v5524_v4 = vperm.slane %v4867_v34, %v8006_v24  ;;  %v4868_v30 = vunpack.c.l.b16 %v4242_v33  ;;  %v4881_v37 = vunpack.c.h.b16 %v4248_v8  ;;  %v10378_v12 = vsel %vm14675_vm14, %v5501_v45, %v5500_v16  ;;  %v10384_v8 = vpop.xlane.xlu2 %1480  ;;  %v10394_v34 = vpop.xlane.xlu0 %1474 }
 0x3c4   :  { %v5523_v5 = vsel %vm3138_vm10, %v5522_v23, %v5521_v18  ;;  %vm14676_vm11 = vcmask 458112   ;;  %v5549_v9 = vperm.slane %v4880_v0, %v7985_v25  ;;  %v4882_v59 = vunpack.c.l.b16 %v10357_v17  ;;  %14677 = vst [vmem:[#allocation35_spill] sm:$0xff] %v10384_v8 }
 0x3c5   :  { %v5546_v6 = vsel %vm14676_vm11, %v5545_v7, %v5544_v57  ;;  %14678 = vst [vmem:[#allocation46_spill] sm:$0xff] %v10386_v47  ;;  %v4869_v29 = vunpack.c.h.b16 %v4242_v33  ;;  %v5547_v38 = vperm.slane %v4879_v42, %v7991_v39  ;;  %v4890_v27 = vunpack.c.l.b16 %v10363_v63  ;;  %v14780_v47 = vld [vmem:[#allocation220_spill] sm:$0xff] }
 0x3c6   :  { %v5565_v45 = vperm.slane %v4888_v52, %v7904_v61  ;;  %14679 = vst [vmem:[#allocation45_spill] sm:$0xff] %v10394_v34  ;;  %v5566_v43 = vperm.slane %v4889_v40, %v7907_v50  ;;  %v4254_v18 = vpack.c.bf16 %v14316_v1, %v14310_v26  ;;  %v1614_v0 = vsel %vm536_vm0, %v383_v28, 0.0  ;;  %v14683_v52 = vld [vmem:[#allocation160_spill] sm:$0xff]  ;;  %v14685_v28 = vld [vmem:[#allocation190_spill] sm:$0xff] }
 0x3c7   :  { %v1611_v36 = vsel %vm536_vm0, %v382_v58, 0.0  ;;  %v5526_v35 = vperm.slane %v4868_v30, %v8049_v15  ;;  %vm14680_vm1 = vcmask 523712   ;;  %v5551_v16 = vperm.slane %v4881_v37, %v8019_v53  ;;  %v14686_v37 = vld [vmem:[#allocation189_spill] sm:$0xff]  ;;  %1615 = vadd.xlane.f32.xlu2 %v1614_v0 }
 0x3c8   :  { %v5548_v33 = vsel %vm14680_vm1, %v5547_v38, %v5546_v6  ;;  %v1608_v42 = vsel %vm536_vm0, %v381_v60, 0.0  ;;  %vm14681_vm9 = vcmask 589312   ;;  %v10408_v23 = vpack.c.bf16 %v14683_v52, %v14682_v3  ;;  %1612 = vadd.xlane.f32.xlu1 %v1611_v36  ;;  %v14689_v38 = vld [vmem:[#allocation194_spill] sm:$0xff]  ;;  %v14693_v36 = vld [vmem:[#allocation171_spill] sm:$0xff] }
 0x3c9   :  { %v5550_v57 = vsel %vm14681_vm9, %v5549_v9, %v5548_v33  ;;  %v4883_v26 = vunpack.c.h.b16 %v10357_v17  ;;  %v5553_v1 = vperm.slane %v4882_v59, %v8016_v31  ;;  %vm14684_vm6 = vcmask 786112   ;;  %v14688_v17 = vld [vmem:[#allocation188_spill] sm:$0xff]  ;;  %1609 = vadd.xlane.f32.xlu0 %v1608_v42  ;;  %v14694_v33 = vld [vmem:[#allocation177_spill] sm:$0xff] }
 0x3ca   :  { %v5525_v7 = vsel %vm14684_vm6, %v5524_v4, %v5523_v5  ;;  %v4891_v40 = vunpack.c.h.b16 %v10363_v63  ;;  %v5568_v30 = vperm.slane %v4890_v27, %v7931_v13  ;;  %v4260_v58 = vpack.c.bf16 %v14686_v37, %v14685_v28  ;;  %v14690_v63 = vld [vmem:[#allocation144_spill] sm:$0xff]  ;;  %v14691_v5 = vld [vmem:[#allocation149_spill] sm:$0xff]  ;;  %vm14698_vm11 = vmmov %vm14684_vm6 }
 0x3cb   :  { %v10418_v6 = vperm.slane %v4869_v29, %v8046_v44  ;;  %vm14687_vm8 = vcmask 130112   ;;  %v4892_v60 = vunpack.c.l.b16 %v4254_v18  ;;  %v4261_v59 = vpack.c.bf16 %v14689_v38, %v14688_v17 }
 0x3cc   :  { %v5567_v9 = vsel %vm14687_vm8, %v5566_v43, %v5565_v45  ;;  %v10424_v4 = vsel %vm3146_vm12, %v5526_v35, %v5525_v7  ;;  %v10428_v27 = vpack.c.bf16 %v14691_v5, %v14690_v63  ;;  %vm14692_vm14 = vcmask 654912   ;;  %v386_v45 = vld [vmem:[%s13571_s0 + $0xb50] sm:$0xff]  ;;  %v385_v43 = vld [vmem:[%s13571_s0 + $0xb48] sm:$0xff]  ;;  %v10442_v7 = vpop.xlane.xlu2 %1489  ;;  %v10451_v63 = vpop.xlane.xlu0 %1483  ;;  %vm14709_vm1 = vmmov %vm14687_vm8 }
 0x3cd   :  { %v5552_v0 = vsel %vm14692_vm14, %v5551_v16, %v5550_v57  ;;  %v4255_v29 = vpack.c.bf16 %v14694_v33, %v14693_v36  ;;  %v4884_v35 = vunpack.c.l.b16 %v10408_v23  ;;  %v5555_v3 = vperm.slane %v4883_v26, %v8006_v24  ;;  %14695 = vst [vmem:[#allocation54_spill] sm:$0xff] %v10442_v7  ;;  %v10444_v16 = vpop.xlane.xlu1 %1486  ;;  %v384_v57 = vld [vmem:[%s13571_s0 + $0xb40] sm:$0xff] }
 0x3ce   :  { %v5554_v42 = vsel %vm3138_vm10, %v5553_v1, %v5552_v0  ;;  %v4893_v52 = vunpack.c.h.b16 %v4254_v18  ;;  %14696 = vst [vmem:[#allocation59_spill] sm:$0xff] %v10444_v16  ;;  %v5570_v28 = vperm.slane %v4891_v40, %v7940_v48  ;;  %v5569_v37 = vsel %vm3106_vm2, %v5568_v30, %v5567_v9  ;;  %v14699_v9 = vld [vmem:[#allocation165_spill] sm:$0xff] }
 0x3cf   :  { %v4904_v17 = vunpack.c.l.b16 %v4260_v58  ;;  %v4905_v38 = vunpack.c.h.b16 %v4260_v58  ;;  %14697 = vst [vmem:[#allocation50_spill] sm:$0xff] %v10451_v63  ;;  %v5572_v1 = vperm.slane %v4892_v60, %v7951_v14  ;;  %v4906_v26 = vunpack.c.l.b16 %v4261_v59  ;;  %v14700_v58 = vld [vmem:[#allocation164_spill] sm:$0xff] }
 0x3d0   :  { %v1623_v18 = vsel %vm536_vm0, %v386_v45, 0.0  ;;  %v1620_v5 = vsel %vm536_vm0, %v385_v43, 0.0  ;;  %v4870_v0 = vunpack.c.l.b16 %v10428_v27  ;;  %v4871_v36 = vunpack.c.h.b16 %v10428_v27 }
 0x3d1   :  { %v4894_v33 = vunpack.c.l.b16 %v4255_v29  ;;  %v1617_v40 = vsel %vm536_vm0, %v384_v57, 0.0  ;;  %v5556_v30 = vsel %vm14698_vm11, %v5555_v3, %v5554_v42  ;;  %v4251_v20 = vpack.c.bf16 %v14700_v58, %v14699_v9  ;;  %1624 = vadd.xlane.f32.xlu2 %v1623_v18  ;;  %1621 = vadd.xlane.f32.xlu1 %v1620_v5  ;;  %v14701_v42 = vld [vmem:[#allocation193_spill] sm:$0xff]  ;;  %v14702_v3 = vld [vmem:[#allocation192_spill] sm:$0xff]  ;;  %v14705_v18 = vld [vmem:[#allocation198_spill] sm:$0xff] }
 0x3d2   :  { %v5571_v63 = vsel %vm3110_vm3, %v5570_v28, %v5569_v37  ;;  %v5574_v60 = vperm.slane %v4893_v52, %v7965_v32  ;;  %v4895_v7 = vunpack.c.h.b16 %v4255_v29  ;;  %v5596_v45 = vperm.slane %v4904_v17, %v7904_v61  ;;  %1618 = vadd.xlane.f32.xlu0 %v1617_v40  ;;  %v14703_v28 = vld [vmem:[#allocation176_spill] sm:$0xff]  ;;  %v14704_v37 = vld [vmem:[#allocation175_spill] sm:$0xff] }
 0x3d3   :  { %v5597_v43 = vperm.slane %v4905_v38, %v7907_v50  ;;  %v4907_v16 = vunpack.c.h.b16 %v4261_v59  ;;  %v5557_v27 = vperm.slane %v4884_v35, %v8049_v15  ;;  %v5573_v57 = vsel %vm3114_vm4, %v5572_v1, %v5571_v63  ;;  %v389_v35 = vld [vmem:[%s13571_s0 + $0xb68] sm:$0xff]  ;;  %v388_v38 = vld [vmem:[%s13571_s0 + $0xb60] sm:$0xff] }
 0x3d4   :  { %v4262_v8 = vpack.c.bf16 %v14702_v3, %v14701_v42  ;;  %v5599_v9 = vperm.slane %v4906_v26, %v7931_v13  ;;  %v5530_v52 = vperm.slane %v4870_v0, %v8040_v2  ;;  %v4885_v29 = vunpack.c.h.b16 %v10408_v23  ;;  %v14706_v23 = vld [vmem:[#allocation197_spill] sm:$0xff]  ;;  %v10487_v0 = vpop.xlane.xlu2 %1498 }
 0x3d5   :  { %v10475_v17 = vpack.c.bf16 %v14704_v37, %v14703_v28  ;;  %v5576_v59 = vperm.slane %v4894_v33, %v7980_v51  ;;  %v5558_v63 = vsel %vm3146_vm12, %v5557_v27, %v5556_v30  ;;  %v4886_v1 = vunpack.c.l.b16 %v4251_v20  ;;  %14707 = vst [vmem:[#allocation49_spill] sm:$0xff] %v10487_v0  ;;  %v10489_v40 = vpop.xlane.xlu1 %1495  ;;  %v387_v33 = vld [vmem:[%s13571_s0 + $0xb58] sm:$0xff] }
 0x3d6   :  { %v4887_v26 = vunpack.c.h.b16 %v4251_v20  ;;  %v4263_v5 = vpack.c.bf16 %v14706_v23, %v14705_v18  ;;  %14708 = vst [vmem:[#allocation34_spill] sm:$0xff] %v10489_v40  ;;  %v5575_v58 = vsel %vm3118_vm5, %v5574_v60, %v5573_v57  ;;  %v5578_v42 = vperm.slane %v4895_v7, %v7991_v39  ;;  %v10498_v20 = vpop.xlane.xlu0 %1492  ;;  %v14712_v60 = vld [vmem:[#allocation182_spill] sm:$0xff]  ;;  %v14713_v57 = vld [vmem:[#allocation181_spill] sm:$0xff] }
 0x3d7   :  { %v5598_v3 = vsel %vm14709_vm1, %v5597_v43, %v5596_v45  ;;  %v5601_v30 = vperm.slane %v4907_v16, %v7940_v48  ;;  %14710 = vst [vmem:[#allocation33_spill] sm:$0xff] %v10498_v20  ;;  %v4908_v27 = vunpack.c.l.b16 %v4262_v8  ;;  %v1632_v37 = vsel %vm536_vm0, %v389_v35, 0.0  ;;  %v14715_v35 = vld [vmem:[#allocation202_spill] sm:$0xff] }
 0x3d8   :  { %v5600_v28 = vsel %vm3106_vm2, %v5599_v9, %v5598_v3  ;;  %v1629_v18 = vsel %vm536_vm0, %v388_v38, 0.0  ;;  %v4896_v23 = vunpack.c.l.b16 %v10475_v17  ;;  %vm14711_vm9 = vcmask 458112   ;;  %v14714_v3 = vld [vmem:[#allocation196_spill] sm:$0xff] }
 0x3d9   :  { %v5577_v40 = vsel %vm14711_vm9, %v5576_v59, %v5575_v58  ;;  %v4257_v7 = vpack.c.bf16 %v14713_v57, %v14712_v60  ;;  %v1626_v45 = vsel %vm536_vm0, %v387_v33, 0.0  ;;  %v5529_v16 = vsel %vm3150_vm13, %v10418_v6, %v10424_v4  ;;  %1633 = vadd.xlane.f32.xlu2 %v1632_v37  ;;  %1630 = vadd.xlane.f32.xlu1 %v1629_v18  ;;  %v14721_v18 = vld [vmem:[#allocation208_spill] sm:$0xff]  ;;  %vm14727_vm1 = vmmov %vm14711_vm9 }
 0x3da   :  { %v5559_v43 = vperm.slane %v4885_v29, %v8046_v44  ;;  %v4910_v9 = vunpack.c.l.b16 %v4263_v5  ;;  %v10514_v20 = vpack.c.bf16 %v14715_v35, %v14714_v3  ;;  %v5532_v38 = vperm.slane %v4871_v36, %v8093_v55  ;;  %1627 = vadd.xlane.f32.xlu0 %v1626_v45  ;;  %v14726_v35 = vld [vmem:[#allocation211_spill] sm:$0xff] }
 0x3db   :  { %v5561_v59 = vperm.slane %v4886_v1, %v8040_v2  ;;  %v4909_v58 = vunpack.c.h.b16 %v4262_v8  ;;  %v5602_v60 = vsel %vm3110_vm3, %v5601_v30, %v5600_v28  ;;  %vm14716_vm6 = vcmask 982912   ;;  %v392_v8 = vld [vmem:[%s13571_s0 + $0xb80] sm:$0xff] }
 0x3dc   :  { %v5531_v33 = vsel %vm14716_vm6, %v5530_v52, %v5529_v16  ;;  %vm14717_vm8 = vcmask 523712   ;;  %v5603_v4 = vperm.slane %v4908_v27, %v7951_v14  ;;  %v5560_v29 = vsel %vm3150_vm13, %v5559_v43, %v5558_v63  ;;  %v391_v52 = vld [vmem:[%s13571_s0 + $0xb78] sm:$0xff]  ;;  %v10535_v30 = vpop.xlane.xlu2 %1507  ;;  %vm14724_vm11 = vmmov %vm14716_vm6 }
 0x3dd   :  { %v5579_v6 = vsel %vm14717_vm8, %v5578_v42, %v5577_v40  ;;  %v5563_v57 = vperm.slane %v4887_v26, %v8093_v55  ;;  %v5580_v36 = vperm.slane %v4896_v23, %v7985_v25  ;;  %v4898_v3 = vunpack.c.l.b16 %v4257_v7  ;;  %14718 = vst [vmem:[#allocation58_spill] sm:$0xff] %v10535_v30  ;;  %v10537_v27 = vpop.xlane.xlu1 %1504 }
 0x3de   :  { %v4911_v1 = vunpack.c.h.b16 %v4263_v5  ;;  %v4897_v40 = vunpack.c.h.b16 %v10475_v17  ;;  %v5604_v42 = vsel %vm3114_vm4, %v5603_v4, %v5602_v60  ;;  %v5607_v63 = vperm.slane %v4910_v9, %v7980_v51  ;;  %14719 = vst [vmem:[#allocation57_spill] sm:$0xff] %v10537_v27  ;;  %v390_v5 = vld [vmem:[%s13571_s0 + $0xb70] sm:$0xff]  ;;  %v14722_v17 = vld [vmem:[#allocation207_spill] sm:$0xff]  ;;  %v10546_v45 = vpop.xlane.xlu0 %1501 }
 0x3df   :  { %v4912_v26 = vunpack.c.l.b16 %v10514_v20  ;;  %vm14720_vm14 = vcmask 589312   ;;  %v5605_v37 = vperm.slane %v4909_v58, %v7965_v32  ;;  %v4268_v23 = vpack.c.bf16 %v14722_v17, %v14721_v18  ;;  %14723 = vst [vmem:[#allocation66_spill] sm:$0xff] %v10546_v45  ;;  %v14725_v9 = vld [vmem:[#allocation212_spill] sm:$0xff] }
 0x3e0   :  { %v5581_v28 = vsel %vm14720_vm14, %v5580_v36, %v5579_v6  ;;  %v5562_v16 = vsel %vm14724_vm11, %v5561_v59, %v5560_v29  ;;  %v4899_v43 = vunpack.c.h.b16 %v4257_v7  ;;  %v4269_v60 = vpack.c.bf16 %v14726_v35, %v14725_v9  ;;  %v14739_v9 = vld [vmem:[#allocation184_spill] sm:$0xff] }
 0x3e1   :  { %v1641_v4 = vsel %vm536_vm0, %v392_v8, 0.0  ;;  %v1638_v30 = vsel %vm536_vm0, %v391_v52, 0.0  ;;  %v5584_v27 = vperm.slane %v4898_v3, %v8016_v31  ;;  %v5606_v6 = vsel %vm3118_vm5, %v5605_v37, %v5604_v42  ;;  %v14733_v42 = vld [vmem:[#allocation200_spill] sm:$0xff] }
 0x3e2   :  { %v5609_v58 = vperm.slane %v4911_v1, %v7991_v39  ;;  %v1635_v36 = vsel %vm536_vm0, %v390_v5, 0.0  ;;  %v5582_v18 = vperm.slane %v4897_v40, %v8019_v53  ;;  %v5608_v59 = vsel %vm14727_vm1, %v5607_v63, %v5606_v6  ;;  %1642 = vadd.xlane.f32.xlu2 %v1641_v4  ;;  %1639 = vadd.xlane.f32.xlu1 %v1638_v30  ;;  %v14732_v40 = vld [vmem:[#allocation201_spill] sm:$0xff]  ;;  %v14765_v45 = vld [vmem:[#allocation232_spill] sm:$0xff] }
 0x3e3   :  { %v4913_v7 = vunpack.c.h.b16 %v10514_v20  ;;  %v5611_v29 = vperm.slane %v4912_v26, %v7985_v25  ;;  %v4920_v17 = vunpack.c.l.b16 %v4268_v23  ;;  %v4921_v8 = vunpack.c.h.b16 %v4268_v23  ;;  %1636 = vadd.xlane.f32.xlu0 %v1635_v36  ;;  %v14738_v23 = vld [vmem:[#allocation185_spill] sm:$0xff]  ;;  %v393_v36 = vld [vmem:[%s13571_s0 + $0xb88] sm:$0xff] }
 0x3e4   :  { %vm14728_vm9 = vcmask 1044484   ;;  %vm14729_vm6 = vcmask 1048512   ;;  %vm14731_vm8 = vcmask 654912   ;;  %v10570_v63 = vpack.c.bf16 %v14733_v42, %v14732_v40  ;;  %v10594_v6 = vpop.xlane.xlu2 %1516  ;;  %v14745_v40 = vld [vmem:[#allocation223_spill] sm:$0xff] }
 0x3e5   :  { %v6219_v3 = vsel %vm14728_vm9, %v10378_v12, %v10234_v56  ;;  %v10565_v1 = vsel %vm14729_vm6, %v5532_v38, %v5531_v33  ;;  %v5583_v52 = vsel %vm14731_vm8, %v5582_v18, %v5581_v28  ;;  %v4922_v20 = vunpack.c.l.b16 %v4269_v60  ;;  %vm14734_vm14 = vmmov %vm14729_vm6  ;;  %v14736_v56 = vld [vmem:[#allocation210_spill] sm:$0xff]  ;;  %v14737_v12 = vld [vmem:[#allocation216_spill] sm:$0xff]  ;;  %14743 = vst [vmem:[#allocation62_spill] sm:$0xff] %v10594_v6 }
 0x3e6   :  { %14730 = vst [vmem:[#allocation71_spill] sm:$0xff] %v10565_v1  ;;  %v5564_v26 = vsel %vm14734_vm14, %v5563_v57, %v5562_v16  ;;  %v5585_v5 = vsel %vm3138_vm10, %v5584_v27, %v5583_v52  ;;  %v5586_v30 = vperm.slane %v4899_v43, %v8006_v24  ;;  %vm14735_vm11 = vcmask 523712   ;;  %v395_v33 = vld [vmem:[%s13571_s0 + $0xb98] sm:$0xff]  ;;  %v394_v28 = vld [vmem:[%s13571_s0 + $0xb90] sm:$0xff]  ;;  %v14741_v16 = vld [vmem:[#allocation186_spill] sm:$0xff] }
 0x3e7   :  { %v5610_v37 = vsel %vm14735_vm11, %v5609_v58, %v5608_v59  ;;  %v4270_v38 = vpack.c.bf16 %v14737_v12, %v14736_v56  ;;  %v10586_v57 = vpack.c.bf16 %v14739_v9, %v14738_v23  ;;  %v14740_v27 = vld [vmem:[#allocation180_spill] sm:$0xff]  ;;  %vm14742_vm1 = vcmask 589312   ;;  %v10596_v58 = vpop.xlane.xlu1 %1513  ;;  %v14746_v42 = vld [vmem:[#allocation227_spill] sm:$0xff]  ;;  %v10605_v12 = vpop.xlane.xlu0 %1510  ;;  %v14748_v9 = vld [vmem:[#allocation205_spill] sm:$0xff] }
 0x3e8   :  { %v10590_v43 = vpack.c.bf16 %v14741_v16, %v14740_v27  ;;  %v5612_v35 = vsel %vm14742_vm1, %v5611_v29, %v5610_v37  ;;  %v5613_v4 = vperm.slane %v4913_v7, %v8019_v53  ;;  %14744 = vst [vmem:[#allocation61_spill] sm:$0xff] %v10596_v58  ;;  %v5627_v18 = vperm.slane %v4920_v17, %v7904_v61  ;;  %v14749_v27 = vld [vmem:[#allocation204_spill] sm:$0xff]  ;;  %vm14751_vm6 = vmmov %vm14731_vm8  ;;  %v14752_v1 = vld [vmem:[#allocation226_spill] sm:$0xff] }
 0x3e9   :  { %v5628_v59 = vperm.slane %v4921_v8, %v7907_v50  ;;  %v4923_v52 = vunpack.c.h.b16 %v4269_v60  ;;  %v4276_v56 = vpack.c.bf16 %v14746_v42, %v14745_v40  ;;  %14747 = vst [vmem:[#allocation70_spill] sm:$0xff] %v10605_v12  ;;  %v4914_v7 = vunpack.c.l.b16 %v10570_v63 }
 0x3ea   :  { %v5630_v29 = vperm.slane %v4922_v20, %v7931_v13  ;;  %v1650_v37 = vsel %vm536_vm0, %v395_v33, 0.0  ;;  %v1647_v23 = vsel %vm536_vm0, %v394_v28, 0.0  ;;  %v4266_v16 = vpack.c.bf16 %v14749_v27, %v14748_v9  ;;  %v14753_v33 = vld [vmem:[#allocation116_spill] sm:$0xff] }
 0x3eb   :  { %v4924_v17 = vunpack.c.l.b16 %v4270_v38  ;;  %v1644_v8 = vsel %vm536_vm0, %v393_v36, 0.0  ;;  %v10615_v60 = vsel %vm4129_vm15, %v5564_v26, %v6219_v3  ;;  %vm14750_vm9 = vcmask 786112   ;;  %1651 = vadd.xlane.f32.xlu2 %v1650_v37  ;;  %1648 = vadd.xlane.f32.xlu1 %v1647_v23  ;;  %v14757_v37 = vld [vmem:[#allocation230_spill] sm:$0xff]  ;;  %v14758_v23 = vld [vmem:[#allocation229_spill] sm:$0xff] }
 0x3ec   :  { %v10618_v40 = vsel %vm14750_vm9, %v5586_v30, %v5585_v5  ;;  %v5614_v20 = vsel %vm14751_vm6, %v5613_v4, %v5612_v35  ;;  %v10624_v6 = vpack.c.bf16 %v14753_v33, %v14752_v1  ;;  %vm14754_vm8 = vcmask 130112   ;;  %1645 = vadd.xlane.f32.xlu0 %v1644_v8  ;;  %v14755_v4 = vld [vmem:[#allocation215_spill] sm:$0xff]  ;;  %v14756_v33 = vld [vmem:[#allocation214_spill] sm:$0xff]  ;;  %vm14767_vm11 = vmmov %vm14750_vm9 }
 0x3ed   :  { %v5629_v28 = vsel %vm14754_vm8, %v5628_v59, %v5627_v18  ;;  %v5632_v9 = vperm.slane %v4923_v52, %v7940_v48  ;;  %v4936_v27 = vunpack.c.l.b16 %v4276_v56  ;;  %v4937_v36 = vunpack.c.h.b16 %v4276_v56  ;;  %v398_v52 = vld [vmem:[%s13571_s0 + $0xbb0] sm:$0xff]  ;;  %v397_v56 = vld [vmem:[%s13571_s0 + $0xba8] sm:$0xff]  ;;  %vm14766_vm14 = vmmov %vm14754_vm8 }
 0x3ee   :  { %v4900_v3 = vunpack.c.l.b16 %v10590_v43  ;;  %v5615_v26 = vperm.slane %v4914_v7, %v8016_v31  ;;  %v5631_v5 = vsel %vm3106_vm2, %v5630_v29, %v5629_v28  ;;  %v4925_v30 = vunpack.c.h.b16 %v4270_v38  ;;  %v10646_v28 = vpop.xlane.xlu2 %1525 }
 0x3ef   :  { %v4916_v1 = vunpack.c.l.b16 %v4266_v16  ;;  %v4271_v18 = vpack.c.bf16 %v14756_v33, %v14755_v4  ;;  %v5634_v59 = vperm.slane %v4924_v17, %v7951_v14  ;;  %v4915_v7 = vunpack.c.h.b16 %v10570_v63  ;;  %14759 = vst [vmem:[#allocation69_spill] sm:$0xff] %v10646_v28  ;;  %v10648_v17 = vpop.xlane.xlu1 %1522  ;;  %v396_v4 = vld [vmem:[%s13571_s0 + $0xba0] sm:$0xff] }
 0x3f0   :  { %v5616_v38 = vsel %vm3138_vm10, %v5615_v26, %v5614_v20  ;;  %v4938_v29 = vunpack.c.l.b16 %v10624_v6  ;;  %v4278_v8 = vpack.c.bf16 %v14758_v23, %v14757_v37  ;;  %14760 = vst [vmem:[#allocation48_spill] sm:$0xff] %v10648_v17  ;;  %v4917_v33 = vunpack.c.h.b16 %v4266_v16  ;;  %v10656_v26 = vpop.xlane.xlu0 %1519  ;;  %v14762_v37 = vld [vmem:[#allocation219_spill] sm:$0xff]  ;;  %v14763_v23 = vld [vmem:[#allocation218_spill] sm:$0xff] }
 0x3f1   :  { %v5633_v42 = vsel %vm3110_vm3, %v5632_v9, %v5631_v5  ;;  %v5658_v63 = vperm.slane %v4936_v27, %v7904_v61  ;;  %v5659_v20 = vperm.slane %v4937_v36, %v7907_v50  ;;  %14761 = vst [vmem:[#allocation53_spill] sm:$0xff] %v10656_v26  ;;  %v5636_v35 = vperm.slane %v4925_v30, %v7965_v32  ;;  %v14764_v30 = vld [vmem:[#allocation228_spill] sm:$0xff] }
 0x3f2   :  { %v4272_v28 = vpack.c.bf16 %v14763_v23, %v14762_v37  ;;  %v1659_v17 = vsel %vm536_vm0, %v398_v52, 0.0  ;;  %v1656_v12 = vsel %vm536_vm0, %v397_v56, 0.0  ;;  %v5619_v58 = vperm.slane %v4916_v1, %v8049_v15 }
 0x3f3   :  { %v4926_v16 = vunpack.c.l.b16 %v4271_v18  ;;  %v5635_v9 = vsel %vm3114_vm4, %v5634_v59, %v5633_v42  ;;  %v1653_v27 = vsel %vm536_vm0, %v396_v4, 0.0  ;;  %v5617_v36 = vperm.slane %v4915_v7, %v8006_v24  ;;  %1660 = vadd.xlane.f32.xlu2 %v1659_v17  ;;  %1657 = vadd.xlane.f32.xlu1 %v1656_v12  ;;  %v14768_v4 = vld [vmem:[#allocation217_spill] sm:$0xff]  ;;  %v401_v12 = vld [vmem:[%s13571_s0 + $0xbc8] sm:$0xff] }
 0x3f4   :  { %v5661_v5 = vperm.slane %v4938_v29, %v7931_v13  ;;  %v4940_v26 = vunpack.c.l.b16 %v4278_v8  ;;  %v4279_v0 = vpack.c.bf16 %v14765_v45, %v14764_v30  ;;  %v5588_v37 = vperm.slane %v4900_v3, %v8049_v15  ;;  %v14769_v29 = vld [vmem:[#allocation222_spill] sm:$0xff]  ;;  %1654 = vadd.xlane.f32.xlu0 %v1653_v27  ;;  %v14771_v17 = vld [vmem:[#allocation209_spill] sm:$0xff] }
 0x3f5   :  { %v4927_v52 = vunpack.c.h.b16 %v4271_v18  ;;  %v4939_v56 = vunpack.c.h.b16 %v10624_v6  ;;  %v5660_v1 = vsel %vm14766_vm14, %v5659_v20, %v5658_v63  ;;  %v5618_v42 = vsel %vm14767_vm11, %v5617_v36, %v5616_v38  ;;  %v14770_v38 = vld [vmem:[#allocation203_spill] sm:$0xff] }
 0x3f6   :  { %v5637_v59 = vsel %vm3118_vm5, %v5636_v35, %v5635_v9  ;;  %v4928_v7 = vunpack.c.l.b16 %v4272_v28  ;;  %v4273_v23 = vpack.c.bf16 %v14769_v29, %v14768_v4  ;;  %v5620_v45 = vsel %vm3146_vm12, %v5619_v58, %v5618_v42  ;;  %v400_v35 = vld [vmem:[%s13571_s0 + $0xbc0] sm:$0xff] }
 0x3f7   :  { %v5621_v3 = vperm.slane %v4917_v33, %v8046_v44  ;;  %v5638_v18 = vperm.slane %v4926_v16, %v7980_v51  ;;  %v4941_v6 = vunpack.c.h.b16 %v4278_v8  ;;  %v4267_v63 = vpack.c.bf16 %v14771_v17, %v14770_v38  ;;  %v10690_v33 = vpop.xlane.xlu2 %1534  ;;  %v10692_v16 = vpop.xlane.xlu1 %1531  ;;  %v399_v8 = vld [vmem:[%s13571_s0 + $0xbb8] sm:$0xff] }
 0x3f8   :  { %v5662_v20 = vsel %vm3106_vm2, %v5661_v5, %v5660_v1  ;;  %v5665_v58 = vperm.slane %v4940_v26, %v7951_v14  ;;  %v4942_v9 = vunpack.c.l.b16 %v4279_v0  ;;  %14772 = vst [vmem:[#allocation60_spill] sm:$0xff] %v10690_v33  ;;  %v5640_v27 = vperm.slane %v4927_v52, %v7991_v39  ;;  %v10700_v4 = vpop.xlane.xlu0 %1528 }
 0x3f9   :  { %14773 = vst [vmem:[#allocation65_spill] sm:$0xff] %v10692_v16  ;;  %vm14774_vm1 = vcmask 458112   ;;  %v4929_v30 = vunpack.c.h.b16 %v4272_v28  ;;  %v5663_v42 = vperm.slane %v4939_v56, %v7940_v48  ;;  %v5642_v26 = vperm.slane %v4928_v7, %v7985_v25  ;;  %v14776_v56 = vld [vmem:[#allocation231_spill] sm:$0xff] }
 0x3fa   :  { %v5639_v36 = vsel %vm14774_vm1, %v5638_v18, %v5637_v59  ;;  %14775 = vst [vmem:[#allocation74_spill] sm:$0xff] %v10700_v4  ;;  %v4930_v5 = vunpack.c.l.b16 %v4273_v23  ;;  %v1668_v1 = vsel %vm536_vm0, %v401_v12, 0.0  ;;  %v1665_v29 = vsel %vm536_vm0, %v400_v35, 0.0  ;;  %v14777_v18 = vld [vmem:[#allocation142_spill] sm:$0xff]  ;;  %v14779_v35 = vld [vmem:[#allocation221_spill] sm:$0xff]  ;;  %vm14785_vm8 = vmmov %vm14774_vm1 }
 0x3fb   :  { %v5664_v38 = vsel %vm3110_vm3, %v5663_v42, %v5662_v20  ;;  %v5667_v17 = vperm.slane %v4941_v6, %v7965_v32  ;;  %v4943_v16 = vunpack.c.h.b16 %v4279_v0  ;;  %v1662_v52 = vsel %vm536_vm0, %v399_v8, 0.0  ;;  %1669 = vadd.xlane.f32.xlu2 %v1668_v1  ;;  %1666 = vadd.xlane.f32.xlu1 %v1665_v29  ;;  %v14782_v8 = vld [vmem:[#allocation234_spill] sm:$0xff]  ;;  %v14793_v0 = vld [vmem:[#allocation172_spill] sm:$0xff] }
 0x3fc   :  { %v4918_v59 = vunpack.c.l.b16 %v4267_v63  ;;  %v5666_v28 = vsel %vm3114_vm4, %v5665_v58, %v5664_v38  ;;  %v4280_v4 = vpack.c.bf16 %v14777_v18, %v14776_v56  ;;  %v5669_v7 = vperm.slane %v4942_v9, %v7980_v51  ;;  %v14783_v38 = vld [vmem:[#allocation233_spill] sm:$0xff]  ;;  %1663 = vadd.xlane.f32.xlu0 %v1662_v52 }
 0x3fd   :  { %vm14778_vm9 = vcmask 523712   ;;  %v5644_v12 = vperm.slane %v4929_v30, %v8019_v53  ;;  %v4274_v20 = vpack.c.bf16 %v14780_v47, %v14779_v35  ;;  %v4931_v42 = vunpack.c.h.b16 %v4273_v23  ;;  %v403_v30 = vld [vmem:[%s13571_s0 + $0xbd8] sm:$0xff] }
 0x3fe   :  { %v5641_v33 = vsel %vm14778_vm9, %v5640_v27, %v5639_v36  ;;  %vm14781_vm6 = vcmask 589312   ;;  %v5646_v58 = vperm.slane %v4930_v5, %v8016_v31  ;;  %v4281_v56 = vpack.c.bf16 %v14783_v38, %v14782_v8  ;;  %vm14790_vm11 = vmmov %vm14778_vm9 }
 0x3ff   :  { %v5643_v6 = vsel %vm14781_vm6, %v5642_v26, %v5641_v33  ;;  %v5589_v9 = vsel %vm3146_vm12, %v5588_v37, %v10618_v40  ;;  %v14784_v27 = vunpack.c.h.b16 %v10590_v43  ;;  %v5668_v23 = vsel %vm3118_vm5, %v5667_v17, %v5666_v28  ;;  %v404_v33 = vld [vmem:[%s13571_s0 + $0xbe0] sm:$0xff]  ;;  %v10735_v37 = vpop.xlane.xlu2 %1543  ;;  %v10737_v43 = vpop.xlane.xlu1 %1540 }
 0x400   :  { %v5671_v36 = vperm.slane %v4943_v16, %v7991_v39  ;;  %v4919_v26 = vunpack.c.h.b16 %v4267_v63  ;;  %v4944_v5 = vunpack.c.l.b16 %v4280_v4  ;;  %v5670_v40 = vsel %vm14785_vm8, %v5669_v7, %v5668_v23  ;;  %14786 = vst [vmem:[#allocation73_spill] sm:$0xff] %v10735_v37  ;;  %v402_v16 = vld [vmem:[%s13571_s0 + $0xbd0] sm:$0xff]  ;;  %v10746_v28 = vpop.xlane.xlu0 %1537  ;;  %v14796_v37 = vld [vmem:[#allocation225_spill] sm:$0xff] }
 0x401   :  { %v5590_v47 = vperm.slane %v14784_v27, %v8046_v44  ;;  %14787 = vst [vmem:[#allocation72_spill] sm:$0xff] %v10737_v43  ;;  %v5622_v1 = vsel %vm3150_vm13, %v5621_v3, %v5620_v45  ;;  %v5623_v29 = vperm.slane %v4918_v59, %v8040_v2  ;;  %vm14788_vm14 = vcmask 654912   ;;  %v14791_v45 = vld [vmem:[#allocation237_spill] sm:$0xff]  ;;  %v14792_v3 = vld [vmem:[#allocation236_spill] sm:$0xff] }
 0x402   :  { %v5645_v17 = vsel %vm14788_vm14, %v5644_v12, %v5643_v6  ;;  %v4932_v52 = vunpack.c.l.b16 %v4274_v20  ;;  %v5648_v63 = vperm.slane %v4931_v42, %v8006_v24  ;;  %14789 = vst [vmem:[#allocation77_spill] sm:$0xff] %v10746_v28  ;;  %v4946_v7 = vunpack.c.l.b16 %v4281_v56 }
 0x403   :  { %v5647_v18 = vsel %vm3138_vm10, %v5646_v58, %v5645_v17  ;;  %v1677_v35 = vsel %vm536_vm0, %v404_v33, 0.0  ;;  %v1674_v8 = vsel %vm536_vm0, %v403_v30, 0.0  ;;  %v4945_v38 = vunpack.c.h.b16 %v4280_v4  ;;  %v14794_v58 = vld [vmem:[#allocation239_spill] sm:$0xff]  ;;  %v14797_v30 = vld [vmem:[#allocation224_spill] sm:$0xff] }
 0x404   :  { %v5672_v27 = vsel %vm14790_vm11, %v5671_v36, %v5670_v40  ;;  %v4284_v59 = vpack.c.bf16 %v14792_v3, %v14791_v45  ;;  %v1671_v12 = vsel %vm536_vm0, %v402_v16, 0.0  ;;  %v5625_v6 = vperm.slane %v4919_v26, %v8093_v55  ;;  %1678 = vadd.xlane.f32.xlu2 %v1677_v35  ;;  %1675 = vadd.xlane.f32.xlu1 %v1674_v8 }
 0x405   :  { %v4933_v42 = vunpack.c.h.b16 %v4274_v20  ;;  %v5673_v23 = vperm.slane %v4944_v5, %v7985_v25  ;;  %v4285_v17 = vpack.c.bf16 %v14794_v58, %v14793_v0  ;;  %vm14795_vm1 = vcmask 786112   ;;  %1672 = vadd.xlane.f32.xlu0 %v1671_v12  ;;  %v14804_v12 = vld [vmem:[#allocation235_spill] sm:$0xff] }
 0x406   :  { %v5649_v33 = vsel %vm14795_vm1, %v5648_v63, %v5647_v18  ;;  %v10762_v4 = vpack.c.bf16 %v14797_v30, %v14796_v37  ;;  %v4947_v36 = vunpack.c.h.b16 %v4281_v56  ;;  %vm14798_vm9 = vcmask 982912   ;;  %v14806_v30 = vld [vmem:[#allocation173_spill] sm:$0xff] }
 0x407   :  { %v5624_v40 = vsel %vm14798_vm9, %v5623_v29, %v5622_v1  ;;  %v14799_v26 = vunpack.c.l.b16 %v10586_v57  ;;  %v5650_v5 = vperm.slane %v4932_v52, %v8049_v15  ;;  %v5674_v16 = vsel %vm14781_vm6, %v5673_v23, %v5672_v27  ;;  %v407_v1 = vld [vmem:[%s13571_s0 + $0xbf8] sm:$0xff]  ;;  %v406_v29 = vld [vmem:[%s13571_s0 + $0xbf0] sm:$0xff]  ;;  %v10780_v8 = vpop.xlane.xlu2 %1552  ;;  %vm14812_vm11 = vmmov %vm14798_vm9 }
 0x408   :  { %v5677_v0 = vperm.slane %v4946_v7, %v8016_v31  ;;  %v5591_v63 = vsel %vm3150_vm13, %v5590_v47, %v5589_v9  ;;  %v5675_v37 = vperm.slane %v4945_v38, %v8019_v53  ;;  %v4952_v56 = vunpack.c.l.b16 %v4284_v59  ;;  %14800 = vst [vmem:[#allocation64_spill] sm:$0xff] %v10780_v8  ;;  %v10782_v7 = vpop.xlane.xlu1 %1549  ;;  %v405_v9 = vld [vmem:[%s13571_s0 + $0xbe8] sm:$0xff]  ;;  %v10794_v23 = vpop.xlane.xlu0 %1546 }
 0x409   :  { %v5592_v20 = vperm.slane %v14799_v26, %v8040_v2  ;;  %v4953_v18 = vunpack.c.h.b16 %v4284_v59  ;;  %v5652_v52 = vperm.slane %v4933_v42, %v8046_v44  ;;  %v4954_v35 = vunpack.c.l.b16 %v4285_v17  ;;  %14801 = vst [vmem:[#allocation63_spill] sm:$0xff] %v10782_v7  ;;  %v14803_v59 = vld [vmem:[#allocation143_spill] sm:$0xff]  ;;  %v14824_v7 = vld [vmem:[#allocation240_spill] sm:$0xff] }
 0x40a   :  { %vm14802_vm8 = vcmask 1048512   ;;  %v5651_v38 = vsel %vm3146_vm12, %v5650_v5, %v5649_v33  ;;  %v4934_v27 = vunpack.c.l.b16 %v10762_v4  ;;  %v5676_v45 = vsel %vm14788_vm14, %v5675_v37, %v5674_v16  ;;  %14805 = vst [vmem:[#allocation86_spill] sm:$0xff] %v10794_v23  ;;  %v14807_v26 = vld [vmem:[#allocation167_spill] sm:$0xff] }
 0x40b   :  { %v5626_v47 = vsel %vm14802_vm8, %v5625_v6, %v5624_v40  ;;  %v5679_v3 = vperm.slane %v4947_v36, %v8006_v24  ;;  %v4282_v42 = vpack.c.bf16 %v14804_v12, %v14803_v59  ;;  %v5678_v58 = vsel %vm3138_vm10, %v5677_v0, %v5676_v45  ;;  %v14810_v45 = vld [vmem:[#allocation199_spill] sm:$0xff]  ;;  %v14811_v12 = vld [vmem:[#allocation213_spill] sm:$0xff] }
 0x40c   :  { %v10799_v8 = vpack.c.bf16 %v14807_v26, %v14806_v30  ;;  %v1686_v6 = vsel %vm536_vm0, %v407_v1, 0.0  ;;  %v1683_v33 = vsel %vm536_vm0, %v406_v29, 0.0  ;;  %v5689_v40 = vperm.slane %v4952_v56, %v7904_v61  ;;  %v14814_v56 = vld [vmem:[#allocation238_spill] sm:$0xff]  ;;  %v14815_v26 = vld [vmem:[#allocation141_spill] sm:$0xff] }
 0x40d   :  { %v5690_v5 = vperm.slane %v4953_v18, %v7907_v50  ;;  %v4955_v36 = vunpack.c.h.b16 %v4285_v17  ;;  %v1680_v16 = vsel %vm536_vm0, %v405_v9, 0.0  ;;  %v14808_v37 = vunpack.c.h.b16 %v10586_v57  ;;  %1687 = vadd.xlane.f32.xlu2 %v1686_v6  ;;  %1684 = vadd.xlane.f32.xlu1 %v1683_v33 }
 0x40e   :  { %v5692_v0 = vperm.slane %v4954_v35, %v7931_v13  ;;  %v4292_v30 = vpack.c.bf16 %v14811_v12, %v14810_v45  ;;  %v10815_v1 = vsel %vm14812_vm11, %v5592_v20, %v5591_v63  ;;  %v4948_v29 = vunpack.c.l.b16 %v4282_v42  ;;  %v14816_v63 = vld [vmem:[#allocation183_spill] sm:$0xff]  ;;  %1681 = vadd.xlane.f32.xlu0 %v1680_v16 }
 0x40f   :  { %v10809_v59 = vperm.slane %v14808_v37, %v8093_v55  ;;  %14813 = vst [vmem:[#allocation84_spill] sm:$0xff] %v10815_v1  ;;  %v10819_v18 = vpack.c.bf16 %v14815_v26, %v14814_v56  ;;  %v10823_v57 = vsel %vm4131_vm7, %v5626_v47, %v10615_v60  ;;  %v10826_v17 = vsel %vm3150_vm13, %v5652_v52, %v5651_v38  ;;  %v14817_v37 = vld [vmem:[#allocation179_spill] sm:$0xff]  ;;  %v410_v47 = vld [vmem:[%s13571_s0 + $0xc10] sm:$0xff]  ;;  %v10847_v26 = vpop.xlane.xlu2 %1561 }
 0x410   :  { %v10830_v9 = vperm.slane %v4934_v27, %v8040_v2  ;;  %v5680_v20 = vsel %vm14795_vm1, %v5679_v3, %v5678_v58  ;;  %v4293_v56 = vpack.c.bf16 %v14817_v37, %v14816_v63  ;;  %v4950_v6 = vunpack.c.l.b16 %v10799_v8  ;;  %v409_v38 = vld [vmem:[%s13571_s0 + $0xc08] sm:$0xff]  ;;  %14819 = vst [vmem:[#allocation89_spill] sm:$0xff] %v10847_v26 }
 0x411   :  { %14809 = vst [vmem:[#allocation85_spill] sm:$0xff] %v10809_v59  ;;  %vm14818_vm9 = vcmask 130112   ;;  %v5694_v60 = vperm.slane %v4955_v36, %v7940_v48  ;;  %v2330_v52 = vmul.f32 0.015625, %v14811_v12  ;;  %v2329_v3 = vmul.f32 0.015625, %v14810_v45 }
 0x412   :  { %v5691_v33 = vsel %vm14818_vm9, %v5690_v5, %v5689_v40  ;;  %v4968_v58 = vunpack.c.l.b16 %v4292_v30  ;;  %v4969_v16 = vunpack.c.h.b16 %v4292_v30  ;;  %v10849_v40 = vpop.xlane.xlu1 %1558  ;;  %v408_v5 = vld [vmem:[%s13571_s0 + $0xc00] sm:$0xff]  ;;  %v4949_v36 = vunpack.c.h.b16 %v4282_v42  ;;  %vm14826_vm6 = vmmov %vm14818_vm9 }
 0x413   :  { %v5693_v27 = vsel %vm3106_vm2, %v5692_v0, %v5691_v33  ;;  %14820 = vst [vmem:[#allocation76_spill] sm:$0xff] %v10849_v40  ;;  %v5681_v12 = vperm.slane %v4948_v29, %v8049_v15  ;;  %v4956_v35 = vunpack.c.l.b16 %v10819_v18  ;;  %v2331_v59 = vmul.f32 0.015625, %v14816_v63  ;;  %v10857_v0 = vpop.xlane.xlu0 %1555  ;;  %v14822_v33 = vld [vmem:[#allocation206_spill] sm:$0xff]  ;;  %vm14827_vm8 = vmmov %vm14826_vm6 }
 0x414   :  { %14821 = vst [vmem:[#allocation75_spill] sm:$0xff] %v10857_v0  ;;  %v4970_v45 = vunpack.c.l.b16 %v4293_v56  ;;  %v14823_v30 = vld [vmem:[#allocation10_spill] sm:$0xff]  ;;  %v1695_v26 = vsel %vm536_vm0, %v410_v47, 0.0  ;;  %v1692_v40 = vsel %vm536_vm0, %v409_v38, 0.0  ;;  %v5695_v23 = vsel %vm3110_vm3, %v5694_v60, %v5693_v27 }
 0x415   :  { %v4294_v1 = vpack.c.bf16 %v14823_v30, %v14822_v33  ;;  %v14825_v42 = vld [vmem:[#allocation146_spill] sm:$0xff]  ;;  %v3626_v29 = vperm.slane %v2330_v52, %v7907_v50  ;;  %v1689_v28 = vsel %vm536_vm0, %v408_v5, 0.0  ;;  %v3625_v63 = vperm.slane %v2329_v3, %v7904_v61  ;;  %1696 = vadd.xlane.f32.xlu2 %v1695_v26  ;;  %1693 = vadd.xlane.f32.xlu1 %v1692_v40 }
 0x416   :  { %v4287_v43 = vpack.c.bf16 %v14825_v42, %v14824_v7  ;;  %v5720_v0 = vperm.slane %v4968_v58, %v7904_v61  ;;  %v5721_v34 = vperm.slane %v4969_v16, %v7907_v50  ;;  %v2332_v22 = vmul.f32 0.015625, %v14817_v37  ;;  %1690 = vadd.xlane.f32.xlu0 %v1689_v28 }
 0x417   :  { %v10873_v47 = vperm.slane %v4950_v6, %v8040_v2  ;;  %v5696_v60 = vperm.slane %v4956_v35, %v7951_v14  ;;  %v3628_v38 = vperm.slane %v2331_v59, %v7931_v13  ;;  %v4971_v7 = vunpack.c.h.b16 %v4293_v56  ;;  %v413_v59 = vld [vmem:[%s13571_s0 + $0xc28] sm:$0xff]  ;;  %v412_v35 = vld [vmem:[%s13571_s0 + $0xc20] sm:$0xff]  ;;  %v10892_v26 = vpop.xlane.xlu2 %1570 }
 0x418   :  { %v5683_v52 = vperm.slane %v4949_v36, %v8046_v44  ;;  %v5723_v27 = vperm.slane %v4970_v45, %v7931_v13  ;;  %v4972_v3 = vunpack.c.l.b16 %v4294_v1  ;;  %v5682_v58 = vsel %vm3146_vm12, %v5681_v12, %v5680_v20  ;;  %14828 = vst [vmem:[#allocation68_spill] sm:$0xff] %v10892_v26 }
 0x419   :  { %v4957_v37 = vunpack.c.h.b16 %v10819_v18  ;;  %v5697_v6 = vsel %vm3114_vm4, %v5696_v60, %v5695_v23  ;;  %v4958_v16 = vunpack.c.l.b16 %v4287_v43  ;;  %v4959_v5 = vunpack.c.h.b16 %v4287_v43  ;;  %v411_v43 = vld [vmem:[%s13571_s0 + $0xc18] sm:$0xff]  ;;  %v14832_v60 = vld [vmem:[#allocation243_spill] sm:$0xff] }
 0x41a   :  { %v3627_v56 = vsel %vm14826_vm6, %v3626_v29, %v3625_v63  ;;  %v5722_v28 = vsel %vm14827_vm8, %v5721_v34, %v5720_v0  ;;  %v2333_v20 = vmul.f32 0.015625, %v14822_v33  ;;  %v3630_v18 = vperm.slane %v2332_v22, %v7940_v48  ;;  %v10894_v23 = vpop.xlane.xlu1 %1567  ;;  %v14831_v63 = vld [vmem:[#allocation145_spill] sm:$0xff] }
 0x41b   :  { %14829 = vst [vmem:[#allocation67_spill] sm:$0xff] %v10894_v23  ;;  %v3629_v40 = vsel %vm3106_vm2, %v3628_v38, %v3627_v56  ;;  %v5725_v36 = vperm.slane %v4971_v7, %v7940_v48  ;;  %v2334_v12 = vmul.f32 0.015625, %v14823_v30  ;;  %v4973_v45 = vunpack.c.h.b16 %v4294_v1  ;;  %v10902_v34 = vpop.xlane.xlu0 %1564  ;;  %v14833_v56 = vld [vmem:[#allocation11_spill] sm:$0xff] }
 0x41c   :  { %14830 = vst [vmem:[#allocation80_spill] sm:$0xff] %v10902_v34  ;;  %v5724_v0 = vsel %vm3106_vm2, %v5723_v27, %v5722_v28  ;;  %v5727_v22 = vperm.slane %v4972_v3, %v7951_v14  ;;  %v1704_v33 = vsel %vm536_vm0, %v413_v59, 0.0  ;;  %v1701_v42 = vsel %vm536_vm0, %v412_v35, 0.0  ;;  %v14834_v7 = vld [vmem:[#allocation187_spill] sm:$0xff] }
 0x41d   :  { %v5700_v29 = vperm.slane %v4958_v16, %v7980_v51  ;;  %v4288_v38 = vpack.c.bf16 %v14832_v60, %v14831_v63  ;;  %v4295_v26 = vpack.c.bf16 %v14834_v7, %v14833_v56  ;;  %v1698_v1 = vsel %vm536_vm0, %v411_v43, 0.0  ;;  %1705 = vadd.xlane.f32.xlu2 %v1704_v33  ;;  %1702 = vadd.xlane.f32.xlu1 %v1701_v42  ;;  %v14835_v60 = vld [vmem:[#allocation18_spill] sm:$0xff] }
 0x41e   :  { %v5698_v30 = vperm.slane %v4957_v37, %v7965_v32  ;;  %v3632_v27 = vperm.slane %v2333_v20, %v7951_v14  ;;  %v3631_v3 = vsel %vm3110_vm3, %v3630_v18, %v3629_v40  ;;  %v2335_v59 = vmul.f32 0.015625, %v14833_v56  ;;  %v14836_v20 = vld [vmem:[#allocation170_spill] sm:$0xff]  ;;  %1699 = vadd.xlane.f32.xlu0 %v1698_v1  ;;  %v414_v56 = vld [vmem:[%s13571_s0 + $0xc30] sm:$0xff] }
 0x41f   :  { %v4951_v35 = vunpack.c.h.b16 %v10799_v8  ;;  %v5726_v16 = vsel %vm3110_vm3, %v5725_v36, %v5724_v0  ;;  %v3634_v28 = vperm.slane %v2334_v12, %v7965_v32  ;;  %v5729_v63 = vperm.slane %v4973_v45, %v7965_v32  ;;  %v416_v45 = vld [vmem:[%s13571_s0 + $0xc40] sm:$0xff]  ;;  %v10942_v42 = vpop.xlane.xlu2 %1579 }
 0x420   :  { %v5699_v43 = vsel %vm3118_vm5, %v5698_v30, %v5697_v6  ;;  %v5728_v37 = vsel %vm3114_vm4, %v5727_v22, %v5726_v16  ;;  %v4296_v23 = vpack.c.bf16 %v14836_v20, %v14835_v60  ;;  %v5684_v18 = vsel %vm3150_vm13, %v5683_v52, %v5682_v58  ;;  %v415_v6 = vld [vmem:[%s13571_s0 + $0xc38] sm:$0xff]  ;;  %v14838_v0 = vld [vmem:[#allocation242_spill] sm:$0xff]  ;;  %14840 = vst [vmem:[#allocation79_spill] sm:$0xff] %v10942_v42 }
 0x421   :  { %vm14837_vm14 = vcmask 458112   ;;  %v5702_v40 = vperm.slane %v4959_v5, %v7991_v39  ;;  %v4960_v36 = vunpack.c.l.b16 %v4288_v38  ;;  %v4974_v12 = vunpack.c.l.b16 %v4295_v26  ;;  %v14839_v22 = vld [vmem:[#allocation241_spill] sm:$0xff] }
 0x422   :  { %v5701_v8 = vsel %vm14837_vm14, %v5700_v29, %v5699_v43  ;;  %v10937_v33 = vpack.c.bf16 %v14839_v22, %v14838_v0  ;;  %v2336_v52 = vmul.f32 0.015625, %v14834_v7  ;;  %v3636_v58 = vperm.slane %v2335_v59, %v7980_v51  ;;  %v10944_v29 = vpop.xlane.xlu1 %1576  ;;  %v14843_v0 = vld [vmem:[#allocation195_spill] sm:$0xff]  ;;  %vm14845_vm1 = vmmov %vm14837_vm14 }
 0x423   :  { %v3633_v5 = vsel %vm3114_vm4, %v3632_v27, %v3631_v3  ;;  %14841 = vst [vmem:[#allocation88_spill] sm:$0xff] %v10944_v29  ;;  %v4975_v1 = vunpack.c.h.b16 %v4295_v26  ;;  %v5730_v16 = vsel %vm3118_vm5, %v5729_v63, %v5728_v37  ;;  %v2337_v43 = vmul.f32 0.015625, %v14835_v60  ;;  %v10952_v7 = vpop.xlane.xlu0 %1573  ;;  %v14844_v27 = vld [vmem:[#allocation174_spill] sm:$0xff]  ;;  %vm14846_vm9 = vmmov %vm14845_vm1 }
 0x424   :  { %v3635_v30 = vsel %vm3118_vm5, %v3634_v28, %v3633_v5  ;;  %14842 = vst [vmem:[#allocation87_spill] sm:$0xff] %v10952_v7  ;;  %v4976_v59 = vunpack.c.l.b16 %v4296_v23  ;;  %v4297_v3 = vpack.c.bf16 %v14844_v27, %v14843_v0  ;;  %v1713_v22 = vsel %vm536_vm0, %v416_v45, 0.0 }
 0x425   :  { %v1710_v42 = vsel %vm536_vm0, %v415_v6, 0.0  ;;  %v4961_v29 = vunpack.c.h.b16 %v4288_v38  ;;  %v5704_v34 = vperm.slane %v4960_v36, %v7985_v25  ;;  %v5731_v26 = vperm.slane %v4974_v12, %v7980_v51  ;;  %1714 = vadd.xlane.f32.xlu2 %v1713_v22  ;;  %v14855_v22 = vld [vmem:[#allocation23_spill] sm:$0xff] }
 0x426   :  { %v1707_v28 = vsel %vm536_vm0, %v414_v56, 0.0  ;;  %v5687_v63 = vperm.slane %v4951_v35, %v8093_v55  ;;  %v3638_v37 = vperm.slane %v2336_v52, %v7991_v39  ;;  %v2338_v60 = vmul.f32 0.015625, %v14836_v20  ;;  %1711 = vadd.xlane.f32.xlu1 %v1710_v42 }
 0x427   :  { %v5686_v5 = vsel %vm14812_vm11, %v10873_v47, %v5684_v18  ;;  %v3637_v45 = vsel %vm14845_vm1, %v3636_v58, %v3635_v30  ;;  %v5732_v6 = vsel %vm14846_vm9, %v5731_v26, %v5730_v16  ;;  %v3640_v38 = vperm.slane %v2337_v43, %v7985_v25  ;;  %1708 = vadd.xlane.f32.xlu0 %v1707_v28  ;;  %v10986_v30 = vpop.xlane.xlu2 %1588  ;;  %v417_v16 = vld [vmem:[%s13571_s0 + $0xc48] sm:$0xff] }
 0x428   :  { %v4977_v36 = vunpack.c.h.b16 %v4296_v23  ;;  %vm14847_vm6 = vcmask 523712   ;;  %v5733_v35 = vperm.slane %v4975_v1, %v7991_v39  ;;  %v5735_v52 = vperm.slane %v4976_v59, %v7985_v25  ;;  %v440_v23 = vld [vmem:[%s13571_s0 + $0xd00] sm:$0xff]  ;;  %14851 = vst [vmem:[#allocation92_spill] sm:$0xff] %v10986_v30 }
 0x429   :  { %v5703_v12 = vsel %vm14847_vm6, %v5702_v40, %v5701_v8  ;;  %v4978_v56 = vunpack.c.l.b16 %v4297_v3  ;;  %v4962_v20 = vunpack.c.l.b16 %v10937_v33  ;;  %vm14848_vm8 = vcmask 589312   ;;  %v418_v8 = vld [vmem:[%s13571_s0 + $0xc50] sm:$0xff]  ;;  %vm14849_vm14 = vmmov %vm14847_vm6 }
 0x42a   :  { %v5705_v47 = vsel %vm14848_vm8, %v5704_v34, %v5703_v12  ;;  %v5706_v18 = vperm.slane %v4961_v29, %v8019_v53  ;;  %v2339_v58 = vmul.f32 0.015625, %v14843_v0  ;;  %v3642_v40 = vperm.slane %v2338_v60, %v8019_v53  ;;  %vm14850_vm11 = vmmov %vm14847_vm6  ;;  %v10988_v29 = vpop.xlane.xlu1 %1585  ;;  %v14854_v0 = vld [vmem:[#allocation178_spill] sm:$0xff] }
 0x42b   :  { %v3639_v42 = vsel %vm14849_vm14, %v3638_v37, %v3637_v45  ;;  %v5734_v1 = vsel %vm14850_vm11, %v5733_v35, %v5732_v6  ;;  %v2340_v34 = vmul.f32 0.015625, %v14844_v27  ;;  %14852 = vst [vmem:[#allocation91_spill] sm:$0xff] %v10988_v29  ;;  %vm14853_vm1 = vmmov %vm14848_vm8  ;;  %v5737_v59 = vperm.slane %v4977_v36, %v8019_v53  ;;  %v10997_v37 = vpop.xlane.xlu0 %1582  ;;  %v14858_v12 = vld [vmem:[#allocation246_spill] sm:$0xff]  ;;  %v14859_v35 = vld [vmem:[#allocation245_spill] sm:$0xff] }
 0x42c   :  { %v3641_v43 = vsel %vm14853_vm1, %v3640_v38, %v3639_v42  ;;  %v4298_v26 = vpack.c.bf16 %v14855_v22, %v14854_v0  ;;  %v4979_v28 = vunpack.c.h.b16 %v4297_v3  ;;  %14856 = vst [vmem:[#allocation90_spill] sm:$0xff] %v10997_v37  ;;  %vm14857_vm9 = vmmov %vm14853_vm1  ;;  %v5739_v60 = vperm.slane %v4978_v56, %v8016_v31 }
 0x42d   :  { %v5736_v27 = vsel %vm14857_vm9, %v5735_v52, %v5734_v1  ;;  %v1785_v45 = vsel %vm536_vm0, %v440_v23, 0.0  ;;  %v1719_v6 = vsel %vm536_vm0, %v418_v8, 0.0  ;;  %v4290_v30 = vpack.c.bf16 %v14859_v35, %v14858_v12 }
 0x42e   :  { %v3644_v38 = vperm.slane %v2339_v58, %v8016_v31  ;;  %v2341_v36 = vmul.f32 0.015625, %v14854_v0  ;;  %v1716_v42 = vsel %vm536_vm0, %v417_v16, 0.0  ;;  %v5708_v3 = vperm.slane %v4962_v20, %v8016_v31  ;;  %1786 = vadd.xlane.f32.xlu2 %v1785_v45  ;;  %1720 = vadd.xlane.f32.xlu1 %v1719_v6  ;;  %v441_v45 = vld [vmem:[%s13571_s0 + $0xd08] sm:$0xff] }
 0x42f   :  { %vm14860_vm6 = vcmask 654912   ;;  %v3646_v56 = vperm.slane %v2340_v34, %v8006_v24  ;;  %v2342_v8 = vmul.f32 0.015625, %v14855_v22  ;;  %v4980_v1 = vunpack.c.l.b16 %v4298_v26  ;;  %1717 = vadd.xlane.f32.xlu0 %v1716_v42  ;;  %v14871_v42 = vld [vmem:[#allocation8_spill] sm:$0xff] }
 0x430   :  { %v5707_v29 = vsel %vm14860_vm6, %v5706_v18, %v5705_v47  ;;  %vm14861_vm8 = vmmov %vm14860_vm6  ;;  %v5741_v12 = vperm.slane %v4979_v28, %v8006_v24  ;;  %v14863_v58 = vunpack.c.h.b16 %v10762_v4  ;;  %v4963_v20 = vunpack.c.h.b16 %v10937_v33  ;;  %v425_v4 = vld [vmem:[%s13571_s0 + $0xc88] sm:$0xff]  ;;  %v424_v33 = vld [vmem:[%s13571_s0 + $0xc80] sm:$0xff] }
 0x431   :  { %v3643_v52 = vsel %vm14861_vm8, %v3642_v40, %v3641_v43  ;;  %vm14862_vm14 = vmmov %vm14860_vm6  ;;  %vm14865_vm11 = vcmask 1048512   ;;  %v5709_v40 = vsel %vm3138_vm10, %v5708_v3, %v5707_v29  ;;  %v4964_v34 = vunpack.c.l.b16 %v4290_v30  ;;  %v14867_v28 = vld [vmem:[#allocation22_spill] sm:$0xff] }
 0x432   :  { %v5738_v23 = vsel %vm14862_vm14, %v5737_v59, %v5736_v27  ;;  %v11018_v16 = vperm.slane %v14863_v58, %v8093_v55  ;;  %v5688_v18 = vsel %vm14865_vm11, %v5687_v63, %v5686_v5  ;;  %v3648_v43 = vperm.slane %v2341_v36, %v8049_v15  ;;  %v14868_v5 = vld [vmem:[#allocation9_spill] sm:$0xff]  ;;  %v1598_v27 = vpop.xlane.xlu2 %1597 }
 0x433   :  { %v5740_v47 = vsel %vm3138_vm10, %v5739_v60, %v5738_v23  ;;  %v3645_v59 = vsel %vm3138_vm10, %v3644_v38, %v3643_v52  ;;  %v4965_v0 = vunpack.c.h.b16 %v4290_v30  ;;  %vm14866_vm1 = vcmask 786112   ;;  %v1595_v60 = vpop.xlane.xlu1 %1594  ;;  %v11042_v36 = vpop.xlane.xlu0 %1591 }
 0x434   :  { %14864 = vst [vmem:[#allocation95_spill] sm:$0xff] %v11018_v16  ;;  %v3647_v22 = vsel %vm14866_vm1, %v3646_v56, %v3645_v59  ;;  %v2343_v63 = vmul.f32 0.015625, %v14867_v28  ;;  %v4299_v29 = vpack.c.bf16 %v14868_v5, %v14867_v28  ;;  %v3650_v6 = vperm.slane %v2342_v8, %v8046_v44  ;;  %vm14869_vm9 = vmmov %vm14866_vm1 }
 0x435   :  { %v4981_v35 = vunpack.c.h.b16 %v4298_v26  ;;  %v5743_v38 = vperm.slane %v4980_v1, %v8049_v15  ;;  %v5742_v30 = vsel %vm14869_vm9, %v5741_v12, %v5740_v47  ;;  %14870 = vst [vmem:[#allocation100_spill] sm:$0xff] %v11042_v36  ;;  %v11045_v3 = vmul.f32 0.015625, %v14871_v42  ;;  %vm14877_vm14 = vmmov %vm14866_vm1 }
 0x436   :  { %v2344_v52 = vmul.f32 0.015625, %v14868_v5  ;;  %v1740_v56 = vsel %vm536_vm0, %v425_v4, 0.0  ;;  %v1737_v23 = vsel %vm536_vm0, %v424_v33, 0.0  ;;  %v5710_v58 = vperm.slane %v4963_v20, %v8006_v24 }
 0x437   :  { %v3649_v8 = vsel %vm3146_vm12, %v3648_v43, %v3647_v22  ;;  %v1788_v26 = vsel %vm536_vm0, %v441_v45, 0.0  ;;  %vm14872_vm6 = vcmask 982912   ;;  %v5744_v12 = vsel %vm3146_vm12, %v5743_v38, %v5742_v30  ;;  %1741 = vadd.xlane.f32.xlu2 %v1740_v56  ;;  %1738 = vadd.xlane.f32.xlu1 %v1737_v23 }
 0x438   :  { %v11056_v1 = vsel %vm14872_vm6, %v10830_v9, %v10826_v17  ;;  %v3652_v47 = vperm.slane %v2343_v63, %v8040_v2  ;;  %v4982_v59 = vunpack.c.l.b16 %v4299_v29  ;;  %vm14874_vm8 = vcmask 1047559   ;;  %1789 = vadd.xlane.f32.xlu0 %v1788_v26  ;;  %vm14880_vm11 = vmmov %vm14872_vm6 }
 0x439   :  { %14873 = vst [vmem:[#allocation99_spill] sm:$0xff] %v11056_v1  ;;  %v11062_v4 = vsel %vm14874_vm8, %v5688_v18, %v10823_v57  ;;  %v11065_v20 = vperm.slane %v4964_v34, %v8049_v15  ;;  %v5745_v43 = vperm.slane %v4981_v35, %v8046_v44  ;;  %v11069_v33 = vsel %vm14877_vm14, %v5710_v58, %v5709_v40  ;;  %v472_v40 = vld [vmem:[%s13571_s0 + $0xe00] sm:$0xff]  ;;  %v14883_v58 = vld [vmem:[#allocation13_spill] sm:$0xff] }
 0x43a   :  { %14875 = vst [vmem:[#allocation78_spill] sm:$0xff] %v11062_v4  ;;  %v11072_v17 = vperm.slane %v4965_v0, %v8046_v44  ;;  %v3656_v9 = vperm.slane %v11045_v3, %v7904_v61  ;;  %v3654_v22 = vperm.slane %v2344_v52, %v8093_v55  ;;  %v3651_v57 = vsel %vm3150_vm13, %v3650_v6, %v3649_v8  ;;  %v443_v0 = vld [vmem:[%s13571_s0 + $0xd18] sm:$0xff]  ;;  %v442_v3 = vld [vmem:[%s13571_s0 + $0xd10] sm:$0xff]  ;;  %v14882_v52 = vld [vmem:[#allocation14_spill] sm:$0xff] }
 0x43b   :  { %14876 = vst [vmem:[#allocation83_spill] sm:$0xff] %v11065_v20  ;;  %v11079_v18 = vsel %vm3150_vm13, %v5745_v43, %v5744_v12  ;;  %v4983_v34 = vunpack.c.h.b16 %v4299_v29  ;;  %v2426_v28 = vmul.f32 0.015625, %v1598_v27  ;;  %v2425_v63 = vmul.f32 0.015625, %v1595_v60  ;;  %v14881_v6 = vld [vmem:[#allocation21_spill] sm:$0xff]  ;;  %v1607_v29 = vpop.xlane.xlu2 %1606  ;;  %v1604_v30 = vpop.xlane.xlu1 %1603 }
 0x43c   :  { %14878 = vst [vmem:[#allocation104_spill] sm:$0xff] %v11069_v33  ;;  %v3653_v5 = vsel %vm14880_vm11, %v3652_v47, %v3651_v57  ;;  %v11089_v45 = vperm.slane %v4982_v59, %v8040_v2  ;;  %v11092_v35 = vmul.f32 0.015625, %v14881_v6  ;;  %v4340_v38 = vpack.c.bf16 %v1598_v27, %v1595_v60  ;;  %v1601_v12 = vpop.xlane.xlu0 %1600 }
 0x43d   :  { %14879 = vst [vmem:[#allocation103_spill] sm:$0xff] %v11072_v17  ;;  %v11098_v56 = vmul.f32 0.015625, %v14882_v52  ;;  %v11102_v23 = vpack.c.bf16 %v14881_v6, %v14882_v52  ;;  %v2346_v8 = vmul.f32 0.015625, %v14883_v58  ;;  %v4300_v26 = vpack.c.bf16 %v14883_v58, %v14871_v42  ;;  %v473_v17 = vld [vmem:[%s13571_s0 + $0xe08] sm:$0xff] }
 0x43e   :  { %v2427_v27 = vmul.f32 0.015625, %v1601_v12  ;;  %v4341_v60 = vpack.c.bf16 %v1604_v30, %v1601_v12  ;;  %v1881_v47 = vsel %vm536_vm0, %v472_v40, 0.0  ;;  %v1794_v59 = vsel %vm536_vm0, %v443_v0, 0.0 }
 0x43f   :  { %v3812_v43 = vperm.slane %v2426_v28, %v7907_v50  ;;  %v3811_v57 = vperm.slane %v2425_v63, %v7904_v61  ;;  %v2428_v16 = vmul.f32 0.015625, %v1604_v30  ;;  %v1791_v6 = vsel %vm536_vm0, %v442_v3, 0.0  ;;  %1882 = vadd.xlane.f32.xlu2 %v1881_v47  ;;  %1795 = vadd.xlane.f32.xlu1 %v1794_v59 }
 0x440   :  { %v11113_v52 = vperm.slane %v4983_v34, %v8093_v55  ;;  %v5064_v1 = vunpack.c.l.b16 %v4340_v38  ;;  %v5065_v4 = vunpack.c.h.b16 %v4340_v38  ;;  %v3814_v42 = vperm.slane %v2427_v27, %v7931_v13  ;;  %1792 = vadd.xlane.f32.xlu0 %v1791_v6 }
 0x441   :  { %vm14884_vm1 = vcmask 1048512   ;;  %v3657_v28 = vperm.slane %v2346_v8, %v7907_v50  ;;  %v5066_v0 = vunpack.c.l.b16 %v4341_v60  ;;  %v3659_v63 = vperm.slane %v11098_v56, %v7931_v13 }
 0x442   :  { %v11117_v58 = vsel %vm14884_vm1, %v3654_v22, %v3653_v5  ;;  %v4986_v34 = vunpack.c.l.b16 %v11102_v23  ;;  %v4987_v38 = vunpack.c.h.b16 %v11102_v23  ;;  %v2429_v30 = vmul.f32 0.015625, %v1607_v29  ;;  %v427_v22 = vld [vmem:[%s13571_s0 + $0xc98] sm:$0xff]  ;;  %v426_v5 = vld [vmem:[%s13571_s0 + $0xc90] sm:$0xff] }
 0x443   :  { %14885 = vst [vmem:[#allocation82_spill] sm:$0xff] %v11117_v58  ;;  %v4984_v3 = vunpack.c.l.b16 %v4300_v26  ;;  %v4985_v8 = vunpack.c.h.b16 %v4300_v26  ;;  %vm14886_vm9 = vcmask 130112   ;;  %v3816_v56 = vperm.slane %v2428_v16, %v7940_v48  ;;  %v1616_v6 = vpop.xlane.xlu2 %1615  ;;  %v1613_v40 = vpop.xlane.xlu1 %1612 }
 0x444   :  { %v3813_v12 = vsel %vm14886_vm9, %v3812_v43, %v3811_v57  ;;  %v5906_v27 = vperm.slane %v5064_v1, %v7904_v61  ;;  %v5907_v23 = vperm.slane %v5065_v4, %v7907_v50  ;;  %v5067_v59 = vunpack.c.h.b16 %v4341_v60  ;;  %vm14887_vm6 = vmmov %vm14886_vm9  ;;  %v1610_v43 = vpop.xlane.xlu0 %1609 }
 0x445   :  { %v3815_v47 = vsel %vm3106_vm2, %v3814_v42, %v3813_v12  ;;  %v3658_v20 = vsel %vm14887_vm6, %v3657_v28, %v3656_v9  ;;  %v5909_v26 = vperm.slane %v5066_v0, %v7931_v13  ;;  %v1746_v16 = vsel %vm536_vm0, %v427_v22, 0.0  ;;  %vm14888_vm8 = vmmov %vm14887_vm6 }
 0x446   :  { %v1743_v1 = vsel %vm536_vm0, %v426_v5, 0.0  ;;  %v3818_v4 = vperm.slane %v2429_v30, %v7951_v14  ;;  %v2431_v57 = vmul.f32 0.015625, %v1613_v40  ;;  %v2430_v42 = vmul.f32 0.015625, %v1610_v43  ;;  %vm14889_vm14 = vmmov %vm14887_vm6 }
 0x447   :  { %v4342_v60 = vpack.c.bf16 %v1610_v43, %v1607_v29  ;;  %v5751_v12 = vperm.slane %v4984_v3, %v7904_v61  ;;  %v5752_v33 = vperm.slane %v4985_v8, %v7907_v50  ;;  %v3817_v36 = vsel %vm3110_vm3, %v3816_v56, %v3815_v47  ;;  %1747 = vadd.xlane.f32.xlu2 %v1746_v16  ;;  %v474_v3 = vld [vmem:[%s13571_s0 + $0xe10] sm:$0xff] }
 0x448   :  { %v1884_v9 = vsel %vm536_vm0, %v473_v17, 0.0  ;;  %v5908_v28 = vsel %vm14888_vm8, %v5907_v23, %v5906_v27  ;;  %v5911_v0 = vperm.slane %v5067_v59, %v7940_v48  ;;  %v3820_v22 = vperm.slane %v2430_v42, %v7965_v32  ;;  %1744 = vadd.xlane.f32.xlu1 %v1743_v1  ;;  %v457_v17 = vld [vmem:[%s13571_s0 + $0xd88] sm:$0xff] }
 0x449   :  { %v5068_v5 = vunpack.c.l.b16 %v4342_v60  ;;  %v5910_v30 = vsel %vm3106_vm2, %v5909_v26, %v5908_v28  ;;  %v2432_v37 = vmul.f32 0.015625, %v1616_v6  ;;  %v11153_v7 = vpack.c.bf16 %v1616_v6, %v1613_v40  ;;  %1885 = vadd.xlane.f32.xlu0 %v1884_v9  ;;  %v14890_v26 = vld [vmem:[#allocation24_spill] sm:$0xff] }
 0x44a   :  { %v5069_v29 = vunpack.c.h.b16 %v4342_v60  ;;  %v5754_v8 = vperm.slane %v4986_v34, %v7931_v13  ;;  %v3822_v56 = vperm.slane %v2431_v57, %v7980_v51  ;;  %v3819_v27 = vsel %vm3114_vm4, %v3818_v4, %v3817_v36 }
 0x44b   :  { %v5913_v40 = vperm.slane %v5068_v5, %v7951_v14  ;;  %v11166_v23 = vperm.slane %v4987_v38, %v7940_v48  ;;  %v3660_v47 = vsel %vm3106_vm2, %v3659_v63, %v3658_v20  ;;  %v5753_v59 = vsel %vm14889_vm14, %v5752_v33, %v5751_v12  ;;  %v1625_v16 = vpop.xlane.xlu2 %1624  ;;  %v1622_v1 = vpop.xlane.xlu1 %1621  ;;  %v456_v38 = vld [vmem:[%s13571_s0 + $0xd80] sm:$0xff] }
 0x44c   :  { %v3821_v6 = vsel %vm3118_vm5, %v3820_v22, %v3819_v27  ;;  %v2349_v43 = vmul.f32 0.015625, %v14890_v26  ;;  %v5912_v34 = vsel %vm3110_vm3, %v5911_v0, %v5910_v30  ;;  %v1887_v36 = vsel %vm536_vm0, %v474_v3, 0.0  ;;  %v1619_v42 = vpop.xlane.xlu0 %1618  ;;  %v14892_v0 = vld [vmem:[#allocation25_spill] sm:$0xff] }
 0x44d   :  { %v1836_v4 = vsel %vm536_vm0, %v457_v17, 0.0  ;;  %v3824_v20 = vperm.slane %v2432_v37, %v7991_v39  ;;  %v5070_v33 = vunpack.c.l.b16 %v11153_v7  ;;  %v5915_v63 = vperm.slane %v5069_v29, %v7965_v32 }
 0x44e   :  { %v2434_v57 = vmul.f32 0.015625, %v1622_v1  ;;  %vm14891_vm11 = vcmask 458112   ;;  %v5914_v12 = vsel %vm3114_vm4, %v5913_v40, %v5912_v34  ;;  %v2433_v9 = vmul.f32 0.015625, %v1619_v42 }
 0x44f   :  { %v3823_v60 = vsel %vm14891_vm11, %v3822_v56, %v3821_v6  ;;  %v4344_v28 = vpack.c.bf16 %v1622_v1, %v1619_v42  ;;  %v11184_v22 = vmul.f32 0.015625, %v14892_v0  ;;  %v14893_v5 = vperm.slane %v11092_v35, %v7940_v48  ;;  %1888 = vadd.xlane.f32.xlu2 %v1887_v36  ;;  %vm14897_vm6 = vmmov %vm14891_vm11 }
 0x450   :  { %v4302_v30 = vpack.c.bf16 %v14892_v0, %v14890_v26  ;;  %v1833_v29 = vsel %vm536_vm0, %v456_v38, 0.0  ;;  %v3663_v3 = vperm.slane %v2349_v43, %v7951_v14  ;;  %v5071_v17 = vunpack.c.h.b16 %v11153_v7  ;;  %1837 = vadd.xlane.f32.xlu1 %v1836_v4  ;;  %v14895_v43 = vld [vmem:[#allocation26_spill] sm:$0xff] }
 0x451   :  { %v3662_v37 = vsel %vm3110_vm3, %v14893_v5, %v3660_v47  ;;  %v3826_v56 = vperm.slane %v2433_v9, %v7985_v25  ;;  %v5072_v27 = vunpack.c.l.b16 %v4344_v28  ;;  %v5916_v40 = vsel %vm3118_vm5, %v5915_v63, %v5914_v12  ;;  %v505_v47 = vld [vmem:[%s13571_s0 + $0xf08] sm:$0xff]  ;;  %1834 = vadd.xlane.f32.xlu0 %v1833_v29  ;;  %v475_v9 = vld [vmem:[%s13571_s0 + $0xe18] sm:$0xff] }
 0x452   :  { %v2435_v6 = vmul.f32 0.015625, %v1625_v16  ;;  %v3828_v34 = vperm.slane %v2434_v57, %v8019_v53  ;;  %vm14894_vm1 = vcmask 523712   ;;  %v5755_v26 = vsel %vm3106_vm2, %v5754_v8, %v5753_v59 }
 0x453   :  { %v3825_v35 = vsel %vm14894_vm1, %v3824_v20, %v3823_v60  ;;  %v11204_v7 = vmul.f32 0.015625, %v14895_v43  ;;  %v5917_v1 = vperm.slane %v5070_v33, %v7980_v51  ;;  %vm14896_vm9 = vcmask 589312   ;;  %v504_v20 = vld [vmem:[%s13571_s0 + $0xf00] sm:$0xff]  ;;  %v1634_v33 = vpop.xlane.xlu2 %1633  ;;  %v1631_v60 = vpop.xlane.xlu1 %1630  ;;  %vm14899_vm14 = vmmov %vm14894_vm1 }
 0x454   :  { %v3827_v38 = vsel %vm14896_vm9, %v3826_v56, %v3825_v35  ;;  %v3665_v36 = vperm.slane %v11184_v22, %v7965_v32  ;;  %v4988_v4 = vunpack.c.l.b16 %v4302_v30  ;;  %v4989_v63 = vunpack.c.h.b16 %v4302_v30  ;;  %v1628_v5 = vpop.xlane.xlu0 %1627  ;;  %vm14900_vm11 = vmmov %vm14896_vm9 }
 0x455   :  { %v5073_v57 = vunpack.c.h.b16 %v4344_v28  ;;  %v3664_v8 = vsel %vm3114_vm4, %v3663_v3, %v3662_v37  ;;  %v5918_v59 = vsel %vm14897_vm6, %v5917_v1, %v5916_v40  ;;  %v5921_v42 = vperm.slane %v5072_v27, %v7985_v25 }
 0x456   :  { %v1980_v12 = vsel %vm536_vm0, %v505_v47, 0.0  ;;  %v5919_v0 = vperm.slane %v5071_v17, %v7991_v39  ;;  %v3830_v22 = vperm.slane %v2435_v6, %v8016_v31  ;;  %vm14898_vm8 = vcmask 654912  }
 0x457   :  { %v3829_v28 = vsel %vm14898_vm8, %v3828_v34, %v3827_v38  ;;  %v1977_v37 = vsel %vm536_vm0, %v504_v20, 0.0  ;;  %v2437_v30 = vmul.f32 0.015625, %v1631_v60  ;;  %v4346_v29 = vpack.c.bf16 %v1634_v33, %v1631_v60  ;;  %1981 = vadd.xlane.f32.xlu2 %v1980_v12  ;;  %vm14901_vm1 = vmmov %vm14898_vm8 }
 0x458   :  { %v2436_v3 = vmul.f32 0.015625, %v1628_v5  ;;  %v4345_v56 = vpack.c.bf16 %v1628_v5, %v1625_v16  ;;  %v5758_v27 = vperm.slane %v4988_v4, %v7951_v14  ;;  %v5920_v40 = vsel %vm14899_vm14, %v5919_v0, %v5918_v59  ;;  %1978 = vadd.xlane.f32.xlu1 %v1977_v37  ;;  %v445_v59 = vld [vmem:[%s13571_s0 + $0xd28] sm:$0xff] }
 0x459   :  { %v5923_v35 = vperm.slane %v5073_v57, %v8019_v53  ;;  %v1890_v47 = vsel %vm536_vm0, %v475_v9, 0.0  ;;  %v5922_v17 = vsel %vm14900_vm11, %v5921_v42, %v5920_v40  ;;  %v3667_v38 = vperm.slane %v11204_v7, %v7980_v51  ;;  %v458_v57 = vld [vmem:[%s13571_s0 + $0xd90] sm:$0xff] }
 0x45a   :  { %v3832_v6 = vperm.slane %v2436_v3, %v8006_v24  ;;  %v5074_v34 = vunpack.c.l.b16 %v4345_v56  ;;  %v5075_v1 = vunpack.c.h.b16 %v4345_v56  ;;  %v5757_v16 = vsel %vm3110_vm3, %v11166_v23, %v5755_v26  ;;  %1891 = vadd.xlane.f32.xlu0 %v1890_v47 }
 0x45b   :  { %v2438_v20 = vmul.f32 0.015625, %v1634_v33  ;;  %v3831_v4 = vsel %vm3138_vm10, %v3830_v22, %v3829_v28  ;;  %v3834_v42 = vperm.slane %v2437_v30, %v8049_v15  ;;  %v5076_v60 = vunpack.c.l.b16 %v4346_v29  ;;  %v1643_v28 = vpop.xlane.xlu2 %1642  ;;  %v1640_v5 = vpop.xlane.xlu1 %1639 }
 0x45c   :  { %v5925_v7 = vperm.slane %v5074_v34, %v8016_v31  ;;  %v5927_v23 = vperm.slane %v5075_v1, %v8006_v24  ;;  %v3666_v26 = vsel %vm3118_vm5, %v3665_v36, %v3664_v8  ;;  %v11246_v33 = vperm.slane %v4989_v63, %v7965_v32  ;;  %v444_v36 = vld [vmem:[%s13571_s0 + $0xd20] sm:$0xff] }
 0x45d   :  { %v5924_v12 = vsel %vm14901_vm1, %v5923_v35, %v5922_v17  ;;  %vm14902_vm9 = vcmask 786112   ;;  %v11251_v0 = vsel %vm3114_vm4, %v5758_v27, %v5757_v16  ;;  %v1839_v37 = vsel %vm536_vm0, %v458_v57, 0.0  ;;  %v1637_v27 = vpop.xlane.xlu0 %1636 }
 0x45e   :  { %v3833_v9 = vsel %vm14902_vm9, %v3832_v6, %v3831_v4  ;;  %v5926_v22 = vsel %vm3138_vm10, %v5925_v7, %v5924_v12  ;;  %v1800_v30 = vsel %vm536_vm0, %v445_v59, 0.0  ;;  %v3836_v63 = vperm.slane %v2438_v20, %v8046_v44  ;;  %vm14903_vm6 = vmmov %vm14902_vm9  ;;  %v14904_v6 = vld [vmem:[#allocation37_spill] sm:$0xff] }
 0x45f   :  { %v5077_v8 = vunpack.c.h.b16 %v4346_v29  ;;  %v5928_v3 = vsel %vm14903_vm6, %v5927_v23, %v5926_v22  ;;  %v2440_v56 = vmul.f32 0.015625, %v1640_v5  ;;  %v5929_v40 = vperm.slane %v5076_v60, %v8049_v15  ;;  %1840 = vadd.xlane.f32.xlu2 %v1839_v37 }
 0x460   :  { %v3835_v35 = vsel %vm3146_vm12, %v3834_v42, %v3833_v9  ;;  %v2439_v47 = vmul.f32 0.015625, %v1637_v27  ;;  %v4347_v17 = vpack.c.bf16 %v1640_v5, %v1637_v27  ;;  %v11264_v34 = vmul.f32 0.015625, %v14904_v6  ;;  %1801 = vadd.xlane.f32.xlu1 %v1800_v30  ;;  %v14907_v5 = vld [vmem:[#allocation38_spill] sm:$0xff] }
 0x461   :  { %v11268_v1 = vpack.c.bf16 %v14904_v6, %v14895_v43  ;;  %v3840_v16 = vperm.slane %v2440_v56, %v8093_v55  ;;  %v1797_v29 = vsel %vm536_vm0, %v444_v36, 0.0  ;;  %v5930_v20 = vsel %vm3146_vm12, %v5929_v40, %v5928_v3  ;;  %v489_v43 = vld [vmem:[%s13571_s0 + $0xe88] sm:$0xff] }
 0x462   :  { %v3838_v4 = vperm.slane %v2439_v47, %v8040_v2  ;;  %v5078_v57 = vunpack.c.l.b16 %v4347_v17  ;;  %v5079_v59 = vunpack.c.h.b16 %v4347_v17  ;;  %vm14905_vm8 = vcmask 458112   ;;  %1798 = vadd.xlane.f32.xlu0 %v1797_v29  ;;  %v459_v47 = vld [vmem:[%s13571_s0 + $0xd98] sm:$0xff] }
 0x463   :  { %v3668_v42 = vsel %vm14905_vm8, %v3667_v38, %v3666_v26  ;;  %v5931_v60 = vperm.slane %v5077_v8, %v8046_v44  ;;  %v3837_v7 = vsel %vm3150_vm13, %v3836_v63, %v3835_v35  ;;  %v2441_v23 = vmul.f32 0.015625, %v1643_v28  ;;  %v14908_v26 = vld [vmem:[#allocation29_spill] sm:$0xff]  ;;  %v488_v63 = vld [vmem:[%s13571_s0 + $0xe80] sm:$0xff]  ;;  %v1652_v27 = vpop.xlane.xlu2 %1651  ;;  %v1649_v40 = vpop.xlane.xlu1 %1648 }
 0x464   :  { %vm14906_vm14 = vcmask 982912   ;;  %v5933_v9 = vperm.slane %v5078_v57, %v8040_v2  ;;  %v5935_v22 = vperm.slane %v5079_v59, %v8093_v55  ;;  %v11284_v38 = vmul.f32 0.015625, %v14907_v5 }
 0x465   :  { %v3839_v12 = vsel %vm14906_vm14, %v3838_v4, %v3837_v7  ;;  %v11288_v36 = vpack.c.bf16 %v14908_v26, %v14907_v5  ;;  %v5932_v37 = vsel %vm3150_vm13, %v5931_v60, %v5930_v20  ;;  %vm14909_vm11 = vcmask 1048512   ;;  %vm14911_vm1 = vmmov %vm14906_vm14  ;;  %v1646_v20 = vpop.xlane.xlu0 %1645 }
 0x466   :  { %v11292_v30 = vsel %vm14909_vm11, %v3840_v16, %v3839_v12  ;;  %v3669_v8 = vperm.slane %v11264_v34, %v7991_v39  ;;  %v4990_v3 = vunpack.c.l.b16 %v11268_v1  ;;  %v5934_v56 = vsel %vm14911_vm1, %v5933_v9, %v5932_v37  ;;  %vm14912_vm9 = vmmov %vm14909_vm11 }
 0x467   :  { %14910 = vst [vmem:[#allocation81_spill] sm:$0xff] %v11292_v30  ;;  %v1932_v35 = vsel %vm536_vm0, %v489_v43, 0.0  ;;  %v11306_v17 = vsel %vm14912_vm9, %v5935_v22, %v5934_v56  ;;  %v2444_v6 = vmul.f32 0.015625, %v1652_v27  ;;  %v2443_v16 = vmul.f32 0.015625, %v1649_v40 }
 0x468   :  { %14913 = vst [vmem:[#allocation102_spill] sm:$0xff] %v11306_v17  ;;  %v4349_v29 = vpack.c.bf16 %v1652_v27, %v1649_v40  ;;  %v3842_v34 = vperm.slane %v2441_v23, %v7904_v61  ;;  %v2442_v4 = vmul.f32 0.015625, %v1646_v20  ;;  %v4348_v57 = vpack.c.bf16 %v1646_v20, %v1643_v28  ;;  %1933 = vadd.xlane.f32.xlu2 %v1932_v35 }
 0x469   :  { %v1929_v59 = vsel %vm536_vm0, %v488_v63, 0.0  ;;  %v3847_v60 = vperm.slane %v2444_v6, %v7940_v48  ;;  %v3845_v7 = vperm.slane %v2443_v16, %v7931_v13  ;;  %v1842_v12 = vsel %vm536_vm0, %v459_v47, 0.0  ;;  %v507_v16 = vld [vmem:[%s13571_s0 + $0xf18] sm:$0xff] }
 0x46a   :  { %v5082_v43 = vunpack.c.l.b16 %v4349_v29  ;;  %v5083_v9 = vunpack.c.h.b16 %v4349_v29  ;;  %v3843_v22 = vperm.slane %v2442_v4, %v7907_v50  ;;  %v5080_v5 = vunpack.c.l.b16 %v4348_v57  ;;  %1930 = vadd.xlane.f32.xlu1 %v1929_v59  ;;  %1843 = vadd.xlane.f32.xlu0 %v1842_v12 }
 0x46b   :  { %v5081_v37 = vunpack.c.h.b16 %v4348_v57  ;;  %v5761_v23 = vsel %vm3118_vm5, %v11246_v33, %v11251_v0  ;;  %v11318_v28 = vmul.f32 0.015625, %v14908_v26  ;;  %v3671_v63 = vperm.slane %v11284_v38, %v7985_v25  ;;  %v428_v33 = vld [vmem:[%s13571_s0 + $0xca0] sm:$0xff]  ;;  %v1661_v4 = vpop.xlane.xlu2 %1660  ;;  %v1658_v57 = vpop.xlane.xlu1 %1657 }
 0x46c   :  { %v5940_v56 = vperm.slane %v5082_v43, %v7931_v13  ;;  %v4992_v27 = vunpack.c.l.b16 %v11288_v36  ;;  %vm14914_vm6 = vcmask 130112   ;;  %v5937_v47 = vperm.slane %v5080_v5, %v7904_v61 }
 0x46d   :  { %v3844_v40 = vsel %vm14914_vm6, %v3843_v22, %v3842_v34  ;;  %v5938_v6 = vperm.slane %v5081_v37, %v7907_v50  ;;  %v4993_v0 = vunpack.c.h.b16 %v11288_v36  ;;  %v4991_v38 = vunpack.c.h.b16 %v11268_v1  ;;  %vm14916_vm14 = vmmov %vm14914_vm6  ;;  %v506_v1 = vld [vmem:[%s13571_s0 + $0xf10] sm:$0xff]  ;;  %v1655_v43 = vpop.xlane.xlu0 %1654 }
 0x46e   :  { %v5762_v26 = vperm.slane %v4990_v3, %v7980_v51  ;;  %v3846_v35 = vsel %vm3106_vm2, %v3845_v7, %v3844_v40  ;;  %vm14915_vm8 = vcmask 523712   ;;  %v5942_v20 = vperm.slane %v5083_v9, %v7940_v48 }
 0x46f   :  { %v3670_v29 = vsel %vm14915_vm8, %v3669_v8, %v3668_v42  ;;  %v5939_v34 = vsel %vm14916_vm14, %v5938_v6, %v5937_v47  ;;  %v3848_v36 = vsel %vm3110_vm3, %v3847_v60, %v3846_v35  ;;  %v2447_v59 = vmul.f32 0.015625, %v1661_v4  ;;  %vm14919_vm6 = vmmov %vm14915_vm8 }
 0x470   :  { %v5941_v3 = vsel %vm3106_vm2, %v5940_v56, %v5939_v34  ;;  %v2446_v7 = vmul.f32 0.015625, %v1658_v57  ;;  %v1749_v12 = vsel %vm536_vm0, %v428_v33, 0.0  ;;  %v2445_v8 = vmul.f32 0.015625, %v1655_v43 }
 0x471   :  { %v5943_v42 = vsel %vm3110_vm3, %v5942_v20, %v5941_v3  ;;  %v4350_v9 = vpack.c.bf16 %v1658_v57, %v1655_v43  ;;  %v1986_v22 = vsel %vm536_vm0, %v507_v16, 0.0  ;;  %vm14917_vm11 = vcmask 458112   ;;  %1750 = vadd.xlane.f32.xlu2 %v1749_v12  ;;  %v14920_v57 = vld [vmem:[#allocation12_spill] sm:$0xff]  ;;  %v429_v12 = vld [vmem:[%s13571_s0 + $0xca8] sm:$0xff] }
 0x472   :  { %v5763_v5 = vsel %vm14917_vm11, %v5762_v26, %v5761_v23  ;;  %v5764_v60 = vperm.slane %v4991_v38, %v7991_v39  ;;  %v3851_v37 = vperm.slane %v2446_v7, %v7965_v32  ;;  %v1983_v40 = vsel %vm536_vm0, %v506_v1, 0.0  ;;  %1987 = vadd.xlane.f32.xlu1 %v1986_v22  ;;  %v14921_v1 = vld [vmem:[#allocation41_spill] sm:$0xff]  ;;  %vm14922_vm8 = vmmov %vm14917_vm11 }
 0x473   :  { %v3853_v56 = vperm.slane %v2447_v59, %v7980_v51  ;;  %v3849_v47 = vperm.slane %v2445_v8, %v7951_v14  ;;  %v5084_v6 = vunpack.c.l.b16 %v4350_v9  ;;  %v5085_v33 = vunpack.c.h.b16 %v4350_v9  ;;  %1984 = vadd.xlane.f32.xlu0 %v1983_v40  ;;  %v1670_v59 = vpop.xlane.xlu2 %1669  ;;  %v1667_v7 = vpop.xlane.xlu1 %1666 }
 0x474   :  { %v11357_v35 = vsel %vm14911_vm1, %v11089_v45, %v11079_v18  ;;  %v3673_v23 = vperm.slane %v11318_v28, %v8019_v53  ;;  %v5766_v38 = vperm.slane %v4992_v27, %v7985_v25  ;;  %v11363_v26 = vperm.slane %v4993_v0, %v8019_v53  ;;  %v477_v0 = vld [vmem:[%s13571_s0 + $0xe28] sm:$0xff]  ;;  %vm14926_vm1 = vmmov %vm14919_vm6 }
 0x475   :  { %v3850_v16 = vsel %vm3114_vm4, %v3849_v47, %v3848_v36  ;;  %v5944_v20 = vperm.slane %v5084_v6, %v7951_v14  ;;  %v5946_v34 = vperm.slane %v5085_v33, %v7965_v32  ;;  %vm14918_vm9 = vcmask 589312   ;;  %v476_v36 = vld [vmem:[%s13571_s0 + $0xe20] sm:$0xff] }
 0x476   :  { %v3672_v18 = vsel %vm14918_vm9, %v3671_v63, %v3670_v29  ;;  %v5765_v45 = vsel %vm14919_vm6, %v5764_v60, %v5763_v5  ;;  %v2355_v28 = vmul.f32 0.015625, %v14920_v57  ;;  %v3852_v27 = vsel %vm3118_vm5, %v3851_v37, %v3850_v16  ;;  %v1664_v60 = vpop.xlane.xlu0 %1663  ;;  %vm14923_vm14 = vmmov %vm14918_vm9 }
 0x477   :  { %v11379_v3 = vmul.f32 0.015625, %v14921_v1  ;;  %v11383_v63 = vpack.c.bf16 %v14921_v1, %v14920_v57  ;;  %v5945_v29 = vsel %vm3114_vm4, %v5944_v20, %v5943_v42  ;;  %v3854_v43 = vsel %vm14922_vm8, %v3853_v56, %v3852_v27  ;;  %vm14927_vm6 = vmmov %vm14922_vm8 }
 0x478   :  { %v5947_v8 = vsel %vm3118_vm5, %v5946_v34, %v5945_v29  ;;  %v2450_v9 = vmul.f32 0.015625, %v1670_v59  ;;  %v2449_v22 = vmul.f32 0.015625, %v1667_v7  ;;  %v4352_v5 = vpack.c.bf16 %v1670_v59, %v1667_v7 }
 0x479   :  { %v2448_v37 = vmul.f32 0.015625, %v1664_v60  ;;  %v4351_v40 = vpack.c.bf16 %v1664_v60, %v1661_v4  ;;  %v1896_v47 = vsel %vm536_vm0, %v477_v0, 0.0  ;;  %v1893_v42 = vsel %vm536_vm0, %v476_v36, 0.0  ;;  %v14924_v4 = vld [vmem:[#allocation36_spill] sm:$0xff] }
 0x47a   :  { %v3675_v6 = vperm.slane %v2355_v28, %v8016_v31  ;;  %v3859_v56 = vperm.slane %v2450_v9, %v8019_v53  ;;  %v3857_v33 = vperm.slane %v2449_v22, %v7985_v25  ;;  %v1752_v16 = vsel %vm536_vm0, %v429_v12, 0.0  ;;  %1897 = vadd.xlane.f32.xlu2 %v1896_v47  ;;  %1894 = vadd.xlane.f32.xlu1 %v1893_v42  ;;  %v520_v28 = vld [vmem:[%s13571_s0 + $0xf80] sm:$0xff]  ;;  %v491_v22 = vld [vmem:[%s13571_s0 + $0xe98] sm:$0xff] }
 0x47b   :  { %v5088_v20 = vunpack.c.l.b16 %v4352_v5  ;;  %v3855_v34 = vperm.slane %v2448_v37, %v7991_v39  ;;  %v5086_v57 = vunpack.c.l.b16 %v4351_v40  ;;  %v5087_v27 = vunpack.c.h.b16 %v4351_v40  ;;  %1753 = vadd.xlane.f32.xlu0 %v1752_v16  ;;  %v1676_v60 = vpop.xlane.xlu1 %1675 }
 0x47c   :  { %v5767_v1 = vsel %vm14923_vm14, %v5766_v38, %v5765_v45  ;;  %v11400_v29 = vmul.f32 0.015625, %v14924_v4  ;;  %vm14925_vm11 = vcmask 654912   ;;  %v5089_v36 = vunpack.c.h.b16 %v4352_v5  ;;  %v1679_v5 = vpop.xlane.xlu2 %1678  ;;  %vm14929_vm14 = vmmov %vm14926_vm1 }
 0x47d   :  { %v3674_v0 = vsel %vm14925_vm11, %v3673_v23, %v3672_v18  ;;  %v3677_v59 = vperm.slane %v11379_v3, %v8006_v24  ;;  %v3856_v7 = vsel %vm14926_vm1, %v3855_v34, %v3854_v43  ;;  %v5948_v12 = vperm.slane %v5086_v57, %v7980_v51  ;;  %vm14928_vm8 = vmmov %vm14925_vm11 }
 0x47e   :  { %v5950_v38 = vperm.slane %v5087_v27, %v7991_v39  ;;  %v3676_v45 = vsel %vm3138_vm10, %v3675_v6, %v3674_v0  ;;  %v4994_v23 = vunpack.c.l.b16 %v11383_v63  ;;  %v4995_v18 = vunpack.c.h.b16 %v11383_v63  ;;  %v490_v63 = vld [vmem:[%s13571_s0 + $0xe90] sm:$0xff]  ;;  %v1673_v16 = vpop.xlane.xlu0 %1672  ;;  %vm14930_vm11 = vmmov %vm14918_vm9 }
 0x47f   :  { %v3858_v9 = vsel %vm14918_vm9, %v3857_v33, %v3856_v7  ;;  %v5952_v3 = vperm.slane %v5088_v20, %v7985_v25  ;;  %v5949_v43 = vsel %vm14927_vm6, %v5948_v12, %v5947_v8  ;;  %v2025_v40 = vsel %vm536_vm0, %v520_v28, 0.0  ;;  %vm14931_vm1 = vmmov %vm14928_vm8 }
 0x480   :  { %v3860_v37 = vsel %vm14928_vm8, %v3859_v56, %v3858_v9  ;;  %v5954_v47 = vperm.slane %v5089_v36, %v8019_v53  ;;  %v5951_v42 = vsel %vm14929_vm14, %v5950_v38, %v5949_v43  ;;  %v2453_v6 = vmul.f32 0.015625, %v1679_v5  ;;  %vm14934_vm6 = vmmov %vm14931_vm1 }
 0x481   :  { %v2452_v33 = vmul.f32 0.015625, %v1676_v60  ;;  %v5953_v20 = vsel %vm14930_vm11, %v5952_v3, %v5951_v42  ;;  %v2451_v8 = vmul.f32 0.015625, %v1673_v16  ;;  %v4353_v34 = vpack.c.bf16 %v1676_v60, %v1673_v16 }
 0x482   :  { %v1938_v57 = vsel %vm536_vm0, %v491_v22, 0.0  ;;  %v5770_v56 = vperm.slane %v4994_v23, %v8016_v31  ;;  %v5955_v0 = vsel %vm14931_vm1, %v5954_v47, %v5953_v20  ;;  %v1935_v28 = vsel %vm536_vm0, %v490_v63, 0.0  ;;  %2026 = vadd.xlane.f32.xlu2 %v2025_v40  ;;  %v14936_v47 = vld [vmem:[#allocation17_spill] sm:$0xff]  ;;  %v14939_v40 = vld [vmem:[#allocation28_spill] sm:$0xff] }
 0x483   :  { %v3863_v27 = vperm.slane %v2452_v33, %v8006_v24  ;;  %v3865_v36 = vperm.slane %v2453_v6, %v8049_v15  ;;  %v3861_v7 = vperm.slane %v2451_v8, %v8016_v31  ;;  %v5090_v12 = vunpack.c.l.b16 %v4353_v34  ;;  %1939 = vadd.xlane.f32.xlu1 %v1938_v57  ;;  %1936 = vadd.xlane.f32.xlu0 %v1935_v28  ;;  %v1685_v16 = vpop.xlane.xlu1 %1684  ;;  %v521_v8 = vld [vmem:[%s13571_s0 + $0xf88] sm:$0xff] }
 0x484   :  { %v5091_v38 = vunpack.c.h.b16 %v4353_v34  ;;  %vm14932_vm9 = vcmask 1048512   ;;  %v5769_v22 = vsel %vm14934_vm6, %v11363_v26, %v5767_v1  ;;  %v11445_v3 = vperm.slane %v4995_v18, %v8006_v24  ;;  %v447_v18 = vld [vmem:[%s13571_s0 + $0xd38] sm:$0xff]  ;;  %v1688_v33 = vpop.xlane.xlu2 %1687 }
 0x485   :  { %v11438_v9 = vsel %vm14932_vm9, %v11113_v52, %v11357_v35  ;;  %v3862_v43 = vsel %vm3138_vm10, %v3861_v7, %v3860_v37  ;;  %v5956_v60 = vperm.slane %v5090_v12, %v8016_v31  ;;  %vm14935_vm8 = vcmask 786112   ;;  %v446_v37 = vld [vmem:[%s13571_s0 + $0xd30] sm:$0xff] }
 0x486   :  { %14933 = vst [vmem:[#allocation107_spill] sm:$0xff] %v11438_v9  ;;  %v5958_v63 = vperm.slane %v5091_v38, %v8006_v24  ;;  %v11451_v52 = vsel %vm14935_vm8, %v3677_v59, %v3676_v45  ;;  %v11454_v35 = vsel %vm3138_vm10, %v5770_v56, %v5769_v22  ;;  %v11457_v26 = vmul.f32 0.015625, %v14936_v47  ;;  %vm14938_vm14 = vmmov %vm14935_vm8  ;;  %v14941_v59 = vld [vmem:[#allocation15_spill] sm:$0xff]  ;;  %v1682_v28 = vpop.xlane.xlu0 %1681  ;;  %v14943_v22 = vld [vmem:[#allocation40_spill] sm:$0xff] }
 0x487   :  { %v3864_v1 = vsel %vm14938_vm14, %v3863_v27, %v3862_v43  ;;  %v11467_v42 = vmul.f32 0.015625, %v14939_v40  ;;  %v11470_v45 = vmul.f32 0.015625, %v14941_v59  ;;  %v5957_v6 = vsel %vm3138_vm10, %v5956_v60, %v5955_v0  ;;  %vm14942_vm11 = vmmov %vm14935_vm8 }
 0x488   :  { %14937 = vst [vmem:[#allocation94_spill] sm:$0xff] %v11457_v26  ;;  %v3866_v20 = vsel %vm3146_vm12, %v3865_v36, %v3864_v1  ;;  %v5959_v34 = vsel %vm14942_vm11, %v5958_v63, %v5957_v6  ;;  %v2456_v57 = vmul.f32 0.015625, %v1688_v33  ;;  %v2455_v56 = vmul.f32 0.015625, %v1685_v16  ;;  %vm14950_vm8 = vmmov %vm14932_vm9 }
 0x489   :  { %14940 = vst [vmem:[#allocation93_spill] sm:$0xff] %v11467_v42  ;;  %v4355_v27 = vpack.c.bf16 %v1688_v33, %v1685_v16  ;;  %v2454_v7 = vmul.f32 0.015625, %v1682_v28  ;;  %v4354_v12 = vpack.c.bf16 %v1682_v28, %v1679_v5  ;;  %v1806_v38 = vsel %vm536_vm0, %v447_v18, 0.0  ;;  %v14945_v18 = vld [vmem:[#allocation27_spill] sm:$0xff]  ;;  %vm14953_vm14 = vmmov %vm14942_vm11 }
 0x48a   :  { %v1803_v0 = vsel %vm536_vm0, %v446_v37, 0.0  ;;  %v11481_v43 = vmul.f32 0.015625, %v14943_v22  ;;  %v3871_v36 = vperm.slane %v2456_v57, %v8093_v55  ;;  %v3869_v60 = vperm.slane %v2455_v56, %v8040_v2  ;;  %1807 = vadd.xlane.f32.xlu2 %v1806_v38  ;;  %v14946_v56 = vld [vmem:[#allocation16_spill] sm:$0xff] }
 0x48b   :  { %v2028_v1 = vsel %vm536_vm0, %v521_v8, 0.0  ;;  %v5094_v63 = vunpack.c.l.b16 %v4355_v27  ;;  %v3867_v6 = vperm.slane %v2454_v7, %v8046_v44  ;;  %v5092_v33 = vunpack.c.l.b16 %v4354_v12  ;;  %1804 = vadd.xlane.f32.xlu1 %v1803_v0  ;;  %v508_v8 = vld [vmem:[%s13571_s0 + $0xf20] sm:$0xff] }
 0x48c   :  { %v5093_v16 = vunpack.c.h.b16 %v4354_v12  ;;  %v11489_v5 = vpack.c.bf16 %v14936_v47, %v14939_v40  ;;  %v11492_v37 = vmul.f32 0.015625, %v14945_v18  ;;  %v11496_v28 = vpack.c.bf16 %v14945_v18, %v14924_v4  ;;  %2029 = vadd.xlane.f32.xlu0 %v2028_v1 }
 0x48d   :  { %v5095_v57 = vunpack.c.h.b16 %v4355_v27  ;;  %v11502_v7 = vmul.f32 0.015625, %v14946_v56  ;;  %v3868_v47 = vsel %vm3150_vm13, %v3867_v6, %v3866_v20  ;;  %v5960_v40 = vperm.slane %v5092_v33, %v8049_v15  ;;  %v461_v20 = vld [vmem:[%s13571_s0 + $0xda8] sm:$0xff] }
 0x48e   :  { %14944 = vst [vmem:[#allocation114_spill] sm:$0xff] %v11489_v5  ;;  %v5962_v12 = vperm.slane %v5093_v16, %v8046_v44  ;;  %v3688_v4 = vperm.slane %v11470_v45, %v7907_v50  ;;  %v3687_v27 = vperm.slane %v11481_v43, %v7904_v61  ;;  %v4308_v38 = vpack.c.bf16 %v14941_v59, %v14943_v22  ;;  %v1697_v45 = vpop.xlane.xlu2 %1696  ;;  %v1694_v16 = vpop.xlane.xlu1 %1693  ;;  %v460_v59 = vld [vmem:[%s13571_s0 + $0xda0] sm:$0xff] }
 0x48f   :  { %vm14947_vm1 = vcmask 982912   ;;  %v5964_v6 = vperm.slane %v5094_v63, %v8040_v2  ;;  %v5961_v1 = vsel %vm3146_vm12, %v5960_v40, %v5959_v34  ;;  %v1989_v43 = vsel %vm536_vm0, %v508_v8, 0.0  ;;  %v1691_v63 = vpop.xlane.xlu0 %1690 }
 0x490   :  { %v3870_v0 = vsel %vm14947_vm1, %v3869_v60, %v3868_v47  ;;  %v5966_v22 = vperm.slane %v5095_v57, %v8093_v55  ;;  %v5963_v60 = vsel %vm3150_vm13, %v5962_v12, %v5961_v1  ;;  %v2459_v18 = vmul.f32 0.015625, %v1697_v45  ;;  %vm14949_vm6 = vmmov %vm14947_vm1 }
 0x491   :  { %v11519_v33 = vsel %vm14932_vm9, %v3871_v36, %v3870_v0  ;;  %v2458_v47 = vmul.f32 0.015625, %v1694_v16  ;;  %v5965_v36 = vsel %vm14949_vm6, %v5964_v6, %v5963_v60  ;;  %v2457_v0 = vmul.f32 0.015625, %v1691_v63 }
 0x492   :  { %14948 = vst [vmem:[#allocation119_spill] sm:$0xff] %v11519_v33  ;;  %v4356_v23 = vpack.c.bf16 %v1694_v16, %v1691_v63  ;;  %v1848_v34 = vsel %vm536_vm0, %v461_v20, 0.0  ;;  %v3876_v40 = vperm.slane %v2459_v18, %v7931_v13  ;;  %v1845_v33 = vsel %vm536_vm0, %v460_v59, 0.0  ;;  %1990 = vadd.xlane.f32.xlu2 %v1989_v43 }
 0x493   :  { %v3874_v8 = vperm.slane %v2458_v47, %v7907_v50  ;;  %v11534_v17 = vsel %vm14950_vm8, %v5966_v22, %v5965_v36  ;;  %v14952_v57 = vperm.slane %v11400_v29, %v8049_v15  ;;  %v5000_v6 = vunpack.c.l.b16 %v4308_v38  ;;  %1849 = vadd.xlane.f32.xlu1 %v1848_v34  ;;  %v522_v36 = vld [vmem:[%s13571_s0 + $0xf90] sm:$0xff]  ;;  %v14956_v34 = vld [vmem:[#allocation31_spill] sm:$0xff] }
 0x494   :  { %14951 = vst [vmem:[#allocation106_spill] sm:$0xff] %v11534_v17  ;;  %v5001_v1 = vunpack.c.h.b16 %v4308_v38  ;;  %v3873_v20 = vperm.slane %v2457_v0, %v7904_v61  ;;  %v11547_v16 = vsel %vm14953_vm14, %v11445_v3, %v11454_v35  ;;  %v3690_v60 = vperm.slane %v11502_v7, %v7931_v13  ;;  %1846 = vadd.xlane.f32.xlu0 %v1845_v33  ;;  %v523_v35 = vld [vmem:[%s13571_s0 + $0xf98] sm:$0xff]  ;;  %v509_v7 = vld [vmem:[%s13571_s0 + $0xf28] sm:$0xff] }
 0x495   :  { %v11541_v12 = vsel %vm3146_vm12, %v14952_v57, %v11451_v52  ;;  %vm14954_vm11 = vcmask 130112   ;;  %v5096_v47 = vunpack.c.l.b16 %v4356_v23  ;;  %v5097_v43 = vunpack.c.h.b16 %v4356_v23 }
 0x496   :  { %v3875_v3 = vsel %vm14954_vm11, %v3874_v8, %v3873_v20  ;;  %vm14955_vm1 = vmmov %vm14954_vm11  ;;  %v11572_v33 = vperm.slane %v5000_v6, %v7904_v61  ;;  %v11575_v0 = vperm.slane %v5001_v1, %v7907_v50  ;;  %v11582_v23 = vpack.c.bf16 %v14956_v34, %v14946_v56 }
 0x497   :  { %v3689_v18 = vsel %vm14955_vm1, %v3688_v4, %v3687_v27  ;;  %v3877_v63 = vsel %vm3106_vm2, %v3876_v40, %v3875_v3  ;;  %v11578_v4 = vmul.f32 0.015625, %v14956_v34  ;;  %v1706_v27 = vpop.xlane.xlu2 %1705  ;;  %v1703_v40 = vpop.xlane.xlu1 %1702  ;;  %v2034_v59 = vsel %vm536_vm0, %v523_v35, 0.0  ;;  %v14957_v35 = vld [vmem:[#allocation39_spill] sm:$0xff]  ;;  %vm14959_vm9 = vmmov %vm14955_vm1 }
 0x498   :  { %v2462_v8 = vmul.f32 0.015625, %v1706_v27  ;;  %v2461_v57 = vmul.f32 0.015625, %v1703_v40  ;;  %v4358_v20 = vpack.c.bf16 %v1706_v27, %v1703_v40  ;;  %v1700_v3 = vpop.xlane.xlu0 %1699  ;;  %v2031_v1 = vsel %vm536_vm0, %v522_v36, 0.0  ;;  %vm14960_vm6 = vmmov %vm14955_vm1 }
 0x499   :  { %v2460_v6 = vmul.f32 0.015625, %v1700_v3  ;;  %v4357_v22 = vpack.c.bf16 %v1700_v3, %v1697_v45  ;;  %v1992_v38 = vsel %vm536_vm0, %v509_v7, 0.0  ;;  %v5968_v52 = vperm.slane %v5096_v47, %v7904_v61  ;;  %v14958_v45 = vld [vmem:[#allocation32_spill] sm:$0xff] }
 0x49a   :  { %v5969_v29 = vperm.slane %v5097_v43, %v7907_v50  ;;  %v3882_v56 = vperm.slane %v2462_v8, %v7965_v32  ;;  %v3880_v34 = vperm.slane %v2461_v57, %v7951_v14  ;;  %v5100_v17 = vunpack.c.l.b16 %v4358_v20  ;;  %2035 = vadd.xlane.f32.xlu2 %v2034_v59  ;;  %v478_v43 = vld [vmem:[%s13571_s0 + $0xe30] sm:$0xff] }
 0x49b   :  { %v3878_v27 = vperm.slane %v2460_v6, %v7940_v48  ;;  %v5098_v40 = vunpack.c.l.b16 %v4357_v22  ;;  %v5099_v26 = vunpack.c.h.b16 %v4357_v22  ;;  %v11593_v42 = vmul.f32 0.015625, %v14957_v35  ;;  %2032 = vadd.xlane.f32.xlu1 %v2031_v1 }
 0x49c   :  { %v11596_v36 = vmul.f32 0.015625, %v14958_v45  ;;  %v3691_v7 = vsel %vm3106_vm2, %v3690_v60, %v3689_v18  ;;  %v5101_v47 = vunpack.c.h.b16 %v4358_v20  ;;  %v3692_v8 = vperm.slane %v11578_v4, %v7940_v48  ;;  %1993 = vadd.xlane.f32.xlu0 %v1992_v38  ;;  %v431_v20 = vld [vmem:[%s13571_s0 + $0xcb8] sm:$0xff] }
 0x49d   :  { %v3879_v22 = vsel %vm3110_vm3, %v3878_v27, %v3877_v63  ;;  %v5971_v57 = vperm.slane %v5098_v40, %v7931_v13  ;;  %v5973_v3 = vperm.slane %v5099_v26, %v7940_v48  ;;  %v5002_v6 = vunpack.c.l.b16 %v11582_v23 }
 0x49e   :  { %v5003_v60 = vunpack.c.h.b16 %v11582_v23  ;;  %v5970_v59 = vsel %vm14959_vm9, %v5969_v29, %v5968_v52  ;;  %v3881_v18 = vsel %vm3114_vm4, %v3880_v34, %v3879_v22  ;;  %v5975_v4 = vperm.slane %v5100_v17, %v7951_v14  ;;  %v430_v29 = vld [vmem:[%s13571_s0 + $0xcb0] sm:$0xff] }
 0x49f   :  { %v5972_v63 = vsel %vm3106_vm2, %v5971_v57, %v5970_v59  ;;  %v1715_v1 = vpop.xlane.xlu2 %1714  ;;  %v1712_v27 = vpop.xlane.xlu1 %1711  ;;  %v3883_v26 = vsel %vm3118_vm5, %v3882_v56, %v3881_v18  ;;  %v1899_v38 = vsel %vm536_vm0, %v478_v43, 0.0  ;;  %v5977_v52 = vperm.slane %v5101_v47, %v7965_v32 }
 0x4a0   :  { %v5974_v23 = vsel %vm3110_vm3, %v5973_v3, %v5972_v63  ;;  %v2465_v34 = vmul.f32 0.015625, %v1715_v1  ;;  %v2464_v40 = vmul.f32 0.015625, %v1712_v27  ;;  %v1709_v22 = vpop.xlane.xlu0 %1708  ;;  %v1758_v30 = vsel %vm536_vm0, %v431_v20, 0.0 }
 0x4a1   :  { %v5976_v17 = vsel %vm3114_vm4, %v5975_v4, %v5974_v23  ;;  %v2463_v57 = vmul.f32 0.015625, %v1709_v22  ;;  %v4359_v59 = vpack.c.bf16 %v1712_v27, %v1709_v22  ;;  %v5785_v56 = vperm.slane %v5002_v6, %v7931_v13 }
 0x4a2   :  { %v3886_v43 = vperm.slane %v2464_v40, %v7991_v39  ;;  %v5978_v18 = vsel %vm3118_vm5, %v5977_v52, %v5976_v17  ;;  %v1755_v9 = vsel %vm536_vm0, %v430_v29, 0.0  ;;  %v3888_v47 = vperm.slane %v2465_v34, %v7985_v25  ;;  %1900 = vadd.xlane.f32.xlu2 %v1899_v38  ;;  %v479_v38 = vld [vmem:[%s13571_s0 + $0xe38] sm:$0xff] }
 0x4a3   :  { %v3884_v3 = vperm.slane %v2463_v57, %v7980_v51  ;;  %v5102_v63 = vunpack.c.l.b16 %v4359_v59  ;;  %v5103_v58 = vunpack.c.h.b16 %v4359_v59  ;;  %v4997_v4 = vunpack.c.h.b16 %v11496_v28  ;;  %1759 = vadd.xlane.f32.xlu1 %v1758_v30  ;;  %v493_v30 = vld [vmem:[%s13571_s0 + $0xea8] sm:$0xff] }
 0x4a4   :  { %v5784_v20 = vsel %vm14960_vm6, %v11575_v0, %v11572_v33  ;;  %v3694_v6 = vperm.slane %v11596_v36, %v7951_v14  ;;  %v4310_v27 = vpack.c.bf16 %v14957_v35, %v14958_v45  ;;  %v3693_v29 = vsel %vm3110_vm3, %v3692_v8, %v3691_v7  ;;  %1756 = vadd.xlane.f32.xlu0 %v1755_v9  ;;  %v14962_v36 = vld [vmem:[#allocation42_spill] sm:$0xff]  ;;  %v14964_v9 = vld [vmem:[#allocation43_spill] sm:$0xff] }
 0x4a5   :  { %vm14961_vm8 = vcmask 458112   ;;  %v5979_v23 = vperm.slane %v5102_v63, %v7980_v51  ;;  %v5981_v34 = vperm.slane %v5103_v58, %v7991_v39  ;;  %v3696_v33 = vperm.slane %v11593_v42, %v7965_v32  ;;  %v492_v45 = vld [vmem:[%s13571_s0 + $0xea0] sm:$0xff] }
 0x4a6   :  { %v3885_v52 = vsel %vm14961_vm8, %v3884_v3, %v3883_v26  ;;  %v5787_v0 = vperm.slane %v5003_v60, %v7940_v48  ;;  %v2367_v40 = vmul.f32 0.015625, %v14962_v36  ;;  %vm14963_vm14 = vcmask 523712   ;;  %vm14965_vm11 = vmmov %vm14961_vm8 }
 0x4a7   :  { %v3887_v35 = vsel %vm14963_vm14, %v3886_v43, %v3885_v52  ;;  %v5786_v58 = vsel %vm3106_vm2, %v5785_v56, %v5784_v20  ;;  %v11657_v7 = vpack.c.bf16 %v14964_v9, %v14962_v36  ;;  %v5980_v42 = vsel %vm14965_vm11, %v5979_v23, %v5978_v18  ;;  %v1787_v8 = vpop.xlane.xlu2 %1786  ;;  %v11660_v60 = vpop.xlane.xlu1 %1720  ;;  %vm14967_vm9 = vmmov %vm14963_vm14 }
 0x4a8   :  { %vm14966_vm1 = vcmask 589312   ;;  %v5004_v22 = vunpack.c.l.b16 %v4310_v27  ;;  %v5005_v17 = vunpack.c.h.b16 %v4310_v27  ;;  %v3695_v57 = vsel %vm3114_vm4, %v3694_v6, %v3693_v29  ;;  %v1718_v56 = vpop.xlane.xlu0 %1717 }
 0x4a9   :  { %v3889_v26 = vsel %vm14966_vm1, %v3888_v47, %v3887_v35  ;;  %v5982_v59 = vsel %vm14967_vm9, %v5981_v34, %v5980_v42  ;;  %v2466_v43 = vmul.f32 0.015625, %v1718_v56  ;;  %v4360_v3 = vpack.c.bf16 %v1718_v56, %v1715_v1  ;;  %v14968_v35 = vld [vmem:[#allocation44_spill] sm:$0xff]  ;;  %vm14971_vm14 = vmmov %vm14966_vm1 }
 0x4aa   :  { %v1944_v18 = vsel %vm536_vm0, %v493_v30, 0.0  ;;  %v1941_v63 = vsel %vm536_vm0, %v492_v45, 0.0  ;;  %v5788_v20 = vsel %vm3110_vm3, %v5787_v0, %v5786_v58  ;;  %v2368_v47 = vmul.f32 0.015625, %v14964_v9  ;;  %vm14974_vm1 = vmmov %vm14967_vm9 }
 0x4ab   :  { %v3698_v52 = vperm.slane %v2367_v40, %v7980_v51  ;;  %v1902_v23 = vsel %vm536_vm0, %v479_v38, 0.0  ;;  %v5006_v27 = vunpack.c.l.b16 %v11657_v7  ;;  %v3890_v6 = vperm.slane %v2466_v43, %v8019_v53  ;;  %1945 = vadd.xlane.f32.xlu2 %v1944_v18  ;;  %1942 = vadd.xlane.f32.xlu1 %v1941_v63  ;;  %v462_v40 = vld [vmem:[%s13571_s0 + $0xdb0] sm:$0xff]  ;;  %vm14975_vm9 = vmmov %vm14961_vm8 }
 0x4ac   :  { %v5104_v29 = vunpack.c.l.b16 %v4360_v3  ;;  %v5105_v34 = vunpack.c.h.b16 %v4360_v3  ;;  %v5789_v1 = vperm.slane %v5004_v22, %v7951_v14  ;;  %v5791_v36 = vperm.slane %v5005_v17, %v7965_v32  ;;  %1903 = vadd.xlane.f32.xlu0 %v1902_v23 }
 0x4ad   :  { %v2369_v30 = vmul.f32 0.015625, %v14968_v35  ;;  %v3697_v0 = vsel %vm3118_vm5, %v3696_v33, %v3695_v57  ;;  %v2489_v45 = vmul.f32 0.015625, %v1787_v8  ;;  %vm14969_vm6 = vcmask 654912   ;;  %v449_v57 = vld [vmem:[%s13571_s0 + $0xd48] sm:$0xff] }
 0x4ae   :  { %v11684_v58 = vsel %vm14969_vm6, %v3890_v6, %v3889_v26  ;;  %v5983_v9 = vperm.slane %v5104_v29, %v7985_v25  ;;  %v5985_v42 = vperm.slane %v5105_v34, %v8019_v53  ;;  %v5790_v38 = vsel %vm3114_vm4, %v5789_v1, %v5788_v20  ;;  %vm14972_vm11 = vmmov %vm14969_vm6 }
 0x4af   :  { %14970 = vst [vmem:[#allocation105_spill] sm:$0xff] %v11684_v58  ;;  %v3700_v22 = vperm.slane %v2368_v47, %v7991_v39  ;;  %v3699_v33 = vsel %vm14961_vm8, %v3698_v52, %v3697_v0  ;;  %v5007_v17 = vunpack.c.h.b16 %v11657_v7  ;;  %v5793_v26 = vperm.slane %v5006_v27, %v7980_v51  ;;  %v1742_v3 = vpop.xlane.xlu2 %1741  ;;  %v1739_v18 = vpop.xlane.xlu1 %1738  ;;  %v448_v7 = vld [vmem:[%s13571_s0 + $0xd40] sm:$0xff] }
 0x4b0   :  { %v11698_v56 = vpack.c.bf16 %v10145_v46, %v14968_v35  ;;  %v5984_v43 = vsel %vm14971_vm14, %v5983_v9, %v5982_v59  ;;  %v1851_v63 = vsel %vm536_vm0, %v462_v40, 0.0  ;;  %v2474_v47 = vmul.f32 0.015625, %v1742_v3  ;;  %v1790_v27 = vpop.xlane.xlu0 %1789 }
 0x4b1   :  { %v11706_v20 = vsel %vm14972_vm11, %v5985_v42, %v5984_v43  ;;  %v2473_v52 = vmul.f32 0.015625, %v1739_v18  ;;  %v11708_v23 = vpack.c.bf16 %v1742_v3, %v1739_v18  ;;  %v3935_v6 = vperm.slane %v2489_v45, %v7904_v61  ;;  %vm14984_vm11 = vmmov %vm14974_vm1 }
 0x4b2   :  { %14973 = vst [vmem:[#allocation118_spill] sm:$0xff] %v11706_v20  ;;  %v2490_v29 = vmul.f32 0.015625, %v1790_v27  ;;  %v4372_v59 = vpack.c.bf16 %v1790_v27, %v1787_v8  ;;  %v1812_v34 = vsel %vm536_vm0, %v449_v57, 0.0  ;;  %v3702_v1 = vperm.slane %v2369_v30, %v7985_v25 }
 0x4b3   :  { %v3905_v35 = vperm.slane %v2474_v47, %v7907_v50  ;;  %v3904_v0 = vperm.slane %v2473_v52, %v7904_v61  ;;  %v1809_v40 = vsel %vm536_vm0, %v448_v7, 0.0  ;;  %v5792_v9 = vsel %vm3118_vm5, %v5791_v36, %v5790_v38  ;;  %1852 = vadd.xlane.f32.xlu2 %v1851_v63  ;;  %1813 = vadd.xlane.f32.xlu1 %v1812_v34  ;;  %v510_v52 = vld [vmem:[%s13571_s0 + $0xf30] sm:$0xff]  ;;  %v463_v34 = vld [vmem:[%s13571_s0 + $0xdb8] sm:$0xff] }
 0x4b4   :  { %v3701_v42 = vsel %vm14974_vm1, %v3700_v22, %v3699_v33  ;;  %v5795_v43 = vperm.slane %v5007_v17, %v7991_v39  ;;  %v3936_v45 = vperm.slane %v2490_v29, %v7907_v50  ;;  %v5794_v8 = vsel %vm14975_vm9, %v5793_v26, %v5792_v9  ;;  %1810 = vadd.xlane.f32.xlu0 %v1809_v40  ;;  %vm14985_vm1 = vmmov %vm14971_vm14 }
 0x4b5   :  { %v11723_v57 = vpack.c.bf16 %v10135_v11, %v10137_v41  ;;  %v5008_v30 = vunpack.c.l.b16 %v11698_v56  ;;  %vm14976_vm6 = vcmask 130112   ;;  %v14977_v36 = vunpack.c.l.b16 %v11489_v5 }
 0x4b6   :  { %v11727_v3 = vsel %vm14976_vm6, %v3905_v35, %v3904_v0  ;;  %v14979_v22 = vperm.slane %v11492_v37, %v8046_v44  ;;  %v14981_v17 = vunpack.c.l.b16 %v11496_v28  ;;  %vm14982_vm8 = vmmov %vm14976_vm6  ;;  %v11750_v63 = vperm.slane %v4997_v4, %v8046_v44 }
 0x4b7   :  { %v11732_v38 = vperm.slane %v14977_v36, %v8040_v2  ;;  %v3937_v18 = vsel %vm14982_vm8, %v3936_v45, %v3935_v6  ;;  %v11753_v7 = vsel %vm14971_vm14, %v3702_v1, %v3701_v42  ;;  %v5128_v37 = vunpack.c.l.b16 %v4372_v59  ;;  %v1883_v29 = vpop.xlane.xlu2 %1882  ;;  %vm14986_vm9 = vmmov %vm14976_vm6 }
 0x4b8   :  { %v11739_v33 = vsel %vm3150_vm13, %v14979_v22, %v11541_v12  ;;  %v11744_v26 = vperm.slane %v14981_v17, %v8049_v15  ;;  %14983 = vst [vmem:[#allocation97_spill] sm:$0xff] %v11750_v63  ;;  %v5129_v47 = vunpack.c.h.b16 %v4372_v59  ;;  %v511_v12 = vld [vmem:[%s13571_s0 + $0xf38] sm:$0xff]  ;;  %v5796_v27 = vsel %vm14984_vm11, %v5795_v43, %v5794_v8  ;;  %v1796_v59 = vpop.xlane.xlu1 %1795  ;;  %vm14990_vm14 = vmmov %vm14986_vm9 }
 0x4b9   :  { %14978 = vst [vmem:[#allocation117_spill] sm:$0xff] %v11732_v38  ;;  %v11763_v6 = vmul.f32 0.015625, %v10135_v11  ;;  %v11766_v28 = vmul.f32 0.015625, %v10137_v41  ;;  %v2370_v4 = vmul.f32 0.015625, %v10145_v46  ;;  %v5009_v35 = vunpack.c.h.b16 %v11698_v56  ;;  %v1793_v11 = vpop.xlane.xlu0 %1792  ;;  %vm14991_vm11 = vmmov %vm14986_vm9 }
 0x4ba   :  { %14980 = vst [vmem:[#allocation98_spill] sm:$0xff] %v11739_v33  ;;  %v5797_v0 = vperm.slane %v5008_v30, %v7985_v25  ;;  %v2492_v40 = vmul.f32 0.015625, %v1796_v59  ;;  %v2491_v9 = vmul.f32 0.015625, %v1793_v11  ;;  %v4373_v42 = vpack.c.bf16 %v1796_v59, %v1793_v11 }
 0x4bb   :  { %v1998_v41 = vsel %vm536_vm0, %v511_v12, 0.0  ;;  %v1995_v46 = vsel %vm536_vm0, %v510_v52, 0.0  ;;  %v6030_v43 = vperm.slane %v5128_v37, %v7904_v61  ;;  %v6031_v45 = vperm.slane %v5129_v47, %v7907_v50  ;;  %v419_v12 = vld [vmem:[%s13571_s0 + $0xc58] sm:$0xff] }
 0x4bc   :  { %v3940_v8 = vperm.slane %v2492_v40, %v7940_v48  ;;  %v1854_v36 = vsel %vm536_vm0, %v463_v34, 0.0  ;;  %v5112_v56 = vunpack.c.l.b16 %v11708_v23  ;;  %v3938_v30 = vperm.slane %v2491_v9, %v7931_v13  ;;  %1999 = vadd.xlane.f32.xlu2 %v1998_v41  ;;  %1996 = vadd.xlane.f32.xlu1 %v1995_v46  ;;  %v525_v34 = vld [vmem:[%s13571_s0 + $0xfa8] sm:$0xff]  ;;  %v524_v40 = vld [vmem:[%s13571_s0 + $0xfa0] sm:$0xff] }
 0x4bd   :  { %v5130_v22 = vunpack.c.l.b16 %v4373_v42  ;;  %v5131_v17 = vunpack.c.h.b16 %v4373_v42  ;;  %v3704_v52 = vperm.slane %v2370_v4, %v8019_v53  ;;  %v5798_v37 = vsel %vm14985_vm1, %v5797_v0, %v5796_v27  ;;  %1855 = vadd.xlane.f32.xlu0 %v1854_v36 }
 0x4be   :  { %v5799_v47 = vperm.slane %v5009_v35, %v8019_v53  ;;  %v5113_v59 = vunpack.c.h.b16 %v11708_v23  ;;  %v2521_v11 = vmul.f32 0.015625, %v1883_v29  ;;  %v3939_v9 = vsel %vm3106_vm2, %v3938_v30, %v3937_v18 }
 0x4bf   :  { %v6033_v4 = vperm.slane %v5130_v22, %v7931_v13  ;;  %v6035_v27 = vperm.slane %v5131_v17, %v7940_v48  ;;  %v11801_v23 = vpack.c.bf16 %v10186_v21, %v10192_v54  ;;  %v6032_v35 = vsel %vm14986_vm9, %v6031_v45, %v6030_v43  ;;  %v1748_v46 = vpop.xlane.xlu2 %1747 }
 0x4c0   :  { %v1722_v0 = vsel %vm536_vm0, %v419_v12, 0.0  ;;  %v11806_v42 = vsel %vm3110_vm3, %v3940_v8, %v3939_v9  ;;  %v5999_v41 = vperm.slane %v5112_v56, %v7904_v61  ;;  %v1745_v30 = vpop.xlane.xlu1 %1744  ;;  %v2040_v22 = vsel %vm536_vm0, %v525_v34, 0.0 }
 0x4c1   :  { %v6034_v18 = vsel %vm3106_vm2, %v6033_v4, %v6032_v35  ;;  %v2037_v36 = vsel %vm536_vm0, %v524_v40, 0.0  ;;  %v2476_v1 = vmul.f32 0.015625, %v1748_v46  ;;  %v2475_v43 = vmul.f32 0.015625, %v1745_v30  ;;  %v1886_v12 = vpop.xlane.xlu0 %1885 }
 0x4c2   :  { %v11813_v17 = vsel %vm3110_vm3, %v6035_v27, %v6034_v18  ;;  %v4365_v45 = vpack.c.bf16 %v1748_v46, %v1745_v30  ;;  %v6000_v8 = vperm.slane %v5113_v59, %v7907_v50  ;;  %v3997_v9 = vperm.slane %v2521_v11, %v7904_v61 }
 0x4c3   :  { %v2522_v56 = vmul.f32 0.015625, %v1886_v12  ;;  %v11817_v38 = vpack.c.bf16 %v1886_v12, %v1883_v29  ;;  %v3909_v4 = vperm.slane %v2476_v1, %v7940_v48  ;;  %v3907_v34 = vperm.slane %v2475_v43, %v7931_v13 }
 0x4c4   :  { %v5114_v35 = vunpack.c.l.b16 %v4365_v45  ;;  %v5115_v40 = vunpack.c.h.b16 %v4365_v45  ;;  %v3706_v27 = vperm.slane %v11766_v28, %v8016_v31  ;;  %vm14987_vm6 = vcmask 654912   ;;  %1723 = vadd.xlane.f32.xlu2 %v1722_v0  ;;  %2041 = vadd.xlane.f32.xlu1 %v2040_v22  ;;  %v480_v0 = vld [vmem:[%s13571_s0 + $0xe40] sm:$0xff] }
 0x4c5   :  { %v3705_v18 = vsel %vm14987_vm6, %v3704_v52, %v11753_v7  ;;  %vm14988_vm8 = vmmov %vm14987_vm6  ;;  %v3998_v59 = vperm.slane %v2522_v56, %v7907_v50  ;;  %v2373_v11 = vmul.f32 0.015625, %v10192_v54  ;;  %v3908_v29 = vsel %vm3106_vm2, %v3907_v34, %v11727_v3  ;;  %2038 = vadd.xlane.f32.xlu0 %v2037_v36 }
 0x4c6   :  { %v5800_v46 = vsel %vm14988_vm8, %v5799_v47, %v5798_v37  ;;  %v6002_v1 = vperm.slane %v5114_v35, %v7931_v13  ;;  %v6004_v30 = vperm.slane %v5115_v40, %v7940_v48  ;;  %v3708_v28 = vperm.slane %v11763_v6, %v8006_v24  ;;  %v433_v6 = vld [vmem:[%s13571_s0 + $0xcc8] sm:$0xff]  ;;  %vm14996_vm6 = vmmov %vm14991_vm11 }
 0x4c7   :  { %v14989_v7 = vunpack.c.l.b16 %v11723_v57  ;;  %v6001_v37 = vsel %vm14990_vm14, %v6000_v8, %v5999_v41  ;;  %v3999_v54 = vsel %vm14991_vm11, %v3998_v59, %v3997_v9  ;;  %v5011_v3 = vunpack.c.h.b16 %v11723_v57  ;;  %v1889_v12 = vpop.xlane.xlu2 %1888  ;;  %v432_v9 = vld [vmem:[%s13571_s0 + $0xcc0] sm:$0xff]  ;;  %vm14999_vm8 = vmmov %vm14996_vm6 }
 0x4c8   :  { %v5012_v47 = vunpack.c.l.b16 %v11801_v23  ;;  %v6003_v43 = vsel %vm3106_vm2, %v6002_v1, %v6001_v37  ;;  %v11849_v22 = vsel %vm3110_vm3, %v3909_v4, %v3908_v29  ;;  %v3707_v41 = vsel %vm3138_vm10, %v3706_v27, %v3705_v18  ;;  %v1838_v8 = vpop.xlane.xlu1 %1837  ;;  %vm15000_vm14 = vmmov %vm14996_vm6 }
 0x4c9   :  { %v5801_v52 = vperm.slane %v14989_v7, %v8016_v31  ;;  %v11854_v57 = vmul.f32 0.015625, %v10186_v21  ;;  %v11857_v45 = vsel %vm3110_vm3, %v6004_v30, %v6003_v43  ;;  %v3710_v56 = vperm.slane %v2373_v11, %v8049_v15  ;;  %v1835_v40 = vpop.xlane.xlu0 %1834  ;;  %v14992_v7 = vld [vmem:[#allocation19_spill] sm:$0xff]  ;;  %vm15001_vm11 = vmmov %vm14996_vm6 }
 0x4ca   :  { %v5013_v4 = vunpack.c.h.b16 %v11801_v23  ;;  %v2523_v34 = vmul.f32 0.015625, %v1889_v12  ;;  %v2506_v35 = vmul.f32 0.015625, %v1838_v8  ;;  %v2505_v27 = vmul.f32 0.015625, %v1835_v40  ;;  %v14993_v43 = vld [vmem:[#allocation47_spill] sm:$0xff] }
 0x4cb   :  { %v5802_v36 = vsel %vm3138_vm10, %v5801_v52, %v5800_v46  ;;  %v11864_v18 = vpack.c.bf16 %v1838_v8, %v1835_v40  ;;  %v1905_v21 = vsel %vm536_vm0, %v480_v0, 0.0  ;;  %v1764_v46 = vsel %vm536_vm0, %v433_v6, 0.0 }
 0x4cc   :  { %v5805_v59 = vperm.slane %v5012_v47, %v8049_v15  ;;  %v4000_v29 = vperm.slane %v2523_v34, %v7931_v13  ;;  %v3967_v1 = vperm.slane %v2506_v35, %v7907_v50  ;;  %v1761_v11 = vsel %vm536_vm0, %v432_v9, 0.0  ;;  %1906 = vadd.xlane.f32.xlu2 %v1905_v21  ;;  %1765 = vadd.xlane.f32.xlu1 %v1764_v46  ;;  %v14997_v21 = vld [vmem:[#allocation52_spill] sm:$0xff] }
 0x4cd   :  { %v5803_v23 = vperm.slane %v5011_v3, %v8006_v24  ;;  %v11874_v30 = vmul.f32 0.015625, %v10241_v19  ;;  %v2377_v52 = vmul.f32 0.015625, %v14992_v7  ;;  %v3966_v37 = vperm.slane %v2505_v27, %v7904_v61  ;;  %1762 = vadd.xlane.f32.xlu0 %v1761_v11 }
 0x4ce   :  { %v11879_v0 = vmul.f32 0.015625, %v14993_v43  ;;  %v3712_v47 = vperm.slane %v11854_v57, %v8046_v44  ;;  %vm14994_vm1 = vcmask 786112   ;;  %v4001_v8 = vsel %vm3106_vm2, %v4000_v29, %v3999_v54  ;;  %v495_v57 = vld [vmem:[%s13571_s0 + $0xeb8] sm:$0xff] }
 0x4cf   :  { %v3709_v6 = vsel %vm14994_vm1, %v3708_v28, %v3707_v41  ;;  %vm14995_vm9 = vmmov %vm14994_vm1  ;;  %v5807_v34 = vperm.slane %v5013_v4, %v8046_v44  ;;  %v11889_v35 = vsel %vm14996_vm6, %v3967_v1, %v3966_v37  ;;  %v4316_v54 = vpack.c.bf16 %v10241_v19, %v14992_v7  ;;  %v481_v4 = vld [vmem:[%s13571_s0 + $0xe48] sm:$0xff] }
 0x4d0   :  { %v5804_v3 = vsel %vm14995_vm9, %v5803_v23, %v5802_v36  ;;  %v3711_v9 = vsel %vm3146_vm12, %v3710_v56, %v3709_v6  ;;  %v5160_v41 = vunpack.c.l.b16 %v11817_v38  ;;  %v5161_v36 = vunpack.c.h.b16 %v11817_v38  ;;  %v494_v56 = vld [vmem:[%s13571_s0 + $0xeb0] sm:$0xff]  ;;  %v1982_v38 = vpop.xlane.xlu2 %1981  ;;  %vm15004_vm1 = vmmov %vm14996_vm6 }
 0x4d1   :  { %v5806_v28 = vsel %vm3146_vm12, %v5805_v59, %v5804_v3  ;;  %v3719_v40 = vperm.slane %v11874_v30, %v7907_v50  ;;  %v3718_v27 = vperm.slane %v2377_v52, %v7904_v61  ;;  %v11909_v46 = vmul.f32 0.015625, %v14997_v21  ;;  %v1979_v59 = vpop.xlane.xlu1 %1978  ;;  %v1892_v23 = vpop.xlane.xlu0 %1891  ;;  %vm15006_vm6 = vmmov %vm15004_vm1 }
 0x4d2   :  { %v11913_v19 = vpack.c.bf16 %v14997_v21, %v14993_v43  ;;  %v2554_v29 = vmul.f32 0.015625, %v1982_v38  ;;  %v2553_v1 = vmul.f32 0.015625, %v1979_v59  ;;  %v11915_v11 = vpack.c.bf16 %v1982_v38, %v1979_v59 }
 0x4d3   :  { %v1950_v7 = vsel %vm536_vm0, %v495_v57, 0.0  ;;  %v2524_v37 = vmul.f32 0.015625, %v1892_v23  ;;  %v4389_v30 = vpack.c.bf16 %v1892_v23, %v1889_v12  ;;  %v1947_v52 = vsel %vm536_vm0, %v494_v56, 0.0 }
 0x4d4   :  { %v1908_v6 = vsel %vm536_vm0, %v481_v4, 0.0  ;;  %v6092_v3 = vperm.slane %v5160_v41, %v7904_v61  ;;  %v6093_v43 = vperm.slane %v5161_v36, %v7907_v50  ;;  %v4060_v21 = vperm.slane %v2554_v29, %v7907_v50  ;;  %1951 = vadd.xlane.f32.xlu2 %v1950_v7  ;;  %1948 = vadd.xlane.f32.xlu1 %v1947_v52 }
 0x4d5   :  { %v4059_v33 = vperm.slane %v2553_v1, %v7904_v61  ;;  %v5016_v5 = vunpack.c.l.b16 %v4316_v54  ;;  %v4002_v38 = vperm.slane %v2524_v37, %v7940_v48  ;;  %v5162_v59 = vunpack.c.l.b16 %v4389_v30  ;;  %1909 = vadd.xlane.f32.xlu0 %v1908_v6  ;;  %v450_v37 = vld [vmem:[%s13571_s0 + $0xd50] sm:$0xff] }
 0x4d6   :  { %v5163_v63 = vunpack.c.h.b16 %v4389_v30  ;;  %v11928_v12 = vsel %vm3146_vm12, %v11744_v26, %v11547_v16  ;;  %v5017_v41 = vunpack.c.h.b16 %v4316_v54  ;;  %v11936_v56 = vsel %vm3150_vm13, %v3712_v47, %v3711_v9  ;;  %v464_v47 = vld [vmem:[%s13571_s0 + $0xdc0] sm:$0xff] }
 0x4d7   :  { %14998 = vst [vmem:[#allocation110_spill] sm:$0xff] %v11928_v12  ;;  %v11933_v36 = vsel %vm14999_vm8, %v4060_v21, %v4059_v33  ;;  %v11939_v4 = vsel %vm3110_vm3, %v4002_v38, %v4001_v8  ;;  %v6095_v29 = vperm.slane %v5162_v59, %v7931_v13  ;;  %v11944_v26 = vsel %vm3150_vm13, %v5807_v34, %v5806_v28  ;;  %v451_v8 = vld [vmem:[%s13571_s0 + $0xd58] sm:$0xff]  ;;  %vm15007_vm8 = vmmov %vm15004_vm1 }
 0x4d8   :  { %v6097_v16 = vperm.slane %v5163_v63, %v7940_v48  ;;  %v5014_v54 = vunpack.c.l.b16 %v11913_v19  ;;  %v6094_v1 = vsel %vm15000_vm14, %v6093_v43, %v6092_v3  ;;  %v11957_v63 = vsel %vm15001_vm11, %v3719_v40, %v3718_v27  ;;  %v1841_v23 = vpop.xlane.xlu2 %1840 }
 0x4d9   :  { %v11960_v9 = vperm.slane %v5016_v5, %v7904_v61  ;;  %v5015_v34 = vunpack.c.h.b16 %v11913_v19  ;;  %v6096_v28 = vsel %vm3106_vm2, %v6095_v29, %v6094_v1  ;;  %v1802_v7 = vpop.xlane.xlu1 %1801  ;;  %v5814_v30 = vperm.slane %v5017_v41, %v7907_v50  ;;  %v1799_v6 = vpop.xlane.xlu0 %1798  ;;  %v15002_v29 = vld [vmem:[#allocation56_spill] sm:$0xff] }
 0x4da   :  { %v11969_v52 = vsel %vm3110_vm3, %v6097_v16, %v6096_v28  ;;  %v2507_v40 = vmul.f32 0.015625, %v1841_v23  ;;  %v2494_v27 = vmul.f32 0.015625, %v1802_v7  ;;  %v2493_v5 = vmul.f32 0.015625, %v1799_v6 }
 0x4db   :  { %v4374_v3 = vpack.c.bf16 %v1802_v7, %v1799_v6  ;;  %v1857_v19 = vsel %vm536_vm0, %v464_v47, 0.0  ;;  %v1818_v43 = vsel %vm536_vm0, %v451_v8, 0.0  ;;  %v11974_v21 = vmul.f32 0.015625, %v10297_v10 }
 0x4dc   :  { %v3969_v38 = vperm.slane %v2507_v40, %v7931_v13  ;;  %v3944_v59 = vperm.slane %v2494_v27, %v7965_v32  ;;  %v1815_v41 = vsel %vm536_vm0, %v450_v37, 0.0  ;;  %v11981_v16 = vpack.c.bf16 %v15002_v29, %v10297_v10  ;;  %1858 = vadd.xlane.f32.xlu2 %v1857_v19  ;;  %1819 = vadd.xlane.f32.xlu1 %v1818_v43  ;;  %v513_v37 = vld [vmem:[%s13571_s0 + $0xf48] sm:$0xff]  ;;  %v512_v19 = vld [vmem:[%s13571_s0 + $0xf40] sm:$0xff] }
 0x4dd   :  { %v3942_v1 = vperm.slane %v2493_v5, %v7951_v14  ;;  %v5132_v28 = vunpack.c.l.b16 %v4374_v3  ;;  %v5133_v7 = vunpack.c.h.b16 %v4374_v3  ;;  %v5809_v47 = vperm.slane %v5014_v54, %v8040_v2  ;;  %v15003_v10 = vld [vmem:[#allocation51_spill] sm:$0xff]  ;;  %1816 = vadd.xlane.f32.xlu0 %v1815_v41 }
 0x4de   :  { %v11986_v8 = vperm.slane %v5015_v34, %v8093_v55  ;;  %v3970_v40 = vsel %vm3106_vm2, %v3969_v38, %v11889_v35  ;;  %v11994_v27 = vmul.f32 0.015625, %v15003_v10  ;;  %v12001_v5 = vmul.f32 0.015625, %v15002_v29 }
 0x4df   :  { %v3943_v6 = vsel %vm3114_vm4, %v3942_v1, %v11806_v42  ;;  %v6037_v54 = vperm.slane %v5132_v28, %v7951_v14  ;;  %v6039_v34 = vperm.slane %v5133_v7, %v7965_v32  ;;  %v5144_v35 = vunpack.c.l.b16 %v11864_v18  ;;  %v465_v42 = vld [vmem:[%s13571_s0 + $0xdc8] sm:$0xff] }
 0x4e0   :  { %v5145_v3 = vunpack.c.h.b16 %v11864_v18  ;;  %v12012_v43 = vsel %vm3118_vm5, %v3944_v59, %v3943_v6  ;;  %v3721_v38 = vperm.slane %v11974_v21, %v7931_v13  ;;  %v5018_v41 = vunpack.c.l.b16 %v11981_v16  ;;  %v1934_v18 = vpop.xlane.xlu2 %1933 }
 0x4e1   :  { %v6038_v29 = vsel %vm3114_vm4, %v6037_v54, %v11813_v17  ;;  %v1931_v1 = vpop.xlane.xlu1 %1930  ;;  %v2004_v28 = vsel %vm536_vm0, %v513_v37, 0.0  ;;  %v2538_v33 = vmul.f32 0.015625, %v1934_v18  ;;  %v1844_v59 = vpop.xlane.xlu0 %1843  ;;  %v2001_v21 = vsel %vm536_vm0, %v512_v19, 0.0 }
 0x4e2   :  { %v12021_v7 = vsel %vm3118_vm5, %v6039_v34, %v6038_v29  ;;  %v2537_v57 = vmul.f32 0.015625, %v1931_v1  ;;  %v12023_v12 = vpack.c.bf16 %v1934_v18, %v1931_v1  ;;  %v2508_v6 = vmul.f32 0.015625, %v1844_v59 }
 0x4e3   :  { %v4381_v44 = vpack.c.bf16 %v1844_v59, %v1841_v23  ;;  %v1860_v20 = vsel %vm536_vm0, %v465_v42, 0.0  ;;  %v6061_v17 = vperm.slane %v5144_v35, %v7904_v61  ;;  %v6062_v54 = vperm.slane %v5145_v3, %v7907_v50 }
 0x4e4   :  { %v4029_v37 = vperm.slane %v2538_v33, %v7907_v50  ;;  %v4028_v34 = vperm.slane %v2537_v57, %v7904_v61  ;;  %v5019_v29 = vunpack.c.h.b16 %v11981_v16  ;;  %v3971_v18 = vperm.slane %v2508_v6, %v7940_v48  ;;  %2005 = vadd.xlane.f32.xlu2 %v2004_v28  ;;  %2002 = vadd.xlane.f32.xlu1 %v2001_v21 }
 0x4e5   :  { %v5146_v1 = vunpack.c.l.b16 %v4381_v44  ;;  %v5147_v58 = vunpack.c.h.b16 %v4381_v44  ;;  %v5815_v23 = vsel %vm15004_vm1, %v5814_v30, %v11960_v9  ;;  %vm15005_vm9 = vcmask 982912   ;;  %1861 = vadd.xlane.f32.xlu0 %v1860_v20 }
 0x4e6   :  { %v5810_v19 = vsel %vm15005_vm9, %v5809_v47, %v11944_v26  ;;  %v12038_v35 = vsel %vm15006_vm6, %v4029_v37, %v4028_v34  ;;  %v3725_v57 = vperm.slane %v11994_v27, %v7951_v14  ;;  %v12043_v33 = vsel %vm3110_vm3, %v3971_v18, %v3970_v40  ;;  %v420_v26 = vld [vmem:[%s13571_s0 + $0xc60] sm:$0xff]  ;;  %v527_v40 = vld [vmem:[%s13571_s0 + $0xfb8] sm:$0xff]  ;;  %vm15009_vm14 = vmmov %vm15005_vm9 }
 0x4e7   :  { %v6064_v16 = vperm.slane %v5146_v1, %v7931_v13  ;;  %v6066_v44 = vperm.slane %v5147_v58, %v7940_v48  ;;  %v3723_v9 = vperm.slane %v12001_v5, %v7940_v48  ;;  %v6063_v30 = vsel %vm15007_vm8, %v6062_v54, %v6061_v17  ;;  %v526_v58 = vld [vmem:[%s13571_s0 + $0xfb0] sm:$0xff]  ;;  %vm15013_vm9 = vmmov %vm15006_vm6 }
 0x4e8   :  { %v5192_v47 = vunpack.c.l.b16 %v11915_v11  ;;  %v5193_v27 = vunpack.c.h.b16 %v11915_v11  ;;  %v3722_v20 = vsel %vm3106_vm2, %v3721_v38, %v11957_v63  ;;  %v5816_v3 = vperm.slane %v5018_v41, %v7931_v13  ;;  %v1751_v28 = vpop.xlane.xlu2 %1750 }
 0x4e9   :  { %v5818_v5 = vperm.slane %v5019_v29, %v7940_v48  ;;  %v6065_v42 = vsel %vm3106_vm2, %v6064_v16, %v6063_v30  ;;  %v1988_v59 = vpop.xlane.xlu1 %1987  ;;  %v2477_v6 = vmul.f32 0.015625, %v1751_v28  ;;  %v1985_v17 = vpop.xlane.xlu0 %1984  ;;  %v1725_v54 = vsel %vm536_vm0, %v420_v26, 0.0 }
 0x4ea   :  { %v12067_v11 = vsel %vm3110_vm3, %v6066_v44, %v6065_v42  ;;  %v2556_v21 = vmul.f32 0.015625, %v1988_v59  ;;  %v2555_v37 = vmul.f32 0.015625, %v1985_v17  ;;  %v4405_v34 = vpack.c.bf16 %v1988_v59, %v1985_v17  ;;  %v434_v59 = vld [vmem:[%s13571_s0 + $0xcd0] sm:$0xff] }
 0x4eb   :  { %v2046_v63 = vsel %vm536_vm0, %v527_v40, 0.0  ;;  %v2043_v38 = vsel %vm536_vm0, %v526_v58, 0.0  ;;  %v6154_v41 = vperm.slane %v5192_v47, %v7904_v61  ;;  %v6155_v29 = vperm.slane %v5193_v27, %v7907_v50 }
 0x4ec   :  { %v3911_v18 = vperm.slane %v2477_v6, %v7951_v14  ;;  %v4064_v1 = vperm.slane %v2556_v21, %v7940_v48  ;;  %v3724_v16 = vsel %vm3110_vm3, %v3723_v9, %v3722_v20  ;;  %v4062_v44 = vperm.slane %v2555_v37, %v7931_v13  ;;  %1726 = vadd.xlane.f32.xlu2 %v1725_v54  ;;  %v435_v9 = vld [vmem:[%s13571_s0 + $0xcd8] sm:$0xff] }
 0x4ed   :  { %v5194_v30 = vunpack.c.l.b16 %v4405_v34  ;;  %v5195_v26 = vunpack.c.h.b16 %v4405_v34  ;;  %v15008_v40 = vperm.slane %v11879_v0, %v8040_v2  ;;  %v5817_v47 = vsel %vm3106_vm2, %v5816_v3, %v5815_v23  ;;  %2047 = vadd.xlane.f32.xlu1 %v2046_v63  ;;  %2044 = vadd.xlane.f32.xlu0 %v2043_v38 }
 0x4ee   :  { %v3912_v27 = vsel %vm3114_vm4, %v3911_v18, %v11849_v22  ;;  %v15010_v20 = vperm.slane %v11909_v46, %v8093_v55  ;;  %vm15011_vm11 = vcmask 1048512   ;;  %v4063_v0 = vsel %vm3106_vm2, %v4062_v44, %v11933_v36  ;;  %v421_v36 = vld [vmem:[%s13571_s0 + $0xc68] sm:$0xff] }
 0x4ef   :  { %v3715_v58 = vsel %vm15009_vm14, %v15008_v40, %v11936_v56  ;;  %v6157_v56 = vperm.slane %v5194_v30, %v7931_v13  ;;  %v6159_v23 = vperm.slane %v5195_v26, %v7940_v48  ;;  %vm15012_vm1 = vmmov %vm15011_vm11  ;;  %v12104_v3 = vsel %vm3114_vm4, %v3725_v57, %v3724_v16 }
 0x4f0   :  { %v12093_v42 = vsel %vm15011_vm11, %v15010_v20, %v3715_v58  ;;  %v12101_v22 = vsel %vm15012_vm1, %v11986_v8, %v5810_v19  ;;  %v6156_v46 = vsel %vm15013_vm9, %v6155_v29, %v6154_v41  ;;  %v12114_v6 = vsel %vm3110_vm3, %v4064_v1, %v4063_v0  ;;  %v1898_v57 = vpop.xlane.xlu2 %1897  ;;  %vm15025_vm9 = vmmov %vm15006_vm6 }
 0x4f1   :  { %v12117_v21 = vsel %vm3110_vm3, %v5818_v5, %v5817_v47  ;;  %v12120_v8 = vmul.f32 0.015625, %v10333_v49  ;;  %v6158_v19 = vsel %vm3106_vm2, %v6157_v56, %v6156_v46  ;;  %v1895_v17 = vpop.xlane.xlu1 %1894  ;;  %v1770_v54 = vsel %vm536_vm0, %v435_v9, 0.0  ;;  %v1754_v41 = vpop.xlane.xlu0 %1753 }
 0x4f2   :  { %v12125_v37 = vsel %vm3110_vm3, %v6159_v23, %v6158_v19  ;;  %v2526_v34 = vmul.f32 0.015625, %v1898_v57  ;;  %v2525_v63 = vmul.f32 0.015625, %v1895_v17  ;;  %v4390_v38 = vpack.c.bf16 %v1898_v57, %v1895_v17  ;;  %v15014_v23 = vld [vmem:[#allocation55_spill] sm:$0xff]  ;;  %v496_v57 = vld [vmem:[%s13571_s0 + $0xec0] sm:$0xff] }
 0x4f3   :  { %v2478_v29 = vmul.f32 0.015625, %v1754_v41  ;;  %v4366_v18 = vpack.c.bf16 %v1754_v41, %v1751_v28  ;;  %v1767_v5 = vsel %vm536_vm0, %v434_v59, 0.0  ;;  %v1728_v1 = vsel %vm536_vm0, %v421_v36, 0.0  ;;  %v482_v41 = vld [vmem:[%s13571_s0 + $0xe50] sm:$0xff] }
 0x4f4   :  { %v4006_v16 = vperm.slane %v2526_v34, %v7965_v32  ;;  %v4004_v44 = vperm.slane %v2525_v63, %v7951_v14  ;;  %v5164_v30 = vunpack.c.l.b16 %v4390_v38  ;;  %v5165_v26 = vunpack.c.h.b16 %v4390_v38  ;;  %1771 = vadd.xlane.f32.xlu2 %v1770_v54 }
 0x4f5   :  { %v4318_v40 = vpack.c.bf16 %v10345_v62, %v15003_v10  ;;  %v3913_v58 = vperm.slane %v2478_v29, %v7965_v32  ;;  %v5116_v47 = vunpack.c.l.b16 %v4366_v18  ;;  %v5117_v9 = vunpack.c.h.b16 %v4366_v18  ;;  %1768 = vadd.xlane.f32.xlu1 %v1767_v5  ;;  %1729 = vadd.xlane.f32.xlu0 %v1728_v1 }
 0x4f6   :  { %v2382_v20 = vmul.f32 0.015625, %v10345_v62  ;;  %v4005_v28 = vsel %vm3114_vm4, %v4004_v44, %v11939_v4  ;;  %v6099_v0 = vperm.slane %v5164_v30, %v7951_v14  ;;  %v6101_v56 = vperm.slane %v5165_v26, %v7965_v32 }
 0x4f7   :  { %v12140_v46 = vmul.f32 0.015625, %v15014_v23  ;;  %v12143_v10 = vsel %vm3118_vm5, %v3913_v58, %v3912_v27  ;;  %v6006_v59 = vperm.slane %v5116_v47, %v7951_v14  ;;  %v6008_v36 = vperm.slane %v5117_v9, %v7965_v32  ;;  %v483_v27 = vld [vmem:[%s13571_s0 + $0xe58] sm:$0xff] }
 0x4f8   :  { %v5176_v62 = vunpack.c.l.b16 %v12023_v12  ;;  %v5177_v4 = vunpack.c.h.b16 %v12023_v12  ;;  %v6100_v19 = vsel %vm3114_vm4, %v6099_v0, %v11969_v52  ;;  %v12158_v17 = vsel %vm3118_vm5, %v4006_v16, %v4005_v28  ;;  %v2027_v63 = vpop.xlane.xlu2 %2026 }
 0x4f9   :  { %v12162_v54 = vpack.c.bf16 %v10333_v49, %v15014_v23  ;;  %v5020_v34 = vunpack.c.l.b16 %v4318_v40  ;;  %v12165_v12 = vsel %vm3118_vm5, %v6101_v56, %v6100_v19  ;;  %v6007_v52 = vsel %vm3114_vm4, %v6006_v59, %v11857_v45  ;;  %v1940_v38 = vpop.xlane.xlu1 %1939  ;;  %v1937_v1 = vpop.xlane.xlu0 %1936 }
 0x4fa   :  { %v3727_v29 = vperm.slane %v2382_v20, %v7965_v32  ;;  %v5021_v18 = vunpack.c.h.b16 %v4318_v40  ;;  %v12174_v5 = vsel %vm3118_vm5, %v6008_v36, %v6007_v52  ;;  %v2540_v49 = vmul.f32 0.015625, %v1940_v38  ;;  %v497_v52 = vld [vmem:[%s13571_s0 + $0xec8] sm:$0xff] }
 0x4fb   :  { %v2539_v16 = vmul.f32 0.015625, %v1937_v1  ;;  %v4397_v44 = vpack.c.bf16 %v1940_v38, %v1937_v1  ;;  %v1953_v30 = vsel %vm536_vm0, %v496_v57, 0.0  ;;  %v1914_v45 = vsel %vm536_vm0, %v483_v27, 0.0 }
 0x4fc   :  { %v6123_v26 = vperm.slane %v5176_v62, %v7904_v61  ;;  %v6124_v58 = vperm.slane %v5177_v4, %v7907_v50  ;;  %v4033_v47 = vperm.slane %v2540_v49, %v7940_v48  ;;  %v1911_v9 = vsel %vm536_vm0, %v482_v41, 0.0  ;;  %1954 = vadd.xlane.f32.xlu2 %v1953_v30  ;;  %v453_v62 = vld [vmem:[%s13571_s0 + $0xd68] sm:$0xff]  ;;  %v452_v4 = vld [vmem:[%s13571_s0 + $0xd60] sm:$0xff] }
 0x4fd   :  { %v5820_v40 = vperm.slane %v5020_v34, %v7951_v14  ;;  %v4031_v20 = vperm.slane %v2539_v16, %v7931_v13  ;;  %v5178_v28 = vunpack.c.l.b16 %v4397_v44  ;;  %v5179_v0 = vunpack.c.h.b16 %v4397_v44  ;;  %1915 = vadd.xlane.f32.xlu1 %v1914_v45  ;;  %1912 = vadd.xlane.f32.xlu0 %v1911_v9 }
 0x4fe   :  { %v3731_v56 = vperm.slane %v12120_v8, %v7991_v39  ;;  %v3729_v23 = vperm.slane %v12140_v46, %v7980_v51  ;;  %v5022_v59 = vunpack.c.l.b16 %v12162_v54  ;;  %v5023_v36 = vunpack.c.h.b16 %v12162_v54 }
 0x4ff   :  { %v2569_v19 = vmul.f32 0.015625, %v2027_v63  ;;  %v4032_v8 = vsel %vm3106_vm2, %v4031_v20, %v12038_v35  ;;  %v6126_v46 = vperm.slane %v5178_v28, %v7931_v13  ;;  %v6128_v57 = vperm.slane %v5179_v0, %v7940_v48 }
 0x500   :  { %v3728_v27 = vsel %vm3118_vm5, %v3727_v29, %v12104_v3  ;;  %v5822_v54 = vperm.slane %v5021_v18, %v7965_v32  ;;  %v6125_v34 = vsel %vm15006_vm6, %v6124_v58, %v6123_v26  ;;  %v12208_v38 = vsel %vm3110_vm3, %v4033_v47, %v4032_v8  ;;  %v1808_v49 = vpop.xlane.xlu2 %1807  ;;  %v15017_v8 = vld [vmem:[#allocation46_spill] sm:$0xff] }
 0x501   :  { %v5821_v35 = vsel %vm3114_vm4, %v5820_v40, %v12117_v21  ;;  %v6127_v41 = vsel %vm3106_vm2, %v6126_v46, %v6125_v34  ;;  %v1805_v1 = vpop.xlane.xlu1 %1804  ;;  %v1824_v3 = vsel %vm536_vm0, %v453_v62, 0.0  ;;  %v1821_v29 = vsel %vm536_vm0, %v452_v4, 0.0  ;;  %v2030_v45 = vpop.xlane.xlu0 %2029  ;;  %v15016_v4 = vld [vmem:[#allocation45_spill] sm:$0xff] }
 0x502   :  { %v12216_v18 = vsel %vm3110_vm3, %v6128_v57, %v6127_v41  ;;  %v2496_v16 = vmul.f32 0.015625, %v1808_v49  ;;  %v2495_v44 = vmul.f32 0.015625, %v1805_v1  ;;  %v4375_v30 = vpack.c.bf16 %v1808_v49, %v1805_v1  ;;  %v15019_v41 = vld [vmem:[#allocation82_spill] sm:$0xff] }
 0x503   :  { %v4090_v26 = vperm.slane %v2569_v19, %v7904_v61  ;;  %v2570_v58 = vmul.f32 0.015625, %v2030_v45  ;;  %v12219_v47 = vpack.c.bf16 %v2030_v45, %v2027_v63  ;;  %v1956_v21 = vsel %vm536_vm0, %v497_v52, 0.0  ;;  %v466_v45 = vld [vmem:[%s13571_s0 + $0xdd0] sm:$0xff] }
 0x504   :  { %v3948_v9 = vperm.slane %v2496_v16, %v7991_v39  ;;  %v3946_v40 = vperm.slane %v2495_v44, %v7980_v51  ;;  %v5134_v20 = vunpack.c.l.b16 %v4375_v30  ;;  %v5135_v28 = vunpack.c.h.b16 %v4375_v30  ;;  %1825 = vadd.xlane.f32.xlu2 %v1824_v3  ;;  %v15029_v16 = vld [vmem:[#allocation35_spill] sm:$0xff] }
 0x505   :  { %vm15015_vm8 = vcmask 458112   ;;  %v5823_v62 = vsel %vm3118_vm5, %v5822_v54, %v5821_v35  ;;  %v4320_v46 = vpack.c.bf16 %v15017_v8, %v15016_v4  ;;  %v4091_v19 = vperm.slane %v2570_v58, %v7907_v50  ;;  %1822 = vadd.xlane.f32.xlu1 %v1821_v29  ;;  %1957 = vadd.xlane.f32.xlu0 %v1956_v21 }
 0x506   :  { %v3730_v0 = vsel %vm15015_vm8, %v3729_v23, %v3728_v27  ;;  %v2385_v63 = vmul.f32 0.015625, %v15016_v4  ;;  %vm15018_vm14 = vmmov %vm15015_vm8  ;;  %v6041_v34 = vperm.slane %v5134_v20, %v7980_v51  ;;  %v6043_v52 = vperm.slane %v5135_v28, %v7991_v39  ;;  %v15022_v27 = vld [vmem:[#allocation107_spill] sm:$0xff] }
 0x507   :  { %v3947_v57 = vsel %vm15018_vm14, %v3946_v40, %v12012_v43  ;;  %vm15020_vm11 = vcmask 1041409   ;;  %v5824_v35 = vperm.slane %v5022_v59, %v7980_v51  ;;  %v12246_v43 = vsel %vm15025_vm9, %v4091_v19, %v4090_v26 }
 0x508   :  { %v12237_v23 = vsel %vm15020_vm11, %v12093_v42, %v15019_v41  ;;  %vm15023_vm1 = vmmov %vm15020_vm11  ;;  %v5826_v49 = vperm.slane %v5023_v36, %v7991_v39  ;;  %vm15026_vm6 = vcmask 523712   ;;  %v6042_v3 = vsel %vm15015_vm8, %v6041_v34, %v12021_v7  ;;  %v514_v42 = vld [vmem:[%s13571_s0 + $0xf50] sm:$0xff]  ;;  %v1991_v44 = vpop.xlane.xlu2 %1990 }
 0x509   :  { %15021 = vst [vmem:[#allocation109_spill] sm:$0xff] %v12237_v23  ;;  %v12242_v54 = vsel %vm15023_vm1, %v12101_v22, %v15022_v27  ;;  %v3732_v1 = vsel %vm15026_vm6, %v3731_v56, %v3730_v0  ;;  %v467_v22 = vld [vmem:[%s13571_s0 + $0xdd8] sm:$0xff]  ;;  %vm15027_vm14 = vmmov %vm15026_vm6  ;;  %v12263_v36 = vmul.f32 0.015625, %v15029_v16  ;;  %v2386_v56 = vmul.f32 0.015625, %v15017_v8  ;;  %v1850_v30 = vpop.xlane.xlu1 %1849  ;;  %v1847_v40 = vpop.xlane.xlu0 %1846 }
 0x50a   :  { %15024 = vst [vmem:[#allocation122_spill] sm:$0xff] %v12242_v54  ;;  %v12259_v59 = vsel %vm15027_vm14, %v3948_v9, %v3947_v57  ;;  %vm15028_vm11 = vmmov %vm15015_vm8  ;;  %v3733_v26 = vperm.slane %v2385_v63, %v7985_v25  ;;  %v5024_v58 = vunpack.c.l.b16 %v4320_v46  ;;  %v2557_v21 = vmul.f32 0.015625, %v1991_v44 }
 0x50b   :  { %v5825_v29 = vsel %vm15028_vm11, %v5824_v35, %v5823_v62  ;;  %vm15030_vm1 = vmmov %vm15026_vm6  ;;  %v2510_v9 = vmul.f32 0.015625, %v1850_v30  ;;  %v2509_v20 = vmul.f32 0.015625, %v1847_v40  ;;  %v4382_v28 = vpack.c.bf16 %v1850_v30, %v1847_v40 }
 0x50c   :  { %v12267_v7 = vsel %vm15030_vm1, %v6043_v52, %v6042_v3  ;;  %v2007_v0 = vsel %vm536_vm0, %v514_v42, 0.0  ;;  %v1866_v62 = vsel %vm536_vm0, %v467_v22, 0.0  ;;  %v5025_v4 = vunpack.c.h.b16 %v4320_v46  ;;  %vm15031_vm9 = vmmov %vm15030_vm1  ;;  %v529_v42 = vld [vmem:[%s13571_s0 + $0xfc8] sm:$0xff]  ;;  %v528_v22 = vld [vmem:[%s13571_s0 + $0xfc0] sm:$0xff] }
 0x50d   :  { %v4066_v8 = vperm.slane %v2557_v21, %v7951_v14  ;;  %v3975_v19 = vperm.slane %v2510_v9, %v7965_v32  ;;  %v1863_v57 = vsel %vm536_vm0, %v466_v45, 0.0  ;;  %v3737_v63 = vperm.slane %v12263_v36, %v8016_v31  ;;  %2008 = vadd.xlane.f32.xlu2 %v2007_v0  ;;  %1867 = vadd.xlane.f32.xlu1 %v1866_v62 }
 0x50e   :  { %v3973_v34 = vperm.slane %v2509_v20, %v7951_v14  ;;  %v5148_v52 = vunpack.c.l.b16 %v4382_v28  ;;  %v5149_v41 = vunpack.c.h.b16 %v4382_v28  ;;  %v3735_v27 = vperm.slane %v2386_v56, %v8019_v53  ;;  %v515_v56 = vld [vmem:[%s13571_s0 + $0xf58] sm:$0xff]  ;;  %1864 = vadd.xlane.f32.xlu0 %v1863_v57 }
 0x50f   :  { %v5827_v35 = vsel %vm15031_vm9, %v5826_v49, %v5825_v29  ;;  %v5208_v3 = vunpack.c.l.b16 %v12219_v47  ;;  %v4067_v46 = vsel %vm3114_vm4, %v4066_v8, %v12114_v6  ;;  %v5209_v49 = vunpack.c.h.b16 %v12219_v47 }
 0x510   :  { %v3974_v29 = vsel %vm3114_vm4, %v3973_v34, %v12043_v33  ;;  %v6068_v6 = vperm.slane %v5148_v52, %v7951_v14  ;;  %v6070_v30 = vperm.slane %v5149_v41, %v7965_v32  ;;  %vm15032_vm6 = vcmask 589312   ;;  %v2036_v20 = vpop.xlane.xlu2 %2035 }
 0x511   :  { %v3734_v45 = vsel %vm15032_vm6, %v3733_v26, %v3732_v1  ;;  %v5828_v21 = vperm.slane %v5024_v58, %v7985_v25  ;;  %v12303_v9 = vperm.slane %v5025_v4, %v8019_v53  ;;  %v12306_v40 = vsel %vm3118_vm5, %v3975_v19, %v3974_v29  ;;  %v2033_v33 = vpop.xlane.xlu1 %2032  ;;  %v1994_v8 = vpop.xlane.xlu0 %1993  ;;  %vm15035_vm11 = vmmov %vm15032_vm6 }
 0x512   :  { %v6069_v47 = vsel %vm3114_vm4, %v6068_v6, %v12067_v11  ;;  %v2052_v28 = vsel %vm536_vm0, %v529_v42, 0.0  ;;  %v2049_v0 = vsel %vm536_vm0, %v528_v22, 0.0  ;;  %v2010_v62 = vsel %vm536_vm0, %v515_v56, 0.0 }
 0x513   :  { %v12314_v1 = vsel %vm3118_vm5, %v6070_v30, %v6069_v47  ;;  %v2572_v26 = vmul.f32 0.015625, %v2036_v20  ;;  %v2571_v58 = vmul.f32 0.015625, %v2033_v33  ;;  %v4413_v4 = vpack.c.bf16 %v2036_v20, %v2033_v33 }
 0x514   :  { %v6185_v19 = vperm.slane %v5208_v3, %v7904_v61  ;;  %v6186_v57 = vperm.slane %v5209_v49, %v7907_v50  ;;  %v2558_v11 = vmul.f32 0.015625, %v1994_v8  ;;  %v4406_v34 = vpack.c.bf16 %v1994_v8, %v1991_v44 }
 0x515   :  { %v4095_v52 = vperm.slane %v2572_v26, %v7940_v48  ;;  %v4093_v41 = vperm.slane %v2571_v58, %v7931_v13  ;;  %v5210_v42 = vunpack.c.l.b16 %v4413_v4  ;;  %v5211_v22 = vunpack.c.h.b16 %v4413_v4  ;;  %2053 = vadd.xlane.f32.xlu2 %v2052_v28  ;;  %2050 = vadd.xlane.f32.xlu1 %v2049_v0  ;;  %v15036_v26 = vld [vmem:[#allocation59_spill] sm:$0xff]  ;;  %v436_v28 = vld [vmem:[%s13571_s0 + $0xce0] sm:$0xff] }
 0x516   :  { %vm15033_vm8 = vcmask 654912   ;;  %v4068_v29 = vperm.slane %v2558_v11, %v7965_v32  ;;  %v5196_v6 = vunpack.c.l.b16 %v4406_v34  ;;  %v5197_v30 = vunpack.c.h.b16 %v4406_v34  ;;  %2011 = vadd.xlane.f32.xlu0 %v2010_v62  ;;  %v422_v34 = vld [vmem:[%s13571_s0 + $0xc70] sm:$0xff] }
 0x517   :  { %v3736_v56 = vsel %vm15033_vm8, %v3735_v27, %v3734_v45  ;;  %v4094_v47 = vsel %vm3106_vm2, %v4093_v41, %v12246_v43  ;;  %v6188_v3 = vperm.slane %v5210_v42, %v7931_v13  ;;  %v6190_v49 = vperm.slane %v5211_v22, %v7940_v48  ;;  %v15037_v43 = vld [vmem:[#allocation54_spill] sm:$0xff]  ;;  %vm15040_vm1 = vmmov %vm15033_vm8 }
 0x518   :  { %vm15034_vm14 = vcmask 130112   ;;  %v12328_v20 = vsel %vm3118_vm5, %v4068_v29, %v4067_v46  ;;  %v6161_v27 = vperm.slane %v5196_v6, %v7951_v14  ;;  %v6163_v45 = vperm.slane %v5197_v30, %v7965_v32  ;;  %v423_v46 = vld [vmem:[%s13571_s0 + $0xc78] sm:$0xff] }
 0x519   :  { %v6187_v44 = vsel %vm15034_vm14, %v6186_v57, %v6185_v19  ;;  %v5829_v33 = vsel %vm15035_vm11, %v5828_v21, %v5827_v35  ;;  %v12335_v58 = vpack.c.bf16 %v15037_v43, %v15036_v26  ;;  %v12345_v0 = vsel %vm3110_vm3, %v4095_v52, %v4094_v47  ;;  %v15039_v35 = vld [vmem:[#allocation50_spill] sm:$0xff]  ;;  %v1901_v57 = vpop.xlane.xlu2 %1900  ;;  %v1760_v11 = vpop.xlane.xlu1 %1759 }
 0x51a   :  { %v6189_v4 = vsel %vm3106_vm2, %v6188_v3, %v6187_v44  ;;  %v12348_v62 = vmul.f32 0.015625, %v15036_v26  ;;  %v2388_v21 = vmul.f32 0.015625, %v15039_v35  ;;  %v6162_v19 = vsel %vm3114_vm4, %v6161_v27, %v12125_v37  ;;  %v1757_v29 = vpop.xlane.xlu0 %1756 }
 0x51b   :  { %v12352_v8 = vsel %vm3110_vm3, %v6190_v49, %v6189_v4  ;;  %v12361_v52 = vpack.c.bf16 %v15039_v35, %v15029_v16  ;;  %v12364_v41 = vsel %vm3118_vm5, %v6163_v45, %v6162_v19  ;;  %v2527_v42 = vmul.f32 0.015625, %v1901_v57 }
 0x51c   :  { %15038 = vst [vmem:[#allocation121_spill] sm:$0xff] %v12348_v62  ;;  %v2480_v22 = vmul.f32 0.015625, %v1760_v11  ;;  %v2479_v6 = vmul.f32 0.015625, %v1757_v29  ;;  %v4367_v30 = vpack.c.bf16 %v1760_v11, %v1757_v29  ;;  %v1773_v37 = vsel %vm536_vm0, %v436_v28, 0.0  ;;  %v484_v11 = vld [vmem:[%s13571_s0 + $0xe60] sm:$0xff] }
 0x51d   :  { %v1734_v47 = vsel %vm536_vm0, %v423_v46, 0.0  ;;  %v5028_v3 = vunpack.c.l.b16 %v12335_v58  ;;  %v4008_v49 = vperm.slane %v2527_v42, %v7980_v51  ;;  %v1731_v16 = vsel %vm536_vm0, %v422_v34, 0.0  ;;  %1774 = vadd.xlane.f32.xlu2 %v1773_v37 }
 0x51e   :  { %v3917_v44 = vperm.slane %v2480_v22, %v7991_v39  ;;  %v3739_v27 = vperm.slane %v2388_v21, %v8006_v24  ;;  %v3915_v45 = vperm.slane %v2479_v6, %v7980_v51  ;;  %v5118_v26 = vunpack.c.l.b16 %v4367_v30  ;;  %1735 = vadd.xlane.f32.xlu1 %v1734_v47  ;;  %v485_v21 = vld [vmem:[%s13571_s0 + $0xe68] sm:$0xff]  ;;  %1732 = vadd.xlane.f32.xlu0 %v1731_v16  ;;  %v15047_v22 = vld [vmem:[#allocation49_spill] sm:$0xff] }
 0x51f   :  { %v5119_v4 = vunpack.c.h.b16 %v4367_v30  ;;  %v12376_v35 = vsel %vm15040_vm1, %v12303_v9, %v5829_v33  ;;  %v3738_v28 = vsel %vm3138_vm10, %v3737_v63, %v3736_v56  ;;  %vm15041_vm9 = vcmask 458112   ;;  %v15051_v56 = vld [vmem:[#allocation58_spill] sm:$0xff] }
 0x520   :  { %v4009_v46 = vsel %vm15041_vm9, %v4008_v49, %v12158_v17  ;;  %vm15042_vm6 = vmmov %vm15041_vm9  ;;  %v6010_v33 = vperm.slane %v5118_v26, %v7980_v51  ;;  %v12394_v63 = vperm.slane %v5028_v3, %v8049_v15  ;;  %vm15044_vm8 = vcmask 523712   ;;  %v15052_v17 = vld [vmem:[#allocation66_spill] sm:$0xff] }
 0x521   :  { %v3916_v9 = vsel %vm15042_vm6, %v3915_v45, %v12143_v10  ;;  %v6012_v36 = vperm.slane %v5119_v4, %v7991_v39  ;;  %v437_v10 = vld [vmem:[%s13571_s0 + $0xce8] sm:$0xff]  ;;  %vm15045_vm14 = vcmask 786112   ;;  %v12411_v29 = vmul.f32 0.015625, %v15047_v22  ;;  %vm15048_vm11 = vmmov %vm15042_vm6  ;;  %v1946_v30 = vpop.xlane.xlu2 %1945  ;;  %v1943_v37 = vpop.xlane.xlu1 %1942 }
 0x522   :  { %15043 = vst [vmem:[#allocation96_spill] sm:$0xff] %v12394_v63  ;;  %v12405_v34 = vsel %vm15044_vm8, %v3917_v44, %v3916_v9  ;;  %v12408_v42 = vsel %vm15045_vm14, %v3739_v27, %v3738_v28  ;;  %v6011_v6 = vsel %vm15048_vm11, %v6010_v33, %v12174_v5  ;;  %v1920_v47 = vsel %vm536_vm0, %v485_v21, 0.0  ;;  %vm15049_vm1 = vmmov %vm15044_vm8  ;;  %v1904_v45 = vpop.xlane.xlu0 %1903  ;;  %v15050_v21 = vld [vmem:[#allocation57_spill] sm:$0xff] }
 0x523   :  { %15046 = vst [vmem:[#allocation101_spill] sm:$0xff] %v12408_v42  ;;  %v12417_v3 = vsel %vm15049_vm1, %v6012_v36, %v6011_v6  ;;  %v2542_v49 = vmul.f32 0.015625, %v1946_v30  ;;  %v2541_v16 = vmul.f32 0.015625, %v1943_v37  ;;  %v4398_v44 = vpack.c.bf16 %v1946_v30, %v1943_v37  ;;  %vm15053_vm9 = vmmov %vm15049_vm1 }
 0x524   :  { %v2528_v26 = vmul.f32 0.015625, %v1904_v45  ;;  %v4391_v27 = vpack.c.bf16 %v1904_v45, %v1901_v57  ;;  %v1917_v4 = vsel %vm536_vm0, %v484_v11, 0.0  ;;  %v1776_v28 = vsel %vm536_vm0, %v437_v10, 0.0  ;;  %vm15054_vm8 = vmmov %vm15049_vm1 }
 0x525   :  { %v4037_v9 = vperm.slane %v2542_v49, %v7965_v32  ;;  %v4035_v5 = vperm.slane %v2541_v16, %v7951_v14  ;;  %v5180_v33 = vunpack.c.l.b16 %v4398_v44  ;;  %v5181_v19 = vunpack.c.h.b16 %v4398_v44  ;;  %1921 = vadd.xlane.f32.xlu2 %v1920_v47  ;;  %vm15057_vm14 = vmmov %vm15042_vm6 }
 0x526   :  { %v12425_v36 = vpack.c.bf16 %v15051_v56, %v15050_v21  ;;  %v4010_v6 = vperm.slane %v2528_v26, %v7991_v39  ;;  %v5166_v30 = vunpack.c.l.b16 %v4391_v27  ;;  %v5167_v37 = vunpack.c.h.b16 %v4391_v27  ;;  %1918 = vadd.xlane.f32.xlu1 %v1917_v4  ;;  %1777 = vadd.xlane.f32.xlu0 %v1776_v28 }
 0x527   :  { %v2394_v57 = vmul.f32 0.015625, %v15052_v17  ;;  %v4036_v11 = vsel %vm3114_vm4, %v4035_v5, %v12208_v38  ;;  %v6130_v10 = vperm.slane %v5180_v33, %v7951_v14  ;;  %v6132_v49 = vperm.slane %v5181_v19, %v7965_v32  ;;  %v498_v5 = vld [vmem:[%s13571_s0 + $0xed0] sm:$0xff] }
 0x528   :  { %v3749_v16 = vperm.slane %v12411_v29, %v7904_v61  ;;  %v12436_v44 = vsel %vm15053_vm9, %v4010_v6, %v4009_v46  ;;  %v6103_v45 = vperm.slane %v5166_v30, %v7980_v51  ;;  %v6105_v26 = vperm.slane %v5167_v37, %v7991_v39  ;;  %v454_v29 = vld [vmem:[%s13571_s0 + $0xd70] sm:$0xff]  ;;  %v499_v46 = vld [vmem:[%s13571_s0 + $0xed8] sm:$0xff] }
 0x529   :  { %v12441_v27 = vmul.f32 0.015625, %v15051_v56  ;;  %v4324_v38 = vpack.c.bf16 %v15052_v17, %v15047_v22  ;;  %v6131_v19 = vsel %vm3114_vm4, %v6130_v10, %v12216_v18  ;;  %v12454_v47 = vsel %vm3118_vm5, %v4037_v9, %v4036_v11  ;;  %v1853_v22 = vpop.xlane.xlu2 %1852  ;;  %v1814_v28 = vpop.xlane.xlu1 %1813 }
 0x52a   :  { %v12457_v56 = vmul.f32 0.015625, %v15050_v21  ;;  %v5034_v4 = vunpack.c.l.b16 %v12425_v36  ;;  %v12461_v17 = vsel %vm3118_vm5, %v6132_v49, %v6131_v19  ;;  %v6104_v18 = vsel %vm15042_vm6, %v6103_v45, %v12165_v12  ;;  %v1811_v30 = vpop.xlane.xlu0 %1810 }
 0x52b   :  { %v3750_v9 = vperm.slane %v2394_v57, %v7907_v50  ;;  %v12470_v33 = vsel %vm15054_vm8, %v6105_v26, %v6104_v18  ;;  %v2511_v21 = vmul.f32 0.015625, %v1853_v22  ;;  %v2498_v6 = vmul.f32 0.015625, %v1814_v28 }
 0x52c   :  { %v2497_v37 = vmul.f32 0.015625, %v1811_v30  ;;  %v4376_v11 = vpack.c.bf16 %v1814_v28, %v1811_v30  ;;  %v1827_v10 = vsel %vm536_vm0, %v454_v29, 0.0  ;;  %v1962_v12 = vsel %vm536_vm0, %v499_v46, 0.0 }
 0x52d   :  { %v5032_v49 = vunpack.c.l.b16 %v4324_v38  ;;  %v3977_v45 = vperm.slane %v2511_v21, %v7980_v51  ;;  %v3952_v19 = vperm.slane %v2498_v6, %v8019_v53  ;;  %v1959_v63 = vsel %vm536_vm0, %v498_v5, 0.0  ;;  %1828 = vadd.xlane.f32.xlu2 %v1827_v10 }
 0x52e   :  { %v5033_v57 = vunpack.c.h.b16 %v4324_v38  ;;  %v3950_v26 = vperm.slane %v2497_v37, %v7985_v25  ;;  %v5136_v18 = vunpack.c.l.b16 %v4376_v11  ;;  %v5137_v62 = vunpack.c.h.b16 %v4376_v11  ;;  %1963 = vadd.xlane.f32.xlu1 %v1962_v12  ;;  %v469_v38 = vld [vmem:[%s13571_s0 + $0xde8] sm:$0xff]  ;;  %1960 = vadd.xlane.f32.xlu0 %v1959_v63  ;;  %v468_v11 = vld [vmem:[%s13571_s0 + $0xde0] sm:$0xff] }
 0x52f   :  { %v15055_v42 = vunpack.c.l.b16 %v12361_v52  ;;  %v15056_v29 = vunpack.c.h.b16 %v12361_v52  ;;  %v3978_v21 = vsel %vm15057_vm14, %v3977_v45, %v12306_v40  ;;  %vm15058_vm11 = vcmask 589312  }
 0x530   :  { %v6045_v6 = vperm.slane %v5136_v18, %v7985_v25  ;;  %v6047_v52 = vperm.slane %v5137_v62, %v8019_v53  ;;  %v3752_v40 = vperm.slane %v12457_v56, %v7931_v13  ;;  %v12502_v30 = vperm.slane %v5034_v4, %v7931_v13  ;;  %vm15061_vm6 = vmmov %vm15058_vm11 }
 0x531   :  { %v12481_v28 = vperm.slane %v15055_v42, %v8016_v31  ;;  %v12486_v46 = vperm.slane %v15056_v29, %v8006_v24  ;;  %v3951_v42 = vsel %vm15058_vm11, %v3950_v26, %v12259_v59  ;;  %vm15059_vm1 = vcmask 130112   ;;  %v455_v59 = vld [vmem:[%s13571_s0 + $0xd78] sm:$0xff]  ;;  %v2000_v4 = vpop.xlane.xlu2 %1999 }
 0x532   :  { %v3751_v37 = vsel %vm15059_vm1, %v3750_v9, %v3749_v16  ;;  %vm15060_vm9 = vcmask 654912   ;;  %v5844_v62 = vperm.slane %v5032_v49, %v7904_v61  ;;  %v5845_v63 = vperm.slane %v5033_v57, %v7907_v50  ;;  %v1997_v16 = vpop.xlane.xlu1 %1996  ;;  %v1856_v29 = vpop.xlane.xlu0 %1855 }
 0x533   :  { %v12512_v10 = vsel %vm15060_vm9, %v3952_v19, %v3951_v42  ;;  %v6046_v56 = vsel %vm15061_vm6, %v6045_v6, %v12267_v7  ;;  %v1872_v9 = vsel %vm536_vm0, %v469_v38, 0.0  ;;  %vm15062_vm8 = vmmov %vm15060_vm9  ;;  %v2560_v45 = vmul.f32 0.015625, %v2000_v4 }
 0x534   :  { %v12520_v12 = vsel %vm15062_vm8, %v6047_v52, %v6046_v56  ;;  %v2559_v26 = vmul.f32 0.015625, %v1997_v16  ;;  %v4407_v18 = vpack.c.bf16 %v2000_v4, %v1997_v16  ;;  %v2512_v19 = vmul.f32 0.015625, %v1856_v29  ;;  %v530_v16 = vld [vmem:[%s13571_s0 + $0xfd0] sm:$0xff]  ;;  %vm15065_vm9 = vmmov %vm15057_vm14  ;;  %v15071_v4 = vld [vmem:[#allocation70_spill] sm:$0xff] }
 0x535   :  { %v4383_v42 = vpack.c.bf16 %v1856_v29, %v1853_v22  ;;  %v1869_v49 = vsel %vm536_vm0, %v468_v11, 0.0  ;;  %v1830_v57 = vsel %vm536_vm0, %v455_v59, 0.0  ;;  %v4072_v5 = vperm.slane %v2560_v45, %v7991_v39  ;;  %1873 = vadd.xlane.f32.xlu2 %v1872_v9 }
 0x536   :  { %v4070_v7 = vperm.slane %v2559_v26, %v7980_v51  ;;  %v5198_v6 = vunpack.c.l.b16 %v4407_v18  ;;  %v5199_v54 = vunpack.c.h.b16 %v4407_v18  ;;  %v2467_v38 = vmul.f32 0.015625, %v11660_v60  ;;  %1870 = vadd.xlane.f32.xlu1 %v1869_v49  ;;  %1831 = vadd.xlane.f32.xlu0 %v1830_v57 }
 0x537   :  { %v3979_v52 = vperm.slane %v2512_v19, %v7991_v39  ;;  %v5150_v56 = vunpack.c.l.b16 %v4383_v42  ;;  %v5151_v23 = vunpack.c.h.b16 %v4383_v42  ;;  %v3753_v45 = vsel %vm3106_vm2, %v3752_v40, %v3751_v37  ;;  %v15064_v19 = vld [vmem:[#allocation61_spill] sm:$0xff]  ;;  %v517_v40 = vld [vmem:[%s13571_s0 + $0xf68] sm:$0xff] }
 0x538   :  { %v4071_v22 = vsel %vm15057_vm14, %v4070_v7, %v12328_v20  ;;  %v6165_v11 = vperm.slane %v5198_v6, %v7980_v51  ;;  %v6167_v59 = vperm.slane %v5199_v54, %v7991_v39  ;;  %vm15063_vm11 = vcmask 523712   ;;  %vm15068_vm14 = vmmov %vm15065_vm9 }
 0x539   :  { %v12538_v26 = vsel %vm15063_vm11, %v3979_v52, %v3978_v21  ;;  %v6072_v18 = vperm.slane %v5150_v56, %v7980_v51  ;;  %v6074_v29 = vperm.slane %v5151_v23, %v7991_v39  ;;  %v5846_v20 = vsel %vm15059_vm1, %v5845_v63, %v5844_v62  ;;  %v516_v21 = vld [vmem:[%s13571_s0 + $0xf60] sm:$0xff]  ;;  %vm15066_vm6 = vmmov %vm15063_vm11 }
 0x53a   :  { %v12544_v54 = vmul.f32 0.015625, %v15064_v19  ;;  %v6166_v9 = vsel %vm15065_vm9, %v6165_v11, %v12364_v41  ;;  %v12555_v37 = vsel %vm15066_vm6, %v4072_v5, %v4071_v22  ;;  %v3892_v23 = vperm.slane %v2467_v38, %v8016_v31  ;;  %vm15067_vm8 = vmmov %vm15066_vm6  ;;  %v1724_v41 = vpop.xlane.xlu2 %1723  ;;  %v2042_v42 = vpop.xlane.xlu1 %2041 }
 0x53b   :  { %v12559_v62 = vsel %vm15067_vm8, %v6167_v59, %v6166_v9  ;;  %v6073_v63 = vsel %vm15068_vm14, %v6072_v18, %v12314_v1  ;;  %v2055_v49 = vsel %vm536_vm0, %v530_v16, 0.0  ;;  %vm15069_vm11 = vmmov %vm15066_vm6  ;;  %v2468_v7 = vmul.f32 0.015625, %v1724_v41  ;;  %v2039_v52 = vpop.xlane.xlu0 %2038  ;;  %v15070_v9 = vld [vmem:[#allocation105_spill] sm:$0xff] }
 0x53c   :  { %v12565_v57 = vsel %vm15069_vm11, %v6074_v29, %v6073_v63  ;;  %v4361_v6 = vpack.c.bf16 %v1724_v41, %v11660_v60  ;;  %v2574_v5 = vmul.f32 0.015625, %v2042_v42  ;;  %v2573_v56 = vmul.f32 0.015625, %v2039_v52 }
 0x53d   :  { %v4414_v38 = vpack.c.bf16 %v2042_v42, %v2039_v52  ;;  %v2016_v22 = vsel %vm536_vm0, %v517_v40, 0.0  ;;  %v2013_v11 = vsel %vm536_vm0, %v516_v21, 0.0  ;;  %v3894_v1 = vperm.slane %v2468_v7, %v8006_v24  ;;  %2056 = vadd.xlane.f32.xlu2 %v2055_v49 }
 0x53e   :  { %v5106_v59 = vunpack.c.l.b16 %v4361_v6  ;;  %v5107_v18 = vunpack.c.h.b16 %v4361_v6  ;;  %v4099_v16 = vperm.slane %v2574_v5, %v7965_v32  ;;  %v3893_v29 = vsel %vm3138_vm10, %v3892_v23, %v15070_v9  ;;  %2017 = vadd.xlane.f32.xlu1 %v2016_v22  ;;  %2014 = vadd.xlane.f32.xlu0 %v2013_v11  ;;  %v15075_v11 = vld [vmem:[#allocation62_spill] sm:$0xff] }
 0x53f   :  { %v4097_v63 = vperm.slane %v2573_v56, %v7951_v14  ;;  %v5212_v60 = vunpack.c.l.b16 %v4414_v38  ;;  %v5213_v41 = vunpack.c.h.b16 %v4414_v38  ;;  %v2397_v13 = vmul.f32 0.015625, %v15071_v4  ;;  %v15074_v38 = vld [vmem:[#allocation118_spill] sm:$0xff] }
 0x540   :  { %vm15072_vm1 = vcmask 786112   ;;  %v5987_v40 = vperm.slane %v5106_v59, %v8016_v31  ;;  %v5989_v21 = vperm.slane %v5107_v18, %v8006_v24  ;;  %v15073_v7 = vperm.slane %v12441_v27, %v7940_v48  ;;  %v439_v27 = vld [vmem:[%s13571_s0 + $0xcf8] sm:$0xff] }
 0x541   :  { %v12577_v42 = vsel %vm15072_vm1, %v3894_v1, %v3893_v29  ;;  %v4098_v6 = vsel %vm3114_vm4, %v4097_v63, %v12345_v0  ;;  %v6192_v5 = vperm.slane %v5212_v60, %v7951_v14  ;;  %v6194_v52 = vperm.slane %v5213_v41, %v7965_v32  ;;  %v438_v0 = vld [vmem:[%s13571_s0 + $0xcf0] sm:$0xff]  ;;  %vm15076_vm9 = vmmov %vm15072_vm1  ;;  %v531_v18 = vld [vmem:[%s13571_s0 + $0xfd8] sm:$0xff] }
 0x542   :  { %v3755_v23 = vsel %vm3110_vm3, %v15073_v7, %v3753_v45  ;;  %v5848_v56 = vsel %vm3106_vm2, %v12502_v30, %v5846_v20  ;;  %v4326_v49 = vpack.c.bf16 %v15064_v19, %v15071_v4  ;;  %v5988_v22 = vsel %vm3138_vm10, %v5987_v40, %v15074_v38  ;;  %v1907_v19 = vpop.xlane.xlu2 %1906  ;;  %v1766_v59 = vpop.xlane.xlu1 %1765 }
 0x543   :  { %v12602_v45 = vsel %vm3118_vm5, %v4099_v16, %v4098_v6  ;;  %v12605_v1 = vmul.f32 0.015625, %v15075_v11  ;;  %v3758_v30 = vperm.slane %v12544_v54, %v7965_v32  ;;  %v12610_v4 = vsel %vm15076_vm9, %v5989_v21, %v5988_v22  ;;  %v1763_v54 = vpop.xlane.xlu0 %1762 }
 0x544   :  { %v6193_v20 = vsel %vm3114_vm4, %v6192_v5, %v12352_v8  ;;  %v3756_v16 = vperm.slane %v2397_v13, %v7951_v14  ;;  %v2529_v29 = vmul.f32 0.015625, %v1907_v19  ;;  %v2482_v63 = vmul.f32 0.015625, %v1766_v59 }
 0x545   :  { %v12619_v9 = vsel %vm3118_vm5, %v6194_v52, %v6193_v20  ;;  %v2481_v60 = vmul.f32 0.015625, %v1763_v54  ;;  %v4368_v41 = vpack.c.bf16 %v1766_v59, %v1763_v54  ;;  %v1782_v40 = vsel %vm536_vm0, %v439_v27, 0.0 }
 0x546   :  { %v1779_v8 = vsel %vm536_vm0, %v438_v0, 0.0  ;;  %v5036_v21 = vunpack.c.l.b16 %v4326_v49  ;;  %v4012_v7 = vperm.slane %v2529_v29, %v7985_v25  ;;  %v3921_v6 = vperm.slane %v2482_v63, %v8019_v53  ;;  %1783 = vadd.xlane.f32.xlu2 %v1782_v40 }
 0x547   :  { %v2058_v5 = vsel %vm536_vm0, %v531_v18, 0.0  ;;  %v5037_v13 = vunpack.c.h.b16 %v4326_v49  ;;  %v3919_v52 = vperm.slane %v2481_v60, %v7985_v25  ;;  %v5120_v38 = vunpack.c.l.b16 %v4368_v41  ;;  %1780 = vadd.xlane.f32.xlu1 %v1779_v8  ;;  %v500_v18 = vld [vmem:[%s13571_s0 + $0xee0] sm:$0xff] }
 0x548   :  { %v5121_v22 = vunpack.c.h.b16 %v4368_v41  ;;  %v15077_v20 = vunpack.c.h.b16 %v12425_v36  ;;  %v3757_v27 = vsel %vm3114_vm4, %v3756_v16, %v3755_v23  ;;  %vm15078_vm6 = vcmask 589312   ;;  %2059 = vadd.xlane.f32.xlu0 %v2058_v5 }
 0x549   :  { %v4013_v0 = vsel %vm15078_vm6, %v4012_v7, %v12436_v44  ;;  %v12639_v49 = vsel %vm3138_vm10, %v12481_v28, %v12376_v35  ;;  %vm15079_vm8 = vmmov %vm15078_vm6  ;;  %v6014_v29 = vperm.slane %v5120_v38, %v7985_v25  ;;  %v5851_v63 = vperm.slane %v5036_v21, %v7951_v14  ;;  %v487_v35 = vld [vmem:[%s13571_s0 + $0xe78] sm:$0xff] }
 0x54a   :  { %v5849_v59 = vperm.slane %v15077_v20, %v7940_v48  ;;  %v3920_v36 = vsel %vm15079_vm8, %v3919_v52, %v12405_v34  ;;  %v6016_v23 = vperm.slane %v5121_v22, %v8019_v53  ;;  %v486_v34 = vld [vmem:[%s13571_s0 + $0xe70] sm:$0xff]  ;;  %vm15080_vm14 = vcmask 654912   ;;  %vm15081_vm11 = vmmov %vm15078_vm6  ;;  %v1952_v41 = vpop.xlane.xlu2 %1951  ;;  %v1949_v40 = vpop.xlane.xlu1 %1948 }
 0x54b   :  { %v12656_v28 = vsel %vm15080_vm14, %v3921_v6, %v3920_v36  ;;  %v12659_v54 = vsel %vm3118_vm5, %v3758_v30, %v3757_v27  ;;  %v12662_v60 = vperm.slane %v5037_v13, %v7965_v32  ;;  %v1965_v8 = vsel %vm536_vm0, %v500_v18, 0.0  ;;  %vm15082_vm1 = vmmov %vm15080_vm14  ;;  %v1910_v52 = vpop.xlane.xlu0 %1909  ;;  %v15083_v18 = vld [vmem:[#allocation53_spill] sm:$0xff] }
 0x54c   :  { %v5850_v16 = vsel %vm3110_vm3, %v5849_v59, %v5848_v56  ;;  %v6015_v56 = vsel %vm15081_vm11, %v6014_v29, %v12417_v3  ;;  %v2544_v7 = vmul.f32 0.015625, %v1952_v41  ;;  %v2543_v5 = vmul.f32 0.015625, %v1949_v40  ;;  %vm15085_vm6 = vmmov %vm15082_vm1 }
 0x54d   :  { %v12668_v21 = vsel %vm15082_vm1, %v6016_v23, %v6015_v56  ;;  %v4399_v6 = vpack.c.bf16 %v1952_v41, %v1949_v40  ;;  %v2530_v38 = vmul.f32 0.015625, %v1910_v52  ;;  %v4392_v30 = vpack.c.bf16 %v1910_v52, %v1907_v19 }
 0x54e   :  { %v1926_v22 = vsel %vm536_vm0, %v487_v35, 0.0  ;;  %v1923_v13 = vsel %vm536_vm0, %v486_v34, 0.0  ;;  %v4041_v20 = vperm.slane %v2544_v7, %v7991_v39  ;;  %v4039_v3 = vperm.slane %v2543_v5, %v7980_v51  ;;  %1966 = vadd.xlane.f32.xlu2 %v1965_v8 }
 0x54f   :  { %v5182_v59 = vunpack.c.l.b16 %v4399_v6  ;;  %v5183_v27 = vunpack.c.h.b16 %v4399_v6  ;;  %v12676_v36 = vpack.c.bf16 %v15083_v18, %v15075_v11  ;;  %v4014_v29 = vperm.slane %v2530_v38, %v8019_v53  ;;  %1927 = vadd.xlane.f32.xlu1 %v1926_v22  ;;  %v15086_v6 = vld [vmem:[#allocation69_spill] sm:$0xff] }
 0x550   :  { %v5168_v23 = vunpack.c.l.b16 %v4392_v30  ;;  %v5169_v56 = vunpack.c.h.b16 %v4392_v30  ;;  %v2400_v19 = vmul.f32 0.015625, %v15083_v18  ;;  %vm15084_vm9 = vcmask 458112   ;;  %1924 = vadd.xlane.f32.xlu0 %v1923_v13 }
 0x551   :  { %v4040_v35 = vsel %vm15084_vm9, %v4039_v3, %v12454_v47  ;;  %v6134_v34 = vperm.slane %v5182_v59, %v7980_v51  ;;  %v6136_v41 = vperm.slane %v5183_v27, %v7991_v39  ;;  %v5852_v40 = vsel %vm3114_vm4, %v5851_v63, %v5850_v16  ;;  %v15087_v47 = vld [vmem:[#allocation48_spill] sm:$0xff]  ;;  %vm15088_vm8 = vmmov %vm15084_vm9  ;;  %v471_v16 = vld [vmem:[%s13571_s0 + $0xdf8] sm:$0xff] }
 0x552   :  { %v12686_v11 = vsel %vm15085_vm6, %v4014_v29, %v4013_v0  ;;  %v6107_v7 = vperm.slane %v5168_v23, %v7985_v25  ;;  %v6109_v5 = vperm.slane %v5169_v56, %v8019_v53  ;;  %v12691_v52 = vmul.f32 0.015625, %v15086_v6  ;;  %v470_v0 = vld [vmem:[%s13571_s0 + $0xdf0] sm:$0xff]  ;;  %v1859_v3 = vpop.xlane.xlu2 %1858  ;;  %v1820_v59 = vpop.xlane.xlu1 %1819  ;;  %v501_v27 = vld [vmem:[%s13571_s0 + $0xee8] sm:$0xff]  ;;  %vm15092_vm9 = vmmov %vm15085_vm6 }
 0x553   :  { %v12694_v38 = vmul.f32 0.015625, %v15087_v47  ;;  %v6135_v8 = vsel %vm15088_vm8, %v6134_v34, %v12461_v17  ;;  %vm15089_vm14 = vcmask 523712   ;;  %v12709_v30 = vpack.c.bf16 %v15086_v6, %v15087_v47  ;;  %v1817_v56 = vpop.xlane.xlu0 %1816  ;;  %vm15094_vm6 = vmmov %vm15088_vm8 }
 0x554   :  { %v12705_v63 = vsel %vm15089_vm14, %v4041_v20, %v4040_v35  ;;  %v5038_v22 = vunpack.c.l.b16 %v12676_v36  ;;  %vm15090_vm11 = vmmov %vm15089_vm14  ;;  %vm15091_vm1 = vcmask 589312   ;;  %v3762_v20 = vperm.slane %v2400_v19, %v7991_v39 }
 0x555   :  { %v12713_v13 = vsel %vm15090_vm11, %v6136_v41, %v6135_v8  ;;  %v6108_v17 = vsel %vm15091_vm1, %v6107_v7, %v12470_v33  ;;  %v2513_v29 = vmul.f32 0.015625, %v1859_v3  ;;  %v2500_v23 = vmul.f32 0.015625, %v1820_v59  ;;  %vm15095_vm8 = vmmov %vm15091_vm1 }
 0x556   :  { %v12722_v18 = vsel %vm15092_vm9, %v6109_v5, %v6108_v17  ;;  %v2499_v35 = vmul.f32 0.015625, %v1817_v56  ;;  %v4377_v34 = vpack.c.bf16 %v1820_v59, %v1817_v56  ;;  %v1878_v41 = vsel %vm536_vm0, %v471_v16, 0.0  ;;  %vm15096_vm14 = vmmov %vm15090_vm11 }
 0x557   :  { %v1875_v33 = vsel %vm536_vm0, %v470_v0, 0.0  ;;  %v5039_v7 = vunpack.c.h.b16 %v12676_v36  ;;  %v3981_v6 = vperm.slane %v2513_v29, %v7985_v25  ;;  %v3956_v47 = vperm.slane %v2500_v23, %v8006_v24  ;;  %1879 = vadd.xlane.f32.xlu2 %v1878_v41  ;;  %v519_v23 = vld [vmem:[%s13571_s0 + $0xf78] sm:$0xff]  ;;  %vm15098_vm1 = vmmov %vm15094_vm6 }
 0x558   :  { %v1968_v19 = vsel %vm536_vm0, %v501_v27, 0.0  ;;  %v5855_v5 = vperm.slane %v5038_v22, %v7980_v51  ;;  %v3954_v8 = vperm.slane %v2499_v35, %v8016_v31  ;;  %v5138_v17 = vunpack.c.l.b16 %v4377_v34  ;;  %1876 = vadd.xlane.f32.xlu1 %v1875_v33  ;;  %v532_v22 = vld [vmem:[%s13571_s0 + $0xfe0] sm:$0xff] }
 0x559   :  { %v5139_v44 = vunpack.c.h.b16 %v4377_v34  ;;  %v12733_v59 = vmul.f32 0.015625, %v15037_v43  ;;  %v5854_v16 = vsel %vm3118_vm5, %v12662_v60, %v5852_v40  ;;  %v15093_v36 = vperm.slane %v12605_v1, %v7980_v51  ;;  %1969 = vadd.xlane.f32.xlu0 %v1968_v19 }
 0x55a   :  { %v3982_v27 = vsel %vm15095_vm8, %v3981_v6, %v12538_v26  ;;  %v3955_v60 = vsel %vm3138_vm10, %v3954_v8, %v12512_v10  ;;  %v6049_v40 = vperm.slane %v5138_v17, %v8016_v31  ;;  %v3764_v26 = vperm.slane %v12694_v38, %v7985_v25  ;;  %v518_v10 = vld [vmem:[%s13571_s0 + $0xf70] sm:$0xff]  ;;  %v2006_v34 = vpop.xlane.xlu2 %2005 }
 0x55b   :  { %v3761_v0 = vsel %vm15094_vm6, %v15093_v36, %v12659_v54  ;;  %v6051_v1 = vperm.slane %v5139_v44, %v8006_v24  ;;  %v5040_v54 = vunpack.c.l.b16 %v12709_v30  ;;  %vm15097_vm11 = vcmask 786112   ;;  %v1862_v17 = vpop.xlane.xlu0 %1861  ;;  %vm15100_vm6 = vmmov %vm15096_vm14 }
 0x55c   :  { %v3763_v29 = vsel %vm15096_vm14, %v3762_v20, %v3761_v0  ;;  %v12764_v56 = vsel %vm15097_vm11, %v3956_v47, %v3955_v60  ;;  %v5856_v44 = vsel %vm15098_vm1, %v5855_v5, %v5854_v16  ;;  %v5857_v35 = vperm.slane %v5039_v7, %v7991_v39  ;;  %v2003_v20 = vpop.xlane.xlu1 %2002  ;;  %vm15099_vm9 = vmmov %vm15097_vm11 }
 0x55d   :  { %v6050_v38 = vsel %vm3138_vm10, %v6049_v40, %v12520_v12  ;;  %v2061_v41 = vsel %vm536_vm0, %v532_v22, 0.0  ;;  %v2562_v6 = vmul.f32 0.015625, %v2006_v34  ;;  %v2561_v19 = vmul.f32 0.015625, %v2003_v20  ;;  %vm15103_vm1 = vmmov %vm15095_vm8 }
 0x55e   :  { %v12772_v33 = vsel %vm15099_vm9, %v6051_v1, %v6050_v38  ;;  %v4408_v8 = vpack.c.bf16 %v2006_v34, %v2003_v20  ;;  %v2514_v47 = vmul.f32 0.015625, %v1862_v17  ;;  %v4384_v36 = vpack.c.bf16 %v1862_v17, %v1859_v3  ;;  %vm15105_vm9 = vmmov %vm15103_vm1  ;;  %v502_v17 = vld [vmem:[%s13571_s0 + $0xef0] sm:$0xff] }
 0x55f   :  { %v2022_v5 = vsel %vm536_vm0, %v519_v23, 0.0  ;;  %v2019_v7 = vsel %vm536_vm0, %v518_v10, 0.0  ;;  %v4076_v16 = vperm.slane %v2562_v6, %v8019_v53  ;;  %v4074_v12 = vperm.slane %v2561_v19, %v7985_v25  ;;  %2062 = vadd.xlane.f32.xlu2 %v2061_v41  ;;  %v15104_v19 = vld [vmem:[#allocation60_spill] sm:$0xff] }
 0x560   :  { %v5200_v0 = vunpack.c.l.b16 %v4408_v8  ;;  %v5201_v60 = vunpack.c.h.b16 %v4408_v8  ;;  %v5858_v22 = vsel %vm15100_vm6, %v5857_v35, %v5856_v44  ;;  %v3983_v40 = vperm.slane %v2514_v47, %v8019_v53  ;;  %2023 = vadd.xlane.f32.xlu1 %v2022_v5  ;;  %v15106_v47 = vld [vmem:[#allocation65_spill] sm:$0xff] }
 0x561   :  { %v5152_v1 = vunpack.c.l.b16 %v4384_v36  ;;  %v5153_v38 = vunpack.c.h.b16 %v4384_v36  ;;  %v5041_v34 = vunpack.c.h.b16 %v12709_v30  ;;  %v4075_v3 = vsel %vm15095_vm8, %v4074_v12, %v12555_v37  ;;  %2020 = vadd.xlane.f32.xlu0 %v2019_v7  ;;  %vm15109_vm8 = vmmov %vm15103_vm1 }
 0x562   :  { %v6169_v23 = vperm.slane %v5200_v0, %v7985_v25  ;;  %v6171_v10 = vperm.slane %v5201_v60, %v8019_v53  ;;  %vm15101_vm14 = vcmask 654912   ;;  %v5859_v30 = vperm.slane %v5040_v54, %v7985_v25  ;;  %v15107_v54 = vld [vmem:[#allocation74_spill] sm:$0xff] }
 0x563   :  { %v12786_v20 = vsel %vm15101_vm14, %v3983_v40, %v3982_v27  ;;  %v6076_v44 = vperm.slane %v5152_v1, %v7985_v25  ;;  %v6078_v35 = vperm.slane %v5153_v38, %v8019_v53  ;;  %vm15102_vm11 = vmmov %vm15101_vm14  ;;  %v3765_v37 = vsel %vm15103_vm1, %v3764_v26, %v3763_v29  ;;  %v503_v27 = vld [vmem:[%s13571_s0 + $0xef8] sm:$0xff]  ;;  %v2045_v1 = vpop.xlane.xlu0 %2044 }
 0x564   :  { %v12791_v6 = vsel %vm15102_vm11, %v4076_v16, %v4075_v3  ;;  %v12796_v8 = vmul.f32 0.015625, %v15104_v19  ;;  %v6170_v41 = vsel %vm15105_vm9, %v6169_v23, %v12559_v62  ;;  %v12807_v36 = vmul.f32 0.015625, %v15106_v47  ;;  %vm15108_vm6 = vmmov %vm15102_vm11  ;;  %v1727_v62 = vpop.xlane.xlu2 %1726  ;;  %v2048_v7 = vpop.xlane.xlu1 %2047  ;;  %v533_v16 = vld [vmem:[%s13571_s0 + $0xfe8] sm:$0xff] }
 0x565   :  { %v2403_v5 = vmul.f32 0.015625, %v15107_v54  ;;  %v12811_v26 = vsel %vm15108_vm6, %v6171_v10, %v6170_v41  ;;  %v6077_v29 = vsel %vm15109_vm8, %v6076_v44, %v12565_v57  ;;  %vm15110_vm14 = vmmov %vm15103_vm1  ;;  %v2469_v60 = vmul.f32 0.015625, %v1727_v62 }
 0x566   :  { %v5860_v12 = vsel %vm15110_vm14, %v5859_v30, %v5858_v22  ;;  %vm15111_vm11 = vmmov %vm15108_vm6  ;;  %v2576_v40 = vmul.f32 0.015625, %v2048_v7  ;;  %v2575_v38 = vmul.f32 0.015625, %v2045_v1  ;;  %v4415_v3 = vpack.c.bf16 %v2048_v7, %v2045_v1  ;;  %v534_v1 = vld [vmem:[%s13571_s0 + $0xff0] sm:$0xff] }
 0x567   :  { %v12820_v0 = vsel %vm15111_vm11, %v6078_v35, %v6077_v29  ;;  %v1974_v23 = vsel %vm536_vm0, %v503_v27, 0.0  ;;  %v1971_v57 = vsel %vm536_vm0, %v502_v17, 0.0  ;;  %v4329_v10 = vpack.c.bf16 %v15106_v47, %v15107_v54  ;;  %vm15113_vm1 = vmmov %vm15108_vm6 }
 0x568   :  { %v3896_v44 = vperm.slane %v2469_v60, %v8049_v15  ;;  %v4103_v41 = vperm.slane %v2576_v40, %v7991_v39  ;;  %v2064_v22 = vsel %vm536_vm0, %v533_v16, 0.0  ;;  %v3768_v35 = vperm.slane %v2403_v5, %v8016_v31  ;;  %1975 = vadd.xlane.f32.xlu2 %v1974_v23  ;;  %1972 = vadd.xlane.f32.xlu1 %v1971_v57  ;;  %vm15115_vm6 = vmmov %vm15113_vm1 }
 0x569   :  { %v4101_v30 = vperm.slane %v2575_v38, %v7980_v51  ;;  %v5214_v29 = vunpack.c.l.b16 %v4415_v3  ;;  %v5215_v43 = vunpack.c.h.b16 %v4415_v3  ;;  %v5861_v27 = vperm.slane %v5041_v34, %v8019_v53  ;;  %2065 = vadd.xlane.f32.xlu0 %v2064_v22  ;;  %v15117_v3 = vld [vmem:[#allocation77_spill] sm:$0xff] }
 0x56a   :  { %v15112_v17 = vperm.slane %v12691_v52, %v8019_v53  ;;  %v3897_v54 = vsel %vm3146_vm12, %v3896_v44, %v12577_v42  ;;  %vm15114_vm9 = vcmask 458112   ;;  %v3770_v52 = vperm.slane %v12807_v36, %v8006_v24  ;;  %v535_v42 = vld [vmem:[%s13571_s0 + $0xff8] sm:$0xff]  ;;  %s6476_s0 = sshll.u32 %s6675_s12, 4  ;;  %s6477_s0 = int_to_ptr.vmem [resolvable:$true] %s6476_s0 }
 0x56b   :  { %v4102_v16 = vsel %vm15114_vm9, %v4101_v30, %v12602_v45  ;;  %v6196_v60 = vperm.slane %v5214_v29, %v7980_v51  ;;  %v6198_v34 = vperm.slane %v5215_v43, %v7991_v39  ;;  %v5042_v40 = vunpack.c.l.b16 %v4329_v10  ;;  %vm15118_vm14 = vmmov %vm15114_vm9 }
 0x56c   :  { %v3767_v47 = vsel %vm15113_vm1, %v15112_v17, %v3765_v37  ;;  %v5862_v37 = vsel %vm15115_vm6, %v5861_v27, %v5860_v12  ;;  %vm15116_vm8 = vcmask 523712   ;;  %v5043_v38 = vunpack.c.h.b16 %v4329_v10  ;;  %v1772_v23 = vpop.xlane.xlu2 %1771  ;;  %v1769_v57 = vpop.xlane.xlu1 %1768 }
 0x56d   :  { %v12855_v45 = vsel %vm15116_vm8, %v4103_v41, %v4102_v16  ;;  %v3769_v43 = vsel %vm3138_vm10, %v3768_v35, %v3767_v47  ;;  %v12860_v36 = vpack.c.bf16 %v15117_v3, %v15104_v19  ;;  %v6197_v12 = vsel %vm15118_vm14, %v6196_v60, %v12619_v9  ;;  %vm15119_vm11 = vmmov %vm15116_vm8  ;;  %v1730_v41 = vpop.xlane.xlu0 %1729 }
 0x56e   :  { %v12865_v44 = vsel %vm15119_vm11, %v6198_v34, %v6197_v12  ;;  %v2484_v22 = vmul.f32 0.015625, %v1772_v23  ;;  %v2483_v30 = vmul.f32 0.015625, %v1769_v57  ;;  %v4369_v29 = vpack.c.bf16 %v1772_v23, %v1769_v57  ;;  %v15120_v34 = vld [vmem:[#allocation166_spill] sm:$0xff] }
 0x56f   :  { %v2470_v27 = vmul.f32 0.015625, %v1730_v41  ;;  %v4362_v17 = vpack.c.bf16 %v1730_v41, %v1727_v62  ;;  %v2070_v10 = vsel %vm536_vm0, %v535_v42, 0.0  ;;  %v2067_v35 = vsel %vm536_vm0, %v534_v1, 0.0 }
 0x570   :  { %v3925_v19 = vperm.slane %v2484_v22, %v8006_v24  ;;  %v3923_v47 = vperm.slane %v2483_v30, %v8016_v31  ;;  %v5122_v9 = vunpack.c.l.b16 %v4369_v29  ;;  %v5123_v16 = vunpack.c.h.b16 %v4369_v29  ;;  %2071 = vadd.xlane.f32.xlu1 %v2070_v10 }
 0x571   :  { %v5863_v60 = vperm.slane %v5042_v40, %v8016_v31  ;;  %v3898_v12 = vperm.slane %v2470_v27, %v15120_v34  ;;  %v5108_v7 = vunpack.c.l.b16 %v4362_v17  ;;  %v5109_v5 = vunpack.c.h.b16 %v4362_v17  ;;  %2068 = vadd.xlane.f32.xlu0 %v2067_v35  ;;  %v15123_v27 = vld [vmem:[#allocation72_spill] sm:$0xff]  ;;  %v15124_v17 = vld [vmem:[#allocation73_spill] sm:$0xff] }
 0x572   :  { %v5865_v23 = vperm.slane %v5043_v38, %v8006_v24  ;;  %v3924_v62 = vsel %vm3138_vm10, %v3923_v47, %v12656_v28  ;;  %v6018_v42 = vperm.slane %v5122_v9, %v8016_v31  ;;  %v6020_v1 = vperm.slane %v5123_v16, %v8006_v24 }
 0x573   :  { %v12879_v57 = vsel %vm3150_vm13, %v3898_v12, %v3897_v54  ;;  %v5991_v22 = vperm.slane %v5108_v7, %v8049_v15  ;;  %v5993_v40 = vperm.slane %v5109_v5, %v15120_v34  ;;  %vm15121_vm0 = vcmask 786112  }
 0x574   :  { %v12884_v30 = vsel %vm15121_vm0, %v3925_v19, %v3924_v62  ;;  %vm15122_vm1 = vmmov %vm15121_vm0  ;;  %v2406_v28 = vmul.f32 0.015625, %v15117_v3  ;;  %v5044_v29 = vunpack.c.l.b16 %v12860_v36  ;;  %v6019_v41 = vsel %vm3138_vm10, %v6018_v42, %v12668_v21 }
 0x575   :  { %v3771_v38 = vsel %vm15122_vm1, %v3770_v52, %v3769_v43  ;;  %v5864_v54 = vsel %vm3138_vm10, %v5863_v60, %v5862_v37  ;;  %v12894_v7 = vpack.c.bf16 %v15124_v17, %v15123_v27  ;;  %vm15125_vm9 = vmmov %vm15121_vm0  ;;  %v5992_v10 = vsel %vm3146_vm12, %v5991_v22, %v12610_v4  ;;  %v1955_v52 = vpop.xlane.xlu2 %1954  ;;  %v1916_v43 = vpop.xlane.xlu1 %1915 }
 0x576   :  { %v12897_v5 = vsel %vm15125_vm9, %v6020_v1, %v6019_v41  ;;  %v2407_v3 = vmul.f32 0.015625, %v15123_v27  ;;  %v12903_v35 = vsel %vm3150_vm13, %v5993_v40, %v5992_v10  ;;  %v2545_v21 = vmul.f32 0.015625, %v1955_v52  ;;  %v1913_v37 = vpop.xlane.xlu0 %1912  ;;  %vm15126_vm6 = vmmov %vm15121_vm0 }
 0x577   :  { %v2532_v19 = vmul.f32 0.015625, %v1916_v43  ;;  %v2408_v47 = vmul.f32 0.015625, %v15124_v17  ;;  %v5045_v9 = vunpack.c.h.b16 %v12860_v36  ;;  %v2531_v16 = vmul.f32 0.015625, %v1913_v37  ;;  %vm15129_vm14 = vmmov %vm15121_vm0 }
 0x578   :  { %v4393_v60 = vpack.c.bf16 %v1916_v43, %v1913_v37  ;;  %v3774_v12 = vperm.slane %v2406_v28, %v15120_v34  ;;  %v5867_v4 = vperm.slane %v5044_v29, %v8049_v15  ;;  %v4043_v62 = vperm.slane %v2545_v21, %v7985_v25  ;;  %vm15130_vm11 = vmmov %vm15121_vm0 }
 0x579   :  { %v4018_v42 = vperm.slane %v2532_v19, %v8006_v24  ;;  %v5046_v1 = vunpack.c.l.b16 %v12894_v7  ;;  %v4016_v22 = vperm.slane %v2531_v16, %v8016_v31  ;;  %v5866_v27 = vsel %vm15126_vm6, %v5865_v23, %v5864_v54 }
 0x57a   :  { %v5170_v40 = vunpack.c.l.b16 %v4393_v60  ;;  %v5171_v41 = vunpack.c.h.b16 %v4393_v60  ;;  %v3776_v36 = vperm.slane %v2407_v3, %v8040_v2  ;;  %v15127_v17 = vperm.slane %v12796_v8, %v8049_v15 }
 0x57b   :  { %vm15128_vm8 = vcmask 589312   ;;  %v5869_v10 = vperm.slane %v5045_v9, %v15120_v34  ;;  %v4017_v43 = vsel %vm3138_vm10, %v4016_v22, %v12686_v11  ;;  %v12929_v23 = vsel %vm15129_vm14, %v12486_v46, %v12639_v49 }
 0x57c   :  { %v3773_v28 = vsel %vm3146_vm12, %v15127_v17, %v3771_v38  ;;  %v4044_v29 = vsel %vm15128_vm8, %v4043_v62, %v12705_v63  ;;  %v6111_v21 = vperm.slane %v5170_v40, %v8016_v31  ;;  %v6113_v19 = vperm.slane %v5171_v41, %v8006_v24  ;;  %v15132_v41 = vld [vmem:[#allocation63_spill] sm:$0xff] }
 0x57d   :  { %v3775_v8 = vsel %vm3150_vm13, %v3774_v12, %v3773_v28  ;;  %v5868_v38 = vsel %vm3146_vm12, %v5867_v4, %v5866_v27  ;;  %v12934_v63 = vsel %vm15130_vm11, %v4018_v42, %v4017_v43  ;;  %v3778_v54 = vperm.slane %v2408_v47, %v8093_v55  ;;  %v1826_v9 = vpop.xlane.xlu2 %1825  ;;  %v1823_v16 = vpop.xlane.xlu1 %1822 }
 0x57e   :  { %v5047_v11 = vunpack.c.h.b16 %v12894_v7  ;;  %v5871_v3 = vperm.slane %v5046_v1, %v8040_v2  ;;  %v6112_v37 = vsel %vm3138_vm10, %v6111_v21, %v12722_v18  ;;  %v2502_v49 = vmul.f32 0.015625, %v1826_v9  ;;  %v1958_v4 = vpop.xlane.xlu0 %1957  ;;  %v15133_v21 = vld [vmem:[#allocation86_spill] sm:$0xff] }
 0x57f   :  { %v12942_v46 = vsel %vm15121_vm0, %v6113_v19, %v6112_v37  ;;  %v2501_v60 = vmul.f32 0.015625, %v1823_v16  ;;  %v4378_v12 = vpack.c.bf16 %v1826_v9, %v1823_v16  ;;  %vm15131_vm1 = vcmask 982912  }
 0x580   :  { %v3777_v62 = vsel %vm15131_vm1, %v3776_v36, %v3775_v8  ;;  %v5870_v47 = vsel %vm3150_vm13, %v5869_v10, %v5868_v38  ;;  %v2546_v42 = vmul.f32 0.015625, %v1958_v4  ;;  %v4400_v7 = vpack.c.bf16 %v1958_v4, %v1955_v52  ;;  %vm15135_vm6 = vmmov %vm15131_vm1 }
 0x581   :  { %v3960_v1 = vperm.slane %v2502_v49, %v15120_v34  ;;  %v3958_v22 = vperm.slane %v2501_v60, %v8049_v15  ;;  %v5140_v18 = vunpack.c.l.b16 %v4378_v12  ;;  %v5141_v40 = vunpack.c.h.b16 %v4378_v12  ;;  %v15137_v12 = vld [vmem:[#allocation64_spill] sm:$0xff] }
 0x582   :  { %v2410_v27 = vmul.f32 0.015625, %v15132_v41  ;;  %v4045_v17 = vperm.slane %v2546_v42, %v8019_v53  ;;  %v5184_v28 = vunpack.c.l.b16 %v4400_v7  ;;  %v5185_v43 = vunpack.c.h.b16 %v4400_v7 }
 0x583   :  { %v2409_v19 = vmul.f32 0.015625, %v15133_v21  ;;  %v3959_v36 = vsel %vm3146_vm12, %v3958_v22, %v12764_v56  ;;  %v6053_v10 = vperm.slane %v5140_v18, %v8049_v15  ;;  %v6055_v52 = vperm.slane %v5141_v40, %v15120_v34 }
 0x584   :  { %vm15134_vm9 = vcmask 654912   ;;  %v6138_v38 = vperm.slane %v5184_v28, %v7985_v25  ;;  %v6140_v37 = vperm.slane %v5185_v43, %v8019_v53  ;;  %v12961_v9 = vsel %vm3150_vm13, %v3960_v1, %v3959_v36 }
 0x585   :  { %v12956_v8 = vsel %vm15134_vm9, %v4045_v17, %v4044_v29  ;;  %v5873_v16 = vperm.slane %v5047_v11, %v8093_v55  ;;  %v5872_v49 = vsel %vm15135_vm6, %v5871_v3, %v5870_v47  ;;  %v4332_v56 = vpack.c.bf16 %v15132_v41, %v15133_v21  ;;  %v2009_v11 = vpop.xlane.xlu2 %2008  ;;  %v1868_v1 = vpop.xlane.xlu1 %1867  ;;  %vm15139_vm11 = vmmov %vm15134_vm9 }
 0x586   :  { %v6054_v60 = vsel %vm3146_vm12, %v6053_v10, %v12772_v33  ;;  %vm15136_vm8 = vcmask 1048512   ;;  %v12971_v4 = vmul.f32 0.015625, %v15137_v12  ;;  %vm15138_vm14 = vcmask 589312   ;;  %v1865_v18 = vpop.xlane.xlu0 %1864 }
 0x587   :  { %v3779_v29 = vsel %vm15136_vm8, %v3778_v54, %v3777_v62  ;;  %v12974_v42 = vsel %vm3150_vm13, %v6055_v52, %v6054_v60  ;;  %v6139_v7 = vsel %vm15138_vm14, %v6138_v38, %v12713_v13  ;;  %v3781_v3 = vperm.slane %v2410_v27, %v7907_v50  ;;  %vm15141_vm0 = vmmov %vm15136_vm8  ;;  %v15142_v27 = vld [vmem:[#allocation75_spill] sm:$0xff] }
 0x588   :  { %v12980_v47 = vsel %vm15139_vm11, %v6140_v37, %v6139_v7  ;;  %v2563_v22 = vmul.f32 0.015625, %v2009_v11  ;;  %v2516_v33 = vmul.f32 0.015625, %v1868_v1  ;;  %v3780_v54 = vperm.slane %v2409_v19, %v7904_v61  ;;  %v15143_v38 = vld [vmem:[#allocation159_spill] sm:$0xff]  ;;  %v15144_v37 = vld [vmem:[#allocation109_spill] sm:$0xff] }
 0x589   :  { %15140 = vst [vmem:[#allocation108_spill] sm:$0xff] %v12980_v47  ;;  %v2515_v62 = vmul.f32 0.015625, %v1865_v18  ;;  %v4385_v40 = vpack.c.bf16 %v1868_v1, %v1865_v18  ;;  %v5874_v41 = vsel %vm15141_vm0, %v5873_v16, %v5872_v49  ;;  %v5048_v17 = vunpack.c.l.b16 %v4332_v56  ;;  %v15146_v49 = vld [vmem:[#allocation122_spill] sm:$0xff]  ;;  %v15150_v18 = vld [vmem:[#allocation89_spill] sm:$0xff] }
 0x58a   :  { %v5049_v28 = vunpack.c.h.b16 %v4332_v56  ;;  %v4078_v13 = vperm.slane %v2563_v22, %v8016_v31  ;;  %v3987_v43 = vperm.slane %v2516_v33, %v8006_v24  ;;  %v4333_v21 = vpack.c.bf16 %v15142_v27, %v15137_v12 }
 0x58b   :  { %v3985_v36 = vperm.slane %v2515_v62, %v8016_v31  ;;  %v5154_v10 = vunpack.c.l.b16 %v4385_v40  ;;  %v5155_v52 = vunpack.c.h.b16 %v4385_v40  ;;  %v3783_v19 = vperm.slane %v12971_v4, %v15143_v38  ;;  %v15151_v40 = vld [vmem:[#allocation76_spill] sm:$0xff] }
 0x58c   :  { %vm15145_vm1 = vcmask 1042434   ;;  %v4079_v16 = vsel %vm3138_vm10, %v4078_v13, %v12791_v6  ;;  %v2412_v12 = vmul.f32 0.015625, %v15142_v27  ;;  %vm15148_vm6 = vcmask 130112  }
 0x58d   :  { %v12993_v60 = vsel %vm15145_vm1, %v3779_v29, %v15144_v37  ;;  %vm15147_vm9 = vmmov %vm15145_vm1  ;;  %v3986_v7 = vsel %vm3138_vm10, %v3985_v36, %v12786_v20  ;;  %v6080_v1 = vperm.slane %v5154_v10, %v8016_v31  ;;  %v6082_v4 = vperm.slane %v5155_v52, %v8006_v24  ;;  %v2054_v27 = vpop.xlane.xlu2 %2053  ;;  %v2051_v36 = vpop.xlane.xlu1 %2050 }
 0x58e   :  { %v12999_v56 = vsel %vm15147_vm9, %v5874_v41, %v15146_v49  ;;  %v3782_v22 = vsel %vm15148_vm6, %v3781_v3, %v3780_v54  ;;  %v5875_v29 = vperm.slane %v5048_v17, %v7904_v61  ;;  %v5876_v33 = vperm.slane %v5049_v28, %v7907_v50  ;;  %v2012_v17 = vpop.xlane.xlu0 %2011  ;;  %vm15156_vm9 = vmmov %vm15148_vm6 }
 0x58f   :  { %vm15149_vm8 = vcmask 786112   ;;  %v13013_v62 = vmul.f32 0.015625, %v15150_v18  ;;  %v2413_v41 = vmul.f32 0.015625, %v15151_v40  ;;  %v5050_v13 = vunpack.c.l.b16 %v4333_v21 }
 0x590   :  { %v13010_v6 = vsel %vm15149_vm8, %v3987_v43, %v3986_v7  ;;  %v6081_v20 = vsel %vm3138_vm10, %v6080_v1, %v12820_v0  ;;  %vm15152_vm14 = vmmov %vm15149_vm8  ;;  %v2578_v61 = vmul.f32 0.015625, %v2054_v27  ;;  %v2577_v54 = vmul.f32 0.015625, %v2051_v36 }
 0x591   :  { %v13019_v3 = vsel %vm15152_vm14, %v6082_v4, %v6081_v20  ;;  %v4416_v50 = vpack.c.bf16 %v2054_v27, %v2051_v36  ;;  %v4334_v28 = vpack.c.bf16 %v15150_v18, %v15151_v40  ;;  %v3785_v43 = vperm.slane %v2412_v12, %v7940_v48  ;;  %vm15154_vm0 = vmmov %vm15149_vm8 }
 0x592   :  { %v2564_v10 = vmul.f32 0.015625, %v2012_v17  ;;  %v4409_v52 = vpack.c.bf16 %v2012_v17, %v2009_v11  ;;  %v4107_v37 = vperm.slane %v2578_v61, %v8019_v53  ;;  %v4105_v0 = vperm.slane %v2577_v54, %v7985_v25  ;;  %vm15159_vm14 = vmmov %vm15154_vm0 }
 0x593   :  { %v5216_v49 = vunpack.c.l.b16 %v4416_v50  ;;  %v5217_v7 = vunpack.c.h.b16 %v4416_v50  ;;  %v5051_v1 = vunpack.c.h.b16 %v4333_v21  ;;  %v5878_v27 = vperm.slane %v5050_v13, %v15143_v38 }
 0x594   :  { %v4080_v4 = vperm.slane %v2564_v10, %v8006_v24  ;;  %v5202_v20 = vunpack.c.l.b16 %v4409_v52  ;;  %v5203_v47 = vunpack.c.h.b16 %v4409_v52  ;;  %vm15153_vm11 = vcmask 589312  }
 0x595   :  { %v4106_v18 = vsel %vm15153_vm11, %v4105_v0, %v12855_v45  ;;  %v6200_v12 = vperm.slane %v5216_v49, %v7985_v25  ;;  %v6202_v11 = vperm.slane %v5217_v7, %v8019_v53  ;;  %vm15155_vm1 = vcmask 654912   ;;  %vm15157_vm6 = vmmov %vm15153_vm11  ;;  %v1775_v10 = vpop.xlane.xlu2 %1774  ;;  %v1736_v52 = vpop.xlane.xlu1 %1735  ;;  %v15160_v49 = vld [vmem:[#allocation80_spill] sm:$0xff] }
 0x596   :  { %v13033_v40 = vsel %vm15154_vm0, %v4080_v4, %v4079_v16  ;;  %v6173_v36 = vperm.slane %v5202_v20, %v8016_v31  ;;  %v6175_v21 = vperm.slane %v5203_v47, %v8006_v24  ;;  %v13038_v61 = vsel %vm15155_vm1, %v4107_v37, %v4106_v18  ;;  %vm15158_vm8 = vmmov %vm15155_vm1 }
 0x597   :  { %v5877_v54 = vsel %vm15156_vm9, %v5876_v33, %v5875_v29  ;;  %v3789_v38 = vperm.slane %v13013_v62, %v7965_v32  ;;  %v3784_v45 = vsel %vm3106_vm2, %v3783_v19, %v3782_v22  ;;  %v6201_v13 = vsel %vm15157_vm6, %v6200_v12, %v12865_v44  ;;  %v1733_v62 = vpop.xlane.xlu0 %1732 }
 0x598   :  { %v3787_v16 = vperm.slane %v2413_v41, %v7951_v14  ;;  %v5052_v50 = vunpack.c.l.b16 %v4334_v28  ;;  %v13048_v17 = vsel %vm15158_vm8, %v6202_v11, %v6201_v13  ;;  %v6174_v47 = vsel %vm3138_vm10, %v6173_v36, %v12811_v26  ;;  %v15161_v26 = vld [vmem:[#allocation67_spill] sm:$0xff] }
 0x599   :  { %v5880_v29 = vperm.slane %v5051_v1, %v7940_v48  ;;  %v13054_v33 = vsel %vm15159_vm14, %v6175_v21, %v6174_v47  ;;  %v2485_v19 = vmul.f32 0.015625, %v1775_v10  ;;  %v2472_v22 = vmul.f32 0.015625, %v1736_v52 }
 0x59a   :  { %v3786_v44 = vsel %vm3110_vm3, %v3785_v43, %v3784_v45  ;;  %v5879_v41 = vsel %vm3106_vm2, %v5878_v27, %v5877_v54  ;;  %v2471_v37 = vmul.f32 0.015625, %v1733_v62  ;;  %v4363_v0 = vpack.c.bf16 %v1736_v52, %v1733_v62 }
 0x59b   :  { %v2415_v7 = vmul.f32 0.015625, %v15160_v49  ;;  %v4335_v4 = vpack.c.bf16 %v15161_v26, %v15160_v49  ;;  %v3927_v20 = vperm.slane %v2485_v19, %v8049_v15  ;;  %v3902_v48 = vperm.slane %v2472_v22, %v8093_v55 }
 0x59c   :  { %v5053_v1 = vunpack.c.h.b16 %v4334_v28  ;;  %v3900_v18 = vperm.slane %v2471_v37, %v8040_v2  ;;  %v5110_v12 = vunpack.c.l.b16 %v4363_v0  ;;  %v5111_v11 = vunpack.c.h.b16 %v4363_v0 }
 0x59d   :  { %v5882_v43 = vperm.slane %v5052_v50, %v7951_v14  ;;  %v3788_v27 = vsel %vm3114_vm4, %v3787_v16, %v3786_v44  ;;  %v5881_v36 = vsel %vm3110_vm3, %v5880_v29, %v5879_v41  ;;  %v3928_v21 = vsel %vm3146_vm12, %v3927_v20, %v12884_v30  ;;  %v15163_v14 = vld [vmem:[#allocation81_spill] sm:$0xff]  ;;  %v13083_v19 = vpop.xlane.xlu2 %1921  ;;  %v13085_v22 = vpop.xlane.xlu1 %1918  ;;  %v15168_v44 = vld [vmem:[#allocation68_spill] sm:$0xff] }
 0x59e   :  { %v2416_v54 = vmul.f32 0.015625, %v15161_v26  ;;  %vm15162_vm2 = vcmask 982912   ;;  %v5995_v28 = vperm.slane %v5110_v12, %v8040_v2  ;;  %v5997_v13 = vperm.slane %v5111_v11, %v8093_v55 }
 0x59f   :  { %v3901_v45 = vsel %vm15162_vm2, %v3900_v18, %v12879_v57  ;;  %v3791_v47 = vperm.slane %v2415_v7, %v7980_v51  ;;  %v5054_v52 = vunpack.c.l.b16 %v4335_v4  ;;  %vm15164_vm11 = vcmask 1043459   ;;  %vm15166_vm0 = vmmov %vm15162_vm2 }
 0x5a0   :  { %v4144_v16 = vsel %vm15164_vm11, %v15163_v14, %v12993_v60  ;;  %vm15165_vm3 = vcmask 1048512   ;;  %v5884_v30 = vperm.slane %v5053_v1, %v7965_v32  ;;  %v3790_v29 = vsel %vm3118_vm5, %v3789_v38, %v3788_v27  ;;  %v15169_v60 = vld [vmem:[#allocation87_spill] sm:$0xff]  ;;  %v1778_v32 = vpop.xlane.xlu0 %1777  ;;  %v15171_v38 = vld [vmem:[#allocation102_spill] sm:$0xff]  ;;  %vm15172_vm6 = vmmov %vm15164_vm11 }
 0x5a1   :  { %v3903_v50 = vsel %vm15165_vm3, %v3902_v48, %v3901_v45  ;;  %v5996_v57 = vsel %vm15166_vm0, %v5995_v28, %v12903_v35  ;;  %vm15167_vm1 = vcmask 1044484   ;;  %v2417_v41 = vmul.f32 0.015625, %v15168_v44  ;;  %vm15170_vm9 = vmmov %vm15165_vm3  ;;  %v15175_v28 = vld [vmem:[#allocation33_spill] sm:$0xff] }
 0x5a2   :  { %v13088_v62 = vsel %vm15167_vm1, %v3903_v50, %v4144_v16  ;;  %v4336_v37 = vpack.c.bf16 %v15169_v60, %v15168_v44  ;;  %v5998_v0 = vsel %vm15170_vm9, %v5997_v13, %v5996_v57  ;;  %v6232_v49 = vsel %vm15172_vm6, %v15171_v38, %v12999_v56  ;;  %vm15173_vm8 = vmmov %vm15167_vm1  ;;  %v15179_v57 = vld [vmem:[#allocation88_spill] sm:$0xff] }
 0x5a3   :  { %v5883_v35 = vsel %vm3114_vm4, %v5882_v43, %v5881_v36  ;;  %v2486_v7 = vmul.f32 0.015625, %v1778_v32  ;;  %v4370_v26 = vpack.c.bf16 %v1778_v32, %v1775_v10  ;;  %v13099_v20 = vsel %vm15173_vm8, %v5998_v0, %v6232_v49  ;;  %v15176_v10 = vld [vmem:[#allocation34_spill] sm:$0xff] }
 0x5a4   :  { %v3793_v48 = vperm.slane %v2416_v54, %v7991_v39  ;;  %vm15174_vm14 = vcmask 458112   ;;  %v5055_v18 = vunpack.c.h.b16 %v4335_v4  ;;  %v5886_v12 = vperm.slane %v5054_v52, %v7980_v51  ;;  %v6598_v4 = vld [vmem:[%s13572_s1 + $0x38] sm:$0xff] }
 0x5a5   :  { %v3792_v1 = vsel %vm15174_vm14, %v3791_v47, %v3790_v29  ;;  %v2418_v11 = vmul.f32 0.015625, %v15169_v60  ;;  %v3929_v27 = vperm.slane %v2486_v7, %v15120_v34  ;;  %v5124_v45 = vunpack.c.l.b16 %v4370_v26  ;;  %vm15178_vm2 = vmmov %vm15174_vm14  ;;  %6344 = vmatpush.bf16.msra.mxu0 %v6598_v4  ;;  %v1829_v32 = vpop.xlane.xlu2 %1828  ;;  %v13130_v38 = vpop.xlane.xlu1 %1963 }
 0x5a6   :  { %v5125_v56 = vunpack.c.h.b16 %v4370_v26  ;;  %v2391_v43 = vmul.f32 0.015625, %v15175_v28  ;;  %v13109_v36 = vpack.c.bf16 %v15176_v10, %v15175_v28  ;;  %v3795_v13 = vperm.slane %v2417_v41, %v7985_v25  ;;  %v15180_v41 = vld [vmem:[#allocation79_spill] sm:$0xff] }
 0x5a7   :  { %v5056_v54 = vunpack.c.l.b16 %v4336_v37  ;;  %v5885_v51 = vsel %vm3118_vm5, %v5884_v30, %v5883_v35  ;;  %v13117_v47 = vsel %vm3150_vm13, %v3929_v27, %v3928_v21  ;;  %v6022_v52 = vperm.slane %v5124_v45, %v8049_v15 }
 0x5a8   :  { %v6024_v14 = vperm.slane %v5125_v56, %v15120_v34  ;;  %vm15177_vm4 = vcmask 523712   ;;  %v5887_v50 = vsel %vm15178_vm2, %v5886_v12, %v5885_v51  ;;  %v5888_v29 = vperm.slane %v5055_v18, %v7991_v39 }
 0x5a9   :  { %v3794_v16 = vsel %vm15177_vm4, %v3793_v48, %v3792_v1  ;;  %v2419_v44 = vmul.f32 0.015625, %v15179_v57  ;;  %v4337_v60 = vpack.c.bf16 %v15180_v41, %v15179_v57  ;;  %v3797_v30 = vperm.slane %v2418_v11, %v8019_v53  ;;  %v13141_v48 = vpop.xlane.xlu0 %1960  ;;  %v15183_v1 = vld [vmem:[#allocation121_spill] sm:$0xff]  ;;  %vm15186_vm5 = vmmov %vm15177_vm4 }
 0x5aa   :  { %v5057_v21 = vunpack.c.h.b16 %v4336_v37  ;;  %v6023_v0 = vsel %vm3146_vm12, %v6022_v52, %v12897_v5  ;;  %v3743_v49 = vperm.slane %v12733_v59, %v15120_v34  ;;  %v15181_v39 = vunpack.c.h.b16 %v12335_v58  ;;  %v6597_v5 = vld [vmem:[%s13572_s1 + $0x30] sm:$0xff]  ;;  %v15182_v37 = vld [vmem:[#allocation101_spill] sm:$0xff]  ;;  %v15190_v52 = vld [vmem:[#allocation90_spill] sm:$0xff] }
 0x5ab   :  { %v5890_v7 = vperm.slane %v5056_v54, %v7985_v25  ;;  %v13139_v26 = vsel %vm3150_vm13, %v6024_v14, %v6023_v0  ;;  %v15184_v18 = vperm.slane %v15183_v1, %v8049_v15  ;;  %v15185_v58 = vld [vmem:[#allocation96_spill] sm:$0xff]  ;;  %v13155_v25 = vmul.f32 0.015625, %v15176_v10  ;;  %6345 = vmatpush.bf16.msra.mxu0 %v6597_v5  ;;  %v15191_v14 = vld [vmem:[#allocation91_spill] sm:$0xff] }
 0x5ac   :  { %v5838_v35 = vperm.slane %v15181_v39, %v15120_v34  ;;  %v5837_v12 = vsel %vm3146_vm12, %v15185_v58, %v12929_v23  ;;  %v3745_v11 = vperm.slane %v2391_v43, %v8040_v2  ;;  %v5030_v27 = vunpack.c.l.b16 %v13109_v36 }
 0x5ad   :  { %v3742_v59 = vsel %vm3146_vm12, %v15184_v18, %v15182_v37  ;;  %v5889_v45 = vsel %vm15186_vm5, %v5888_v29, %v5887_v50  ;;  %v2420_v56 = vmul.f32 0.015625, %v15180_v41  ;;  %vm15187_vm11 = vcmask 589312   ;;  %v15193_v29 = vld [vmem:[#allocation97_spill] sm:$0xff] }
 0x5ae   :  { %v3796_v28 = vsel %vm15187_vm11, %v3795_v13, %v3794_v16  ;;  %v3799_v54 = vperm.slane %v2419_v44, %v8016_v31  ;;  %v5058_v4 = vunpack.c.l.b16 %v4337_v60  ;;  %vm15188_vm3 = vcmask 654912   ;;  %vm15189_vm0 = vmmov %vm15187_vm11  ;;  %v6596_v13 = vld [vmem:[%s13572_s1 + $0x28] sm:$0xff]  ;;  %v15192_v16 = vld [vmem:[#allocation110_spill] sm:$0xff] }
 0x5af   :  { %v3798_v51 = vsel %vm15188_vm3, %v3797_v30, %v3796_v28  ;;  %v5892_v23 = vperm.slane %v5057_v21, %v8019_v53  ;;  %v5891_v10 = vsel %vm15189_vm0, %v5890_v7, %v5889_v45  ;;  %v2421_v43 = vmul.f32 0.015625, %v15190_v52  ;;  %6346 = vmatpush.bf16.msra.mxu0 %v6596_v13  ;;  %vm15195_vm9 = vmmov %vm15188_vm3  ;;  %v15196_v45 = vld [vmem:[#allocation92_spill] sm:$0xff] }
 0x5b0   :  { %v4338_v57 = vpack.c.bf16 %v15191_v14, %v15190_v52  ;;  %v2503_v50 = vmul.f32 0.015625, %v1829_v32  ;;  %v13175_v44 = vsel %vm3150_vm13, %v15193_v29, %v15192_v16  ;;  %v3747_v53 = vperm.slane %v13155_v25, %v8093_v55  ;;  %v6604_v25 = vld [vmem:[%s13572_s1 + $0x68] sm:$0xff] }
 0x5b1   :  { %v3744_v41 = vsel %vm3150_vm13, %v3743_v49, %v3742_v59  ;;  %v5059_v30 = vunpack.c.h.b16 %v4337_v60  ;;  %v5839_v21 = vsel %vm3150_vm13, %v5838_v35, %v5837_v12  ;;  %v5031_v0 = vunpack.c.h.b16 %v13109_v36  ;;  %v13190_v49 = vpop.xlane.xlu2 %1873  ;;  %v13192_v60 = vpop.xlane.xlu1 %1870 }
 0x5b2   :  { %v3801_v39 = vperm.slane %v2420_v56, %v8006_v24  ;;  %v2422_v7 = vmul.f32 0.015625, %v15191_v14  ;;  %vm15194_vm1 = vcmask 982912   ;;  %v5840_v37 = vperm.slane %v5030_v27, %v8040_v2  ;;  %v1832_v12 = vpop.xlane.xlu0 %1831  ;;  %v15197_v56 = vld [vmem:[#allocation100_spill] sm:$0xff] }
 0x5b3   :  { %v13185_v5 = vsel %vm15194_vm1, %v3745_v11, %v3744_v41  ;;  %v3800_v1 = vsel %vm3138_vm10, %v3799_v54, %v3798_v51  ;;  %v5893_v18 = vsel %vm15195_vm9, %v5892_v23, %v5891_v10  ;;  %v5894_v36 = vperm.slane %v5058_v4, %v8016_v31  ;;  %v6595_v11 = vld [vmem:[%s13572_s1 + $0x20] sm:$0xff]  ;;  %vm15199_vm8 = vmmov %vm15194_vm1 }
 0x5b4   :  { %v3803_v35 = vperm.slane %v2421_v43, %v8049_v15  ;;  %v5060_v59 = vunpack.c.l.b16 %v4338_v57  ;;  %v3962_v58 = vperm.slane %v2503_v50, %v8040_v2  ;;  %v5896_v27 = vperm.slane %v5059_v30, %v8006_v24  ;;  %6347 = vmatpush.bf16.msra.mxu0 %v6595_v11  ;;  %v6594_v30 = vld [vmem:[%s13572_s1 + $0x18] sm:$0xff]  ;;  %vm15202_vm4 = vmmov %vm15194_vm1 }
 0x5b5   :  { %v4339_v28 = vpack.c.bf16 %v15197_v56, %v15196_v45  ;;  %v2504_v54 = vmul.f32 0.015625, %v1832_v12  ;;  %v4379_v51 = vpack.c.bf16 %v1832_v12, %v1829_v32  ;;  %v5895_v23 = vsel %vm3138_vm10, %v5894_v36, %v5893_v18  ;;  %v15201_v36 = vld [vmem:[#allocation114_spill] sm:$0xff]  ;;  %vm15204_vm5 = vmmov %vm15194_vm1 }
 0x5b6   :  { %v2423_v4 = vmul.f32 0.015625, %v15196_v45  ;;  %v3805_v10 = vperm.slane %v2422_v7, %v15120_v34  ;;  %vm15198_vm6 = vcmask 786112   ;;  %v5061_v43 = vunpack.c.h.b16 %v4338_v57  ;;  %v6606_v57 = vld [vmem:[%s13572_s1 + $0x78] sm:$0xff]  ;;  %vm15211_vm3 = vmmov %vm15194_vm1 }
 0x5b7   :  { %v3802_v52 = vsel %vm15198_vm6, %v3801_v39, %v3800_v1  ;;  %v3964_v14 = vperm.slane %v2504_v54, %v8093_v55  ;;  %v5142_v50 = vunpack.c.l.b16 %v4379_v51  ;;  %v5143_v13 = vunpack.c.h.b16 %v4379_v51  ;;  %6358 = vmatpush.bf16.msra.mxu1 %v6606_v57  ;;  %vm15203_vm2 = vmmov %vm15198_vm6 }
 0x5b8   :  { %v3804_v16 = vsel %vm3146_vm12, %v3803_v35, %v3802_v52  ;;  %v5898_v29 = vperm.slane %v5060_v59, %v8049_v15  ;;  %v2424_v32 = vmul.f32 0.015625, %v15197_v56  ;;  %v3963_v41 = vsel %vm15199_vm8, %v3962_v58, %v12961_v9  ;;  %6348 = vmatpush.bf16.msra.mxu0 %v6594_v30  ;;  %v15213_v30 = vld [vmem:[#allocation83_spill] sm:$0xff]  ;;  %vm15215_vm0 = vmmov %vm15194_vm1 }
 0x5b9   :  { %v5062_v39 = vunpack.c.l.b16 %v4339_v28  ;;  %vm15200_vm14 = vcmask 1048512   ;;  %v6057_v1 = vperm.slane %v5142_v50, %v8040_v2  ;;  %v6059_v18 = vperm.slane %v5143_v13, %v8093_v55  ;;  %v13234_v54 = vpop.xlane.xlu2 %2056  ;;  %v15208_v13 = vld [vmem:[#allocation98_spill] sm:$0xff]  ;;  %vm15217_vm9 = vmmov %vm15215_vm0 }
 0x5ba   :  { %v3965_v7 = vsel %vm15200_vm14, %v3964_v14, %v3963_v41  ;;  %v4999_v35 = vunpack.c.h.b16 %v15201_v36  ;;  %v5841_v59 = vsel %vm15202_vm4, %v5840_v37, %v5839_v21  ;;  %v5842_v9 = vperm.slane %v5031_v0, %v8093_v55  ;;  %v13236_v21 = vpop.xlane.xlu1 %2017  ;;  %v13240_v51 = vpop.xlane.xlu0 %2014  ;;  %vm15205_vm11 = vmmov %vm15200_vm14  ;;  %v15207_v14 = vld [vmem:[#allocation191_spill] sm:$0xff] }
 0x5bb   :  { %v13227_v58 = vsel %vm4129_vm15, %v3965_v7, %v13088_v62  ;;  %v3807_v12 = vperm.slane %v2423_v4, %v8040_v2  ;;  %v5897_v11 = vsel %vm15203_vm2, %v5896_v27, %v5895_v23  ;;  %v5900_v45 = vperm.slane %v5061_v43, %v15120_v34  ;;  %v6593_v27 = vld [vmem:[%s13572_s1 + $0x10] sm:$0xff]  ;;  %vm15216_vm1 = vmmov %vm15205_vm11 }
 0x5bc   :  { %v6058_v56 = vsel %vm15204_vm5, %v6057_v1, %v12974_v42  ;;  %v3806_v0 = vsel %vm3150_vm13, %v3805_v10, %v3804_v16  ;;  %v3809_v62 = vperm.slane %v2424_v32, %v8093_v55  ;;  %v5063_v37 = vunpack.c.h.b16 %v4339_v28  ;;  %v6605_v23 = vld [vmem:[%s13572_s1 + $0x70] sm:$0xff]  ;;  %v15209_v16 = vld [vmem:[#allocation93_spill] sm:$0xff]  ;;  %6349 = vmatpush.bf16.msra.mxu0 %v6593_v27  ;;  %vm15218_vm6 = vmmov %vm15216_vm1 }
 0x5bd   :  { %v6060_v42 = vsel %vm15205_vm11, %v6059_v18, %v6058_v56  ;;  %v5899_v4 = vsel %vm3146_vm12, %v5898_v29, %v5897_v11  ;;  %v5902_v52 = vperm.slane %v5062_v39, %v8040_v2  ;;  %v4394_v10 = vpack.c.bf16 %v13083_v19, %v13085_v22  ;;  %v15206_v43 = vld [vmem:[#allocation244_spill] sm:$0xff]  ;;  %6359 = vmatpush.bf16.msra.mxu1 %v6605_v23  ;;  %vm15219_vm8 = vmmov %vm15216_vm1  ;;  %v15220_v27 = vld [vmem:[#allocation94_spill] sm:$0xff] }
 0x5be   :  { %v13255_v28 = vsel %vm4129_vm15, %v6060_v42, %v13099_v20  ;;  %v13259_v50 = vpack.c.bf16 %v15207_v14, %v15206_v43  ;;  %v15210_v32 = vperm.slane %v15209_v16, %v8040_v2  ;;  %v15212_v29 = vld [vmem:[#allocation104_spill] sm:$0xff]  ;;  %v5780_v39 = vperm.slane %v4999_v35, %v8093_v55  ;;  %v15214_v20 = vld [vmem:[#allocation117_spill] sm:$0xff]  ;;  %vm15222_vm14 = vmmov %vm15216_vm1 }
 0x5bf   :  { %v5713_v57 = vsel %vm3146_vm12, %v15213_v30, %v15212_v29  ;;  %v5779_v7 = vsel %vm15215_vm0, %v15214_v20, %v13175_v44  ;;  %v3748_v1 = vsel %vm15216_vm1, %v3747_v53, %v13185_v5  ;;  %v3808_v18 = vsel %vm15217_vm9, %v3807_v12, %v3806_v0  ;;  %v6592_v44 = vld [vmem:[%s13572_s1 + $0x8] sm:$0xff]  ;;  %vm15223_vm4 = vmmov %vm15215_vm0  ;;  %v6591_v29 = vld [vmem:[%s13572_s1] sm:$0xff] }
 0x5c0   :  { %v3684_v41 = vsel %vm15211_vm3, %v15210_v32, %v15208_v13  ;;  %v5843_v36 = vsel %vm15218_vm6, %v5842_v9, %v5841_v59  ;;  %v5901_v11 = vsel %vm3150_vm13, %v5900_v45, %v5899_v4  ;;  %v3810_v56 = vsel %vm15219_vm8, %v3809_v62, %v3808_v18  ;;  %vm15224_vm2 = vmmov %vm15216_vm1  ;;  %6350 = vmatpush.bf16.msra.mxu0 %v6592_v44  ;;  %v15226_v62 = vld [vmem:[#allocation103_spill] sm:$0xff]  ;;  %v6603_v30 = vld [vmem:[%s13572_s1 + $0x60] sm:$0xff] }
 0x5c1   :  { %v5904_v35 = vperm.slane %v5063_v37, %v8093_v55  ;;  %v15221_v53 = vperm.slane %v15220_v27, %v8093_v55  ;;  %v5903_v59 = vsel %vm15223_vm4, %v5902_v52, %v5901_v11  ;;  %v2533_v9 = vmul.f32 0.015625, %v13085_v22  ;;  %6360 = vmatpush.bf16.msra.mxu1 %v6604_v25  ;;  %v1784_v22 = vpop.xlane.xlu2 %1783  ;;  %vm15229_vm0 = vmmov %vm15216_vm1  ;;  %v15230_v44 = vld [vmem:[#allocation119_spill] sm:$0xff] }
 0x5c2   :  { %v5172_v12 = vunpack.c.l.b16 %v4394_v10  ;;  %v5781_v45 = vsel %vm15224_vm2, %v5780_v39, %v5779_v7  ;;  %vm15225_vm5 = vcmask 1041409   ;;  %v13299_v37 = vsel %vm3150_vm13, %v15226_v62, %v5713_v57  ;;  %v1781_v43 = vpop.xlane.xlu1 %1780  ;;  %vm15233_vm6 = vmmov %vm15223_vm4 }
 0x5c3   :  { %v3686_v5 = vsel %vm15222_vm14, %v15221_v53, %v3684_v41  ;;  %v4966_v23 = vunpack.c.l.b16 %v13259_v50  ;;  %v4967_v42 = vunpack.c.h.b16 %v13259_v50  ;;  %vm15227_vm11 = vmmov %vm15225_vm5  ;;  %vm15228_vm3 = vcmask 1042434   ;;  %v13306_v41 = vpop.xlane.xlu0 %2059 }
 0x5c4   :  { %v4149_v0 = vsel %vm15225_vm5, %v3748_v1, %v3686_v5  ;;  %v6237_v4 = vsel %vm15227_vm11, %v5843_v36, %v5781_v45  ;;  %v5905_v14 = vsel %vm15229_vm0, %v5904_v35, %v5903_v59  ;;  %v2488_v13 = vmul.f32 0.015625, %v1784_v22  ;;  %6351 = vmatpush.bf16.msra.mxu0 %v6591_v29  ;;  %vm15232_vm9 = vmmov %vm15228_vm3  ;;  %v6602_v59 = vld [vmem:[%s13572_s1 + $0x58] sm:$0xff] }
 0x5c5   :  { %v4150_v52 = vsel %vm15228_vm3, %v3810_v56, %v4149_v0  ;;  %v2487_v16 = vmul.f32 0.015625, %v1781_v43  ;;  %v4371_v32 = vpack.c.bf16 %v1784_v22, %v1781_v43  ;;  %v2534_v57 = vmul.f32 0.015625, %v13083_v19  ;;  %6361 = vmatpush.bf16.msra.mxu1 %v6603_v30  ;;  %vm15234_vm8 = vmmov %vm15229_vm0 }
 0x5c6   :  { %v4020_v39 = vperm.slane %v2533_v9, %v8049_v15  ;;  %v5173_v20 = vunpack.c.h.b16 %v4394_v10  ;;  %v6115_v7 = vperm.slane %v5172_v12, %v8049_v15  ;;  %v3933_v1 = vperm.slane %v2488_v13, %v8093_v55  ;;  %vm15236_vm2 = vmmov %vm15229_vm0 }
 0x5c7   :  { %v3931_v18 = vperm.slane %v2487_v16, %v8040_v2  ;;  %v5126_v36 = vunpack.c.l.b16 %v4371_v32  ;;  %v5127_v11 = vunpack.c.h.b16 %v4371_v32  ;;  %v13320_v56 = vperm.slane %v4966_v23, %v8040_v2  ;;  %vm15240_vm3 = vmmov %vm15223_vm4 }
 0x5c8   :  { %v2547_v35 = vmul.f32 0.015625, %v13141_v48  ;;  %vm15231_vm1 = vcmask 1043459   ;;  %v6238_v10 = vsel %vm15232_vm9, %v5905_v14, %v6237_v4  ;;  %v13328_v25 = vpack.c.bf16 %v13190_v49, %v13192_v60  ;;  %v15237_v14 = vld [vmem:[#allocation106_spill] sm:$0xff]  ;;  %vm15242_vm9 = vmmov %vm15229_vm0 }
 0x5c9   :  { %v4151_v19 = vsel %vm15231_vm1, %v15230_v44, %v4150_v52  ;;  %v3932_v27 = vsel %vm15233_vm6, %v3931_v18, %v13117_v47  ;;  %v6026_v53 = vperm.slane %v5126_v36, %v8040_v2  ;;  %v6028_v5 = vperm.slane %v5127_v11, %v8093_v55  ;;  %6362 = vmatpush.bf16.msra.mxu1 %v6602_v59  ;;  %v13356_v43 = vpop.xlane.xlu2 %1966  ;;  %vm15238_vm5 = vmmov %vm15231_vm1 }
 0x5ca   :  { %v4022_v9 = vperm.slane %v2534_v57, %v15120_v34  ;;  %v4021_v12 = vsel %vm3146_vm12, %v4020_v39, %v12934_v63  ;;  %v6117_v45 = vperm.slane %v5173_v20, %v15120_v34  ;;  %v3934_v0 = vsel %vm15234_vm8, %v3933_v1, %v3932_v27  ;;  %vm15241_vm1 = vmmov %vm15240_vm3 }
 0x5cb   :  { %v6116_v47 = vsel %vm3146_vm12, %v6115_v7, %v12942_v46  ;;  %v4401_v62 = vpack.c.bf16 %v13130_v38, %v13141_v48  ;;  %vm15235_vm14 = vcmask 1044484   ;;  %v6027_v4 = vsel %vm15223_vm4, %v6026_v53, %v13139_v26  ;;  %v1928_v46 = vpop.xlane.xlu1 %1927  ;;  %v1925_v26 = vpop.xlane.xlu0 %1924  ;;  %vm15244_vm6 = vmmov %vm15241_vm1 }
 0x5cc   :  { %v13347_v23 = vsel %vm15235_vm14, %v3934_v0, %v4151_v19  ;;  %v13352_v52 = vmul.f32 0.015625, %v13130_v38  ;;  %v2517_v63 = vmul.f32 0.015625, %v13192_v60  ;;  %v6029_v22 = vsel %vm15236_vm2, %v6028_v5, %v6027_v4  ;;  %v6601_v38 = vld [vmem:[%s13572_s1 + $0x50] sm:$0xff]  ;;  %vm15239_vm11 = vmmov %vm15235_vm14 }
 0x5cd   :  { %v6239_v48 = vsel %vm15238_vm5, %v15237_v14, %v6238_v10  ;;  %v4047_v13 = vperm.slane %v2547_v35, %v8016_v31  ;;  %v5156_v16 = vunpack.c.l.b16 %v13328_v25  ;;  %v2536_v32 = vmul.f32 0.015625, %v1928_v46  ;;  %6363 = vmatpush.bf16.msra.mxu1 %v6601_v38  ;;  %vm15245_vm8 = vmmov %vm15229_vm0 }
 0x5ce   :  { %v13366_v60 = vsel %vm15239_vm11, %v6029_v22, %v6239_v48  ;;  %v6118_v29 = vsel %vm3150_vm13, %v6117_v45, %v6116_v47  ;;  %v4023_v30 = vsel %vm3150_vm13, %v4022_v9, %v4021_v12  ;;  %v2535_v57 = vmul.f32 0.015625, %v1925_v26  ;;  %vm15247_vm4 = vmmov %vm15241_vm1 }
 0x5cf   :  { %v4395_v39 = vpack.c.bf16 %v1928_v46, %v1925_v26  ;;  %v5186_v20 = vunpack.c.l.b16 %v4401_v62  ;;  %v5187_v7 = vunpack.c.h.b16 %v4401_v62  ;;  %v2518_v1 = vmul.f32 0.015625, %v13190_v49  ;;  %v6600_v49 = vld [vmem:[%s13572_s1 + $0x48] sm:$0xff]  ;;  %vm15249_vm5 = vmmov %vm15229_vm0 }
 0x5d0   :  { %v4026_v18 = vperm.slane %v2536_v32, %v8093_v55  ;;  %v3989_v36 = vperm.slane %v2517_v63, %v8049_v15  ;;  %v4024_v11 = vperm.slane %v2535_v57, %v8040_v2  ;;  %v4049_v19 = vperm.slane %v13352_v52, %v8006_v24  ;;  %vm15250_vm11 = vmmov %vm15241_vm1 }
 0x5d1   :  { %v5174_v35 = vunpack.c.l.b16 %v4395_v39  ;;  %v5175_v44 = vunpack.c.h.b16 %v4395_v39  ;;  %v4048_v10 = vsel %vm3138_vm10, %v4047_v13, %v12956_v8  ;;  %v5157_v27 = vunpack.c.h.b16 %v13328_v25  ;;  %6364 = vmatpush.bf16.msra.mxu1 %v6600_v49  ;;  %v1880_v52 = vpop.xlane.xlu2 %1879  ;;  %v15243_v39 = vld [vmem:[#allocation108_spill] sm:$0xff] }
 0x5d2   :  { %v6084_v53 = vperm.slane %v5156_v16, %v8049_v15  ;;  %v4410_v5 = vpack.c.bf16 %v13236_v21, %v13240_v51  ;;  %v4025_v59 = vsel %vm15240_vm3, %v4024_v11, %v4023_v30  ;;  %v6142_v45 = vperm.slane %v5186_v20, %v8016_v31  ;;  %vm15251_vm3 = vmmov %vm15229_vm0 }
 0x5d3   :  { %v6119_v9 = vperm.slane %v5174_v35, %v8040_v2  ;;  %v6121_v12 = vperm.slane %v5175_v44, %v8093_v55  ;;  %v6144_v8 = vperm.slane %v5187_v7, %v8006_v24  ;;  %v3991_v25 = vperm.slane %v2518_v1, %v15120_v34  ;;  %v1877_v63 = vpop.xlane.xlu1 %1876  ;;  %v1970_v13 = vpop.xlane.xlu0 %1969 }
 0x5d4   :  { %v4027_v0 = vsel %vm15229_vm0, %v4026_v18, %v4025_v59  ;;  %v3990_v47 = vsel %vm3146_vm12, %v3989_v36, %v13010_v6  ;;  %v2565_v62 = vmul.f32 0.015625, %v13240_v51  ;;  %v2520_v46 = vmul.f32 0.015625, %v1880_v52  ;;  %v6599_v6 = vld [vmem:[%s13572_s1 + $0x40] sm:$0xff]  ;;  %s6463_s1 = sshll.u32 %s6678_s18, 4  ;;  %s6464_s1 = int_to_ptr.vmem [resolvable:$true] %s6463_s1 }
 0x5d5   :  { %v13397_v4 = vsel %vm4131_vm7, %v4027_v0, %v13227_v58  ;;  %v6120_v22 = vsel %vm15241_vm1, %v6119_v9, %v6118_v29  ;;  %v2519_v14 = vmul.f32 0.015625, %v1877_v63  ;;  %v4387_v48 = vpack.c.bf16 %v1880_v52, %v1877_v63  ;;  %6365 = vmatpush.bf16.msra.mxu1 %v6599_v6 }
 0x5d6   :  { %v6122_v16 = vsel %vm15242_vm9, %v6121_v12, %v6120_v22  ;;  %v6085_v51 = vsel %vm3146_vm12, %v6084_v53, %v13019_v3  ;;  %v6086_v58 = vperm.slane %v5157_v27, %v15120_v34  ;;  %v5204_v32 = vunpack.c.l.b16 %v4410_v5  ;;  %vm15253_vm9 = vmmov %vm15251_vm3 }
 0x5d7   :  { %v13409_v26 = vsel %vm4131_vm7, %v6122_v16, %v13255_v28  ;;  %v3995_v38 = vperm.slane %v2520_v46, %v8093_v55  ;;  %v3993_v29 = vperm.slane %v2519_v14, %v8040_v2  ;;  %v5158_v30 = vunpack.c.l.b16 %v4387_v48 }
 0x5d8   :  { %v5159_v57 = vunpack.c.h.b16 %v4387_v48  ;;  %v6143_v20 = vsel %vm3138_vm10, %v6142_v45, %v15243_v39  ;;  %v2566_v7 = vmul.f32 0.015625, %v13236_v21  ;;  %v4082_v3 = vperm.slane %v2565_v62, %v8049_v15 }
 0x5d9   :  { %v3992_v1 = vsel %vm3150_vm13, %v3991_v25, %v3990_v47  ;;  %v5205_v18 = vunpack.c.h.b16 %v4410_v5  ;;  %v6088_v36 = vperm.slane %v5158_v30, %v8040_v2  ;;  %v6087_v35 = vsel %vm3150_vm13, %v6086_v58, %v6085_v51  ;;  %v2063_v25 = vpop.xlane.xlu2 %2062 }
 0x5da   :  { %v3994_v28 = vsel %vm15244_vm6, %v3993_v29, %v3992_v1  ;;  %v6090_v11 = vperm.slane %v5159_v57, %v8093_v55  ;;  %v6177_v44 = vperm.slane %v5204_v32, %v8049_v15  ;;  %v4402_v53 = vpack.c.bf16 %v1970_v13, %v13356_v43 }
 0x5db   :  { %v3996_v27 = vsel %vm15245_vm8, %v3995_v38, %v3994_v28  ;;  %v2549_v21 = vmul.f32 0.015625, %v13356_v43  ;;  %vm15246_vm14 = vcmask 786112   ;;  %v6089_v59 = vsel %vm15247_vm4, %v6088_v36, %v6087_v35  ;;  %v2024_v0 = vpop.xlane.xlu1 %2023  ;;  %vm15256_vm8 = vmmov %vm15241_vm1 }
 0x5dc   :  { %v4050_v49 = vsel %vm15246_vm14, %v4049_v19, %v4048_v10  ;;  %v13429_v5 = vsel %vm4129_vm15, %v3996_v27, %v13347_v23  ;;  %vm15248_vm2 = vmmov %vm15246_vm14  ;;  %v13434_v12 = vmul.f32 0.015625, %v13234_v54  ;;  %v4084_v45 = vperm.slane %v2566_v7, %v15120_v34  ;;  %v2021_v10 = vpop.xlane.xlu0 %2020 }
 0x5dd   :  { %v6145_v9 = vsel %vm15248_vm2, %v6144_v8, %v6143_v20  ;;  %v6091_v47 = vsel %vm15249_vm5, %v6090_v11, %v6089_v59  ;;  %v4083_v43 = vsel %vm3146_vm12, %v4082_v3, %v13033_v40  ;;  %v6179_v19 = vperm.slane %v5205_v18, %v15120_v34  ;;  %vm15257_vm14 = vmmov %vm15251_vm3 }
 0x5de   :  { %v2568_v23 = vmul.f32 0.015625, %v2024_v0  ;;  %v13443_v62 = vsel %vm4129_vm15, %v6091_v47, %v13366_v60  ;;  %v6178_v8 = vsel %vm3146_vm12, %v6177_v44, %v13054_v33  ;;  %v5188_v52 = vunpack.c.l.b16 %v4402_v53  ;;  %vm15258_vm4 = vmmov %vm15241_vm1 }
 0x5df   :  { %v2567_v63 = vmul.f32 0.015625, %v2021_v10  ;;  %v4411_v22 = vpack.c.bf16 %v2024_v0, %v2021_v10  ;;  %v4417_v46 = vpack.c.bf16 %v13306_v41, %v13234_v54  ;;  %v4051_v14 = vperm.slane %v2549_v21, %v8049_v15  ;;  %v15255_v10 = vld [vmem:[#allocation78_spill] sm:$0xff]  ;;  %vm15259_vm2 = vmmov %vm15251_vm3 }
 0x5e0   :  { %v2550_v40 = vmul.f32 0.015625, %v1970_v13  ;;  %v4088_v48 = vperm.slane %v2568_v23, %v8093_v55  ;;  %v5189_v16 = vunpack.c.h.b16 %v4402_v53  ;;  %v4109_v58 = vperm.slane %v13434_v12, %v8016_v31 }
 0x5e1   :  { %v4086_v6 = vperm.slane %v2567_v63, %v8040_v2  ;;  %v5206_v51 = vunpack.c.l.b16 %v4411_v22  ;;  %v5207_v60 = vunpack.c.h.b16 %v4411_v22  ;;  %v2580_v33 = vmul.f32 0.015625, %v13306_v41  ;;  %v1976_v18 = vpop.xlane.xlu2 %1975 }
 0x5e2   :  { %v4085_v32 = vsel %vm3150_vm13, %v4084_v45, %v4083_v43  ;;  %v6180_v38 = vsel %vm3150_vm13, %v6179_v19, %v6178_v8  ;;  %v6146_v54 = vperm.slane %v5188_v52, %v8049_v15  ;;  %v5218_v57 = vunpack.c.l.b16 %v4417_v46 }
 0x5e3   :  { %v4087_v13 = vsel %vm15250_vm11, %v4086_v6, %v4085_v32  ;;  %v6181_v29 = vperm.slane %v5206_v51, %v8040_v2  ;;  %v6183_v30 = vperm.slane %v5207_v60, %v8093_v55  ;;  %v5219_v39 = vunpack.c.h.b16 %v4417_v46  ;;  %v1973_v28 = vpop.xlane.xlu1 %1972  ;;  %vm15261_vm11 = vmmov %vm15241_vm1 }
 0x5e4   :  { %v4052_v20 = vsel %vm3146_vm12, %v4051_v14, %v4050_v49  ;;  %v4089_v7 = vsel %vm15251_vm3, %v4088_v48, %v4087_v13  ;;  %v4053_v41 = vperm.slane %v2550_v40, %v15120_v34  ;;  %v6148_v3 = vperm.slane %v5189_v16, %v15120_v34  ;;  %v2066_v27 = vpop.xlane.xlu0 %2065 }
 0x5e5   :  { %vm15252_vm0 = vcmask 1047559   ;;  %v6182_v36 = vsel %vm15241_vm1, %v6181_v29, %v6180_v38  ;;  %v2552_v11 = vmul.f32 0.015625, %v1976_v18  ;;  %v2551_v35 = vmul.f32 0.015625, %v1973_v28 }
 0x5e6   :  { %v4148_v1 = vsel %vm15252_vm0, %v4089_v7, %v13397_v4  ;;  %v4403_v44 = vpack.c.bf16 %v1976_v18, %v1973_v28  ;;  %v6184_v53 = vsel %vm15253_vm9, %v6183_v30, %v6182_v36  ;;  %v6147_v21 = vsel %vm3146_vm12, %v6146_v54, %v6145_v9  ;;  %vm15254_vm6 = vmmov %vm15252_vm0 }
 0x5e7   :  { %4162 = vst [vmem:[#allocation4 + $0x10] sm:$0xff] %v4148_v1  ;;  %v2581_v49 = vmul.f32 0.015625, %v2063_v25  ;;  %v4418_v59 = vpack.c.bf16 %v2066_v27, %v2063_v25  ;;  %v6236_v12 = vsel %vm15254_vm6, %v6184_v53, %v13409_v26  ;;  %v4057_v4 = vperm.slane %v2552_v11, %v8093_v55  ;;  %v15267_v1 = vld [vmem:[#allocation30_spill] sm:$0xff]  ;;  %v15269_v11 = vld [vmem:[#allocation99_spill] sm:$0xff]  ;;  %vm15272_vm9 = vmmov %vm15259_vm2 }
 0x5e8   :  { %v4055_v45 = vperm.slane %v2551_v35, %v8040_v2  ;;  %v5190_v0 = vunpack.c.l.b16 %v4403_v44  ;;  %v5191_v47 = vunpack.c.h.b16 %v4403_v44  ;;  %v6204_v43 = vperm.slane %v5218_v57, %v8016_v31  ;;  %v15270_v35 = vld [vmem:[#allocation95_spill] sm:$0xff]  ;;  %vm15273_vm6 = vmmov %vm15259_vm2 }
 0x5e9   :  { %v4054_v19 = vsel %vm3150_vm13, %v4053_v41, %v4052_v20  ;;  %v5220_v23 = vunpack.c.l.b16 %v4418_v59  ;;  %v6244_v8 = vpack.c.b16 %v6236_v12, %v15255_v10  ;;  %v2582_v26 = vmul.f32 0.015625, %v2066_v27  ;;  %v15263_v41 = vld [vmem:[#allocation84_spill] sm:$0xff]  ;;  %v6612_v10 = vld [vmem:[%s13574_s3 + $0x28] sm:$0xff] }
 0x5ea   :  { %v4056_v9 = vsel %vm15256_vm8, %v4055_v45, %v4054_v19  ;;  %v6150_v25 = vperm.slane %v5190_v0, %v8040_v2  ;;  %v6152_v52 = vperm.slane %v5191_v47, %v8093_v55  ;;  %v4111_v63 = vperm.slane %v2580_v33, %v8006_v24  ;;  %v6614_v19 = vld [vmem:[%s13574_s3 + $0x38] sm:$0xff] }
 0x5eb   :  { %v6206_v22 = vperm.slane %v5219_v39, %v8006_v24  ;;  %v6149_v46 = vsel %vm3150_vm13, %v6148_v3, %v6147_v21  ;;  %v4058_v31 = vsel %vm15257_vm14, %v4057_v4, %v4056_v9  ;;  %6352 = vmatmul.bf16.vlgmr.msra.gmra.mxu0 %v6244_v8  ;;  %v4113_v14 = vperm.slane %v2581_v49, %v8049_v15  ;;  %v2072_v60 = vpop.xlane.xlu1 %2071  ;;  %v15264_v3 = vld [vmem:[#allocation85_spill] sm:$0xff]  ;;  %v15274_v49 = vld [vmem:[#allocation71_spill] sm:$0xff]  ;;  %v6611_v8 = vld [vmem:[%s13574_s3 + $0x20] sm:$0xff] }
 0x5ec   :  { %v4154_v40 = vsel %vm4131_vm7, %v4058_v31, %v13429_v5  ;;  %v5221_v48 = vunpack.c.h.b16 %v4418_v59  ;;  %v6151_v16 = vsel %vm15258_vm4, %v6150_v25, %v6149_v46  ;;  %v5718_v6 = vperm.slane %v4967_v42, %v8093_v55  ;;  %v2069_v54 = vpop.xlane.xlu0 %2068  ;;  %vm15277_vm4 = vmmov %vm15241_vm1  ;;  %6443 = vmatpush.bf16.msra.mxu2 %v6614_v19  ;;  %v6610_v9 = vld [vmem:[%s13574_s3 + $0x18] sm:$0xff]  ;;  %v6609_v25 = vld [vmem:[%s13574_s3 + $0x10] sm:$0xff] }
 0x5ed   :  { %v6205_v24 = vsel %vm3138_vm10, %v6204_v43, %v13048_v17  ;;  %v6208_v51 = vperm.slane %v5220_v23, %v8049_v15  ;;  %v6153_v33 = vsel %vm15259_vm2, %v6152_v52, %v6151_v16  ;;  %v4110_v32 = vsel %vm3138_vm10, %v4109_v58, %v13038_v61  ;;  %vm15265_vm10 = vmmov %vm15259_vm2  ;;  %v6613_v23 = vld [vmem:[%s13574_s3 + $0x30] sm:$0xff]  ;;  %v6608_v52 = vld [vmem:[%s13574_s3 + $0x8] sm:$0xff] }
 0x5ee   :  { %v4115_v5 = vperm.slane %v2582_v26, %v15120_v34  ;;  %v2584_v38 = vmul.f32 0.015625, %v2072_v60  ;;  %v6242_v13 = vsel %vm4131_vm7, %v6153_v33, %v13443_v62  ;;  %vm15260_vm5 = vcmask 786112   ;;  %v6607_v26 = vld [vmem:[%s13574_s3] sm:$0xff] }
 0x5ef   :  { %v4112_v50 = vsel %vm15260_vm5, %v4111_v63, %v4110_v32  ;;  %v2583_v42 = vmul.f32 0.015625, %v2069_v54  ;;  %v4419_v29 = vpack.c.bf16 %v2072_v60, %v2069_v54  ;;  %v5717_v15 = vsel %vm15261_vm11, %v13320_v56, %v13299_v37  ;;  %vm15262_vm3 = vmmov %vm15260_vm5  ;;  %v15266_v56 = vld [vmem:[#allocation20_spill] sm:$0xff]  ;;  %v6621_v46 = vld [vmem:[%s13573_s2] ss:$0 sm:$0xff]  ;;  %s6677_s2 = smov 16  }
 0x5f0   :  { %v6207_v17 = vsel %vm15262_vm3, %v6206_v22, %v6205_v24  ;;  %v4114_v30 = vsel %vm3146_vm12, %v4113_v14, %v4112_v50  ;;  %v6210_v61 = vperm.slane %v5221_v48, %v15120_v34  ;;  %v4119_v58 = vperm.slane %v2584_v38, %v8093_v55  ;;  %6444 = vmatpush.bf16.msra.mxu2 %v6613_v23  ;;  %v6622_v33 = vld [vmem:[%s13575_s4] ss:$0 sm:$0xff] }
 0x5f1   :  { %v6209_v57 = vsel %vm3146_vm12, %v6208_v51, %v6207_v17  ;;  %v4117_v62 = vperm.slane %v2583_v42, %v8040_v2  ;;  %v5222_v39 = vunpack.c.l.b16 %v4419_v29  ;;  %v5223_v20 = vunpack.c.h.b16 %v4419_v29  ;;  %vm15271_vm12 = vmmov %vm15259_vm2 }
 0x5f2   :  { %v4116_v7 = vsel %vm3150_vm13, %v4115_v5, %v4114_v30  ;;  %v5595_v37 = vsel %vm15265_vm10, %v15264_v3, %v15263_v41  ;;  %vm15268_vm0 = vcmask 1043459   ;;  %v5657_v44 = vsel %vm15271_vm12, %v15270_v35, %v15269_v11 }
 0x5f3   :  { %v6225_v18 = vsel %vm15268_vm0, %v15267_v1, %v15266_v56  ;;  %v4118_v34 = vsel %vm15241_vm1, %v4117_v62, %v4116_v7  ;;  %v6212_v28 = vperm.slane %v5222_v39, %v8040_v2  ;;  %v6214_v36 = vperm.slane %v5223_v20, %v8093_v55 }
 0x5f4   :  { %v4120_v27 = vsel %vm15272_vm9, %v4119_v58, %v4118_v34  ;;  %v5719_v53 = vsel %vm15273_vm6, %v5718_v6, %v5717_v15  ;;  %v6211_v21 = vsel %vm3150_vm13, %v6210_v61, %v6209_v57  ;;  %vm15275_vm8 = vcmask 1044484   ;;  %6445 = vmatpush.bf16.msra.mxu2 %v6612_v10 }
 0x5f5   :  { %v6226_v59 = vsel %vm15275_vm8, %v15274_v49, %v6225_v18  ;;  %vm15276_vm14 = vcmask 1047559   ;;  %v6213_v4 = vsel %vm15277_vm4, %v6212_v28, %v6211_v21 }
 0x5f6   :  { %v4155_v12 = vsel %vm15276_vm14, %v4120_v27, %v4154_v40  ;;  %v6227_v2 = vsel %vm4129_vm15, %v5595_v37, %v6226_v59  ;;  %v6215_v55 = vsel %vm15259_vm2, %v6214_v36, %v6213_v4  ;;  %vm15278_vm5 = vmmov %vm15276_vm14 }
 0x5f7   :  { %4163 = vst [vmem:[#allocation4 + $0x18] sm:$0xff] %v4155_v12  ;;  %v6228_v45 = vsel %vm4131_vm7, %v5657_v44, %v6227_v2  ;;  %vm15279_vm11 = vmmov %vm15278_vm5 }
 0x5f8   :  { %v6229_v0 = vsel %vm15278_vm5, %v5719_v53, %v6228_v45  ;;  %v6243_v47 = vsel %vm15279_vm11, %v6215_v55, %v6242_v13  ;;  %6446 = vmatpush.bf16.msra.mxu2 %v6611_v8  ;;  %6484 = dma.vmem_to_hbm [thread:$0]  %s6477_s0, 512, %s6479_s14, [#allocation5], %s6676_s15, %s6676_s15, %s6677_s2  }
 0x5f9   :  { %v6245_v43 = vpack.c.b16 %v6243_v47, %v6229_v0 }
 0x5fb   :  { %6366 = vmatmul.bf16.vlgmr.msra.gmra.mxu1 %v6245_v43 }
 0x5fc   :  { %6447 = vmatpush.bf16.msra.mxu2 %v6610_v9 }
 0x600   :  { %6448 = vmatpush.bf16.msra.mxu2 %v6609_v25 }
 0x604   :  { %6449 = vmatpush.bf16.msra.mxu2 %v6608_v52 }
 0x608   :  { %6450 = vmatpush.bf16.msra.mxu2 %v6607_v26 }
 0x668   :  { %v6353_v63 = vpop.f32.mrf.mxu0 }
 0x669   :  { %v6354_v14 = vadd.f32 %v6621_v46, %v6353_v63 }
 0x670   :  { %v6355_v31 = vpop.f32.mrf.mxu0 }
 0x671   :  { %v6356_v40 = vadd.f32 %v6621_v46, %v6355_v31 }
 0x678   :  { %v6367_v22 = vpop.f32.mrf.mxu1 }
 0x679   :  { %v6368_v48 = vadd.f32 %v6367_v22, %v6354_v14 }
 0x67b   :  { %v6372_v24 = vmax.f32 %v6368_v48, 0.0 }
 0x680   :  { %v6369_v16 = vpop.f32.mrf.mxu1 }
 0x681   :  { %v6370_v6 = vadd.f32 %v6369_v16, %v6356_v40 }
 0x683   :  { %v6373_v51 = vmax.f32 %v6370_v6, 0.0 }
 0x685   :  { %v6374_v60 = vpack.c.bf16 %v6373_v51, %v6372_v24 }
 0x687   :  { %6451 = vmatmul.bf16.vlgmr.msra.gmra.mxu2 %v6374_v60 }
 0x70a   :  { %v6452_v32 = vpop.f32.mrf.mxu2 }
 0x70b   :  { %v6453_v5 = vadd.f32 %v6622_v33, %v6452_v32 }
 0x70d   :  { %6457 = vst [vmem:[#allocation2] sm:$0xff] %v6453_v5 }
 0x712   :  { %v6454_v38 = vpop.f32.mrf.mxu2 }
 0x713   :  { %v6455_v54 = vadd.f32 %v6622_v33, %v6454_v38 }
 0x715   :  { %6458 = vst [vmem:[#allocation2 + $0x8] sm:$0xff] %v6455_v54 }
 0x716   :  { %6471 = dma.vmem_to_hbm [thread:$0]  %s6464_s1, 256, %s6466_s21, [#allocation3], %s6679_s6, %s6679_s6, %s6680_s22  }
 0x717   :  { %6671 = dma.done.wait [#allocation3], 256  }
 0x718   :  { %6672 = vsyncadd [#allocation3], 4294967040 }
 0x719   :  { %6673 = dma.done.wait [#allocation5], 512  }
 0x71a   :  { %6674 = vsyncadd [#allocation5], 4294966784 }
 0x71b   :  { %6493 = vsyncpa [#allocation3], 1 }
 0x71c   :  { %6494 = vsyncpa [#allocation5], 1 }

</bundles_post_ra>
